<compile_context>
chip_gen: v7x
topology: tpu7x:2x2x1
jax: 0.10.0
libtpu: 0.0.40
codegen_flags: <defaults>
</compile_context>

<pallas_src>
import numpy as np
import jax
import jax.numpy as jnp
from jax.experimental import pallas as pl
from jax.experimental.pallas import tpu as pltpu

BN_EPS = 1e-5
SIMAM_LAMBDA = 1e-4
GRID_SIZE = 5
SPLINE_ORDER = 3
K_BASIS = GRID_SIZE + SPLINE_ORDER  # 8 cubic B-spline basis functions


# ----------------------------------------------------------------------------- helpers
def spline_basis_list(x, grid_size=GRID_SIZE, spline_order=SPLINE_ORDER):
  """Cubic B-spline basis values of x (elementwise), grid on [-1, 1]. Returns a list of
  grid_size + spline_order arrays shaped like x. Pure jnp -> usable inside kernels.
  Degree-0 bases via single-sided compares: b_j = 1[x>=t_j] - 1[x>=t_{j+1}] (identical
  to (x>=t_j)&(x<t_{j+1}) for an increasing knot vector, but cheaper on the VALU)."""
  h = 2.0 / grid_size
  t = [-1.0 + (j - spline_order) * h for j in range(grid_size + 2 * spline_order + 1)]
  ge = [(x >= tj).astype(x.dtype) for tj in t]
  bases = [ge[j] - ge[j + 1] for j in range(len(t) - 1)]
  for d in range(1, spline_order + 1):
    new = []
    for j in range(len(t) - 1 - d):
      left = (x - t[j]) / (t[j + d] - t[j]) * bases[j]
      right = (t[j + d + 1] - x) / (t[j + d + 1] - t[j + 1]) * bases[j + 1]
      new.append(left + right)
    bases = new
  return bases


def fold_bn_vec(bn):
  s = bn['gamma'] / jnp.sqrt(bn['var'] + BN_EPS)
  sh = bn['beta'] - bn['mean'] * s
  return s, sh


def kan_fused_weight(wb, ws, scale, shift):
  """Fuse base + spline weights (and folded-BN scale/shift) into one wide-K matmul weight
  for the (C, P) layout: y = W_fused @ concat([silu(x), B_0(x)..B_7(x)]) + b."""
  parts = [wb.T] + [ws[k].T for k in range(ws.shape[0])]
  wf = jnp.concatenate(parts, axis=1) * scale[:, None]     # (Cout, 9*Cin)
  return wf, shift[:, None]                                # (Cout, 1)


def parity_taps(wt, bias, scale=None, shift=None):
  """PyTorch ConvTranspose2d weight (Cin, Cout, 3, 3) -> per-output-parity tap matrices
  with K pre-concatenated to match the in-kernel shift operand order, plus fused bias.
    p00 <- [W11]             @  s00
    p01 <- [W10 | W12]       @ [s00; s01]
    p10 <- [W21 | W01]       @ [s10; s00]
    p11 <- [W20|W00|W02|W22] @ [s10; s00; s01; s11]
  Optional folded-BN scale/shift applied per output channel."""
  wT = jnp.transpose(jnp.flip(wt, axis=(2, 3)), (2, 3, 1, 0))   # (3, 3, Cout, Cin)
  if scale is not None:
    wT = wT * scale[None, None, :, None]
    bias = bias * scale
  if shift is not None:
    bias = bias + shift
  tap = lambda ky, kx: wT[ky, kx]
  t00 = tap(1, 1)
  t01 = jnp.concatenate([tap(1, 0), tap(1, 2)], axis=1)
  t10 = jnp.concatenate([tap(2, 1), tap(0, 1)], axis=1)
  t11 = jnp.concatenate([tap(2, 0), tap(0, 0), tap(0, 2), tap(2, 2)], axis=1)
  return (t00, t01, t10, t11), bias[:, None]


def prepare_params(p):
  """One-time host-side weight fusion — hoisted out of the jitted forward so the per-call
  path is only: concat(x,h) -> pallas_call -> phase interleave."""
  s1, sh1 = fold_bn_vec(p['bn1'])
  s2, sh2 = fold_bn_vec(p['bn2'])
  s3, sh3 = fold_bn_vec(p['bn3'])
  s4, sh4 = fold_bn_vec(p['bn4'])

  w1, b1 = kan_fused_weight(p['kan1_wb'], p['kan1_ws'], s1, sh1)      # (C4, 9*(C+R))
  w3, b3 = kan_fused_weight(p['kan3_wb'], p['kan3_ws'], s3, sh3)      # (F, 9*C4)
  t2, b2 = parity_taps(p['deconv2_w'], p['deconv2_b'], scale=s2, shift=sh2)

  # Fused deconv_x + deconv_h: block-diagonal taps over the concatenated (x, h) input.
  # norm4's scale/shift is folded into the h rows only (it applies to deconv_h + conv_out).
  C, F = p['deconvx_w'].shape[:2]
  R = p['deconvh_w'].shape[0]
  wt_big = jnp.zeros((C + R, F + R, 3, 3), jnp.float32)
  wt_big = wt_big.at[:C, :F].set(p['deconvx_w'])
  wt_big = wt_big.at[C:, F:].set(p['deconvh_w'])
  b_big = jnp.concatenate([p['deconvx_b'], p['deconvh_b']])
  scale_big = jnp.concatenate([jnp.ones((F,), jnp.float32), s4])
  shift_big = jnp.concatenate([jnp.zeros((F,), jnp.float32), sh4])
  ti, bi = parity_taps(wt_big, b_big, scale=scale_big, shift=shift_big)

  wco = p['convout_w'].T * s4[:, None]                                # (R, F), s4 folded

  return dict(w1=w1, b1=b1, t2=t2, b2=b2, w3=w3, b3=b3, ti=ti, bi=bi, wco=wco)


# ----------------------------------------------------------------------------- kernel
def make_decoder_kernel(H, W, n_filters):
  P = H * W
  F = n_filters
  inv_4p = 1.0 / float(4 * P)
  n_simam = float(4 * P - 1)     # (2H)*(2W) - 1

  def kernel(xc_ref,
             w1_ref, b1_ref,                                   # fused ConvKAN1 (+norm1)
             t2a_ref, t2b_ref, t2c_ref, t2d_ref, b2_ref,       # deconv2 taps (+norm2)
             w3_ref, b3_ref,                                   # fused ConvKAN3 (+norm3)
             tia_ref, tib_ref, tic_ref, tid_ref, bi_ref,       # fused deconv_x/deconv_h
             wco_ref,                                          # conv_out (norm4 scale folded)
             out_ref, hout_ref):
    xc = xc_ref[0]                                             # (C+R, P)

    # Boundary masks for the (i, j+1), (i+1, j), (i+1, j+1) shifted views (computed once).
    col = jax.lax.broadcasted_iota(jnp.int32, (1, P), 1)
    jm = col % W != (W - 1)
    m01 = (jm & (col < P - 1)).astype(jnp.float32)
    m10 = (col < P - W).astype(jnp.float32)
    m11 = (jm & (col < P - W - 1)).astype(jnp.float32)

    def shift4(v):
      # s[:, p] = v[:, p+k] with zero boundary: XLU lane rotation + mask (no copies).
      s01 = pltpu.roll(v, P - 1, axis=1) * m01
      s10 = pltpu.roll(v, P - W, axis=1) * m10
      s11 = pltpu.roll(v, P - W - 1, axis=1) * m11
      return v, s01, s10, s11

    def deconv(v, ta_ref, tb_ref, tc_ref, td_ref, b_ref):
      # Phase-decomposed ConvTranspose2d(3, stride=2, padding=1, output_padding=1).
      # K-concatenated taps -> exactly one MXU dot per output parity; result is the
      # lane-stacked (Cout, 4P) slab [p00 | p01 | p10 | p11].
      s00, s01, s10, s11 = shift4(v)
      b = b_ref[...]
      p00 = jnp.dot(ta_ref[...], s00, preferred_element_type=jnp.float32) + b
      p01 = jnp.dot(tb_ref[...], jnp.concatenate([s00, s01], axis=0),
                    preferred_element_type=jnp.float32) + b
      p10 = jnp.dot(tc_ref[...], jnp.concatenate([s10, s00], axis=0),
                    preferred_element_type=jnp.float32) + b
      p11 = jnp.dot(td_ref[...], jnp.concatenate([s10, s00, s01, s11], axis=0),
                    preferred_element_type=jnp.float32) + b
      return jnp.concatenate([p00, p01, p10, p11], axis=1)

    def kan(v, wf_ref, bias_ref):
      # 1x1 ConvKAN as ONE wide-K MXU matmul over [SiLU(x), B_0(x)..B_7(x)].
      # TODO(synk): at large P stage the 9 feature blocks in a VMEM scratch instead of
      #             materializing the (9*Cin, L) concat (VMEM liveness on v7x).
      feats = [v * jax.nn.sigmoid(v)] + spline_basis_list(v)
      feat = jnp.concatenate(feats, axis=0)
      return jnp.dot(wf_ref[...], feat, preferred_element_type=jnp.float32) + bias_ref[...]

    # ---- conv1 (ConvKAN 1x1) + norm1 + relu1 on the pre-concatenated (x, h) -----------
    o1 = jnp.maximum(kan(xc, w1_ref, b1_ref), 0.0)             # (C//4, P)

    # ---- deconv2 + norm2 + relu2 -> lane-stacked 4-phase slab --------------------------
    o2 = jnp.maximum(deconv(o1, t2a_ref, t2b_ref, t2c_ref, t2d_ref, b2_ref), 0.0)  # (C//4, 4P)

    # ---- conv3 (ConvKAN 1x1) + norm3 ---------------------------------------------------
    o3 = kan(o2, w3_ref, b3_ref)                               # (F, 4P)

    # ---- SimAM over the full (2H, 2W) map == the whole 4P lane axis --------------------
    mu = jnp.sum(o3, axis=1, keepdims=True) * inv_4p
    d = (o3 - mu) ** 2
    inv = 1.0 / (4.0 * (jnp.sum(d, axis=1, keepdims=True) / n_simam + SIMAM_LAMBDA))
    sim = o3 * jax.nn.sigmoid(d * inv + 0.5)

    # ---- fused deconv_x(x) / deconv_h(h) (block-diagonal taps over x ‖ h) --------------
    # rows [0:F)   -> identity branch (deconv_x)
    # rows [F:F+R) -> h branch (deconv_h, norm4 scale/shift already folded)
    ih = deconv(xc, tia_ref, tib_ref, tic_ref, tid_ref, bi_ref)   # (F+R, 4P)

    # ---- out = relu(sim + identity); h = tanh(norm4(deconv_h(h) + conv_out(out))) ------
    # conv_out sees the FINAL out (PyTorch in-place aliasing of `y = out`).
    o = jnp.maximum(sim + ih[:F], 0.0)                            # (F, 4P)
    y_out = jnp.dot(wco_ref[...], o, preferred_element_type=jnp.float32)   # (R, 4P)
    out_ref[0] = o
    hout_ref[0] = jnp.tanh(ih[F:] + y_out)

  return kernel


# ----------------------------------------------------------------------------- forward
@jax.jit
def forward_pallas(x, h, fw):
  N, C, H, W = x.shape
  R = h.shape[1]
  F_ = fw['w3'].shape[0]
  P = H * W

  # Free trailing-dim reshapes; single channel concat (feeds both conv1 and the fused
  # identity/h deconv). Channels -> sublanes, spatial -> lanes inside the kernel.
  xc = jnp.concatenate([x.reshape(N, C, P), h.reshape(N, R, P)], axis=1)   # (N, C+R, P)

  weights = [fw['w1'], fw['b1'], *fw['t2'], fw['b2'],
             fw['w3'], fw['b3'], *fw['ti'], fw['bi'], fw['wco']]

  def full_spec(a):
    nd = a.ndim
    return pl.BlockSpec(a.shape, lambda n, _z=(0,) * nd: _z)

  out_ph, h_ph = pl.pallas_call(
      make_decoder_kernel(H, W, F_),
      out_shape=(jax.ShapeDtypeStruct((N, F_, 4 * P), jnp.float32),
                 jax.ShapeDtypeStruct((N, R, 4 * P), jnp.float32)),
      grid=(N,),
      in_specs=[pl.BlockSpec((1, C + R, P), lambda n: (n, 0, 0))]
               + [full_spec(a) for a in weights],
      out_specs=(pl.BlockSpec((1, F_, 4 * P), lambda n: (n, 0, 0)),
                 pl.BlockSpec((1, R, 4 * P), lambda n: (n, 0, 0))),
      compiler_params=pltpu.CompilerParams(dimension_semantics=("parallel",)),
  )(xc, *weights)

  # Interleave the 4 parity phases back into NCHW (single transpose per output).
  out = out_ph.reshape(N, F_, 2, 2, H, W).transpose(0, 1, 4, 2, 5, 3) \
              .reshape(N, F_, 2 * H, 2 * W)
  hh = h_ph.reshape(N, R, 2, 2, H, W).transpose(0, 1, 4, 2, 5, 3) \
           .reshape(N, R, 2 * H, 2 * W)
  return out, hh


# ----------------------------------------------------------------------------- pure-JAX reference
def forward_ref(x, h, p):
  HPc = jax.lax.Precision.HIGHEST
  N, C, H, W = x.shape
  xn = jnp.transpose(x, (0, 2, 3, 1))
  hn = jnp.transpose(h, (0, 2, 3, 1))

  def bn(v, q):
    s = q['gamma'] / jnp.sqrt(q['var'] + BN_EPS)
    return (v - q['mean']) * s + q['beta']

  def kan(v, wb, ws):
    y = jnp.einsum('nhwc,cd->nhwd', v * jax.nn.sigmoid(v), wb, precision=HPc)
    for k, b in enumerate(spline_basis_list(v)):
      y = y + jnp.einsum('nhwc,cd->nhwd', b, ws[k], precision=HPc)
    return y

  def tconv(v, wt, b):
    wf = jnp.transpose(jnp.flip(wt, axis=(2, 3)), (2, 3, 0, 1))
    y = jax.lax.conv_general_dilated(v, wf, (1, 1), ((1, 2), (1, 2)),
                                     lhs_dilation=(2, 2),
                                     dimension_numbers=('NHWC', 'HWIO', 'NHWC'),
                                     precision=HPc)
    return y + b

  o = jnp.maximum(bn(kan(jnp.concatenate([xn, hn], -1), p['kan1_wb'], p['kan1_ws']), p['bn1']), 0.0)
  o = jnp.maximum(bn(tconv(o, p['deconv2_w'], p['deconv2_b']), p['bn2']), 0.0)
  o = bn(kan(o, p['kan3_wb'], p['kan3_ws']), p['bn3'])
  mu = o.mean(axis=(1, 2), keepdims=True)
  d = (o - mu) ** 2
  s = d.sum(axis=(1, 2), keepdims=True)
  n = (2 * H) * (2 * W) - 1
  sim = o * jax.nn.sigmoid(d / (4.0 * (s / n + SIMAM_LAMBDA)) + 0.5)
  ident = tconv(xn, p['deconvx_w'], p['deconvx_b'])
  out = jnp.maximum(sim + ident, 0.0)
  y_out = jnp.einsum('nhwc,cd->nhwd', out, p['convout_w'], precision=HPc)
  hh = jnp.tanh(bn(tconv(hn, p['deconvh_w'], p['deconvh_b']) + y_out, p['bn4']))
  return jnp.transpose(out, (0, 3, 1, 2)), jnp.transpose(hh, (0, 3, 1, 2))


# ----------------------------------------------------------------------------- params
def init_params(key, in_channels, n_filters, rla_channel):
  C4 = in_channels // 4
  ks = jax.random.split(key, 16)

  def nrm(k, shape, s=0.1):
    return s * jax.random.normal(k, shape, jnp.float32)

  def bn_params(k, c):
    k1, k2, k3, k4 = jax.random.split(k, 4)
    return dict(gamma=1.0 + 0.1 * jax.random.normal(k1, (c,), jnp.float32),
                beta=0.1 * jax.random.normal(k2, (c,), jnp.float32),
                mean=0.1 * jax.random.normal(k3, (c,), jnp.float32),
                var=1.0 + 0.5 * jax.random.uniform(k4, (c,), jnp.float32))

  return dict(
      kan1_wb=nrm(ks[0], (in_channels + rla_channel, C4)),
      kan1_ws=nrm(ks[1], (K_BASIS, in_channels + rla_channel, C4)),
      bn1=bn_params(ks[2], C4),
      deconv2_w=nrm(ks[3], (C4, C4, 3, 3)),
      deconv2_b=nrm(ks[4], (C4,)),
      bn2=bn_params(ks[5], C4),
      kan3_wb=nrm(ks[6], (C4, n_filters)),
      kan3_ws=nrm(ks[7], (K_BASIS, C4, n_filters)),
      bn3=bn_params(ks[8], n_filters),
      deconvx_w=nrm(ks[9], (in_channels, n_filters, 3, 3)),
      deconvx_b=nrm(ks[10], (n_filters,)),
      deconvh_w=nrm(ks[11], (rla_channel, rla_channel, 3, 3)),
      deconvh_b=nrm(ks[12], (rla_channel,)),
      convout_w=nrm(ks[13], (n_filters, rla_channel)),   # 1x1 conv_out, no bias
      bn4=bn_params(ks[14], rla_channel),
  )


# ----------------------------------------------------------------------------- main
if __name__ == "__main__":
  N, C, H, W = 2, 16, 16, 16     # in_channels=16 -> C//4 = 4; P = 256 (lane aligned)
  R, F_ = 8, 8                   # rla_channel=8, n_filters=8
  key = jax.random.PRNGKey(0)
  kx, kh, kp = jax.random.split(key, 3)
  x = jax.random.normal(kx, (N, C, H, W), jnp.float32)
  h = jax.random.normal(kh, (N, R, H, W), jnp.float32)
  params = init_params(kp, C, F_, R)

  fused = prepare_params(params)        # one-time weight fusion, not part of the forward

  out, h_new = forward_pallas(x, h, fused)
  out = jax.block_until_ready(out)
  h_new = jax.block_until_ready(h_new)

  assert out.shape == (N, F_, 2 * H, 2 * W)
  assert h_new.shape == (N, R, 2 * H, 2 * W)

  out_ref, h_ref = forward_ref(x, h, params)
  np.testing.assert_allclose(np.asarray(out), np.asarray(out_ref), rtol=2e-3, atol=2e-3)
  np.testing.assert_allclose(np.asarray(h_new), np.asarray(h_ref), rtol=2e-3, atol=2e-3)

  print("KERNEL_OK")
</pallas_src>

<mosaic_0001>
module attributes {stable_mosaic.version = 11 : i64} {
  func.func @kernel(%arg0: i32, %arg1: memref<1x24x256xf32, #tpu.memory_space<vmem>>, %arg2: memref<4x216xf32, #tpu.memory_space<vmem>>, %arg3: memref<4x1xf32, #tpu.memory_space<vmem>>, %arg4: memref<4x4xf32, #tpu.memory_space<vmem>>, %arg5: memref<4x8xf32, #tpu.memory_space<vmem>>, %arg6: memref<4x8xf32, #tpu.memory_space<vmem>>, %arg7: memref<4x16xf32, #tpu.memory_space<vmem>>, %arg8: memref<4x1xf32, #tpu.memory_space<vmem>>, %arg9: memref<8x36xf32, #tpu.memory_space<vmem>>, %arg10: memref<8x1xf32, #tpu.memory_space<vmem>>, %arg11: memref<16x24xf32, #tpu.memory_space<vmem>>, %arg12: memref<16x48xf32, #tpu.memory_space<vmem>>, %arg13: memref<16x48xf32, #tpu.memory_space<vmem>>, %arg14: memref<16x96xf32, #tpu.memory_space<vmem>>, %arg15: memref<16x1xf32, #tpu.memory_space<vmem>>, %arg16: memref<8x8xf32, #tpu.memory_space<vmem>>, %arg17: memref<1x8x1024xf32, #tpu.memory_space<vmem>>, %arg18: memref<1x8x1024xf32, #tpu.memory_space<vmem>>) attributes {dimension_semantics = [#tpu.dimension_semantics<parallel>], iteration_bounds = array<i64: 2>, scalar_prefetch = 0 : i64, scratch_operands = 0 : i64, tpu.core_type = #tpu.core_type<tc>, window_params = [{transform_indices = @transform_0, window_bounds = array<i64: 1, 24, 256>}, {pipeline_mode = #tpu.pipeline_mode<synchronous>, transform_indices = @transform_1, window_bounds = array<i64: 4, 216>}, {pipeline_mode = #tpu.pipeline_mode<synchronous>, transform_indices = @transform_2, window_bounds = array<i64: 4, 1>}, {pipeline_mode = #tpu.pipeline_mode<synchronous>, transform_indices = @transform_3, window_bounds = array<i64: 4, 4>}, {pipeline_mode = #tpu.pipeline_mode<synchronous>, transform_indices = @transform_4, window_bounds = array<i64: 4, 8>}, {pipeline_mode = #tpu.pipeline_mode<synchronous>, transform_indices = @transform_5, window_bounds = array<i64: 4, 8>}, {pipeline_mode = #tpu.pipeline_mode<synchronous>, transform_indices = @transform_6, window_bounds = array<i64: 4, 16>}, {pipeline_mode = #tpu.pipeline_mode<synchronous>, transform_indices = @transform_7, window_bounds = array<i64: 4, 1>}, {pipeline_mode = #tpu.pipeline_mode<synchronous>, transform_indices = @transform_8, window_bounds = array<i64: 8, 36>}, {pipeline_mode = #tpu.pipeline_mode<synchronous>, transform_indices = @transform_9, window_bounds = array<i64: 8, 1>}, {pipeline_mode = #tpu.pipeline_mode<synchronous>, transform_indices = @transform_10, window_bounds = array<i64: 16, 24>}, {pipeline_mode = #tpu.pipeline_mode<synchronous>, transform_indices = @transform_11, window_bounds = array<i64: 16, 48>}, {pipeline_mode = #tpu.pipeline_mode<synchronous>, transform_indices = @transform_12, window_bounds = array<i64: 16, 48>}, {pipeline_mode = #tpu.pipeline_mode<synchronous>, transform_indices = @transform_13, window_bounds = array<i64: 16, 96>}, {pipeline_mode = #tpu.pipeline_mode<synchronous>, transform_indices = @transform_14, window_bounds = array<i64: 16, 1>}, {pipeline_mode = #tpu.pipeline_mode<synchronous>, transform_indices = @transform_15, window_bounds = array<i64: 8, 8>}, {transform_indices = @transform_16, window_bounds = array<i64: 1, 8, 1024>}, {transform_indices = @transform_17, window_bounds = array<i64: 1, 8, 1024>}]} {
    %c0 = arith.constant 0 : index
    %c0_0 = arith.constant 0 : index
    %c0_1 = arith.constant 0 : index
    %0 = vector.load %arg1[%c0, %c0_0, %c0_1] : memref<1x24x256xf32, #tpu.memory_space<vmem>>, vector<1x24x256xf32>
    %1 = vector.shape_cast %0 : vector<1x24x256xf32> to vector<24x256xf32>
    %2 = tpu.iota {dimensions = array<i32: 1>} : vector<1x256xi32>
    %c16_i32 = arith.constant 16 : i32
    %c0_i32 = arith.constant 0 : i32
    %3 = arith.cmpi eq, %c16_i32, %c0_i32 : i32
    %c1_i32 = arith.constant 1 : i32
    %4 = arith.select %3, %c1_i32, %c16_i32 : i32
    %5 = vector.broadcast %4 : i32 to vector<1x256xi32>
    %6 = arith.remsi %2, %5 : vector<1x256xi32>
    %c0_i32_2 = arith.constant 0 : i32
    %7 = vector.broadcast %c0_i32_2 : i32 to vector<1x256xi32>
    %8 = arith.cmpi ne, %6, %7 : vector<1x256xi32>
    %c0_i32_3 = arith.constant 0 : i32
    %9 = vector.broadcast %c0_i32_3 : i32 to vector<1x256xi32>
    %10 = arith.cmpi slt, %6, %9 : vector<1x256xi32>
    %c0_i32_4 = arith.constant 0 : i32
    %11 = arith.cmpi slt, %4, %c0_i32_4 : i32
    %12 = vector.broadcast %11 : i1 to vector<1x256xi1>
    %13 = vector.broadcast %12 : vector<1x256xi1> to vector<1x256xi1>
    %14 = arith.xori %10, %13 : vector<1x256xi1>
    %15 = arith.andi %14, %8 : vector<1x256xi1>
    %16 = vector.broadcast %4 : i32 to vector<1x256xi32>
    %17 = arith.addi %6, %16 : vector<1x256xi32>
    %18 = arith.select %15, %17, %6 : vector<1x256xi1>, vector<1x256xi32>
    %c15_i32 = arith.constant 15 : i32
    %19 = vector.broadcast %c15_i32 : i32 to vector<1x256xi32>
    %20 = arith.cmpi ne, %18, %19 : vector<1x256xi32>
    %c255_i32 = arith.constant 255 : i32
    %21 = vector.broadcast %c255_i32 : i32 to vector<1x256xi32>
    %22 = arith.cmpi slt, %2, %21 : vector<1x256xi32>
    %23 = arith.andi %20, %22 : vector<1x256xi1>
    %24 = arith.extui %23 : vector<1x256xi1> to vector<1x256xi32>
    %25 = arith.sitofp %24 : vector<1x256xi32> to vector<1x256xf32>
    %c240_i32 = arith.constant 240 : i32
    %26 = vector.broadcast %c240_i32 : i32 to vector<1x256xi32>
    %27 = arith.cmpi slt, %2, %26 : vector<1x256xi32>
    %28 = arith.extui %27 : vector<1x256xi1> to vector<1x256xi32>
    %29 = arith.sitofp %28 : vector<1x256xi32> to vector<1x256xf32>
    %c239_i32 = arith.constant 239 : i32
    %30 = vector.broadcast %c239_i32 : i32 to vector<1x256xi32>
    %31 = arith.cmpi slt, %2, %30 : vector<1x256xi32>
    %32 = arith.andi %20, %31 : vector<1x256xi1>
    %33 = arith.extui %32 : vector<1x256xi1> to vector<1x256xi32>
    %34 = arith.sitofp %33 : vector<1x256xi32> to vector<1x256xf32>
    %35 = arith.negf %1 : vector<24x256xf32>
    %36 = math.exp %35 : vector<24x256xf32>
    %cst = arith.constant 1.000000e+00 : f32
    %37 = vector.broadcast %cst : f32 to vector<24x256xf32>
    %38 = arith.addf %37, %36 : vector<24x256xf32>
    %39 = arith.divf %37, %38 : vector<24x256xf32>
    %40 = arith.mulf %1, %39 : vector<24x256xf32>
    %cst_5 = arith.constant -2.200000e+00 : f32
    %41 = vector.broadcast %cst_5 : f32 to vector<24x256xf32>
    %42 = arith.cmpf oge, %1, %41 : vector<24x256xf32>
    %43 = arith.extui %42 : vector<24x256xi1> to vector<24x256xi32>
    %44 = arith.sitofp %43 : vector<24x256xi32> to vector<24x256xf32>
    %cst_6 = arith.constant -1.800000e+00 : f32
    %45 = vector.broadcast %cst_6 : f32 to vector<24x256xf32>
    %46 = arith.cmpf oge, %1, %45 : vector<24x256xf32>
    %47 = arith.extui %46 : vector<24x256xi1> to vector<24x256xi32>
    %48 = arith.sitofp %47 : vector<24x256xi32> to vector<24x256xf32>
    %cst_7 = arith.constant -1.400000e+00 : f32
    %49 = vector.broadcast %cst_7 : f32 to vector<24x256xf32>
    %50 = arith.cmpf oge, %1, %49 : vector<24x256xf32>
    %51 = arith.extui %50 : vector<24x256xi1> to vector<24x256xi32>
    %52 = arith.sitofp %51 : vector<24x256xi32> to vector<24x256xf32>
    %cst_8 = arith.constant -1.000000e+00 : f32
    %53 = vector.broadcast %cst_8 : f32 to vector<24x256xf32>
    %54 = arith.cmpf oge, %1, %53 : vector<24x256xf32>
    %55 = arith.extui %54 : vector<24x256xi1> to vector<24x256xi32>
    %56 = arith.sitofp %55 : vector<24x256xi32> to vector<24x256xf32>
    %cst_9 = arith.constant -6.000000e-01 : f32
    %57 = vector.broadcast %cst_9 : f32 to vector<24x256xf32>
    %58 = arith.cmpf oge, %1, %57 : vector<24x256xf32>
    %59 = arith.extui %58 : vector<24x256xi1> to vector<24x256xi32>
    %60 = arith.sitofp %59 : vector<24x256xi32> to vector<24x256xf32>
    %cst_10 = arith.constant -2.000000e-01 : f32
    %61 = vector.broadcast %cst_10 : f32 to vector<24x256xf32>
    %62 = arith.cmpf oge, %1, %61 : vector<24x256xf32>
    %63 = arith.extui %62 : vector<24x256xi1> to vector<24x256xi32>
    %64 = arith.sitofp %63 : vector<24x256xi32> to vector<24x256xf32>
    %cst_11 = arith.constant 2.000000e-01 : f32
    %65 = vector.broadcast %cst_11 : f32 to vector<24x256xf32>
    %66 = arith.cmpf oge, %1, %65 : vector<24x256xf32>
    %67 = arith.extui %66 : vector<24x256xi1> to vector<24x256xi32>
    %68 = arith.sitofp %67 : vector<24x256xi32> to vector<24x256xf32>
    %cst_12 = arith.constant 6.000000e-01 : f32
    %69 = vector.broadcast %cst_12 : f32 to vector<24x256xf32>
    %70 = arith.cmpf oge, %1, %69 : vector<24x256xf32>
    %71 = arith.extui %70 : vector<24x256xi1> to vector<24x256xi32>
    %72 = arith.sitofp %71 : vector<24x256xi32> to vector<24x256xf32>
    %cst_13 = arith.constant 1.000000e+00 : f32
    %73 = vector.broadcast %cst_13 : f32 to vector<24x256xf32>
    %74 = arith.cmpf oge, %1, %73 : vector<24x256xf32>
    %75 = arith.extui %74 : vector<24x256xi1> to vector<24x256xi32>
    %76 = arith.sitofp %75 : vector<24x256xi32> to vector<24x256xf32>
    %cst_14 = arith.constant 1.400000e+00 : f32
    %77 = vector.broadcast %cst_14 : f32 to vector<24x256xf32>
    %78 = arith.cmpf oge, %1, %77 : vector<24x256xf32>
    %79 = arith.extui %78 : vector<24x256xi1> to vector<24x256xi32>
    %80 = arith.sitofp %79 : vector<24x256xi32> to vector<24x256xf32>
    %cst_15 = arith.constant 1.800000e+00 : f32
    %81 = vector.broadcast %cst_15 : f32 to vector<24x256xf32>
    %82 = arith.cmpf oge, %1, %81 : vector<24x256xf32>
    %83 = arith.extui %82 : vector<24x256xi1> to vector<24x256xi32>
    %84 = arith.sitofp %83 : vector<24x256xi32> to vector<24x256xf32>
    %cst_16 = arith.constant 2.200000e+00 : f32
    %85 = vector.broadcast %cst_16 : f32 to vector<24x256xf32>
    %86 = arith.cmpf oge, %1, %85 : vector<24x256xf32>
    %87 = arith.extui %86 : vector<24x256xi1> to vector<24x256xi32>
    %88 = arith.sitofp %87 : vector<24x256xi32> to vector<24x256xf32>
    %89 = arith.subf %44, %48 : vector<24x256xf32>
    %90 = arith.subf %48, %52 : vector<24x256xf32>
    %91 = arith.subf %52, %56 : vector<24x256xf32>
    %92 = arith.subf %56, %60 : vector<24x256xf32>
    %93 = arith.subf %60, %64 : vector<24x256xf32>
    %94 = arith.subf %64, %68 : vector<24x256xf32>
    %95 = arith.subf %68, %72 : vector<24x256xf32>
    %96 = arith.subf %72, %76 : vector<24x256xf32>
    %97 = arith.subf %76, %80 : vector<24x256xf32>
    %98 = arith.subf %80, %84 : vector<24x256xf32>
    %99 = arith.subf %84, %88 : vector<24x256xf32>
    %cst_17 = arith.constant -2.200000e+00 : f32
    %100 = vector.broadcast %cst_17 : f32 to vector<24x256xf32>
    %101 = arith.subf %1, %100 : vector<24x256xf32>
    %cst_18 = arith.constant 4.000000e-01 : f32
    %102 = vector.broadcast %cst_18 : f32 to vector<24x256xf32>
    %103 = arith.divf %101, %102 : vector<24x256xf32>
    %104 = arith.mulf %103, %89 : vector<24x256xf32>
    %cst_19 = arith.constant -1.400000e+00 : f32
    %105 = vector.broadcast %cst_19 : f32 to vector<24x256xf32>
    %106 = arith.subf %105, %1 : vector<24x256xf32>
    %cst_20 = arith.constant 4.000000e-01 : f32
    %107 = vector.broadcast %cst_20 : f32 to vector<24x256xf32>
    %108 = arith.divf %106, %107 : vector<24x256xf32>
    %109 = arith.mulf %108, %90 : vector<24x256xf32>
    %110 = arith.addf %104, %109 : vector<24x256xf32>
    %cst_21 = arith.constant -1.800000e+00 : f32
    %111 = vector.broadcast %cst_21 : f32 to vector<24x256xf32>
    %112 = arith.subf %1, %111 : vector<24x256xf32>
    %cst_22 = arith.constant 4.000000e-01 : f32
    %113 = vector.broadcast %cst_22 : f32 to vector<24x256xf32>
    %114 = arith.divf %112, %113 : vector<24x256xf32>
    %115 = arith.mulf %114, %90 : vector<24x256xf32>
    %cst_23 = arith.constant -1.000000e+00 : f32
    %116 = vector.broadcast %cst_23 : f32 to vector<24x256xf32>
    %117 = arith.subf %116, %1 : vector<24x256xf32>
    %cst_24 = arith.constant 4.000000e-01 : f32
    %118 = vector.broadcast %cst_24 : f32 to vector<24x256xf32>
    %119 = arith.divf %117, %118 : vector<24x256xf32>
    %120 = arith.mulf %119, %91 : vector<24x256xf32>
    %121 = arith.addf %115, %120 : vector<24x256xf32>
    %cst_25 = arith.constant -1.400000e+00 : f32
    %122 = vector.broadcast %cst_25 : f32 to vector<24x256xf32>
    %123 = arith.subf %1, %122 : vector<24x256xf32>
    %cst_26 = arith.constant 4.000000e-01 : f32
    %124 = vector.broadcast %cst_26 : f32 to vector<24x256xf32>
    %125 = arith.divf %123, %124 : vector<24x256xf32>
    %126 = arith.mulf %125, %91 : vector<24x256xf32>
    %cst_27 = arith.constant -6.000000e-01 : f32
    %127 = vector.broadcast %cst_27 : f32 to vector<24x256xf32>
    %128 = arith.subf %127, %1 : vector<24x256xf32>
    %cst_28 = arith.constant 4.000000e-01 : f32
    %129 = vector.broadcast %cst_28 : f32 to vector<24x256xf32>
    %130 = arith.divf %128, %129 : vector<24x256xf32>
    %131 = arith.mulf %130, %92 : vector<24x256xf32>
    %132 = arith.addf %126, %131 : vector<24x256xf32>
    %cst_29 = arith.constant -1.000000e+00 : f32
    %133 = vector.broadcast %cst_29 : f32 to vector<24x256xf32>
    %134 = arith.subf %1, %133 : vector<24x256xf32>
    %cst_30 = arith.constant 4.000000e-01 : f32
    %135 = vector.broadcast %cst_30 : f32 to vector<24x256xf32>
    %136 = arith.divf %134, %135 : vector<24x256xf32>
    %137 = arith.mulf %136, %92 : vector<24x256xf32>
    %cst_31 = arith.constant -2.000000e-01 : f32
    %138 = vector.broadcast %cst_31 : f32 to vector<24x256xf32>
    %139 = arith.subf %138, %1 : vector<24x256xf32>
    %cst_32 = arith.constant 4.000000e-01 : f32
    %140 = vector.broadcast %cst_32 : f32 to vector<24x256xf32>
    %141 = arith.divf %139, %140 : vector<24x256xf32>
    %142 = arith.mulf %141, %93 : vector<24x256xf32>
    %143 = arith.addf %137, %142 : vector<24x256xf32>
    %cst_33 = arith.constant -6.000000e-01 : f32
    %144 = vector.broadcast %cst_33 : f32 to vector<24x256xf32>
    %145 = arith.subf %1, %144 : vector<24x256xf32>
    %cst_34 = arith.constant 4.000000e-01 : f32
    %146 = vector.broadcast %cst_34 : f32 to vector<24x256xf32>
    %147 = arith.divf %145, %146 : vector<24x256xf32>
    %148 = arith.mulf %147, %93 : vector<24x256xf32>
    %cst_35 = arith.constant 2.000000e-01 : f32
    %149 = vector.broadcast %cst_35 : f32 to vector<24x256xf32>
    %150 = arith.subf %149, %1 : vector<24x256xf32>
    %cst_36 = arith.constant 4.000000e-01 : f32
    %151 = vector.broadcast %cst_36 : f32 to vector<24x256xf32>
    %152 = arith.divf %150, %151 : vector<24x256xf32>
    %153 = arith.mulf %152, %94 : vector<24x256xf32>
    %154 = arith.addf %148, %153 : vector<24x256xf32>
    %cst_37 = arith.constant -2.000000e-01 : f32
    %155 = vector.broadcast %cst_37 : f32 to vector<24x256xf32>
    %156 = arith.subf %1, %155 : vector<24x256xf32>
    %cst_38 = arith.constant 4.000000e-01 : f32
    %157 = vector.broadcast %cst_38 : f32 to vector<24x256xf32>
    %158 = arith.divf %156, %157 : vector<24x256xf32>
    %159 = arith.mulf %158, %94 : vector<24x256xf32>
    %cst_39 = arith.constant 6.000000e-01 : f32
    %160 = vector.broadcast %cst_39 : f32 to vector<24x256xf32>
    %161 = arith.subf %160, %1 : vector<24x256xf32>
    %cst_40 = arith.constant 4.000000e-01 : f32
    %162 = vector.broadcast %cst_40 : f32 to vector<24x256xf32>
    %163 = arith.divf %161, %162 : vector<24x256xf32>
    %164 = arith.mulf %163, %95 : vector<24x256xf32>
    %165 = arith.addf %159, %164 : vector<24x256xf32>
    %cst_41 = arith.constant 2.000000e-01 : f32
    %166 = vector.broadcast %cst_41 : f32 to vector<24x256xf32>
    %167 = arith.subf %1, %166 : vector<24x256xf32>
    %cst_42 = arith.constant 4.000000e-01 : f32
    %168 = vector.broadcast %cst_42 : f32 to vector<24x256xf32>
    %169 = arith.divf %167, %168 : vector<24x256xf32>
    %170 = arith.mulf %169, %95 : vector<24x256xf32>
    %cst_43 = arith.constant 1.000000e+00 : f32
    %171 = vector.broadcast %cst_43 : f32 to vector<24x256xf32>
    %172 = arith.subf %171, %1 : vector<24x256xf32>
    %cst_44 = arith.constant 4.000000e-01 : f32
    %173 = vector.broadcast %cst_44 : f32 to vector<24x256xf32>
    %174 = arith.divf %172, %173 : vector<24x256xf32>
    %175 = arith.mulf %174, %96 : vector<24x256xf32>
    %176 = arith.addf %170, %175 : vector<24x256xf32>
    %cst_45 = arith.constant 6.000000e-01 : f32
    %177 = vector.broadcast %cst_45 : f32 to vector<24x256xf32>
    %178 = arith.subf %1, %177 : vector<24x256xf32>
    %cst_46 = arith.constant 4.000000e-01 : f32
    %179 = vector.broadcast %cst_46 : f32 to vector<24x256xf32>
    %180 = arith.divf %178, %179 : vector<24x256xf32>
    %181 = arith.mulf %180, %96 : vector<24x256xf32>
    %cst_47 = arith.constant 1.400000e+00 : f32
    %182 = vector.broadcast %cst_47 : f32 to vector<24x256xf32>
    %183 = arith.subf %182, %1 : vector<24x256xf32>
    %cst_48 = arith.constant 4.000000e-01 : f32
    %184 = vector.broadcast %cst_48 : f32 to vector<24x256xf32>
    %185 = arith.divf %183, %184 : vector<24x256xf32>
    %186 = arith.mulf %185, %97 : vector<24x256xf32>
    %187 = arith.addf %181, %186 : vector<24x256xf32>
    %cst_49 = arith.constant 1.000000e+00 : f32
    %188 = vector.broadcast %cst_49 : f32 to vector<24x256xf32>
    %189 = arith.subf %1, %188 : vector<24x256xf32>
    %cst_50 = arith.constant 4.000000e-01 : f32
    %190 = vector.broadcast %cst_50 : f32 to vector<24x256xf32>
    %191 = arith.divf %189, %190 : vector<24x256xf32>
    %192 = arith.mulf %191, %97 : vector<24x256xf32>
    %cst_51 = arith.constant 1.800000e+00 : f32
    %193 = vector.broadcast %cst_51 : f32 to vector<24x256xf32>
    %194 = arith.subf %193, %1 : vector<24x256xf32>
    %cst_52 = arith.constant 4.000000e-01 : f32
    %195 = vector.broadcast %cst_52 : f32 to vector<24x256xf32>
    %196 = arith.divf %194, %195 : vector<24x256xf32>
    %197 = arith.mulf %196, %98 : vector<24x256xf32>
    %198 = arith.addf %192, %197 : vector<24x256xf32>
    %cst_53 = arith.constant 1.400000e+00 : f32
    %199 = vector.broadcast %cst_53 : f32 to vector<24x256xf32>
    %200 = arith.subf %1, %199 : vector<24x256xf32>
    %cst_54 = arith.constant 4.000000e-01 : f32
    %201 = vector.broadcast %cst_54 : f32 to vector<24x256xf32>
    %202 = arith.divf %200, %201 : vector<24x256xf32>
    %203 = arith.mulf %202, %98 : vector<24x256xf32>
    %cst_55 = arith.constant 2.200000e+00 : f32
    %204 = vector.broadcast %cst_55 : f32 to vector<24x256xf32>
    %205 = arith.subf %204, %1 : vector<24x256xf32>
    %cst_56 = arith.constant 4.000000e-01 : f32
    %206 = vector.broadcast %cst_56 : f32 to vector<24x256xf32>
    %207 = arith.divf %205, %206 : vector<24x256xf32>
    %208 = arith.mulf %207, %99 : vector<24x256xf32>
    %209 = arith.addf %203, %208 : vector<24x256xf32>
    %cst_57 = arith.constant -2.200000e+00 : f32
    %210 = vector.broadcast %cst_57 : f32 to vector<24x256xf32>
    %211 = arith.subf %1, %210 : vector<24x256xf32>
    %cst_58 = arith.constant 8.000000e-01 : f32
    %212 = vector.broadcast %cst_58 : f32 to vector<24x256xf32>
    %213 = arith.divf %211, %212 : vector<24x256xf32>
    %214 = arith.mulf %213, %110 : vector<24x256xf32>
    %cst_59 = arith.constant -1.000000e+00 : f32
    %215 = vector.broadcast %cst_59 : f32 to vector<24x256xf32>
    %216 = arith.subf %215, %1 : vector<24x256xf32>
    %cst_60 = arith.constant 8.000000e-01 : f32
    %217 = vector.broadcast %cst_60 : f32 to vector<24x256xf32>
    %218 = arith.divf %216, %217 : vector<24x256xf32>
    %219 = arith.mulf %218, %121 : vector<24x256xf32>
    %220 = arith.addf %214, %219 : vector<24x256xf32>
    %cst_61 = arith.constant -1.800000e+00 : f32
    %221 = vector.broadcast %cst_61 : f32 to vector<24x256xf32>
    %222 = arith.subf %1, %221 : vector<24x256xf32>
    %cst_62 = arith.constant 8.000000e-01 : f32
    %223 = vector.broadcast %cst_62 : f32 to vector<24x256xf32>
    %224 = arith.divf %222, %223 : vector<24x256xf32>
    %225 = arith.mulf %224, %121 : vector<24x256xf32>
    %cst_63 = arith.constant -6.000000e-01 : f32
    %226 = vector.broadcast %cst_63 : f32 to vector<24x256xf32>
    %227 = arith.subf %226, %1 : vector<24x256xf32>
    %cst_64 = arith.constant 8.000000e-01 : f32
    %228 = vector.broadcast %cst_64 : f32 to vector<24x256xf32>
    %229 = arith.divf %227, %228 : vector<24x256xf32>
    %230 = arith.mulf %229, %132 : vector<24x256xf32>
    %231 = arith.addf %225, %230 : vector<24x256xf32>
    %cst_65 = arith.constant -1.400000e+00 : f32
    %232 = vector.broadcast %cst_65 : f32 to vector<24x256xf32>
    %233 = arith.subf %1, %232 : vector<24x256xf32>
    %cst_66 = arith.constant 8.000000e-01 : f32
    %234 = vector.broadcast %cst_66 : f32 to vector<24x256xf32>
    %235 = arith.divf %233, %234 : vector<24x256xf32>
    %236 = arith.mulf %235, %132 : vector<24x256xf32>
    %cst_67 = arith.constant -2.000000e-01 : f32
    %237 = vector.broadcast %cst_67 : f32 to vector<24x256xf32>
    %238 = arith.subf %237, %1 : vector<24x256xf32>
    %cst_68 = arith.constant 8.000000e-01 : f32
    %239 = vector.broadcast %cst_68 : f32 to vector<24x256xf32>
    %240 = arith.divf %238, %239 : vector<24x256xf32>
    %241 = arith.mulf %240, %143 : vector<24x256xf32>
    %242 = arith.addf %236, %241 : vector<24x256xf32>
    %cst_69 = arith.constant -1.000000e+00 : f32
    %243 = vector.broadcast %cst_69 : f32 to vector<24x256xf32>
    %244 = arith.subf %1, %243 : vector<24x256xf32>
    %cst_70 = arith.constant 8.000000e-01 : f32
    %245 = vector.broadcast %cst_70 : f32 to vector<24x256xf32>
    %246 = arith.divf %244, %245 : vector<24x256xf32>
    %247 = arith.mulf %246, %143 : vector<24x256xf32>
    %cst_71 = arith.constant 2.000000e-01 : f32
    %248 = vector.broadcast %cst_71 : f32 to vector<24x256xf32>
    %249 = arith.subf %248, %1 : vector<24x256xf32>
    %cst_72 = arith.constant 8.000000e-01 : f32
    %250 = vector.broadcast %cst_72 : f32 to vector<24x256xf32>
    %251 = arith.divf %249, %250 : vector<24x256xf32>
    %252 = arith.mulf %251, %154 : vector<24x256xf32>
    %253 = arith.addf %247, %252 : vector<24x256xf32>
    %cst_73 = arith.constant -6.000000e-01 : f32
    %254 = vector.broadcast %cst_73 : f32 to vector<24x256xf32>
    %255 = arith.subf %1, %254 : vector<24x256xf32>
    %cst_74 = arith.constant 8.000000e-01 : f32
    %256 = vector.broadcast %cst_74 : f32 to vector<24x256xf32>
    %257 = arith.divf %255, %256 : vector<24x256xf32>
    %258 = arith.mulf %257, %154 : vector<24x256xf32>
    %cst_75 = arith.constant 6.000000e-01 : f32
    %259 = vector.broadcast %cst_75 : f32 to vector<24x256xf32>
    %260 = arith.subf %259, %1 : vector<24x256xf32>
    %cst_76 = arith.constant 8.000000e-01 : f32
    %261 = vector.broadcast %cst_76 : f32 to vector<24x256xf32>
    %262 = arith.divf %260, %261 : vector<24x256xf32>
    %263 = arith.mulf %262, %165 : vector<24x256xf32>
    %264 = arith.addf %258, %263 : vector<24x256xf32>
    %cst_77 = arith.constant -2.000000e-01 : f32
    %265 = vector.broadcast %cst_77 : f32 to vector<24x256xf32>
    %266 = arith.subf %1, %265 : vector<24x256xf32>
    %cst_78 = arith.constant 8.000000e-01 : f32
    %267 = vector.broadcast %cst_78 : f32 to vector<24x256xf32>
    %268 = arith.divf %266, %267 : vector<24x256xf32>
    %269 = arith.mulf %268, %165 : vector<24x256xf32>
    %cst_79 = arith.constant 1.000000e+00 : f32
    %270 = vector.broadcast %cst_79 : f32 to vector<24x256xf32>
    %271 = arith.subf %270, %1 : vector<24x256xf32>
    %cst_80 = arith.constant 8.000000e-01 : f32
    %272 = vector.broadcast %cst_80 : f32 to vector<24x256xf32>
    %273 = arith.divf %271, %272 : vector<24x256xf32>
    %274 = arith.mulf %273, %176 : vector<24x256xf32>
    %275 = arith.addf %269, %274 : vector<24x256xf32>
    %cst_81 = arith.constant 2.000000e-01 : f32
    %276 = vector.broadcast %cst_81 : f32 to vector<24x256xf32>
    %277 = arith.subf %1, %276 : vector<24x256xf32>
    %cst_82 = arith.constant 8.000000e-01 : f32
    %278 = vector.broadcast %cst_82 : f32 to vector<24x256xf32>
    %279 = arith.divf %277, %278 : vector<24x256xf32>
    %280 = arith.mulf %279, %176 : vector<24x256xf32>
    %cst_83 = arith.constant 1.400000e+00 : f32
    %281 = vector.broadcast %cst_83 : f32 to vector<24x256xf32>
    %282 = arith.subf %281, %1 : vector<24x256xf32>
    %cst_84 = arith.constant 8.000000e-01 : f32
    %283 = vector.broadcast %cst_84 : f32 to vector<24x256xf32>
    %284 = arith.divf %282, %283 : vector<24x256xf32>
    %285 = arith.mulf %284, %187 : vector<24x256xf32>
    %286 = arith.addf %280, %285 : vector<24x256xf32>
    %cst_85 = arith.constant 6.000000e-01 : f32
    %287 = vector.broadcast %cst_85 : f32 to vector<24x256xf32>
    %288 = arith.subf %1, %287 : vector<24x256xf32>
    %cst_86 = arith.constant 8.000000e-01 : f32
    %289 = vector.broadcast %cst_86 : f32 to vector<24x256xf32>
    %290 = arith.divf %288, %289 : vector<24x256xf32>
    %291 = arith.mulf %290, %187 : vector<24x256xf32>
    %cst_87 = arith.constant 1.800000e+00 : f32
    %292 = vector.broadcast %cst_87 : f32 to vector<24x256xf32>
    %293 = arith.subf %292, %1 : vector<24x256xf32>
    %cst_88 = arith.constant 8.000000e-01 : f32
    %294 = vector.broadcast %cst_88 : f32 to vector<24x256xf32>
    %295 = arith.divf %293, %294 : vector<24x256xf32>
    %296 = arith.mulf %295, %198 : vector<24x256xf32>
    %297 = arith.addf %291, %296 : vector<24x256xf32>
    %cst_89 = arith.constant 1.000000e+00 : f32
    %298 = vector.broadcast %cst_89 : f32 to vector<24x256xf32>
    %299 = arith.subf %1, %298 : vector<24x256xf32>
    %cst_90 = arith.constant 8.000000e-01 : f32
    %300 = vector.broadcast %cst_90 : f32 to vector<24x256xf32>
    %301 = arith.divf %299, %300 : vector<24x256xf32>
    %302 = arith.mulf %301, %198 : vector<24x256xf32>
    %cst_91 = arith.constant 2.200000e+00 : f32
    %303 = vector.broadcast %cst_91 : f32 to vector<24x256xf32>
    %304 = arith.subf %303, %1 : vector<24x256xf32>
    %cst_92 = arith.constant 8.000000e-01 : f32
    %305 = vector.broadcast %cst_92 : f32 to vector<24x256xf32>
    %306 = arith.divf %304, %305 : vector<24x256xf32>
    %307 = arith.mulf %306, %209 : vector<24x256xf32>
    %308 = arith.addf %302, %307 : vector<24x256xf32>
    %cst_93 = arith.constant -2.200000e+00 : f32
    %309 = vector.broadcast %cst_93 : f32 to vector<24x256xf32>
    %310 = arith.subf %1, %309 : vector<24x256xf32>
    %cst_94 = arith.constant 1.200000e+00 : f32
    %311 = vector.broadcast %cst_94 : f32 to vector<24x256xf32>
    %312 = arith.divf %310, %311 : vector<24x256xf32>
    %313 = arith.mulf %312, %220 : vector<24x256xf32>
    %cst_95 = arith.constant -6.000000e-01 : f32
    %314 = vector.broadcast %cst_95 : f32 to vector<24x256xf32>
    %315 = arith.subf %314, %1 : vector<24x256xf32>
    %cst_96 = arith.constant 1.200000e+00 : f32
    %316 = vector.broadcast %cst_96 : f32 to vector<24x256xf32>
    %317 = arith.divf %315, %316 : vector<24x256xf32>
    %318 = arith.mulf %317, %231 : vector<24x256xf32>
    %319 = arith.addf %313, %318 : vector<24x256xf32>
    %cst_97 = arith.constant -1.800000e+00 : f32
    %320 = vector.broadcast %cst_97 : f32 to vector<24x256xf32>
    %321 = arith.subf %1, %320 : vector<24x256xf32>
    %cst_98 = arith.constant 1.200000e+00 : f32
    %322 = vector.broadcast %cst_98 : f32 to vector<24x256xf32>
    %323 = arith.divf %321, %322 : vector<24x256xf32>
    %324 = arith.mulf %323, %231 : vector<24x256xf32>
    %cst_99 = arith.constant -2.000000e-01 : f32
    %325 = vector.broadcast %cst_99 : f32 to vector<24x256xf32>
    %326 = arith.subf %325, %1 : vector<24x256xf32>
    %cst_100 = arith.constant 1.200000e+00 : f32
    %327 = vector.broadcast %cst_100 : f32 to vector<24x256xf32>
    %328 = arith.divf %326, %327 : vector<24x256xf32>
    %329 = arith.mulf %328, %242 : vector<24x256xf32>
    %330 = arith.addf %324, %329 : vector<24x256xf32>
    %cst_101 = arith.constant -1.400000e+00 : f32
    %331 = vector.broadcast %cst_101 : f32 to vector<24x256xf32>
    %332 = arith.subf %1, %331 : vector<24x256xf32>
    %cst_102 = arith.constant 1.200000e+00 : f32
    %333 = vector.broadcast %cst_102 : f32 to vector<24x256xf32>
    %334 = arith.divf %332, %333 : vector<24x256xf32>
    %335 = arith.mulf %334, %242 : vector<24x256xf32>
    %cst_103 = arith.constant 2.000000e-01 : f32
    %336 = vector.broadcast %cst_103 : f32 to vector<24x256xf32>
    %337 = arith.subf %336, %1 : vector<24x256xf32>
    %cst_104 = arith.constant 1.200000e+00 : f32
    %338 = vector.broadcast %cst_104 : f32 to vector<24x256xf32>
    %339 = arith.divf %337, %338 : vector<24x256xf32>
    %340 = arith.mulf %339, %253 : vector<24x256xf32>
    %341 = arith.addf %335, %340 : vector<24x256xf32>
    %cst_105 = arith.constant -1.000000e+00 : f32
    %342 = vector.broadcast %cst_105 : f32 to vector<24x256xf32>
    %343 = arith.subf %1, %342 : vector<24x256xf32>
    %cst_106 = arith.constant 1.200000e+00 : f32
    %344 = vector.broadcast %cst_106 : f32 to vector<24x256xf32>
    %345 = arith.divf %343, %344 : vector<24x256xf32>
    %346 = arith.mulf %345, %253 : vector<24x256xf32>
    %cst_107 = arith.constant 6.000000e-01 : f32
    %347 = vector.broadcast %cst_107 : f32 to vector<24x256xf32>
    %348 = arith.subf %347, %1 : vector<24x256xf32>
    %cst_108 = arith.constant 1.200000e+00 : f32
    %349 = vector.broadcast %cst_108 : f32 to vector<24x256xf32>
    %350 = arith.divf %348, %349 : vector<24x256xf32>
    %351 = arith.mulf %350, %264 : vector<24x256xf32>
    %352 = arith.addf %346, %351 : vector<24x256xf32>
    %cst_109 = arith.constant -6.000000e-01 : f32
    %353 = vector.broadcast %cst_109 : f32 to vector<24x256xf32>
    %354 = arith.subf %1, %353 : vector<24x256xf32>
    %cst_110 = arith.constant 1.200000e+00 : f32
    %355 = vector.broadcast %cst_110 : f32 to vector<24x256xf32>
    %356 = arith.divf %354, %355 : vector<24x256xf32>
    %357 = arith.mulf %356, %264 : vector<24x256xf32>
    %cst_111 = arith.constant 1.000000e+00 : f32
    %358 = vector.broadcast %cst_111 : f32 to vector<24x256xf32>
    %359 = arith.subf %358, %1 : vector<24x256xf32>
    %cst_112 = arith.constant 1.200000e+00 : f32
    %360 = vector.broadcast %cst_112 : f32 to vector<24x256xf32>
    %361 = arith.divf %359, %360 : vector<24x256xf32>
    %362 = arith.mulf %361, %275 : vector<24x256xf32>
    %363 = arith.addf %357, %362 : vector<24x256xf32>
    %cst_113 = arith.constant -2.000000e-01 : f32
    %364 = vector.broadcast %cst_113 : f32 to vector<24x256xf32>
    %365 = arith.subf %1, %364 : vector<24x256xf32>
    %cst_114 = arith.constant 1.200000e+00 : f32
    %366 = vector.broadcast %cst_114 : f32 to vector<24x256xf32>
    %367 = arith.divf %365, %366 : vector<24x256xf32>
    %368 = arith.mulf %367, %275 : vector<24x256xf32>
    %cst_115 = arith.constant 1.400000e+00 : f32
    %369 = vector.broadcast %cst_115 : f32 to vector<24x256xf32>
    %370 = arith.subf %369, %1 : vector<24x256xf32>
    %cst_116 = arith.constant 1.200000e+00 : f32
    %371 = vector.broadcast %cst_116 : f32 to vector<24x256xf32>
    %372 = arith.divf %370, %371 : vector<24x256xf32>
    %373 = arith.mulf %372, %286 : vector<24x256xf32>
    %374 = arith.addf %368, %373 : vector<24x256xf32>
    %cst_117 = arith.constant 2.000000e-01 : f32
    %375 = vector.broadcast %cst_117 : f32 to vector<24x256xf32>
    %376 = arith.subf %1, %375 : vector<24x256xf32>
    %cst_118 = arith.constant 1.200000e+00 : f32
    %377 = vector.broadcast %cst_118 : f32 to vector<24x256xf32>
    %378 = arith.divf %376, %377 : vector<24x256xf32>
    %379 = arith.mulf %378, %286 : vector<24x256xf32>
    %cst_119 = arith.constant 1.800000e+00 : f32
    %380 = vector.broadcast %cst_119 : f32 to vector<24x256xf32>
    %381 = arith.subf %380, %1 : vector<24x256xf32>
    %cst_120 = arith.constant 1.200000e+00 : f32
    %382 = vector.broadcast %cst_120 : f32 to vector<24x256xf32>
    %383 = arith.divf %381, %382 : vector<24x256xf32>
    %384 = arith.mulf %383, %297 : vector<24x256xf32>
    %385 = arith.addf %379, %384 : vector<24x256xf32>
    %cst_121 = arith.constant 6.000000e-01 : f32
    %386 = vector.broadcast %cst_121 : f32 to vector<24x256xf32>
    %387 = arith.subf %1, %386 : vector<24x256xf32>
    %cst_122 = arith.constant 1.200000e+00 : f32
    %388 = vector.broadcast %cst_122 : f32 to vector<24x256xf32>
    %389 = arith.divf %387, %388 : vector<24x256xf32>
    %390 = arith.mulf %389, %297 : vector<24x256xf32>
    %cst_123 = arith.constant 2.200000e+00 : f32
    %391 = vector.broadcast %cst_123 : f32 to vector<24x256xf32>
    %392 = arith.subf %391, %1 : vector<24x256xf32>
    %cst_124 = arith.constant 1.200000e+00 : f32
    %393 = vector.broadcast %cst_124 : f32 to vector<24x256xf32>
    %394 = arith.divf %392, %393 : vector<24x256xf32>
    %395 = arith.mulf %394, %308 : vector<24x256xf32>
    %396 = arith.addf %390, %395 : vector<24x256xf32>
    %397 = tpu.concatenate %40, %319, %330, %341, %352, %363, %374, %385, %396 in 0 : vector<24x256xf32>, vector<24x256xf32>, vector<24x256xf32>, vector<24x256xf32>, vector<24x256xf32>, vector<24x256xf32>, vector<24x256xf32>, vector<24x256xf32>, vector<24x256xf32> -> vector<216x256xf32>
    %c0_125 = arith.constant 0 : index
    %c0_126 = arith.constant 0 : index
    %398 = vector.load %arg2[%c0_125, %c0_126] : memref<4x216xf32, #tpu.memory_space<vmem>>, vector<4x216xf32>
    %cst_127 = arith.constant dense<0.000000e+00> : vector<4x256xf32>
    %399 = tpu.matmul %398, %397, %cst_127 {dimension_numbers = #tpu.dot_dimension_numbers<[1], [0], [0], [1], [0, 0, 1, 1], [], []>} : vector<4x216xf32>, vector<216x256xf32>, vector<4x256xf32> -> vector<4x256xf32>
    %c0_128 = arith.constant 0 : index
    %c0_129 = arith.constant 0 : index
    %400 = vector.load %arg3[%c0_128, %c0_129] : memref<4x1xf32, #tpu.memory_space<vmem>>, vector<4x1xf32>
    %401 = vector.broadcast %400 : vector<4x1xf32> to vector<4x256xf32>
    %402 = arith.addf %399, %401 : vector<4x256xf32>
    %cst_130 = arith.constant 0.000000e+00 : f32
    %403 = vector.broadcast %cst_130 : f32 to vector<4x256xf32>
    %404 = arith.maximumf %402, %403 : vector<4x256xf32>
    %c255_i32_131 = arith.constant 255 : i32
    %405 = tpu.dynamic_rotate %404 by %c255_i32_131 dim 1 : vector<4x256xf32>, i32 -> vector<4x256xf32>
    %406 = vector.broadcast %25 : vector<1x256xf32> to vector<4x256xf32>
    %407 = arith.mulf %405, %406 : vector<4x256xf32>
    %c240_i32_132 = arith.constant 240 : i32
    %408 = tpu.dynamic_rotate %404 by %c240_i32_132 dim 1 : vector<4x256xf32>, i32 -> vector<4x256xf32>
    %409 = vector.broadcast %29 : vector<1x256xf32> to vector<4x256xf32>
    %410 = arith.mulf %408, %409 : vector<4x256xf32>
    %c239_i32_133 = arith.constant 239 : i32
    %411 = tpu.dynamic_rotate %404 by %c239_i32_133 dim 1 : vector<4x256xf32>, i32 -> vector<4x256xf32>
    %412 = vector.broadcast %34 : vector<1x256xf32> to vector<4x256xf32>
    %413 = arith.mulf %411, %412 : vector<4x256xf32>
    %c0_134 = arith.constant 0 : index
    %c0_135 = arith.constant 0 : index
    %414 = vector.load %arg8[%c0_134, %c0_135] : memref<4x1xf32, #tpu.memory_space<vmem>>, vector<4x1xf32>
    %c0_136 = arith.constant 0 : index
    %c0_137 = arith.constant 0 : index
    %415 = vector.load %arg4[%c0_136, %c0_137] : memref<4x4xf32, #tpu.memory_space<vmem>>, vector<4x4xf32>
    %cst_138 = arith.constant dense<0.000000e+00> : vector<4x256xf32>
    %416 = tpu.matmul %415, %404, %cst_138 {dimension_numbers = #tpu.dot_dimension_numbers<[1], [0], [0], [1], [0, 0, 1, 1], [], []>} : vector<4x4xf32>, vector<4x256xf32>, vector<4x256xf32> -> vector<4x256xf32>
    %417 = vector.broadcast %414 : vector<4x1xf32> to vector<4x256xf32>
    %418 = arith.addf %416, %417 : vector<4x256xf32>
    %c0_139 = arith.constant 0 : index
    %c0_140 = arith.constant 0 : index
    %419 = vector.load %arg5[%c0_139, %c0_140] : memref<4x8xf32, #tpu.memory_space<vmem>>, vector<4x8xf32>
    %420 = tpu.concatenate %404, %407 in 0 : vector<4x256xf32>, vector<4x256xf32> -> vector<8x256xf32>
    %cst_141 = arith.constant dense<0.000000e+00> : vector<4x256xf32>
    %421 = tpu.matmul %419, %420, %cst_141 {dimension_numbers = #tpu.dot_dimension_numbers<[1], [0], [0], [1], [0, 0, 1, 1], [], []>} : vector<4x8xf32>, vector<8x256xf32>, vector<4x256xf32> -> vector<4x256xf32>
    %422 = vector.broadcast %414 : vector<4x1xf32> to vector<4x256xf32>
    %423 = arith.addf %421, %422 : vector<4x256xf32>
    %c0_142 = arith.constant 0 : index
    %c0_143 = arith.constant 0 : index
    %424 = vector.load %arg6[%c0_142, %c0_143] : memref<4x8xf32, #tpu.memory_space<vmem>>, vector<4x8xf32>
    %425 = tpu.concatenate %410, %404 in 0 : vector<4x256xf32>, vector<4x256xf32> -> vector<8x256xf32>
    %cst_144 = arith.constant dense<0.000000e+00> : vector<4x256xf32>
    %426 = tpu.matmul %424, %425, %cst_144 {dimension_numbers = #tpu.dot_dimension_numbers<[1], [0], [0], [1], [0, 0, 1, 1], [], []>} : vector<4x8xf32>, vector<8x256xf32>, vector<4x256xf32> -> vector<4x256xf32>
    %427 = vector.broadcast %414 : vector<4x1xf32> to vector<4x256xf32>
    %428 = arith.addf %426, %427 : vector<4x256xf32>
    %c0_145 = arith.constant 0 : index
    %c0_146 = arith.constant 0 : index
    %429 = vector.load %arg7[%c0_145, %c0_146] : memref<4x16xf32, #tpu.memory_space<vmem>>, vector<4x16xf32>
    %430 = tpu.concatenate %410, %404, %407, %413 in 0 : vector<4x256xf32>, vector<4x256xf32>, vector<4x256xf32>, vector<4x256xf32> -> vector<16x256xf32>
    %cst_147 = arith.constant dense<0.000000e+00> : vector<4x256xf32>
    %431 = tpu.matmul %429, %430, %cst_147 {dimension_numbers = #tpu.dot_dimension_numbers<[1], [0], [0], [1], [0, 0, 1, 1], [], []>} : vector<4x16xf32>, vector<16x256xf32>, vector<4x256xf32> -> vector<4x256xf32>
    %432 = vector.broadcast %414 : vector<4x1xf32> to vector<4x256xf32>
    %433 = arith.addf %431, %432 : vector<4x256xf32>
    %434 = tpu.concatenate %418, %423, %428, %433 in 1 : vector<4x256xf32>, vector<4x256xf32>, vector<4x256xf32>, vector<4x256xf32> -> vector<4x1024xf32>
    %cst_148 = arith.constant 0.000000e+00 : f32
    %435 = vector.broadcast %cst_148 : f32 to vector<4x1024xf32>
    %436 = arith.maximumf %434, %435 : vector<4x1024xf32>
    %437 = arith.negf %436 : vector<4x1024xf32>
    %438 = math.exp %437 : vector<4x1024xf32>
    %cst_149 = arith.constant 1.000000e+00 : f32
    %439 = vector.broadcast %cst_149 : f32 to vector<4x1024xf32>
    %440 = arith.addf %439, %438 : vector<4x1024xf32>
    %441 = arith.divf %439, %440 : vector<4x1024xf32>
    %442 = arith.mulf %436, %441 : vector<4x1024xf32>
    %cst_150 = arith.constant -2.200000e+00 : f32
    %443 = vector.broadcast %cst_150 : f32 to vector<4x1024xf32>
    %444 = arith.cmpf oge, %436, %443 : vector<4x1024xf32>
    %445 = arith.extui %444 : vector<4x1024xi1> to vector<4x1024xi32>
    %446 = arith.sitofp %445 : vector<4x1024xi32> to vector<4x1024xf32>
    %cst_151 = arith.constant -1.800000e+00 : f32
    %447 = vector.broadcast %cst_151 : f32 to vector<4x1024xf32>
    %448 = arith.cmpf oge, %436, %447 : vector<4x1024xf32>
    %449 = arith.extui %448 : vector<4x1024xi1> to vector<4x1024xi32>
    %450 = arith.sitofp %449 : vector<4x1024xi32> to vector<4x1024xf32>
    %cst_152 = arith.constant -1.400000e+00 : f32
    %451 = vector.broadcast %cst_152 : f32 to vector<4x1024xf32>
    %452 = arith.cmpf oge, %436, %451 : vector<4x1024xf32>
    %453 = arith.extui %452 : vector<4x1024xi1> to vector<4x1024xi32>
    %454 = arith.sitofp %453 : vector<4x1024xi32> to vector<4x1024xf32>
    %cst_153 = arith.constant -1.000000e+00 : f32
    %455 = vector.broadcast %cst_153 : f32 to vector<4x1024xf32>
    %456 = arith.cmpf oge, %436, %455 : vector<4x1024xf32>
    %457 = arith.extui %456 : vector<4x1024xi1> to vector<4x1024xi32>
    %458 = arith.sitofp %457 : vector<4x1024xi32> to vector<4x1024xf32>
    %cst_154 = arith.constant -6.000000e-01 : f32
    %459 = vector.broadcast %cst_154 : f32 to vector<4x1024xf32>
    %460 = arith.cmpf oge, %436, %459 : vector<4x1024xf32>
    %461 = arith.extui %460 : vector<4x1024xi1> to vector<4x1024xi32>
    %462 = arith.sitofp %461 : vector<4x1024xi32> to vector<4x1024xf32>
    %cst_155 = arith.constant -2.000000e-01 : f32
    %463 = vector.broadcast %cst_155 : f32 to vector<4x1024xf32>
    %464 = arith.cmpf oge, %436, %463 : vector<4x1024xf32>
    %465 = arith.extui %464 : vector<4x1024xi1> to vector<4x1024xi32>
    %466 = arith.sitofp %465 : vector<4x1024xi32> to vector<4x1024xf32>
    %cst_156 = arith.constant 2.000000e-01 : f32
    %467 = vector.broadcast %cst_156 : f32 to vector<4x1024xf32>
    %468 = arith.cmpf oge, %436, %467 : vector<4x1024xf32>
    %469 = arith.extui %468 : vector<4x1024xi1> to vector<4x1024xi32>
    %470 = arith.sitofp %469 : vector<4x1024xi32> to vector<4x1024xf32>
    %cst_157 = arith.constant 6.000000e-01 : f32
    %471 = vector.broadcast %cst_157 : f32 to vector<4x1024xf32>
    %472 = arith.cmpf oge, %436, %471 : vector<4x1024xf32>
    %473 = arith.extui %472 : vector<4x1024xi1> to vector<4x1024xi32>
    %474 = arith.sitofp %473 : vector<4x1024xi32> to vector<4x1024xf32>
    %cst_158 = arith.constant 1.000000e+00 : f32
    %475 = vector.broadcast %cst_158 : f32 to vector<4x1024xf32>
    %476 = arith.cmpf oge, %436, %475 : vector<4x1024xf32>
    %477 = arith.extui %476 : vector<4x1024xi1> to vector<4x1024xi32>
    %478 = arith.sitofp %477 : vector<4x1024xi32> to vector<4x1024xf32>
    %cst_159 = arith.constant 1.400000e+00 : f32
    %479 = vector.broadcast %cst_159 : f32 to vector<4x1024xf32>
    %480 = arith.cmpf oge, %436, %479 : vector<4x1024xf32>
    %481 = arith.extui %480 : vector<4x1024xi1> to vector<4x1024xi32>
    %482 = arith.sitofp %481 : vector<4x1024xi32> to vector<4x1024xf32>
    %cst_160 = arith.constant 1.800000e+00 : f32
    %483 = vector.broadcast %cst_160 : f32 to vector<4x1024xf32>
    %484 = arith.cmpf oge, %436, %483 : vector<4x1024xf32>
    %485 = arith.extui %484 : vector<4x1024xi1> to vector<4x1024xi32>
    %486 = arith.sitofp %485 : vector<4x1024xi32> to vector<4x1024xf32>
    %cst_161 = arith.constant 2.200000e+00 : f32
    %487 = vector.broadcast %cst_161 : f32 to vector<4x1024xf32>
    %488 = arith.cmpf oge, %436, %487 : vector<4x1024xf32>
    %489 = arith.extui %488 : vector<4x1024xi1> to vector<4x1024xi32>
    %490 = arith.sitofp %489 : vector<4x1024xi32> to vector<4x1024xf32>
    %491 = arith.subf %446, %450 : vector<4x1024xf32>
    %492 = arith.subf %450, %454 : vector<4x1024xf32>
    %493 = arith.subf %454, %458 : vector<4x1024xf32>
    %494 = arith.subf %458, %462 : vector<4x1024xf32>
    %495 = arith.subf %462, %466 : vector<4x1024xf32>
    %496 = arith.subf %466, %470 : vector<4x1024xf32>
    %497 = arith.subf %470, %474 : vector<4x1024xf32>
    %498 = arith.subf %474, %478 : vector<4x1024xf32>
    %499 = arith.subf %478, %482 : vector<4x1024xf32>
    %500 = arith.subf %482, %486 : vector<4x1024xf32>
    %501 = arith.subf %486, %490 : vector<4x1024xf32>
    %cst_162 = arith.constant -2.200000e+00 : f32
    %502 = vector.broadcast %cst_162 : f32 to vector<4x1024xf32>
    %503 = arith.subf %436, %502 : vector<4x1024xf32>
    %cst_163 = arith.constant 4.000000e-01 : f32
    %504 = vector.broadcast %cst_163 : f32 to vector<4x1024xf32>
    %505 = arith.divf %503, %504 : vector<4x1024xf32>
    %506 = arith.mulf %505, %491 : vector<4x1024xf32>
    %cst_164 = arith.constant -1.400000e+00 : f32
    %507 = vector.broadcast %cst_164 : f32 to vector<4x1024xf32>
    %508 = arith.subf %507, %436 : vector<4x1024xf32>
    %cst_165 = arith.constant 4.000000e-01 : f32
    %509 = vector.broadcast %cst_165 : f32 to vector<4x1024xf32>
    %510 = arith.divf %508, %509 : vector<4x1024xf32>
    %511 = arith.mulf %510, %492 : vector<4x1024xf32>
    %512 = arith.addf %506, %511 : vector<4x1024xf32>
    %cst_166 = arith.constant -1.800000e+00 : f32
    %513 = vector.broadcast %cst_166 : f32 to vector<4x1024xf32>
    %514 = arith.subf %436, %513 : vector<4x1024xf32>
    %cst_167 = arith.constant 4.000000e-01 : f32
    %515 = vector.broadcast %cst_167 : f32 to vector<4x1024xf32>
    %516 = arith.divf %514, %515 : vector<4x1024xf32>
    %517 = arith.mulf %516, %492 : vector<4x1024xf32>
    %cst_168 = arith.constant -1.000000e+00 : f32
    %518 = vector.broadcast %cst_168 : f32 to vector<4x1024xf32>
    %519 = arith.subf %518, %436 : vector<4x1024xf32>
    %cst_169 = arith.constant 4.000000e-01 : f32
    %520 = vector.broadcast %cst_169 : f32 to vector<4x1024xf32>
    %521 = arith.divf %519, %520 : vector<4x1024xf32>
    %522 = arith.mulf %521, %493 : vector<4x1024xf32>
    %523 = arith.addf %517, %522 : vector<4x1024xf32>
    %cst_170 = arith.constant -1.400000e+00 : f32
    %524 = vector.broadcast %cst_170 : f32 to vector<4x1024xf32>
    %525 = arith.subf %436, %524 : vector<4x1024xf32>
    %cst_171 = arith.constant 4.000000e-01 : f32
    %526 = vector.broadcast %cst_171 : f32 to vector<4x1024xf32>
    %527 = arith.divf %525, %526 : vector<4x1024xf32>
    %528 = arith.mulf %527, %493 : vector<4x1024xf32>
    %cst_172 = arith.constant -6.000000e-01 : f32
    %529 = vector.broadcast %cst_172 : f32 to vector<4x1024xf32>
    %530 = arith.subf %529, %436 : vector<4x1024xf32>
    %cst_173 = arith.constant 4.000000e-01 : f32
    %531 = vector.broadcast %cst_173 : f32 to vector<4x1024xf32>
    %532 = arith.divf %530, %531 : vector<4x1024xf32>
    %533 = arith.mulf %532, %494 : vector<4x1024xf32>
    %534 = arith.addf %528, %533 : vector<4x1024xf32>
    %cst_174 = arith.constant -1.000000e+00 : f32
    %535 = vector.broadcast %cst_174 : f32 to vector<4x1024xf32>
    %536 = arith.subf %436, %535 : vector<4x1024xf32>
    %cst_175 = arith.constant 4.000000e-01 : f32
    %537 = vector.broadcast %cst_175 : f32 to vector<4x1024xf32>
    %538 = arith.divf %536, %537 : vector<4x1024xf32>
    %539 = arith.mulf %538, %494 : vector<4x1024xf32>
    %cst_176 = arith.constant -2.000000e-01 : f32
    %540 = vector.broadcast %cst_176 : f32 to vector<4x1024xf32>
    %541 = arith.subf %540, %436 : vector<4x1024xf32>
    %cst_177 = arith.constant 4.000000e-01 : f32
    %542 = vector.broadcast %cst_177 : f32 to vector<4x1024xf32>
    %543 = arith.divf %541, %542 : vector<4x1024xf32>
    %544 = arith.mulf %543, %495 : vector<4x1024xf32>
    %545 = arith.addf %539, %544 : vector<4x1024xf32>
    %cst_178 = arith.constant -6.000000e-01 : f32
    %546 = vector.broadcast %cst_178 : f32 to vector<4x1024xf32>
    %547 = arith.subf %436, %546 : vector<4x1024xf32>
    %cst_179 = arith.constant 4.000000e-01 : f32
    %548 = vector.broadcast %cst_179 : f32 to vector<4x1024xf32>
    %549 = arith.divf %547, %548 : vector<4x1024xf32>
    %550 = arith.mulf %549, %495 : vector<4x1024xf32>
    %cst_180 = arith.constant 2.000000e-01 : f32
    %551 = vector.broadcast %cst_180 : f32 to vector<4x1024xf32>
    %552 = arith.subf %551, %436 : vector<4x1024xf32>
    %cst_181 = arith.constant 4.000000e-01 : f32
    %553 = vector.broadcast %cst_181 : f32 to vector<4x1024xf32>
    %554 = arith.divf %552, %553 : vector<4x1024xf32>
    %555 = arith.mulf %554, %496 : vector<4x1024xf32>
    %556 = arith.addf %550, %555 : vector<4x1024xf32>
    %cst_182 = arith.constant -2.000000e-01 : f32
    %557 = vector.broadcast %cst_182 : f32 to vector<4x1024xf32>
    %558 = arith.subf %436, %557 : vector<4x1024xf32>
    %cst_183 = arith.constant 4.000000e-01 : f32
    %559 = vector.broadcast %cst_183 : f32 to vector<4x1024xf32>
    %560 = arith.divf %558, %559 : vector<4x1024xf32>
    %561 = arith.mulf %560, %496 : vector<4x1024xf32>
    %cst_184 = arith.constant 6.000000e-01 : f32
    %562 = vector.broadcast %cst_184 : f32 to vector<4x1024xf32>
    %563 = arith.subf %562, %436 : vector<4x1024xf32>
    %cst_185 = arith.constant 4.000000e-01 : f32
    %564 = vector.broadcast %cst_185 : f32 to vector<4x1024xf32>
    %565 = arith.divf %563, %564 : vector<4x1024xf32>
    %566 = arith.mulf %565, %497 : vector<4x1024xf32>
    %567 = arith.addf %561, %566 : vector<4x1024xf32>
    %cst_186 = arith.constant 2.000000e-01 : f32
    %568 = vector.broadcast %cst_186 : f32 to vector<4x1024xf32>
    %569 = arith.subf %436, %568 : vector<4x1024xf32>
    %cst_187 = arith.constant 4.000000e-01 : f32
    %570 = vector.broadcast %cst_187 : f32 to vector<4x1024xf32>
    %571 = arith.divf %569, %570 : vector<4x1024xf32>
    %572 = arith.mulf %571, %497 : vector<4x1024xf32>
    %cst_188 = arith.constant 1.000000e+00 : f32
    %573 = vector.broadcast %cst_188 : f32 to vector<4x1024xf32>
    %574 = arith.subf %573, %436 : vector<4x1024xf32>
    %cst_189 = arith.constant 4.000000e-01 : f32
    %575 = vector.broadcast %cst_189 : f32 to vector<4x1024xf32>
    %576 = arith.divf %574, %575 : vector<4x1024xf32>
    %577 = arith.mulf %576, %498 : vector<4x1024xf32>
    %578 = arith.addf %572, %577 : vector<4x1024xf32>
    %cst_190 = arith.constant 6.000000e-01 : f32
    %579 = vector.broadcast %cst_190 : f32 to vector<4x1024xf32>
    %580 = arith.subf %436, %579 : vector<4x1024xf32>
    %cst_191 = arith.constant 4.000000e-01 : f32
    %581 = vector.broadcast %cst_191 : f32 to vector<4x1024xf32>
    %582 = arith.divf %580, %581 : vector<4x1024xf32>
    %583 = arith.mulf %582, %498 : vector<4x1024xf32>
    %cst_192 = arith.constant 1.400000e+00 : f32
    %584 = vector.broadcast %cst_192 : f32 to vector<4x1024xf32>
    %585 = arith.subf %584, %436 : vector<4x1024xf32>
    %cst_193 = arith.constant 4.000000e-01 : f32
    %586 = vector.broadcast %cst_193 : f32 to vector<4x1024xf32>
    %587 = arith.divf %585, %586 : vector<4x1024xf32>
    %588 = arith.mulf %587, %499 : vector<4x1024xf32>
    %589 = arith.addf %583, %588 : vector<4x1024xf32>
    %cst_194 = arith.constant 1.000000e+00 : f32
    %590 = vector.broadcast %cst_194 : f32 to vector<4x1024xf32>
    %591 = arith.subf %436, %590 : vector<4x1024xf32>
    %cst_195 = arith.constant 4.000000e-01 : f32
    %592 = vector.broadcast %cst_195 : f32 to vector<4x1024xf32>
    %593 = arith.divf %591, %592 : vector<4x1024xf32>
    %594 = arith.mulf %593, %499 : vector<4x1024xf32>
    %cst_196 = arith.constant 1.800000e+00 : f32
    %595 = vector.broadcast %cst_196 : f32 to vector<4x1024xf32>
    %596 = arith.subf %595, %436 : vector<4x1024xf32>
    %cst_197 = arith.constant 4.000000e-01 : f32
    %597 = vector.broadcast %cst_197 : f32 to vector<4x1024xf32>
    %598 = arith.divf %596, %597 : vector<4x1024xf32>
    %599 = arith.mulf %598, %500 : vector<4x1024xf32>
    %600 = arith.addf %594, %599 : vector<4x1024xf32>
    %cst_198 = arith.constant 1.400000e+00 : f32
    %601 = vector.broadcast %cst_198 : f32 to vector<4x1024xf32>
    %602 = arith.subf %436, %601 : vector<4x1024xf32>
    %cst_199 = arith.constant 4.000000e-01 : f32
    %603 = vector.broadcast %cst_199 : f32 to vector<4x1024xf32>
    %604 = arith.divf %602, %603 : vector<4x1024xf32>
    %605 = arith.mulf %604, %500 : vector<4x1024xf32>
    %cst_200 = arith.constant 2.200000e+00 : f32
    %606 = vector.broadcast %cst_200 : f32 to vector<4x1024xf32>
    %607 = arith.subf %606, %436 : vector<4x1024xf32>
    %cst_201 = arith.constant 4.000000e-01 : f32
    %608 = vector.broadcast %cst_201 : f32 to vector<4x1024xf32>
    %609 = arith.divf %607, %608 : vector<4x1024xf32>
    %610 = arith.mulf %609, %501 : vector<4x1024xf32>
    %611 = arith.addf %605, %610 : vector<4x1024xf32>
    %cst_202 = arith.constant -2.200000e+00 : f32
    %612 = vector.broadcast %cst_202 : f32 to vector<4x1024xf32>
    %613 = arith.subf %436, %612 : vector<4x1024xf32>
    %cst_203 = arith.constant 8.000000e-01 : f32
    %614 = vector.broadcast %cst_203 : f32 to vector<4x1024xf32>
    %615 = arith.divf %613, %614 : vector<4x1024xf32>
    %616 = arith.mulf %615, %512 : vector<4x1024xf32>
    %cst_204 = arith.constant -1.000000e+00 : f32
    %617 = vector.broadcast %cst_204 : f32 to vector<4x1024xf32>
    %618 = arith.subf %617, %436 : vector<4x1024xf32>
    %cst_205 = arith.constant 8.000000e-01 : f32
    %619 = vector.broadcast %cst_205 : f32 to vector<4x1024xf32>
    %620 = arith.divf %618, %619 : vector<4x1024xf32>
    %621 = arith.mulf %620, %523 : vector<4x1024xf32>
    %622 = arith.addf %616, %621 : vector<4x1024xf32>
    %cst_206 = arith.constant -1.800000e+00 : f32
    %623 = vector.broadcast %cst_206 : f32 to vector<4x1024xf32>
    %624 = arith.subf %436, %623 : vector<4x1024xf32>
    %cst_207 = arith.constant 8.000000e-01 : f32
    %625 = vector.broadcast %cst_207 : f32 to vector<4x1024xf32>
    %626 = arith.divf %624, %625 : vector<4x1024xf32>
    %627 = arith.mulf %626, %523 : vector<4x1024xf32>
    %cst_208 = arith.constant -6.000000e-01 : f32
    %628 = vector.broadcast %cst_208 : f32 to vector<4x1024xf32>
    %629 = arith.subf %628, %436 : vector<4x1024xf32>
    %cst_209 = arith.constant 8.000000e-01 : f32
    %630 = vector.broadcast %cst_209 : f32 to vector<4x1024xf32>
    %631 = arith.divf %629, %630 : vector<4x1024xf32>
    %632 = arith.mulf %631, %534 : vector<4x1024xf32>
    %633 = arith.addf %627, %632 : vector<4x1024xf32>
    %cst_210 = arith.constant -1.400000e+00 : f32
    %634 = vector.broadcast %cst_210 : f32 to vector<4x1024xf32>
    %635 = arith.subf %436, %634 : vector<4x1024xf32>
    %cst_211 = arith.constant 8.000000e-01 : f32
    %636 = vector.broadcast %cst_211 : f32 to vector<4x1024xf32>
    %637 = arith.divf %635, %636 : vector<4x1024xf32>
    %638 = arith.mulf %637, %534 : vector<4x1024xf32>
    %cst_212 = arith.constant -2.000000e-01 : f32
    %639 = vector.broadcast %cst_212 : f32 to vector<4x1024xf32>
    %640 = arith.subf %639, %436 : vector<4x1024xf32>
    %cst_213 = arith.constant 8.000000e-01 : f32
    %641 = vector.broadcast %cst_213 : f32 to vector<4x1024xf32>
    %642 = arith.divf %640, %641 : vector<4x1024xf32>
    %643 = arith.mulf %642, %545 : vector<4x1024xf32>
    %644 = arith.addf %638, %643 : vector<4x1024xf32>
    %cst_214 = arith.constant -1.000000e+00 : f32
    %645 = vector.broadcast %cst_214 : f32 to vector<4x1024xf32>
    %646 = arith.subf %436, %645 : vector<4x1024xf32>
    %cst_215 = arith.constant 8.000000e-01 : f32
    %647 = vector.broadcast %cst_215 : f32 to vector<4x1024xf32>
    %648 = arith.divf %646, %647 : vector<4x1024xf32>
    %649 = arith.mulf %648, %545 : vector<4x1024xf32>
    %cst_216 = arith.constant 2.000000e-01 : f32
    %650 = vector.broadcast %cst_216 : f32 to vector<4x1024xf32>
    %651 = arith.subf %650, %436 : vector<4x1024xf32>
    %cst_217 = arith.constant 8.000000e-01 : f32
    %652 = vector.broadcast %cst_217 : f32 to vector<4x1024xf32>
    %653 = arith.divf %651, %652 : vector<4x1024xf32>
    %654 = arith.mulf %653, %556 : vector<4x1024xf32>
    %655 = arith.addf %649, %654 : vector<4x1024xf32>
    %cst_218 = arith.constant -6.000000e-01 : f32
    %656 = vector.broadcast %cst_218 : f32 to vector<4x1024xf32>
    %657 = arith.subf %436, %656 : vector<4x1024xf32>
    %cst_219 = arith.constant 8.000000e-01 : f32
    %658 = vector.broadcast %cst_219 : f32 to vector<4x1024xf32>
    %659 = arith.divf %657, %658 : vector<4x1024xf32>
    %660 = arith.mulf %659, %556 : vector<4x1024xf32>
    %cst_220 = arith.constant 6.000000e-01 : f32
    %661 = vector.broadcast %cst_220 : f32 to vector<4x1024xf32>
    %662 = arith.subf %661, %436 : vector<4x1024xf32>
    %cst_221 = arith.constant 8.000000e-01 : f32
    %663 = vector.broadcast %cst_221 : f32 to vector<4x1024xf32>
    %664 = arith.divf %662, %663 : vector<4x1024xf32>
    %665 = arith.mulf %664, %567 : vector<4x1024xf32>
    %666 = arith.addf %660, %665 : vector<4x1024xf32>
    %cst_222 = arith.constant -2.000000e-01 : f32
    %667 = vector.broadcast %cst_222 : f32 to vector<4x1024xf32>
    %668 = arith.subf %436, %667 : vector<4x1024xf32>
    %cst_223 = arith.constant 8.000000e-01 : f32
    %669 = vector.broadcast %cst_223 : f32 to vector<4x1024xf32>
    %670 = arith.divf %668, %669 : vector<4x1024xf32>
    %671 = arith.mulf %670, %567 : vector<4x1024xf32>
    %cst_224 = arith.constant 1.000000e+00 : f32
    %672 = vector.broadcast %cst_224 : f32 to vector<4x1024xf32>
    %673 = arith.subf %672, %436 : vector<4x1024xf32>
    %cst_225 = arith.constant 8.000000e-01 : f32
    %674 = vector.broadcast %cst_225 : f32 to vector<4x1024xf32>
    %675 = arith.divf %673, %674 : vector<4x1024xf32>
    %676 = arith.mulf %675, %578 : vector<4x1024xf32>
    %677 = arith.addf %671, %676 : vector<4x1024xf32>
    %cst_226 = arith.constant 2.000000e-01 : f32
    %678 = vector.broadcast %cst_226 : f32 to vector<4x1024xf32>
    %679 = arith.subf %436, %678 : vector<4x1024xf32>
    %cst_227 = arith.constant 8.000000e-01 : f32
    %680 = vector.broadcast %cst_227 : f32 to vector<4x1024xf32>
    %681 = arith.divf %679, %680 : vector<4x1024xf32>
    %682 = arith.mulf %681, %578 : vector<4x1024xf32>
    %cst_228 = arith.constant 1.400000e+00 : f32
    %683 = vector.broadcast %cst_228 : f32 to vector<4x1024xf32>
    %684 = arith.subf %683, %436 : vector<4x1024xf32>
    %cst_229 = arith.constant 8.000000e-01 : f32
    %685 = vector.broadcast %cst_229 : f32 to vector<4x1024xf32>
    %686 = arith.divf %684, %685 : vector<4x1024xf32>
    %687 = arith.mulf %686, %589 : vector<4x1024xf32>
    %688 = arith.addf %682, %687 : vector<4x1024xf32>
    %cst_230 = arith.constant 6.000000e-01 : f32
    %689 = vector.broadcast %cst_230 : f32 to vector<4x1024xf32>
    %690 = arith.subf %436, %689 : vector<4x1024xf32>
    %cst_231 = arith.constant 8.000000e-01 : f32
    %691 = vector.broadcast %cst_231 : f32 to vector<4x1024xf32>
    %692 = arith.divf %690, %691 : vector<4x1024xf32>
    %693 = arith.mulf %692, %589 : vector<4x1024xf32>
    %cst_232 = arith.constant 1.800000e+00 : f32
    %694 = vector.broadcast %cst_232 : f32 to vector<4x1024xf32>
    %695 = arith.subf %694, %436 : vector<4x1024xf32>
    %cst_233 = arith.constant 8.000000e-01 : f32
    %696 = vector.broadcast %cst_233 : f32 to vector<4x1024xf32>
    %697 = arith.divf %695, %696 : vector<4x1024xf32>
    %698 = arith.mulf %697, %600 : vector<4x1024xf32>
    %699 = arith.addf %693, %698 : vector<4x1024xf32>
    %cst_234 = arith.constant 1.000000e+00 : f32
    %700 = vector.broadcast %cst_234 : f32 to vector<4x1024xf32>
    %701 = arith.subf %436, %700 : vector<4x1024xf32>
    %cst_235 = arith.constant 8.000000e-01 : f32
    %702 = vector.broadcast %cst_235 : f32 to vector<4x1024xf32>
    %703 = arith.divf %701, %702 : vector<4x1024xf32>
    %704 = arith.mulf %703, %600 : vector<4x1024xf32>
    %cst_236 = arith.constant 2.200000e+00 : f32
    %705 = vector.broadcast %cst_236 : f32 to vector<4x1024xf32>
    %706 = arith.subf %705, %436 : vector<4x1024xf32>
    %cst_237 = arith.constant 8.000000e-01 : f32
    %707 = vector.broadcast %cst_237 : f32 to vector<4x1024xf32>
    %708 = arith.divf %706, %707 : vector<4x1024xf32>
    %709 = arith.mulf %708, %611 : vector<4x1024xf32>
    %710 = arith.addf %704, %709 : vector<4x1024xf32>
    %cst_238 = arith.constant -2.200000e+00 : f32
    %711 = vector.broadcast %cst_238 : f32 to vector<4x1024xf32>
    %712 = arith.subf %436, %711 : vector<4x1024xf32>
    %cst_239 = arith.constant 1.200000e+00 : f32
    %713 = vector.broadcast %cst_239 : f32 to vector<4x1024xf32>
    %714 = arith.divf %712, %713 : vector<4x1024xf32>
    %715 = arith.mulf %714, %622 : vector<4x1024xf32>
    %cst_240 = arith.constant -6.000000e-01 : f32
    %716 = vector.broadcast %cst_240 : f32 to vector<4x1024xf32>
    %717 = arith.subf %716, %436 : vector<4x1024xf32>
    %cst_241 = arith.constant 1.200000e+00 : f32
    %718 = vector.broadcast %cst_241 : f32 to vector<4x1024xf32>
    %719 = arith.divf %717, %718 : vector<4x1024xf32>
    %720 = arith.mulf %719, %633 : vector<4x1024xf32>
    %721 = arith.addf %715, %720 : vector<4x1024xf32>
    %cst_242 = arith.constant -1.800000e+00 : f32
    %722 = vector.broadcast %cst_242 : f32 to vector<4x1024xf32>
    %723 = arith.subf %436, %722 : vector<4x1024xf32>
    %cst_243 = arith.constant 1.200000e+00 : f32
    %724 = vector.broadcast %cst_243 : f32 to vector<4x1024xf32>
    %725 = arith.divf %723, %724 : vector<4x1024xf32>
    %726 = arith.mulf %725, %633 : vector<4x1024xf32>
    %cst_244 = arith.constant -2.000000e-01 : f32
    %727 = vector.broadcast %cst_244 : f32 to vector<4x1024xf32>
    %728 = arith.subf %727, %436 : vector<4x1024xf32>
    %cst_245 = arith.constant 1.200000e+00 : f32
    %729 = vector.broadcast %cst_245 : f32 to vector<4x1024xf32>
    %730 = arith.divf %728, %729 : vector<4x1024xf32>
    %731 = arith.mulf %730, %644 : vector<4x1024xf32>
    %732 = arith.addf %726, %731 : vector<4x1024xf32>
    %cst_246 = arith.constant -1.400000e+00 : f32
    %733 = vector.broadcast %cst_246 : f32 to vector<4x1024xf32>
    %734 = arith.subf %436, %733 : vector<4x1024xf32>
    %cst_247 = arith.constant 1.200000e+00 : f32
    %735 = vector.broadcast %cst_247 : f32 to vector<4x1024xf32>
    %736 = arith.divf %734, %735 : vector<4x1024xf32>
    %737 = arith.mulf %736, %644 : vector<4x1024xf32>
    %cst_248 = arith.constant 2.000000e-01 : f32
    %738 = vector.broadcast %cst_248 : f32 to vector<4x1024xf32>
    %739 = arith.subf %738, %436 : vector<4x1024xf32>
    %cst_249 = arith.constant 1.200000e+00 : f32
    %740 = vector.broadcast %cst_249 : f32 to vector<4x1024xf32>
    %741 = arith.divf %739, %740 : vector<4x1024xf32>
    %742 = arith.mulf %741, %655 : vector<4x1024xf32>
    %743 = arith.addf %737, %742 : vector<4x1024xf32>
    %cst_250 = arith.constant -1.000000e+00 : f32
    %744 = vector.broadcast %cst_250 : f32 to vector<4x1024xf32>
    %745 = arith.subf %436, %744 : vector<4x1024xf32>
    %cst_251 = arith.constant 1.200000e+00 : f32
    %746 = vector.broadcast %cst_251 : f32 to vector<4x1024xf32>
    %747 = arith.divf %745, %746 : vector<4x1024xf32>
    %748 = arith.mulf %747, %655 : vector<4x1024xf32>
    %cst_252 = arith.constant 6.000000e-01 : f32
    %749 = vector.broadcast %cst_252 : f32 to vector<4x1024xf32>
    %750 = arith.subf %749, %436 : vector<4x1024xf32>
    %cst_253 = arith.constant 1.200000e+00 : f32
    %751 = vector.broadcast %cst_253 : f32 to vector<4x1024xf32>
    %752 = arith.divf %750, %751 : vector<4x1024xf32>
    %753 = arith.mulf %752, %666 : vector<4x1024xf32>
    %754 = arith.addf %748, %753 : vector<4x1024xf32>
    %cst_254 = arith.constant -6.000000e-01 : f32
    %755 = vector.broadcast %cst_254 : f32 to vector<4x1024xf32>
    %756 = arith.subf %436, %755 : vector<4x1024xf32>
    %cst_255 = arith.constant 1.200000e+00 : f32
    %757 = vector.broadcast %cst_255 : f32 to vector<4x1024xf32>
    %758 = arith.divf %756, %757 : vector<4x1024xf32>
    %759 = arith.mulf %758, %666 : vector<4x1024xf32>
    %cst_256 = arith.constant 1.000000e+00 : f32
    %760 = vector.broadcast %cst_256 : f32 to vector<4x1024xf32>
    %761 = arith.subf %760, %436 : vector<4x1024xf32>
    %cst_257 = arith.constant 1.200000e+00 : f32
    %762 = vector.broadcast %cst_257 : f32 to vector<4x1024xf32>
    %763 = arith.divf %761, %762 : vector<4x1024xf32>
    %764 = arith.mulf %763, %677 : vector<4x1024xf32>
    %765 = arith.addf %759, %764 : vector<4x1024xf32>
    %cst_258 = arith.constant -2.000000e-01 : f32
    %766 = vector.broadcast %cst_258 : f32 to vector<4x1024xf32>
    %767 = arith.subf %436, %766 : vector<4x1024xf32>
    %cst_259 = arith.constant 1.200000e+00 : f32
    %768 = vector.broadcast %cst_259 : f32 to vector<4x1024xf32>
    %769 = arith.divf %767, %768 : vector<4x1024xf32>
    %770 = arith.mulf %769, %677 : vector<4x1024xf32>
    %cst_260 = arith.constant 1.400000e+00 : f32
    %771 = vector.broadcast %cst_260 : f32 to vector<4x1024xf32>
    %772 = arith.subf %771, %436 : vector<4x1024xf32>
    %cst_261 = arith.constant 1.200000e+00 : f32
    %773 = vector.broadcast %cst_261 : f32 to vector<4x1024xf32>
    %774 = arith.divf %772, %773 : vector<4x1024xf32>
    %775 = arith.mulf %774, %688 : vector<4x1024xf32>
    %776 = arith.addf %770, %775 : vector<4x1024xf32>
    %cst_262 = arith.constant 2.000000e-01 : f32
    %777 = vector.broadcast %cst_262 : f32 to vector<4x1024xf32>
    %778 = arith.subf %436, %777 : vector<4x1024xf32>
    %cst_263 = arith.constant 1.200000e+00 : f32
    %779 = vector.broadcast %cst_263 : f32 to vector<4x1024xf32>
    %780 = arith.divf %778, %779 : vector<4x1024xf32>
    %781 = arith.mulf %780, %688 : vector<4x1024xf32>
    %cst_264 = arith.constant 1.800000e+00 : f32
    %782 = vector.broadcast %cst_264 : f32 to vector<4x1024xf32>
    %783 = arith.subf %782, %436 : vector<4x1024xf32>
    %cst_265 = arith.constant 1.200000e+00 : f32
    %784 = vector.broadcast %cst_265 : f32 to vector<4x1024xf32>
    %785 = arith.divf %783, %784 : vector<4x1024xf32>
    %786 = arith.mulf %785, %699 : vector<4x1024xf32>
    %787 = arith.addf %781, %786 : vector<4x1024xf32>
    %cst_266 = arith.constant 6.000000e-01 : f32
    %788 = vector.broadcast %cst_266 : f32 to vector<4x1024xf32>
    %789 = arith.subf %436, %788 : vector<4x1024xf32>
    %cst_267 = arith.constant 1.200000e+00 : f32
    %790 = vector.broadcast %cst_267 : f32 to vector<4x1024xf32>
    %791 = arith.divf %789, %790 : vector<4x1024xf32>
    %792 = arith.mulf %791, %699 : vector<4x1024xf32>
    %cst_268 = arith.constant 2.200000e+00 : f32
    %793 = vector.broadcast %cst_268 : f32 to vector<4x1024xf32>
    %794 = arith.subf %793, %436 : vector<4x1024xf32>
    %cst_269 = arith.constant 1.200000e+00 : f32
    %795 = vector.broadcast %cst_269 : f32 to vector<4x1024xf32>
    %796 = arith.divf %794, %795 : vector<4x1024xf32>
    %797 = arith.mulf %796, %710 : vector<4x1024xf32>
    %798 = arith.addf %792, %797 : vector<4x1024xf32>
    %799 = tpu.concatenate %442, %721, %732, %743, %754, %765, %776, %787, %798 in 0 : vector<4x1024xf32>, vector<4x1024xf32>, vector<4x1024xf32>, vector<4x1024xf32>, vector<4x1024xf32>, vector<4x1024xf32>, vector<4x1024xf32>, vector<4x1024xf32>, vector<4x1024xf32> -> vector<36x1024xf32>
    %c0_270 = arith.constant 0 : index
    %c0_271 = arith.constant 0 : index
    %800 = vector.load %arg9[%c0_270, %c0_271] : memref<8x36xf32, #tpu.memory_space<vmem>>, vector<8x36xf32>
    %cst_272 = arith.constant dense<0.000000e+00> : vector<8x1024xf32>
    %801 = tpu.matmul %800, %799, %cst_272 {dimension_numbers = #tpu.dot_dimension_numbers<[1], [0], [0], [1], [0, 0, 1, 1], [], []>} : vector<8x36xf32>, vector<36x1024xf32>, vector<8x1024xf32> -> vector<8x1024xf32>
    %c0_273 = arith.constant 0 : index
    %c0_274 = arith.constant 0 : index
    %802 = vector.load %arg10[%c0_273, %c0_274] : memref<8x1xf32, #tpu.memory_space<vmem>>, vector<8x1xf32>
    %803 = vector.broadcast %802 : vector<8x1xf32> to vector<8x1024xf32>
    %804 = arith.addf %801, %803 : vector<8x1024xf32>
    %cst_275 = arith.constant dense<0.000000e+00> : vector<8xf32>
    %805 = vector.multi_reduction <add>, %804, %cst_275 [1] : vector<8x1024xf32> to vector<8xf32>
    %806 = vector.shape_cast %805 : vector<8xf32> to vector<8x1xf32>
    %cst_276 = arith.constant 9.765625E-4 : f32
    %807 = vector.broadcast %cst_276 : f32 to vector<8x1xf32>
    %808 = arith.mulf %806, %807 : vector<8x1xf32>
    %809 = vector.broadcast %808 : vector<8x1xf32> to vector<8x1024xf32>
    %810 = arith.subf %804, %809 : vector<8x1024xf32>
    %811 = arith.mulf %810, %810 : vector<8x1024xf32>
    %cst_277 = arith.constant dense<0.000000e+00> : vector<8xf32>
    %812 = vector.multi_reduction <add>, %811, %cst_277 [1] : vector<8x1024xf32> to vector<8xf32>
    %813 = vector.shape_cast %812 : vector<8xf32> to vector<8x1xf32>
    %cst_278 = arith.constant 1.023000e+03 : f32
    %814 = vector.broadcast %cst_278 : f32 to vector<8x1xf32>
    %815 = arith.divf %813, %814 : vector<8x1xf32>
    %cst_279 = arith.constant 9.99999974E-5 : f32
    %816 = vector.broadcast %cst_279 : f32 to vector<8x1xf32>
    %817 = arith.addf %815, %816 : vector<8x1xf32>
    %cst_280 = arith.constant 4.000000e+00 : f32
    %818 = vector.broadcast %cst_280 : f32 to vector<8x1xf32>
    %819 = arith.mulf %818, %817 : vector<8x1xf32>
    %cst_281 = arith.constant 1.000000e+00 : f32
    %820 = vector.broadcast %cst_281 : f32 to vector<8x1xf32>
    %821 = arith.divf %820, %819 : vector<8x1xf32>
    %822 = vector.broadcast %821 : vector<8x1xf32> to vector<8x1024xf32>
    %823 = arith.mulf %811, %822 : vector<8x1024xf32>
    %cst_282 = arith.constant 5.000000e-01 : f32
    %824 = vector.broadcast %cst_282 : f32 to vector<8x1024xf32>
    %825 = arith.addf %823, %824 : vector<8x1024xf32>
    %826 = arith.negf %825 : vector<8x1024xf32>
    %827 = math.exp %826 : vector<8x1024xf32>
    %cst_283 = arith.constant 1.000000e+00 : f32
    %828 = vector.broadcast %cst_283 : f32 to vector<8x1024xf32>
    %829 = arith.addf %828, %827 : vector<8x1024xf32>
    %830 = arith.divf %828, %829 : vector<8x1024xf32>
    %831 = arith.mulf %804, %830 : vector<8x1024xf32>
    %c255_i32_284 = arith.constant 255 : i32
    %832 = tpu.dynamic_rotate %1 by %c255_i32_284 dim 1 : vector<24x256xf32>, i32 -> vector<24x256xf32>
    %833 = vector.broadcast %25 : vector<1x256xf32> to vector<24x256xf32>
    %834 = arith.mulf %832, %833 : vector<24x256xf32>
    %c240_i32_285 = arith.constant 240 : i32
    %835 = tpu.dynamic_rotate %1 by %c240_i32_285 dim 1 : vector<24x256xf32>, i32 -> vector<24x256xf32>
    %836 = vector.broadcast %29 : vector<1x256xf32> to vector<24x256xf32>
    %837 = arith.mulf %835, %836 : vector<24x256xf32>
    %c239_i32_286 = arith.constant 239 : i32
    %838 = tpu.dynamic_rotate %1 by %c239_i32_286 dim 1 : vector<24x256xf32>, i32 -> vector<24x256xf32>
    %839 = vector.broadcast %34 : vector<1x256xf32> to vector<24x256xf32>
    %840 = arith.mulf %838, %839 : vector<24x256xf32>
    %c0_287 = arith.constant 0 : index
    %c0_288 = arith.constant 0 : index
    %841 = vector.load %arg15[%c0_287, %c0_288] : memref<16x1xf32, #tpu.memory_space<vmem>>, vector<16x1xf32>
    %c0_289 = arith.constant 0 : index
    %c0_290 = arith.constant 0 : index
    %842 = vector.load %arg11[%c0_289, %c0_290] : memref<16x24xf32, #tpu.memory_space<vmem>>, vector<16x24xf32>
    %cst_291 = arith.constant dense<0.000000e+00> : vector<16x256xf32>
    %843 = tpu.matmul %842, %1, %cst_291 {dimension_numbers = #tpu.dot_dimension_numbers<[1], [0], [0], [1], [0, 0, 1, 1], [], []>} : vector<16x24xf32>, vector<24x256xf32>, vector<16x256xf32> -> vector<16x256xf32>
    %844 = vector.broadcast %841 : vector<16x1xf32> to vector<16x256xf32>
    %845 = arith.addf %843, %844 : vector<16x256xf32>
    %c0_292 = arith.constant 0 : index
    %c0_293 = arith.constant 0 : index
    %846 = vector.load %arg12[%c0_292, %c0_293] : memref<16x48xf32, #tpu.memory_space<vmem>>, vector<16x48xf32>
    %847 = tpu.concatenate %1, %834 in 0 : vector<24x256xf32>, vector<24x256xf32> -> vector<48x256xf32>
    %cst_294 = arith.constant dense<0.000000e+00> : vector<16x256xf32>
    %848 = tpu.matmul %846, %847, %cst_294 {dimension_numbers = #tpu.dot_dimension_numbers<[1], [0], [0], [1], [0, 0, 1, 1], [], []>} : vector<16x48xf32>, vector<48x256xf32>, vector<16x256xf32> -> vector<16x256xf32>
    %849 = vector.broadcast %841 : vector<16x1xf32> to vector<16x256xf32>
    %850 = arith.addf %848, %849 : vector<16x256xf32>
    %c0_295 = arith.constant 0 : index
    %c0_296 = arith.constant 0 : index
    %851 = vector.load %arg13[%c0_295, %c0_296] : memref<16x48xf32, #tpu.memory_space<vmem>>, vector<16x48xf32>
    %852 = tpu.concatenate %837, %1 in 0 : vector<24x256xf32>, vector<24x256xf32> -> vector<48x256xf32>
    %cst_297 = arith.constant dense<0.000000e+00> : vector<16x256xf32>
    %853 = tpu.matmul %851, %852, %cst_297 {dimension_numbers = #tpu.dot_dimension_numbers<[1], [0], [0], [1], [0, 0, 1, 1], [], []>} : vector<16x48xf32>, vector<48x256xf32>, vector<16x256xf32> -> vector<16x256xf32>
    %854 = vector.broadcast %841 : vector<16x1xf32> to vector<16x256xf32>
    %855 = arith.addf %853, %854 : vector<16x256xf32>
    %c0_298 = arith.constant 0 : index
    %c0_299 = arith.constant 0 : index
    %856 = vector.load %arg14[%c0_298, %c0_299] : memref<16x96xf32, #tpu.memory_space<vmem>>, vector<16x96xf32>
    %857 = tpu.concatenate %837, %1, %834, %840 in 0 : vector<24x256xf32>, vector<24x256xf32>, vector<24x256xf32>, vector<24x256xf32> -> vector<96x256xf32>
    %cst_300 = arith.constant dense<0.000000e+00> : vector<16x256xf32>
    %858 = tpu.matmul %856, %857, %cst_300 {dimension_numbers = #tpu.dot_dimension_numbers<[1], [0], [0], [1], [0, 0, 1, 1], [], []>} : vector<16x96xf32>, vector<96x256xf32>, vector<16x256xf32> -> vector<16x256xf32>
    %859 = vector.broadcast %841 : vector<16x1xf32> to vector<16x256xf32>
    %860 = arith.addf %858, %859 : vector<16x256xf32>
    %861 = tpu.concatenate %845, %850, %855, %860 in 1 : vector<16x256xf32>, vector<16x256xf32>, vector<16x256xf32>, vector<16x256xf32> -> vector<16x1024xf32>
    %862 = vector.extract_strided_slice %861 {offsets = [0, 0], sizes = [8, 1024], strides = [1, 1]} : vector<16x1024xf32> to vector<8x1024xf32>
    %863 = arith.addf %831, %862 : vector<8x1024xf32>
    %cst_301 = arith.constant 0.000000e+00 : f32
    %864 = vector.broadcast %cst_301 : f32 to vector<8x1024xf32>
    %865 = arith.maximumf %863, %864 : vector<8x1024xf32>
    %c0_302 = arith.constant 0 : index
    %c0_303 = arith.constant 0 : index
    %866 = vector.load %arg16[%c0_302, %c0_303] : memref<8x8xf32, #tpu.memory_space<vmem>>, vector<8x8xf32>
    %cst_304 = arith.constant dense<0.000000e+00> : vector<8x1024xf32>
    %867 = tpu.matmul %866, %865, %cst_304 {dimension_numbers = #tpu.dot_dimension_numbers<[1], [0], [0], [1], [0, 0, 1, 1], [], []>} : vector<8x8xf32>, vector<8x1024xf32>, vector<8x1024xf32> -> vector<8x1024xf32>
    %c0_305 = arith.constant 0 : index
    %c0_306 = arith.constant 0 : index
    %c0_307 = arith.constant 0 : index
    %868 = vector.load %arg17[%c0_305, %c0_306, %c0_307] : memref<1x8x1024xf32, #tpu.memory_space<vmem>>, vector<1x8x1024xf32>
    %869 = vector.shape_cast %868 : vector<1x8x1024xf32> to vector<8x1024xf32>
    %870 = vector.shape_cast %865 : vector<8x1024xf32> to vector<1x8x1024xf32>
    tpu.vector_store %arg17[%c0_305, %c0_306, %c0_307], %870 {strides = array<i32>} : memref<1x8x1024xf32, #tpu.memory_space<vmem>>, vector<1x8x1024xf32>,
    %871 = vector.extract_strided_slice %861 {offsets = [8, 0], sizes = [8, 1024], strides = [1, 1]} : vector<16x1024xf32> to vector<8x1024xf32>
    %872 = arith.addf %871, %867 : vector<8x1024xf32>
    %873 = math.tanh %872 : vector<8x1024xf32>
    %c0_308 = arith.constant 0 : index
    %c0_309 = arith.constant 0 : index
    %c0_310 = arith.constant 0 : index
    %874 = vector.load %arg18[%c0_308, %c0_309, %c0_310] : memref<1x8x1024xf32, #tpu.memory_space<vmem>>, vector<1x8x1024xf32>
    %875 = vector.shape_cast %874 : vector<1x8x1024xf32> to vector<8x1024xf32>
    %876 = vector.shape_cast %873 : vector<8x1024xf32> to vector<1x8x1024xf32>
    tpu.vector_store %arg18[%c0_308, %c0_309, %c0_310], %876 {strides = array<i32>} : memref<1x8x1024xf32, #tpu.memory_space<vmem>>, vector<1x8x1024xf32>,
    return
  }
  func.func @transform_0(%arg0: i32) -> (i32, i32, i32) {
    %c0_i32 = arith.constant 0 : i32
    %c0_i32_0 = arith.constant 0 : i32
    %c0_i32_1 = arith.constant 0 : i32
    return %arg0, %c0_i32, %c0_i32_0 : i32, i32, i32
  }
  func.func @transform_1(%arg0: i32) -> (i32, i32) {
    %c0_i32 = arith.constant 0 : i32
    %c0_i32_0 = arith.constant 0 : i32
    %c0_i32_1 = arith.constant 0 : i32
    return %c0_i32, %c0_i32_0 : i32, i32
  }
  func.func @transform_2(%arg0: i32) -> (i32, i32) {
    %c0_i32 = arith.constant 0 : i32
    %c0_i32_0 = arith.constant 0 : i32
    %c0_i32_1 = arith.constant 0 : i32
    return %c0_i32, %c0_i32_0 : i32, i32
  }
  func.func @transform_3(%arg0: i32) -> (i32, i32) {
    %c0_i32 = arith.constant 0 : i32
    %c0_i32_0 = arith.constant 0 : i32
    %c0_i32_1 = arith.constant 0 : i32
    return %c0_i32, %c0_i32_0 : i32, i32
  }
  func.func @transform_4(%arg0: i32) -> (i32, i32) {
    %c0_i32 = arith.constant 0 : i32
    %c0_i32_0 = arith.constant 0 : i32
    %c0_i32_1 = arith.constant 0 : i32
    return %c0_i32, %c0_i32_0 : i32, i32
  }
  func.func @transform_5(%arg0: i32) -> (i32, i32) {
    %c0_i32 = arith.constant 0 : i32
    %c0_i32_0 = arith.constant 0 : i32
    %c0_i32_1 = arith.constant 0 : i32
    return %c0_i32, %c0_i32_0 : i32, i32
  }
  func.func @transform_6(%arg0: i32) -> (i32, i32) {
    %c0_i32 = arith.constant 0 : i32
    %c0_i32_0 = arith.constant 0 : i32
    %c0_i32_1 = arith.constant 0 : i32
    return %c0_i32, %c0_i32_0 : i32, i32
  }
  func.func @transform_7(%arg0: i32) -> (i32, i32) {
    %c0_i32 = arith.constant 0 : i32
    %c0_i32_0 = arith.constant 0 : i32
    %c0_i32_1 = arith.constant 0 : i32
    return %c0_i32, %c0_i32_0 : i32, i32
  }
  func.func @transform_8(%arg0: i32) -> (i32, i32) {
    %c0_i32 = arith.constant 0 : i32
    %c0_i32_0 = arith.constant 0 : i32
    %c0_i32_1 = arith.constant 0 : i32
    return %c0_i32, %c0_i32_0 : i32, i32
  }
  func.func @transform_9(%arg0: i32) -> (i32, i32) {
    %c0_i32 = arith.constant 0 : i32
    %c0_i32_0 = arith.constant 0 : i32
    %c0_i32_1 = arith.constant 0 : i32
    return %c0_i32, %c0_i32_0 : i32, i32
  }
  func.func @transform_10(%arg0: i32) -> (i32, i32) {
    %c0_i32 = arith.constant 0 : i32
    %c0_i32_0 = arith.constant 0 : i32
    %c0_i32_1 = arith.constant 0 : i32
    return %c0_i32, %c0_i32_0 : i32, i32
  }
  func.func @transform_11(%arg0: i32) -> (i32, i32) {
    %c0_i32 = arith.constant 0 : i32
    %c0_i32_0 = arith.constant 0 : i32
    %c0_i32_1 = arith.constant 0 : i32
    return %c0_i32, %c0_i32_0 : i32, i32
  }
  func.func @transform_12(%arg0: i32) -> (i32, i32) {
    %c0_i32 = arith.constant 0 : i32
    %c0_i32_0 = arith.constant 0 : i32
    %c0_i32_1 = arith.constant 0 : i32
    return %c0_i32, %c0_i32_0 : i32, i32
  }
  func.func @transform_13(%arg0: i32) -> (i32, i32) {
    %c0_i32 = arith.constant 0 : i32
    %c0_i32_0 = arith.constant 0 : i32
    %c0_i32_1 = arith.constant 0 : i32
    return %c0_i32, %c0_i32_0 : i32, i32
  }
  func.func @transform_14(%arg0: i32) -> (i32, i32) {
    %c0_i32 = arith.constant 0 : i32
    %c0_i32_0 = arith.constant 0 : i32
    %c0_i32_1 = arith.constant 0 : i32
    return %c0_i32, %c0_i32_0 : i32, i32
  }
  func.func @transform_15(%arg0: i32) -> (i32, i32) {
    %c0_i32 = arith.constant 0 : i32
    %c0_i32_0 = arith.constant 0 : i32
    %c0_i32_1 = arith.constant 0 : i32
    return %c0_i32, %c0_i32_0 : i32, i32
  }
  func.func @transform_16(%arg0: i32) -> (i32, i32, i32) {
    %c0_i32 = arith.constant 0 : i32
    %c0_i32_0 = arith.constant 0 : i32
    %c0_i32_1 = arith.constant 0 : i32
    return %arg0, %c0_i32, %c0_i32_0 : i32, i32, i32
  }
  func.func @transform_17(%arg0: i32) -> (i32, i32, i32) {
    %c0_i32 = arith.constant 0 : i32
    %c0_i32_0 = arith.constant 0 : i32
    %c0_i32_1 = arith.constant 0 : i32
    return %arg0, %c0_i32, %c0_i32_0 : i32, i32, i32
  }
}

</mosaic_0001>

<bundles_post_ra>
// kernel: forward_pallas.1
= control target key start
LH: loop header
LB: loop body
LE: loop exit
PB: predicated region body
PF: predicated region fallthrough
CT: control target
= control target key end

     0   :  { %s6198_s24 = smov 0   ;;  %s8722_s0 = inlined_call_operand.vmem [shape: f32[2,24,256], index: 0, kind: input, shape index: {}]   ;;  %s8723_s1 = inlined_call_operand.vmem [shape: f32[4,216], index: 1, kind: input, shape index: {}]   ;;  %s8724_s2 = inlined_call_operand.vmem [shape: f32[4,1], index: 2, kind: input, shape index: {}]   ;;  %s8725_s3 = inlined_call_operand.vmem [shape: f32[4,4], index: 3, kind: input, shape index: {}]   ;;  %s8726_s4 = inlined_call_operand.vmem [shape: f32[4,8], index: 4, kind: input, shape index: {}]   ;;  %s8727_s5 = inlined_call_operand.vmem [shape: f32[4,8], index: 5, kind: input, shape index: {}]   ;;  %s8728_s6 = inlined_call_operand.vmem [shape: f32[4,16], index: 6, kind: input, shape index: {}]   ;;  %s8729_s7 = inlined_call_operand.vmem [shape: f32[4,1], index: 7, kind: input, shape index: {}]   ;;  %s8730_s8 = inlined_call_operand.vmem [shape: f32[8,36], index: 8, kind: input, shape index: {}]   ;;  %s8731_s9 = inlined_call_operand.vmem [shape: f32[8,1], index: 9, kind: input, shape index: {}]   ;;  %s8732_s10 = inlined_call_operand.vmem [shape: f32[16,24], index: 10, kind: input, shape index: {}]   ;;  %s8733_s11 = inlined_call_operand.vmem [shape: f32[16,48], index: 11, kind: input, shape index: {}]   ;;  %s8734_s12 = inlined_call_operand.vmem [shape: f32[16,48], index: 12, kind: input, shape index: {}]   ;;  %s8735_s13 = inlined_call_operand.vmem [shape: f32[16,96], index: 13, kind: input, shape index: {}]   ;;  %s8736_s14 = inlined_call_operand.vmem [shape: f32[16,1], index: 14, kind: input, shape index: {}]   ;;  %s8737_s15 = inlined_call_operand.vmem [shape: f32[8,8], index: 15, kind: input, shape index: {}]   ;;  %s8738_s16 = inlined_call_operand.vmem [shape: f32[2,8,1024], index: 16, kind: output, shape index: {0}]   ;;  %s8739_s17 = inlined_call_operand.vmem [shape: f32[2,8,1024], index: 17, kind: output, shape index: {1}]  }
   0x1   :  { %8779 = sst [smem:[#allocation14_spill]] %s8722_s0 }
   0x2   :  { %8780 = sst [smem:[#allocation15_spill]] %s8723_s1 }
   0x3 LB: > { %s5417_s25 = sadd.s32 4294967295, %s6101_s24   ;;  %p5421_p0 = scmp.ge.s32.totalorder %s6101_s24, 1  ;;  %s6101_s24 = sphi %s6198_s24, %s28_s24  }
   0x4   : > { %p490_p1 = scmp.lt.s32.totalorder %s6101_s24, 3 }
   0x6   : > { %p491_p2 = pnand %p5421_p0, %p490_p1 }
   0x8   : > { %494 = sbr.rel (%p491_p2) target bundleno = 2020 (0x7e4), region = 84 }
   0xf   : > { %p547_p3 = scmp.lt.s32.totalorder %s5417_s25, 1  ;;  %v8740_v0 = vmov 0.0   ;;  %s8781_s29 = sld [smem:[#allocation14_spill]] }
  0x10   : > { %2070 = vmatprep.mubr.f32.mxu1 %v8740_v0  ;;  %s8839_s19 = sld [smem:[#allocation15_spill]]  ;;  %s6105_s21 = smov 127  }
  0x11   : > { %s8843_s25 = smov (!%p547_p3, %s5417_s25), 1  ;;  %s6107_s27 = smov 111  }
  0x12   : > { %s5953_s26 = smul.u32 48, %s8843_s25  ;;  %s5795_s22 = sshll.u32 %s8843_s25, 6 }
  0x15   : > { %s6213_s0 = scalar_lea.vmem %s8781_s29, %s5953_s26  ;;  %s6106_s26 = smov 112  }
  0x16   : > { %v6216_v1 = vld [vmem:[%s6213_s0 + $0x8] sm:$0xff]  ;;  %v6219_v2 = vld [vmem:[%s6213_s0 + $0x18] sm:$0xff]  ;;  %v6227_v6 = vld [vmem:[%s6213_s0] sm:$0xff] }
  0x17   : > { %v6222_v3 = vld [vmem:[%s6213_s0 + $0x28] sm:$0xff]  ;;  %v5433_v4 = vmul.f32 -1.442695, %v6216_v1  ;;  %v5435_v5 = vmul.f32 -1.442695, %v6219_v2  ;;  %v6230_v7 = vld [vmem:[%s6213_s0 + $0x10] sm:$0xff] }
  0x18   : > { %v5432_v8 = vmul.f32 -1.442695, %v6227_v6  ;;  %v5437_v9 = vmul.f32 -1.442695, %v6222_v3  ;;  %vm716_vm0 = vcmp.ge.f32.partialorder %v6216_v1, -1.0  ;;  %v1005_v23 = vsub.f32 -1.0, %v6216_v1 }
  0x19   : > { %5970 = vpow2.f32 %v5433_v4  ;;  %v5434_v10 = vmul.f32 -1.442695, %v6230_v7  ;;  %vm662_vm1 = vcmp.ge.f32.partialorder %v6216_v1, -2.2  ;;  %vm680_vm2 = vcmp.ge.f32.partialorder %v6216_v1, -1.8 }
  0x1a   : > { %5972 = vpow2.f32 %v5435_v5  ;;  %v5439_v11 = vsel %vm662_vm1, 1.0, %v8740_v0  ;;  %v5445_v12 = vsel %vm680_vm2, 1.0, %v8740_v0  ;;  %vm698_vm3 = vcmp.ge.f32.partialorder %v6216_v1, -1.4  ;;  %v6263_v32 = vld [vmem:[%s6213_s0 + $0x20] sm:$0xff] }
  0x1b   : > { %5974 = vpow2.f32 %v5432_v8  ;;  %v5451_v13 = vsel %vm698_vm3, 1.0, %v8740_v0  ;;  %v5457_v14 = vsel %vm716_vm0, 1.0, %v8740_v0  ;;  %vm734_vm4 = vcmp.ge.f32.partialorder %v6216_v1, -0.6  ;;  %8782 = vst [vmem:[#allocation2_spill] sm:$0xff] %v6263_v32 }
  0x1c   : > { %5976 = vpow2.f32 %v5434_v10  ;;  %v6245_v15 = vsel %vm734_vm4, 1.0, %v8740_v0  ;;  %v878_v16 = vsub.f32 %v5439_v11, %v5445_v12  ;;  %v884_v17 = vsub.f32 %v5445_v12, %v5451_v13 }
  0x1d   : > { %5978 = vpow2.f32 %v5437_v9  ;;  %v890_v18 = vsub.f32 %v5451_v13, %v5457_v14  ;;  %v5511_v19 = vadd.f32 2.2, %v6216_v1  ;;  %v6249_v20 = vsub.f32 %v5457_v14, %v6245_v15 }
  0x1e   : > { %v963_v21 = vsub.f32 -1.4, %v6216_v1  ;;  %v6253_v22 = vadd.f32 1.8, %v6216_v1  ;;  %v6257_v25 = vadd.f32 1.4, %v6216_v1 }
  0x1f   : > { %v951_v24 = vmul.f32 2.5, %v5511_v19  ;;  %v1047_v26 = vsub.f32 -0.6, %v6216_v1  ;;  %v1366_v27 = vmul.f32 1.25, %v5511_v19  ;;  %vm715_vm5 = vcmp.ge.f32.partialorder %v6227_v6, -1.0 }
  0x20   : > { %v969_v28 = vmul.f32 2.5, %v963_v21  ;;  %v993_v29 = vmul.f32 2.5, %v6253_v22  ;;  %v1011_v30 = vmul.f32 2.5, %v1005_v23  ;;  %v1378_v31 = vmul.f32 1.25, %v1005_v23 }
  0x21   : > { %v957_v33 = vmul.f32 %v951_v24, %v878_v16  ;;  %v1035_v34 = vmul.f32 2.5, %v6257_v25  ;;  %v1053_v35 = vmul.f32 2.5, %v1047_v26  ;;  %v1396_v36 = vmul.f32 1.25, %v6253_v22 }
  0x22   : > { %v975_v37 = vmul.f32 %v969_v28, %v884_v17  ;;  %v999_v38 = vmul.f32 %v993_v29, %v884_v17  ;;  %v1017_v39 = vmul.f32 %v1011_v30, %v890_v18  ;;  %v1408_v40 = vmul.f32 1.25, %v1047_v26 }
  0x23   : > { %v5971_v41 = vpop.eup %5970  ;;  %v1041_v42 = vmul.f32 %v1035_v34, %v890_v18  ;;  %v1059_v43 = vmul.f32 %v1053_v35, %v6249_v20  ;;  %v1637_v44 = vmul.f32 0.8333333, %v5511_v19  ;;  %v1649_v45 = vmul.f32 0.8333333, %v1047_v26 }
  0x24   : > { %v5973_v46 = vpop.eup %5972  ;;  %v638_v47 = vadd.f32 1.0, %v5971_v41  ;;  %v981_v48 = vadd.f32 %v975_v37, %v957_v33  ;;  %v1023_v49 = vadd.f32 %v1017_v39, %v999_v38  ;;  %v5436_v50 = vmul.f32 -1.442695, %v6263_v32 }
  0x25   : > { %v5975_v51 = vpop.eup %5974  ;;  %v640_v52 = vadd.f32 1.0, %v5973_v46  ;;  %v6269_v53 = vadd.f32 %v1059_v43, %v1041_v42  ;;  %vm661_vm6 = vcmp.ge.f32.partialorder %v6227_v6, -2.2  ;;  %vm679_vm7 = vcmp.ge.f32.partialorder %v6227_v6, -1.8 }
  0x26   : > { %v5977_v54 = vpop.eup %5976  ;;  %5980 = vrcp.f32 %v638_v47  ;;  %v637_v55 = vadd.f32 1.0, %v5975_v51  ;;  %v1372_v56 = vmul.f32 %v1366_v27, %v981_v48  ;;  %v1384_v57 = vmul.f32 %v1378_v31, %v1023_v49 }
  0x27   : > { %v5979_v58 = vpop.eup %5978  ;;  %5982 = vrcp.f32 %v640_v52  ;;  %v639_v59 = vadd.f32 1.0, %v5977_v54  ;;  %v1402_v60 = vmul.f32 %v1396_v36, %v1023_v49  ;;  %v1414_v61 = vmul.f32 %v1408_v40, %v6269_v53 }
  0x28   : > { %5984 = vrcp.f32 %v637_v55  ;;  %v642_v62 = vadd.f32 1.0, %v5979_v58  ;;  %v1390_v63 = vadd.f32 %v1384_v57, %v1372_v56  ;;  %v5438_v4 = vsel %vm661_vm6, 1.0, %v8740_v0 }
  0x29   : > { %5986 = vrcp.f32 %v639_v59  ;;  %v6275_v5 = vadd.f32 %v1414_v61, %v1402_v60  ;;  %v5444_v8 = vsel %vm679_vm7, 1.0, %v8740_v0  ;;  %vm697_vm8 = vcmp.ge.f32.partialorder %v6227_v6, -1.4 }
  0x2a   : > { %5988 = vrcp.f32 %v642_v62  ;;  %v1643_v9 = vmul.f32 %v1637_v44, %v1390_v63  ;;  %v5450_v10 = vsel %vm697_vm8, 1.0, %v8740_v0  ;;  %v5456_v11 = vsel %vm715_vm5, 1.0, %v8740_v0 }
  0x2b   : > { %v1655_v12 = vmul.f32 %v1649_v45, %v6275_v5  ;;  %5990 = vpow2.f32 %v5436_v50  ;;  %vm733_vm9 = vcmp.ge.f32.partialorder %v6227_v6, -0.6  ;;  %v877_v13 = vsub.f32 %v5438_v4, %v5444_v8 }
  0x2c   : > { %v6288_v14 = vsel %vm733_vm9, 1.0, %v8740_v0  ;;  %v883_v16 = vsub.f32 %v5444_v8, %v5450_v10  ;;  %v889_v17 = vsub.f32 %v5450_v10, %v5456_v11  ;;  %v5510_v18 = vadd.f32 2.2, %v6227_v6 }
  0x2d   : > { %v1661_v19 = vadd.f32 %v1655_v12, %v1643_v9  ;;  %v6292_v21 = vsub.f32 %v5456_v11, %v6288_v14  ;;  %v962_v23 = vsub.f32 -1.4, %v6227_v6  ;;  %v6296_v24 = vadd.f32 1.8, %v6227_v6 }
  0x2e   : > { %v950_v26 = vmul.f32 2.5, %v5510_v18  ;;  %v1004_v27 = vsub.f32 -1.0, %v6227_v6  ;;  %v6300_v28 = vadd.f32 1.4, %v6227_v6  ;;  %v1046_v29 = vsub.f32 -0.6, %v6227_v6 }
  0x2f   : > { %v968_v30 = vmul.f32 2.5, %v962_v23  ;;  %v992_v31 = vmul.f32 2.5, %v6296_v24  ;;  %v1365_v33 = vmul.f32 1.25, %v5510_v18  ;;  %v1395_v34 = vmul.f32 1.25, %v6296_v24 }
  0x30   : > { %v5981_v35 = vpop.eup %5980  ;;  %v956_v36 = vmul.f32 %v950_v26, %v877_v13  ;;  %v1010_v37 = vmul.f32 2.5, %v1004_v27  ;;  %v1034_v38 = vmul.f32 2.5, %v6300_v28  ;;  %v1052_v39 = vmul.f32 2.5, %v1046_v29 }
  0x31   : > { %v5983_v40 = vpop.eup %5982  ;;  %v656_v41 = vmul.f32 %v5981_v35, %v6216_v1  ;;  %v974_v42 = vmul.f32 %v968_v30, %v883_v16  ;;  %v998_v43 = vmul.f32 %v992_v31, %v883_v16  ;;  %v1377_v44 = vmul.f32 1.25, %v1004_v27 }
  0x32   : > { %v5985_v45 = vpop.eup %5984  ;;  %v658_v46 = vmul.f32 %v5983_v40, %v6219_v2  ;;  %v1016_v47 = vmul.f32 %v1010_v37, %v889_v17  ;;  %v1040_v48 = vmul.f32 %v1034_v38, %v889_v17  ;;  %v1058_v49 = vmul.f32 %v1052_v39, %v6292_v21 }
  0x33   : > { %v5987_v50 = vpop.eup %5986  ;;  %v655_v51 = vmul.f32 %v5985_v45, %v6227_v6  ;;  %v980_v52 = vadd.f32 %v974_v42, %v956_v36  ;;  %v1407_v54 = vmul.f32 1.25, %v1046_v29  ;;  %v1636_v55 = vmul.f32 0.8333333, %v5510_v18 }
  0x34   : > { %v5989_v56 = vpop.eup %5988  ;;  %v5797_v57 = vpack.c.bf16 %v658_v46, %v656_v41  ;;  %v657_v58 = vmul.f32 %v5987_v50, %v6230_v7  ;;  %v1022_v59 = vadd.f32 %v1016_v47, %v998_v43  ;;  %v6311_v60 = vadd.f32 %v1058_v49, %v1040_v48 }
  0x35   : > { %v5991_v61 = vpop.eup %5990  ;;  %v660_v62 = vmul.f32 %v5989_v56, %v6222_v3  ;;  %v1371_v63 = vmul.f32 %v1365_v33, %v980_v52  ;;  %v1648_v4 = vmul.f32 0.8333333, %v1046_v29  ;;  %vm664_vm10 = vcmp.ge.f32.partialorder %v6219_v2, -2.2 }
  0x36   : > { %5798 = vmatprep.subr.bf16.mxu0 %v5797_v57  ;;  %v5799_v8 = vpack.c.bf16 %v657_v58, %v655_v51  ;;  %v641_v9 = vadd.f32 1.0, %v5991_v61  ;;  %v1383_v10 = vmul.f32 %v1377_v44, %v1022_v59  ;;  %v1401_v11 = vmul.f32 %v1395_v34, %v1022_v59 }
  0x37   : > { %v5801_v12 = vpack.c.bf16 %v1661_v19, %v660_v62  ;;  %v1413_v13 = vmul.f32 %v1407_v54, %v6311_v60  ;;  %vm666_vm11 = vcmp.ge.f32.partialorder %v6222_v3, -2.2  ;;  %v5441_v16 = vsel %vm664_vm10, 1.0, %v8740_v0 }
  0x38   : > { %5800 = vmatpush1.bf16.msra.mxu0 %v5799_v8  ;;  %5992 = vrcp.f32 %v641_v9  ;;  %v1389_v17 = vadd.f32 %v1383_v10, %v1371_v63  ;;  %v5443_v18 = vsel %vm666_vm11, 1.0, %v8740_v0  ;;  %vm682_vm12 = vcmp.ge.f32.partialorder %v6219_v2, -1.8 }
  0x39   : > { %5802 = vmatprep.subr.bf16.mxu0 %v5801_v12  ;;  %v6320_v23 = vadd.f32 %v1413_v13, %v1401_v11  ;;  %vm684_vm13 = vcmp.ge.f32.partialorder %v6222_v3, -1.8  ;;  %v5447_v19 = vsel %vm682_vm12, 1.0, %v8740_v0  ;;  %vm700_vm14 = vcmp.ge.f32.partialorder %v6219_v2, -1.4 }
  0x3a   : > { %v1642_v26 = vmul.f32 %v1636_v55, %v1389_v17  ;;  %v5449_v27 = vsel %vm684_vm13, 1.0, %v8740_v0  ;;  %vm702_vm15 = vcmp.ge.f32.partialorder %v6222_v3, -1.4  ;;  %v5453_v29 = vsel %vm700_vm14, 1.0, %v8740_v0 }
  0x3b   : > { %v1654_v30 = vmul.f32 %v1648_v4, %v6320_v23  ;;  %v5455_v31 = vsel %vm702_vm15, 1.0, %v8740_v0  ;;  %vm718_vm0 = vcmp.ge.f32.partialorder %v6219_v2, -1.0  ;;  %vm720_vm1 = vcmp.ge.f32.partialorder %v6222_v3, -1.0 }
  0x3c   : > { %v5459_v33 = vsel %vm718_vm0, 1.0, %v8740_v0  ;;  %v5461_v34 = vsel %vm720_vm1, 1.0, %v8740_v0  ;;  %vm736_vm2 = vcmp.ge.f32.partialorder %v6219_v2, -0.6  ;;  %vm738_vm3 = vcmp.ge.f32.partialorder %v6222_v3, -0.6 }
  0x3d   : > { %v1660_v35 = vadd.f32 %v1654_v30, %v1642_v26  ;;  %v6337_v36 = vsel %vm736_vm2, 1.0, %v8740_v0  ;;  %v6340_v37 = vsel %vm738_vm3, 1.0, %v8740_v0  ;;  %v880_v38 = vsub.f32 %v5441_v16, %v5447_v19 }
  0x3e   : > { %v882_v39 = vsub.f32 %v5443_v18, %v5449_v27  ;;  %v886_v40 = vsub.f32 %v5447_v19, %v5453_v29  ;;  %v888_v41 = vsub.f32 %v5449_v27, %v5455_v31  ;;  %v892_v42 = vsub.f32 %v5453_v29, %v5459_v33 }
  0x3f   : > { %v894_v43 = vsub.f32 %v5455_v31, %v5461_v34  ;;  %v6343_v44 = vsub.f32 %v5459_v33, %v6337_v36  ;;  %v5513_v45 = vadd.f32 2.2, %v6219_v2  ;;  %v6347_v46 = vsub.f32 %v5461_v34, %v6340_v37 }
  0x40   : > { %v6350_v47 = vadd.f32 2.2, %v6222_v3  ;;  %v965_v48 = vsub.f32 -1.4, %v6219_v2  ;;  %v967_v49 = vsub.f32 -1.4, %v6222_v3 }
  0x41   : > { %v953_v50 = vmul.f32 2.5, %v5513_v45  ;;  %v6355_v51 = vadd.f32 1.8, %v6219_v2  ;;  %v6358_v52 = vadd.f32 1.8, %v6222_v3  ;;  %v1007_v54 = vsub.f32 -1.0, %v6219_v2 }
  0x42   : > { %v5993_v55 = vpop.eup %5992  ;;  %v955_v56 = vmul.f32 2.5, %v6350_v47  ;;  %v971_v57 = vmul.f32 2.5, %v965_v48  ;;  %v973_v58 = vmul.f32 2.5, %v967_v49  ;;  %v1009_v59 = vsub.f32 -1.0, %v6222_v3 }
  0x43   : > { %8783 = vst [vmem:[#allocation3_spill] sm:$0xff] %v6358_v52  ;;  %v659_v61 = vmul.f32 %v5993_v55, %v6263_v32  ;;  %v959_v62 = vmul.f32 %v953_v50, %v880_v38  ;;  %v995_v63 = vmul.f32 2.5, %v6355_v51  ;;  %v997_v4 = vmul.f32 2.5, %v6358_v52 }
  0x44   : > { %v961_v8 = vmul.f32 %v955_v56, %v882_v39  ;;  %v977_v9 = vmul.f32 %v971_v57, %v886_v40  ;;  %v979_v10 = vmul.f32 %v973_v58, %v888_v41  ;;  %v1013_v11 = vmul.f32 2.5, %v1007_v54 }
  0x45   : > { %v5803_v12 = vpack.c.bf16 %v1660_v35, %v659_v61  ;;  %v1001_v13 = vmul.f32 %v995_v63, %v886_v40  ;;  %v1003_v16 = vmul.f32 %v997_v4, %v888_v41  ;;  %v1015_v17 = vmul.f32 2.5, %v1009_v59 }
  0x46   : > { %v983_v18 = vadd.f32 %v977_v9, %v959_v62  ;;  %v985_v19 = vadd.f32 %v979_v10, %v961_v8  ;;  %v1019_v26 = vmul.f32 %v1013_v11, %v892_v42  ;;  %v6367_v27 = vadd.f32 1.4, %v6219_v2 }
  0x47   : > { %5804 = vmatpush1.bf16.msra.mxu0 %v5803_v12  ;;  %v1021_v29 = vmul.f32 %v1015_v17, %v894_v43  ;;  %v6370_v30 = vadd.f32 1.4, %v6222_v3  ;;  %v1049_v31 = vsub.f32 -0.6, %v6219_v2  ;;  %v1051_v33 = vsub.f32 -0.6, %v6222_v3 }
  0x48   : > { %v1025_v34 = vadd.f32 %v1019_v26, %v1001_v13  ;;  %v1037_v35 = vmul.f32 2.5, %v6367_v27  ;;  %v1368_v38 = vmul.f32 1.25, %v5513_v45  ;;  %v1370_v39 = vmul.f32 1.25, %v6350_v47 }
  0x49   : > { %v1027_v40 = vadd.f32 %v1021_v29, %v1003_v16  ;;  %v1039_v41 = vmul.f32 2.5, %v6370_v30  ;;  %v1055_v48 = vmul.f32 2.5, %v1049_v31  ;;  %v1057_v49 = vmul.f32 2.5, %v1051_v33 }
  0x4a   : > { %v1043_v50 = vmul.f32 %v1037_v35, %v892_v42  ;;  %v1374_v55 = vmul.f32 %v1368_v38, %v983_v18  ;;  %v1376_v56 = vmul.f32 %v1370_v39, %v985_v19  ;;  %v1380_v57 = vmul.f32 1.25, %v1007_v54 }
  0x4b   : > { %v1045_v58 = vmul.f32 %v1039_v41, %v894_v43  ;;  %v1061_v61 = vmul.f32 %v1055_v48, %v6343_v44  ;;  %v1063_v62 = vmul.f32 %v1057_v49, %v6347_v46  ;;  %v1382_v63 = vmul.f32 1.25, %v1009_v59 }
  0x4c   : > { %v1386_v4 = vmul.f32 %v1380_v57, %v1025_v34  ;;  %v1398_v8 = vmul.f32 1.25, %v6355_v51  ;;  %v1400_v9 = vmul.f32 1.25, %v6358_v52  ;;  %v1410_v10 = vmul.f32 1.25, %v1049_v31 }
  0x4d   : > { %v6381_v11 = vadd.f32 %v1061_v61, %v1043_v50  ;;  %v6383_v12 = vadd.f32 %v1063_v62, %v1045_v58  ;;  %v1388_v42 = vmul.f32 %v1382_v63, %v1027_v40  ;;  %v1412_v13 = vmul.f32 1.25, %v1051_v33 }
  0x4e   : > { %v1392_v16 = vadd.f32 %v1386_v4, %v1374_v55  ;;  %v1404_v54 = vmul.f32 %v1398_v8, %v1025_v34  ;;  %v1406_v43 = vmul.f32 %v1400_v9, %v1027_v40  ;;  %v1639_v17 = vmul.f32 0.8333333, %v5513_v45 }
  0x4f   : > { %8784 = vst [vmem:[#allocation4_spill] sm:$0xff] %v6383_v12  ;;  %v1394_v18 = vadd.f32 %v1388_v42, %v1376_v56  ;;  %v1416_v19 = vmul.f32 %v1410_v10, %v6381_v11  ;;  %v1418_v59 = vmul.f32 %v1412_v13, %v6383_v12  ;;  %v1641_v26 = vmul.f32 0.8333333, %v6350_v47 }
  0x50   : > { %v1645_v29 = vmul.f32 %v1639_v17, %v1392_v16  ;;  %v1651_v35 = vmul.f32 0.8333333, %v1049_v31  ;;  %v1653_v38 = vmul.f32 0.8333333, %v1051_v33  ;;  %vm663_vm4 = vcmp.ge.f32.partialorder %v6230_v7, -2.2 }
  0x51   : > { %v6389_v39 = vadd.f32 %v1416_v19, %v1404_v54  ;;  %v6391_v41 = vadd.f32 %v1418_v59, %v1406_v43  ;;  %v1647_v48 = vmul.f32 %v1641_v26, %v1394_v18  ;;  %vm665_vm5 = vcmp.ge.f32.partialorder %v6263_v32, -2.2 }
  0x52   : > { %v5440_v45 = vsel %vm663_vm4, 1.0, %v8740_v0  ;;  %v5442_v34 = vsel %vm665_vm5, 1.0, %v8740_v0  ;;  %vm681_vm6 = vcmp.ge.f32.partialorder %v6230_v7, -1.8  ;;  %vm683_vm7 = vcmp.ge.f32.partialorder %v6263_v32, -1.8 }
  0x53   : > { %8785 = vst [vmem:[#allocation5_spill] sm:$0xff] %v6391_v41  ;;  %v1657_v47 = vmul.f32 %v1651_v35, %v6389_v39  ;;  %v1659_v31 = vmul.f32 %v1653_v38, %v6391_v41  ;;  %v5446_v33 = vsel %vm681_vm6, 1.0, %v8740_v0  ;;  %v5448_v40 = vsel %vm683_vm7, 1.0, %v8740_v0 }
  0x54   : > { %vm699_vm8 = vcmp.ge.f32.partialorder %v6230_v7, -1.4  ;;  %vm701_vm9 = vcmp.ge.f32.partialorder %v6263_v32, -1.4  ;;  %vm717_vm10 = vcmp.ge.f32.partialorder %v6230_v7, -1.0  ;;  %vm719_vm11 = vcmp.ge.f32.partialorder %v6263_v32, -1.0 }
  0x55   : > { %v1663_v49 = vadd.f32 %v1657_v47, %v1645_v29  ;;  %v1665_v50 = vadd.f32 %v1659_v31, %v1647_v48  ;;  %v5452_v55 = vsel %vm699_vm8, 1.0, %v8740_v0  ;;  %v5454_v56 = vsel %vm701_vm9, 1.0, %v8740_v0 }
  0x56   : > { %v5458_v57 = vsel %vm717_vm10, 1.0, %v8740_v0  ;;  %v5460_v58 = vsel %vm719_vm11, 1.0, %v8740_v0  ;;  %vm735_vm12 = vcmp.ge.f32.partialorder %v6230_v7, -0.6  ;;  %vm737_vm13 = vcmp.ge.f32.partialorder %v6263_v32, -0.6 }
  0x57   : > { %v5805_v61 = vpack.c.bf16 %v1665_v50, %v1663_v49  ;;  %v6413_v62 = vsel %vm735_vm12, 1.0, %v8740_v0  ;;  %v6416_v63 = vsel %vm737_vm13, 1.0, %v8740_v0  ;;  %v879_v4 = vsub.f32 %v5440_v45, %v5446_v33 }
  0x58   : > { %8786 = vst [vmem:[#allocation6_spill] sm:$0xff] %v6416_v63  ;;  %v881_v8 = vsub.f32 %v5442_v34, %v5448_v40  ;;  %v885_v9 = vsub.f32 %v5446_v33, %v5452_v55  ;;  %v887_v10 = vsub.f32 %v5448_v40, %v5454_v56  ;;  %v891_v42 = vsub.f32 %v5452_v55, %v5458_v57 }
  0x59   : > { %5806 = vmatprep.subr.bf16.mxu0 %v5805_v61  ;;  %v893_v13 = vsub.f32 %v5454_v56, %v5460_v58  ;;  %v6419_v16 = vsub.f32 %v5458_v57, %v6413_v62  ;;  %v5512_v54 = vadd.f32 2.2, %v6230_v7  ;;  %v6423_v43 = vsub.f32 %v5460_v58, %v6416_v63 }
  0x5a   : > { %v5514_v17 = vadd.f32 2.2, %v6263_v32  ;;  %v964_v18 = vsub.f32 -1.4, %v6230_v7  ;;  %v966_v19 = vsub.f32 -1.4, %v6263_v32 }
  0x5b   : > { %v952_v59 = vmul.f32 2.5, %v5512_v54  ;;  %v6429_v26 = vadd.f32 1.8, %v6230_v7  ;;  %v6432_v29 = vadd.f32 1.8, %v6263_v32  ;;  %v1006_v35 = vsub.f32 -1.0, %v6230_v7 }
  0x5c   : > { %v954_v38 = vmul.f32 2.5, %v5514_v17  ;;  %v970_v48 = vmul.f32 2.5, %v964_v18  ;;  %v972_v45 = vmul.f32 2.5, %v966_v19  ;;  %v1008_v34 = vsub.f32 -1.0, %v6263_v32 }
  0x5d   : > { %v958_v47 = vmul.f32 %v952_v59, %v879_v4  ;;  %v994_v31 = vmul.f32 2.5, %v6429_v26  ;;  %v996_v33 = vmul.f32 2.5, %v6432_v29  ;;  %v1012_v40 = vmul.f32 2.5, %v1006_v35 }
  0x5e   : > { %v960_v49 = vmul.f32 %v954_v38, %v881_v8  ;;  %v976_v50 = vmul.f32 %v970_v48, %v885_v9  ;;  %v978_v55 = vmul.f32 %v972_v45, %v887_v10  ;;  %v1014_v56 = vmul.f32 2.5, %v1008_v34 }
  0x5f   : > { %v1000_v57 = vmul.f32 %v994_v31, %v885_v9  ;;  %v1002_v58 = vmul.f32 %v996_v33, %v887_v10  ;;  %v1018_v61 = vmul.f32 %v1012_v40, %v891_v42  ;;  %v6439_v0 = vadd.f32 1.4, %v6230_v7 }
  0x60   : > { %v982_v18 = vadd.f32 %v976_v50, %v958_v47  ;;  %v984_v19 = vadd.f32 %v978_v55, %v960_v49  ;;  %v1020_v63 = vmul.f32 %v1014_v56, %v893_v13  ;;  %v6442_v4 = vadd.f32 1.4, %v6263_v32 }
  0x61   : > { %v1024_v59 = vadd.f32 %v1018_v61, %v1000_v57  ;;  %v1036_v41 = vmul.f32 2.5, %v6439_v0  ;;  %v1048_v8 = vsub.f32 -0.6, %v6230_v7  ;;  %v1050_v38 = vsub.f32 -0.6, %v6263_v32 }
  0x62   : > { %8787 = vst [vmem:[#allocation7_spill] sm:$0xff] %v6442_v4  ;;  %v1026_v48 = vadd.f32 %v1020_v63, %v1002_v58  ;;  %v1038_v9 = vmul.f32 2.5, %v6442_v4  ;;  %v1367_v10 = vmul.f32 1.25, %v5512_v54  ;;  %v1369_v45 = vmul.f32 1.25, %v5514_v17 }
  0x63   : > { %v1042_v31 = vmul.f32 %v1036_v41, %v891_v42  ;;  %v1054_v33 = vmul.f32 2.5, %v1048_v8  ;;  %v1056_v47 = vmul.f32 2.5, %v1050_v38  ;;  %v1379_v40 = vmul.f32 1.25, %v1006_v35 }
  0x64   : > { %v1044_v49 = vmul.f32 %v1038_v9, %v893_v13  ;;  %v1373_v50 = vmul.f32 %v1367_v10, %v982_v18  ;;  %v1375_v55 = vmul.f32 %v1369_v45, %v984_v19  ;;  %v1381_v56 = vmul.f32 1.25, %v1008_v34 }
  0x65   : > { %v1060_v57 = vmul.f32 %v1054_v33, %v6419_v16  ;;  %v1062_v61 = vmul.f32 %v1056_v47, %v6423_v43  ;;  %v1385_v52 = vmul.f32 %v1379_v40, %v1024_v59  ;;  %v1397_v32 = vmul.f32 1.25, %v6429_v26 }
  0x66   : > { %v1387_v63 = vmul.f32 %v1381_v56, %v1026_v48  ;;  %v1399_v58 = vmul.f32 1.25, %v6432_v29  ;;  %v1409_v4 = vmul.f32 1.25, %v1048_v8  ;;  %v1411_v12 = vmul.f32 1.25, %v1050_v38 }
  0x67   : > { %v6452_v41 = vadd.f32 %v1060_v57, %v1042_v31  ;;  %v6454_v42 = vadd.f32 %v1062_v61, %v1044_v49  ;;  %v1391_v13 = vadd.f32 %v1385_v52, %v1373_v50  ;;  %v1403_v35 = vmul.f32 %v1397_v32, %v1024_v59 }
  0x68   : > { %v1393_v18 = vadd.f32 %v1387_v63, %v1375_v55  ;;  %v1405_v34 = vmul.f32 %v1399_v58, %v1026_v48  ;;  %v1638_v19 = vmul.f32 0.8333333, %v5512_v54  ;;  %v1640_v9 = vmul.f32 0.8333333, %v5514_v17 }
  0x69   : > { %v1415_v10 = vmul.f32 %v1409_v4, %v6452_v41  ;;  %v1417_v45 = vmul.f32 %v1411_v12, %v6454_v42  ;;  %v1650_v33 = vmul.f32 0.8333333, %v1048_v8  ;;  %v1652_v47 = vmul.f32 0.8333333, %v1050_v38 }
  0x6a   : > { %v1644_v40 = vmul.f32 %v1638_v19, %v1391_v13  ;;  %v1646_v56 = vmul.f32 %v1640_v9, %v1393_v18  ;;  %vm752_vm14 = vcmp.ge.f32.partialorder %v6216_v1, -0.2  ;;  %vm754_vm15 = vcmp.ge.f32.partialorder %v6219_v2, -0.2 }
  0x6b   : > { %v6460_v31 = vadd.f32 %v1415_v10, %v1403_v35  ;;  %v6462_v52 = vadd.f32 %v1417_v45, %v1405_v34  ;;  %v8788_v32 = vmov 0.0   ;;  %v6479_v4 = vadd.f32 1.0, %v6216_v1 }
  0x6c   : > { %v6465_v59 = vsel %vm752_vm14, 1.0, %v8788_v32  ;;  %v6468_v54 = vsel %vm754_vm15, 1.0, %v8788_v32  ;;  %v6482_v8 = vadd.f32 1.0, %v6219_v2  ;;  %v1089_v49 = vsub.f32 -0.2, %v6216_v1 }
  0x6d   : > { %v6472_v12 = vsub.f32 %v6245_v15, %v6465_v59  ;;  %v6476_v17 = vsub.f32 %v6337_v36, %v6468_v54  ;;  %v1656_v38 = vmul.f32 %v1650_v33, %v6460_v31  ;;  %v1658_v48 = vmul.f32 %v1652_v47, %v6462_v52 }
  0x6e   : > { %v1091_v50 = vsub.f32 -0.2, %v6219_v2  ;;  %v1077_v15 = vmul.f32 2.5, %v6479_v4  ;;  %v1079_v55 = vmul.f32 2.5, %v6482_v8  ;;  %v1426_v36 = vmul.f32 1.25, %v6257_v25 }
  0x6f   : > { %v1428_v57 = vmul.f32 1.25, %v6367_v27  ;;  %v1662_v61 = vadd.f32 %v1656_v38, %v1644_v40  ;;  %v1664_v63 = vadd.f32 %v1658_v48, %v1646_v56  ;;  %v1095_v58 = vmul.f32 2.5, %v1089_v49 }
  0x70   : > { %v1097_v13 = vmul.f32 2.5, %v1091_v50  ;;  %v1083_v35 = vmul.f32 %v1077_v15, %v6249_v20  ;;  %v1085_v18 = vmul.f32 %v1079_v55, %v6343_v44  ;;  %v1432_v34 = vmul.f32 %v1426_v36, %v6269_v53 }
  0x71   : > { %v1434_v2 = vmul.f32 %v1428_v57, %v6381_v11  ;;  %v5807_v19 = vpack.c.bf16 %v1664_v63, %v1662_v61  ;;  %v1101_v9 = vmul.f32 %v1095_v58, %v6472_v12  ;;  %v1438_v45 = vmul.f32 1.25, %v1089_v49 }
  0x72   : > { %v1103_v10 = vmul.f32 %v1097_v13, %v6476_v17  ;;  %v1440_v33 = vmul.f32 1.25, %v1091_v50  ;;  %v1667_v47 = vmul.f32 0.8333333, %v6253_v22  ;;  %v1669_v40 = vmul.f32 0.8333333, %v6355_v51 }
  0x73   : > { %v6501_v56 = vadd.f32 1.0, %v6227_v6  ;;  %5808 = vmatpush1.bf16.msra.mxu0 %v5807_v19  ;;  %v6503_v20 = vadd.f32 %v1101_v9, %v1083_v35  ;;  %v1679_v44 = vmul.f32 0.8333333, %v1089_v49  ;;  %v1681_v11 = vmul.f32 0.8333333, %v1091_v50 }
  0x74   : > { %v6505_v53 = vadd.f32 %v1103_v10, %v1085_v18  ;;  %v1673_v38 = vmul.f32 %v1667_v47, %v6275_v5  ;;  %v1675_v48 = vmul.f32 %v1669_v40, %v6389_v39  ;;  %vm751_vm0 = vcmp.ge.f32.partialorder %v6227_v6, -0.2 }
  0x75   : > { %vm753_vm1 = vcmp.ge.f32.partialorder %v6230_v7, -0.2  ;;  %v1444_v22 = vmul.f32 %v1438_v45, %v6503_v20  ;;  %v6514_v15 = vsel %vm751_vm0, 1.0, %v8788_v32  ;;  %v6528_v39 = vadd.f32 1.0, %v6230_v7 }
  0x76   : > { %v1446_v51 = vmul.f32 %v1440_v33, %v6505_v53  ;;  %v6517_v55 = vsel %vm753_vm1, 1.0, %v8788_v32  ;;  %v6521_v49 = vsub.f32 %v6288_v14, %v6514_v15  ;;  %v1076_v50 = vmul.f32 2.5, %v6501_v56 }
  0x77   : > { %v6525_v5 = vsub.f32 %v6413_v62, %v6517_v55  ;;  %v6531_v36 = vadd.f32 %v1444_v22, %v1432_v34  ;;  %v1088_v61 = vsub.f32 -0.2, %v6227_v6  ;;  %v1090_v63 = vsub.f32 -0.2, %v6230_v7 }
  0x78   : > { %v6533_v57 = vadd.f32 %v1446_v51, %v1434_v2  ;;  %v1078_v14 = vmul.f32 2.5, %v6528_v39  ;;  %v1082_v58 = vmul.f32 %v1076_v50, %v6292_v21  ;;  %v1425_v62 = vmul.f32 1.25, %v6300_v28 }
  0x79   : > { %v1427_v13 = vmul.f32 1.25, %v6439_v0  ;;  %v1685_v35 = vmul.f32 %v1679_v44, %v6531_v36  ;;  %v1094_v34 = vmul.f32 2.5, %v1088_v61  ;;  %v1096_v19 = vmul.f32 2.5, %v1090_v63 }
  0x7a   : > { %v1687_v18 = vmul.f32 %v1681_v11, %v6533_v57  ;;  %v1084_v2 = vmul.f32 %v1078_v14, %v6419_v16  ;;  %v1431_v9 = vmul.f32 %v1425_v62, %v6311_v60  ;;  %v1437_v10 = vmul.f32 1.25, %v1088_v61 }
  0x7b   : > { %v1433_v7 = vmul.f32 %v1427_v13, %v6452_v41  ;;  %v1691_v45 = vadd.f32 %v1685_v35, %v1673_v38  ;;  %v1100_v21 = vmul.f32 %v1094_v34, %v6521_v49  ;;  %v1102_v47 = vmul.f32 %v1096_v19, %v6525_v5 }
  0x7c   : > { %v1693_v33 = vadd.f32 %v1687_v18, %v1675_v48  ;;  %v1439_v40 = vmul.f32 1.25, %v1090_v63  ;;  %v1666_v44 = vmul.f32 0.8333333, %v6296_v24  ;;  %v1668_v11 = vmul.f32 0.8333333, %v6429_v26 }
  0x7d   : > { %v6551_v22 = vadd.f32 1.0, %v6222_v3  ;;  %v6553_v51 = vadd.f32 %v1100_v21, %v1082_v58  ;;  %v6555_v60 = vadd.f32 %v1102_v47, %v1084_v2  ;;  %v1678_v41 = vmul.f32 0.8333333, %v1088_v61 }
  0x7e   : > { %v5809_v16 = vpack.c.bf16 %v1693_v33, %v1691_v45  ;;  %v1672_v38 = vmul.f32 %v1666_v44, %v6320_v23  ;;  %v1674_v48 = vmul.f32 %v1668_v11, %v6460_v31  ;;  %v1680_v50 = vmul.f32 0.8333333, %v1090_v63  ;;  %v8790_v45 = vld [vmem:[#allocation4_spill] sm:$0xff] }
  0x7f   : > { %8789 = vst [vmem:[#allocation8_spill] sm:$0xff] %v6551_v22  ;;  %vm756_vm2 = vcmp.ge.f32.partialorder %v6222_v3, -0.2  ;;  %v1443_v24 = vmul.f32 %v1437_v10, %v6553_v51  ;;  %v1445_v26 = vmul.f32 %v1439_v40, %v6555_v60  ;;  %vm770_vm3 = vcmp.ge.f32.partialorder %v6216_v1, 0.2 }
  0x80   : > { %5810 = vmatprep.subr.bf16.mxu0 %v5809_v16  ;;  %v6563_v14 = vsel %vm756_vm2, 1.0, %v8788_v32  ;;  %v6567_v58 = vsel %vm770_vm3, 1.0, %v8788_v32  ;;  %v1081_v31 = vmul.f32 2.5, %v6551_v22  ;;  %v1093_v61 = vsub.f32 -0.2, %v6222_v3 }
  0x81   : > { %v6571_v23 = vsub.f32 %v6340_v37, %v6563_v14  ;;  %v6575_v63 = vadd.f32 %v1443_v24, %v1431_v9  ;;  %v6577_v62 = vadd.f32 %v1445_v26, %v1433_v7  ;;  %v6581_v13 = vsub.f32 %v6465_v59, %v6567_v58 }
  0x82   : > { %v6584_v35 = vadd.f32 0.6, %v6216_v1  ;;  %v1087_v18 = vmul.f32 %v1081_v31, %v6347_v46  ;;  %v1099_v34 = vmul.f32 2.5, %v1093_v61  ;;  %v1131_v37 = vsub.f32 0.2, %v6216_v1 }
  0x83   : > { %v1430_v19 = vmul.f32 1.25, %v6370_v30  ;;  %v1684_v3 = vmul.f32 %v1678_v41, %v6575_v63  ;;  %v1686_v2 = vmul.f32 %v1680_v50, %v6577_v62  ;;  %v1442_v7 = vmul.f32 1.25, %v1093_v61  ;;  %v8791_v41 = vld [vmem:[#allocation3_spill] sm:$0xff] }
  0x84   : > { %v1119_v9 = vmul.f32 2.5, %v6584_v35  ;;  %v1105_v59 = vmul.f32 %v1099_v34, %v6571_v23  ;;  %v1137_v10 = vmul.f32 2.5, %v1131_v37  ;;  %v1456_v21 = vmul.f32 1.25, %v6479_v4 }
  0x85   : > { %v1436_v33 = vmul.f32 %v1430_v19, %v8790_v45  ;;  %v1690_v46 = vadd.f32 %v1684_v3, %v1672_v38  ;;  %v1692_v47 = vadd.f32 %v1686_v2, %v1674_v48  ;;  %v1468_v40 = vmul.f32 1.25, %v1131_v37  ;;  %v8792_v48 = vld [vmem:[#allocation5_spill] sm:$0xff]  ;;  %v8793_v3 = vld [vmem:[#allocation2_spill] sm:$0xff] }
  0x86   : > { %v1125_v1 = vmul.f32 %v1119_v9, %v6472_v12  ;;  %v6596_v44 = vadd.f32 %v1105_v59, %v1087_v18  ;;  %v1143_v11 = vmul.f32 %v1137_v10, %v6581_v13  ;;  %v1462_v16 = vmul.f32 %v1456_v21, %v6503_v20  ;;  %v8795_v9 = vld [vmem:[#allocation6_spill] sm:$0xff] }
  0x87   : > { %v1671_v50 = vmul.f32 0.8333333, %v8791_v41  ;;  %v5811_v24 = vpack.c.bf16 %v1692_v47, %v1690_v46  ;;  %v1683_v26 = vmul.f32 0.8333333, %v1093_v61  ;;  %v1697_v31 = vmul.f32 0.8333333, %v6257_v25 }
  0x88   : > { %v1709_v34 = vmul.f32 0.8333333, %v1131_v37  ;;  %v6602_v19 = vadd.f32 %v1143_v11, %v1125_v1  ;;  %v1448_v38 = vmul.f32 %v1442_v7, %v6596_v44  ;;  %vm755_vm4 = vcmp.ge.f32.partialorder %v8793_v3, -0.2  ;;  %v8796_v47 = vld [vmem:[#allocation7_spill] sm:$0xff] }
  0x89   : > { %v1677_v12 = vmul.f32 %v1671_v50, %v8792_v48  ;;  %5812 = vmatpush1.bf16.msra.mxu0 %v5811_v24  ;;  %v1703_v18 = vmul.f32 %v1697_v31, %v6531_v36  ;;  %v6609_v20 = vsel %vm755_vm4, 1.0, %v8788_v32  ;;  %vm769_vm5 = vcmp.ge.f32.partialorder %v6227_v6, 0.2 }
  0x8a   : > { %v6613_v61 = vadd.f32 1.0, %v8793_v3  ;;  %v6615_v25 = vadd.f32 %v1448_v38, %v1436_v33  ;;  %v1474_v37 = vmul.f32 %v1468_v40, %v6602_v19  ;;  %v6619_v2 = vsel %vm769_vm5, 1.0, %v8788_v32 }
  0x8b   : > { %v6623_v7 = vsub.f32 %v8795_v9, %v6609_v20  ;;  %v6627_v36 = vsub.f32 %v6514_v15, %v6619_v2  ;;  %v1092_v10 = vsub.f32 -0.2, %v8793_v3  ;;  %v6632_v45 = vadd.f32 0.6, %v6227_v6 }
  0x8c   : > { %8794 = vst [vmem:[#allocation4_spill] sm:$0xff] %v6613_v61  ;;  %v1080_v59 = vmul.f32 2.5, %v6613_v61  ;;  %v6634_v33 = vadd.f32 %v1474_v37, %v1462_v16  ;;  %v1689_v21 = vmul.f32 %v1683_v26, %v6615_v25  ;;  %v1130_v46 = vsub.f32 0.2, %v6227_v6 }
  0x8d   : > { %v1429_v1 = vmul.f32 1.25, %v8796_v47  ;;  %v1098_v11 = vmul.f32 2.5, %v1092_v10  ;;  %v1118_v15 = vmul.f32 2.5, %v6632_v45  ;;  %v1441_v41 = vmul.f32 1.25, %v1092_v10 }
  0x8e   : > { %v1086_v40 = vmul.f32 %v1080_v59, %v6423_v43  ;;  %v1695_v50 = vadd.f32 %v1689_v21, %v1677_v12  ;;  %v1715_v24 = vmul.f32 %v1709_v34, %v6634_v33  ;;  %v1136_v31 = vmul.f32 2.5, %v1130_v46 }
  0x8f   : > { %v1435_v38 = vmul.f32 %v1429_v1, %v6454_v42  ;;  %v1104_v16 = vmul.f32 %v1098_v11, %v6623_v7  ;;  %v1124_v26 = vmul.f32 %v1118_v15, %v6521_v49  ;;  %v1455_v6 = vmul.f32 1.25, %v6501_v56  ;;  %v6656_v11 = vld [vmem:[%s6213_s0 + $0x18] sm:$0xff] }
  0x90   : > { %v1467_v48 = vmul.f32 1.25, %v1130_v46  ;;  %v1721_v43 = vadd.f32 %v1715_v24, %v1703_v18  ;;  %v1142_v3 = vmul.f32 %v1136_v31, %v6627_v36  ;;  %v1670_v37 = vmul.f32 0.8333333, %v6432_v29 }
  0x91   : > { %v1682_v12 = vmul.f32 0.8333333, %v1092_v10  ;;  %v6648_v9 = vadd.f32 %v1104_v16, %v1086_v40  ;;  %v1461_v34 = vmul.f32 %v1455_v6, %v6553_v51  ;;  %v1696_v42 = vmul.f32 0.8333333, %v6300_v28  ;;  %v6662_v10 = vld [vmem:[%s6213_s0 + $0x28] sm:$0xff] }
  0x92   : > { %v1708_v59 = vmul.f32 0.8333333, %v1130_v46  ;;  %v5813_v21 = vpack.c.bf16 %v1721_v43, %v1695_v50  ;;  %v6652_v1 = vadd.f32 %v1142_v3, %v1124_v26  ;;  %v1676_v49 = vmul.f32 %v1670_v37, %v6462_v52 }
  0x93   : > { %vm772_vm6 = vcmp.ge.f32.partialorder %v6656_v11, 0.2  ;;  %v1447_v18 = vmul.f32 %v1441_v41, %v6648_v9  ;;  %v1702_v29 = vmul.f32 %v1696_v42, %v6575_v63  ;;  %vm774_vm7 = vcmp.ge.f32.partialorder %v6662_v10, 0.2 }
  0x94   : > { %v6666_v28 = vsel %vm772_vm6, 1.0, %v8788_v32  ;;  %5814 = vmatprep.subr.bf16.mxu0 %v5813_v21  ;;  %v1473_v51 = vmul.f32 %v1467_v48, %v6652_v1  ;;  %v6670_v52 = vsel %vm774_vm7, 1.0, %v8788_v32  ;;  %v6677_v40 = vadd.f32 0.6, %v6656_v11 }
  0x95   : > { %v6674_v46 = vsub.f32 %v6468_v54, %v6666_v28  ;;  %v6679_v63 = vadd.f32 %v1447_v18, %v1435_v38  ;;  %v6683_v15 = vsub.f32 %v6563_v14, %v6670_v52  ;;  %v6686_v41 = vadd.f32 0.6, %v6662_v10 }
  0x96   : > { %8797 = vst [vmem:[#allocation3_spill] sm:$0xff] %v6677_v40  ;;  %v1133_v50 = vsub.f32 0.2, %v6656_v11  ;;  %v6689_v24 = vadd.f32 %v1473_v51, %v1461_v34  ;;  %v1121_v31 = vmul.f32 2.5, %v6677_v40  ;;  %v1135_v54 = vsub.f32 0.2, %v6662_v10 }
  0x97   : > { %8798 = vst [vmem:[#allocation5_spill] sm:$0xff] %v6686_v41  ;;  %v1458_v16 = vmul.f32 1.25, %v6482_v8  ;;  %v1688_v38 = vmul.f32 %v1682_v12, %v6679_v63  ;;  %v1123_v26 = vmul.f32 2.5, %v6686_v41  ;;  %v1460_v14 = vmul.f32 1.25, %v6551_v22 }
  0x98   : > { %v1139_v6 = vmul.f32 2.5, %v1133_v50  ;;  %v1714_v48 = vmul.f32 %v1708_v59, %v6689_v24  ;;  %v1127_v43 = vmul.f32 %v1121_v31, %v6476_v17  ;;  %v1141_v3 = vmul.f32 2.5, %v1135_v54 }
  0x99   : > { %v1464_v37 = vmul.f32 %v1458_v16, %v6505_v53  ;;  %v1694_v34 = vadd.f32 %v1688_v38, %v1676_v49  ;;  %v1129_v42 = vmul.f32 %v1123_v26, %v6571_v23  ;;  %v1466_v12 = vmul.f32 %v1460_v14, %v6596_v44  ;;  %v6711_v38 = vld [vmem:[%s6213_s0 + $0x10] sm:$0xff] }
  0x9a   : > { %v1145_v21 = vmul.f32 %v1139_v6, %v6674_v46  ;;  %v1720_v18 = vadd.f32 %v1714_v48, %v1702_v29  ;;  %v1147_v51 = vmul.f32 %v1141_v3, %v6683_v15  ;;  %v1470_v22 = vmul.f32 1.25, %v1133_v50  ;;  %v6718_v6 = vld [vmem:[%s6213_s0 + $0x20] sm:$0xff] }
  0x9b   : > { %v1472_v41 = vmul.f32 1.25, %v1135_v54  ;;  %v1699_v17 = vmul.f32 0.8333333, %v6367_v27  ;;  %v1701_v53 = vmul.f32 0.8333333, %v6370_v30  ;;  %vm808_vm2 = vcmp.ge.f32.partialorder %v6656_v11, 1.0 }
  0x9c   : > { %v6704_v59 = vadd.f32 %v1145_v21, %v1127_v43  ;;  %v1711_v31 = vmul.f32 0.8333333, %v1133_v50  ;;  %v5815_v49 = vpack.c.bf16 %v1720_v18, %v1694_v34  ;;  %v6708_v16 = vadd.f32 %v1147_v51, %v1129_v42 }
  0x9d   : > { %v1713_v23 = vmul.f32 0.8333333, %v1135_v54  ;;  %vm771_vm8 = vcmp.ge.f32.partialorder %v6711_v38, 0.2  ;;  %v1705_v29 = vmul.f32 %v1699_v17, %v6533_v57  ;;  %v1707_v26 = vmul.f32 %v1701_v53, %v6615_v25 }
  0x9e   : > { %v1476_v44 = vmul.f32 %v1470_v22, %v6704_v59  ;;  %vm773_vm9 = vcmp.ge.f32.partialorder %v6718_v6, 0.2  ;;  %5816 = vmatpush1.bf16.msra.mxu0 %v5815_v49  ;;  %v1478_v27 = vmul.f32 %v1472_v41, %v6708_v16  ;;  %v6723_v30 = vsel %vm771_vm8, 1.0, %v8788_v32 }
  0x9f   : > { %v6726_v50 = vsel %vm773_vm9, 1.0, %v8788_v32  ;;  %v6729_v54 = vadd.f32 0.6, %v6711_v38  ;;  %v6735_v57 = vsub.f32 %v6517_v55, %v6723_v30  ;;  %v6742_v41 = vadd.f32 0.6, %v6718_v6 }
  0xa0   : > { %v6731_v22 = vadd.f32 %v1476_v44, %v1464_v37  ;;  %v6739_v25 = vsub.f32 %v6609_v20, %v6726_v50  ;;  %v6744_v14 = vadd.f32 %v1478_v27, %v1466_v12  ;;  %v1132_v43 = vsub.f32 0.2, %v6711_v38 }
  0xa1   : > { %8799 = vst [vmem:[#allocation2_spill] sm:$0xff] %v6729_v54  ;;  %8800 = vst [vmem:[#allocation6_spill] sm:$0xff] %v6742_v41  ;;  %v1120_v48 = vmul.f32 2.5, %v6729_v54  ;;  %v1134_v3 = vsub.f32 0.2, %v6718_v6  ;;  %v1122_v55 = vmul.f32 2.5, %v6742_v41 }
  0xa2   : > { %v1717_v37 = vmul.f32 %v1711_v31, %v6731_v22  ;;  %v1457_v34 = vmul.f32 1.25, %v6528_v39  ;;  %v1459_v20 = vmul.f32 1.25, %v6613_v61  ;;  %v1719_v42 = vmul.f32 %v1713_v23, %v6744_v14 }
  0xa3   : > { %v1126_v21 = vmul.f32 %v1120_v48, %v6525_v5  ;;  %v1138_v12 = vmul.f32 2.5, %v1132_v43  ;;  %v1140_v18 = vmul.f32 2.5, %v1134_v3  ;;  %v1128_v17 = vmul.f32 %v1122_v55, %v6623_v7 }
  0xa4   : > { %v1723_v51 = vadd.f32 %v1717_v37, %v1705_v29  ;;  %v1463_v53 = vmul.f32 %v1457_v34, %v6555_v60  ;;  %v1465_v49 = vmul.f32 %v1459_v20, %v6648_v9  ;;  %v1725_v31 = vadd.f32 %v1719_v42, %v1707_v26  ;;  %v6770_v34 = vld [vmem:[%s6213_s0 + $0x8] sm:$0xff] }
  0xa5   : > { %v1144_v44 = vmul.f32 %v1138_v12, %v6735_v57  ;;  %v1146_v27 = vmul.f32 %v1140_v18, %v6739_v25  ;;  %v1469_v61 = vmul.f32 1.25, %v1132_v43  ;;  %v1471_v41 = vmul.f32 1.25, %v1134_v3  ;;  %8801 = vst [vmem:[#allocation7_spill] sm:$0xff] %v6770_v34 }
  0xa6   : > { %v1698_v23 = vmul.f32 0.8333333, %v6439_v0  ;;  %v1700_v5 = vmul.f32 0.8333333, %v8796_v47  ;;  %v1486_v29 = vmul.f32 1.25, %v6584_v35  ;;  %v5817_v48 = vpack.c.bf16 %v1725_v31, %v1723_v51 }
  0xa7   : > { %v6763_v7 = vadd.f32 %v1144_v44, %v1126_v21  ;;  %v6765_v60 = vadd.f32 %v1146_v27, %v1128_v17  ;;  %v1710_v9 = vmul.f32 0.8333333, %v1132_v43  ;;  %v1712_v55 = vmul.f32 0.8333333, %v1134_v3 }
  0xa8   : > { %v1704_v26 = vmul.f32 %v1698_v23, %v6577_v62  ;;  %v1706_v37 = vmul.f32 %v1700_v5, %v6679_v63  ;;  %vm788_vm10 = vcmp.ge.f32.partialorder %v6770_v34, 0.6  ;;  %5818 = vmatprep.subr.bf16.mxu0 %v5817_v48  ;;  %vm790_vm11 = vcmp.ge.f32.partialorder %v6656_v11, 0.6 }
  0xa9   : > { %v1475_v0 = vmul.f32 %v1469_v61, %v6763_v7  ;;  %v1477_v47 = vmul.f32 %v1471_v41, %v6765_v60  ;;  %v6777_v20 = vsel %vm788_vm10, 1.0, %v8788_v32  ;;  %v6780_v43 = vsel %vm790_vm11, 1.0, %v8788_v32 }
  0xaa   : > { %v6784_v62 = vsub.f32 %v6567_v58, %v6777_v20  ;;  %v6787_v63 = vadd.f32 0.2, %v6770_v34  ;;  %v6790_v3 = vadd.f32 0.2, %v6656_v11  ;;  %v6798_v42 = vsub.f32 %v6666_v28, %v6780_v43 }
  0xab   : > { %v6792_v61 = vadd.f32 %v1475_v0, %v1463_v53  ;;  %v6794_v41 = vadd.f32 %v1477_v47, %v1465_v49  ;;  %v1173_v21 = vsub.f32 0.6, %v6770_v34  ;;  %v1175_v18 = vsub.f32 0.6, %v6656_v11 }
  0xac   : > { %v1161_v12 = vmul.f32 2.5, %v6787_v63  ;;  %v1163_v58 = vmul.f32 2.5, %v6790_v3  ;;  %v1488_v51 = vmul.f32 1.25, %v6677_v40  ;;  %v1492_v31 = vmul.f32 %v1486_v29, %v6602_v19 }
  0xad   : > { %v1716_v17 = vmul.f32 %v1710_v9, %v6792_v61  ;;  %v1718_v53 = vmul.f32 %v1712_v55, %v6794_v41  ;;  %v1179_v49 = vmul.f32 2.5, %v1173_v21  ;;  %v1181_v27 = vmul.f32 2.5, %v1175_v18 }
  0xae   : > { %v1167_v28 = vmul.f32 %v1161_v12, %v6581_v13  ;;  %v1169_v44 = vmul.f32 %v1163_v58, %v6674_v46  ;;  %v1494_v23 = vmul.f32 %v1488_v51, %v6704_v59  ;;  %v1498_v47 = vmul.f32 1.25, %v1173_v21 }
  0xaf   : > { %v1722_v5 = vadd.f32 %v1716_v17, %v1704_v26  ;;  %v1724_v48 = vadd.f32 %v1718_v53, %v1706_v37  ;;  %v1185_v0 = vmul.f32 %v1179_v49, %v6784_v62  ;;  %v1187_v9 = vmul.f32 %v1181_v27, %v6798_v42  ;;  %v6822_v37 = vld [vmem:[%s6213_s0] sm:$0xff] }
  0xb0   : > { %v1500_v40 = vmul.f32 1.25, %v1175_v18  ;;  %v1727_v55 = vmul.f32 0.8333333, %v6479_v4  ;;  %v1729_v19 = vmul.f32 0.8333333, %v6482_v8  ;;  %v1485_v27 = vmul.f32 1.25, %v6632_v45 }
  0xb1   : > { %v5819_v29 = vpack.c.bf16 %v1724_v48, %v1722_v5  ;;  %v6815_v13 = vadd.f32 %v1185_v0, %v1167_v28  ;;  %v1739_v46 = vmul.f32 0.8333333, %v1173_v21  ;;  %v1741_v12 = vmul.f32 0.8333333, %v1175_v18 }
  0xb2   : > { %v6817_v58 = vadd.f32 %v1187_v9, %v1169_v44  ;;  %v1733_v59 = vmul.f32 %v1727_v55, %v6634_v33  ;;  %v1735_v26 = vmul.f32 %v1729_v19, %v6731_v22  ;;  %vm787_vm12 = vcmp.ge.f32.partialorder %v6822_v37, 0.6 }
  0xb3   : > { %5820 = vmatpush1.bf16.msra.mxu0 %v5819_v29  ;;  %v1504_v4 = vmul.f32 %v1498_v47, %v6815_v13  ;;  %vm789_vm13 = vcmp.ge.f32.partialorder %v6711_v38, 0.6  ;;  %v6828_v8 = vsel %vm787_vm12, 1.0, %v8788_v32  ;;  %v6831_v21 = vadd.f32 0.2, %v6822_v37 }
  0xb4   : > { %v1506_v18 = vmul.f32 %v1500_v40, %v6817_v58  ;;  %v6835_v33 = vsel %vm789_vm13, 1.0, %v8788_v32  ;;  %v6839_v22 = vsub.f32 %v6619_v2, %v6828_v8  ;;  %v6842_v51 = vadd.f32 0.2, %v6711_v38 }
  0xb5   : > { %v6844_v17 = vadd.f32 %v1504_v4, %v1492_v31  ;;  %v6848_v53 = vsub.f32 %v6723_v30, %v6835_v33  ;;  %v1160_v49 = vmul.f32 2.5, %v6831_v21  ;;  %v1172_v40 = vsub.f32 0.6, %v6822_v37 }
  0xb6   : > { %8802 = vst [vmem:[#allocation9_spill] sm:$0xff] %v6842_v51  ;;  %v6852_v28 = vadd.f32 %v1506_v18, %v1494_v23  ;;  %v1162_v44 = vmul.f32 2.5, %v6842_v51  ;;  %v1174_v2 = vsub.f32 0.6, %v6711_v38  ;;  %v1487_v30 = vmul.f32 1.25, %v6729_v54 }
  0xb7   : > { %v1745_v5 = vmul.f32 %v1739_v46, %v6844_v17  ;;  %v1166_v31 = vmul.f32 %v1160_v49, %v6627_v36  ;;  %v1178_v48 = vmul.f32 2.5, %v1172_v40  ;;  %v1491_v23 = vmul.f32 %v1485_v27, %v6652_v1 }
  0xb8   : > { %v1747_v0 = vmul.f32 %v1741_v12, %v6852_v28  ;;  %v1168_v47 = vmul.f32 %v1162_v44, %v6735_v57  ;;  %v1180_v9 = vmul.f32 2.5, %v1174_v2  ;;  %v1493_v29 = vmul.f32 %v1487_v30, %v6763_v7  ;;  %v8806_v30 = vld [vmem:[#allocation5_spill] sm:$0xff] }
  0xb9   : > { %v1751_v55 = vadd.f32 %v1745_v5, %v1733_v59  ;;  %v1184_v19 = vmul.f32 %v1178_v48, %v6839_v22  ;;  %v1497_v4 = vmul.f32 1.25, %v1172_v40  ;;  %v1499_v36 = vmul.f32 1.25, %v1174_v2 }
  0xba   : > { %v1753_v18 = vadd.f32 %v1747_v0, %v1735_v26  ;;  %v1186_v46 = vmul.f32 %v1180_v9, %v6848_v53  ;;  %v1726_v49 = vmul.f32 0.8333333, %v6501_v56  ;;  %v1728_v12 = vmul.f32 0.8333333, %v6528_v39 }
  0xbb   : > { %v6867_v54 = vadd.f32 %v1184_v19, %v1166_v31  ;;  %v1738_v57 = vmul.f32 0.8333333, %v1172_v40  ;;  %v1740_v44 = vmul.f32 0.8333333, %v1174_v2  ;;  %vm792_vm14 = vcmp.ge.f32.partialorder %v6662_v10, 0.6 }
  0xbc   : > { %v5821_v51 = vpack.c.bf16 %v1753_v18, %v1751_v55  ;;  %v6870_v1 = vadd.f32 %v1186_v46, %v1168_v47  ;;  %v1732_v59 = vmul.f32 %v1726_v49, %v6689_v24  ;;  %v1734_v26 = vmul.f32 %v1728_v12, %v6792_v61 }
  0xbd   : > { %v1503_v7 = vmul.f32 %v1497_v4, %v6867_v54  ;;  %v6877_v27 = vsel %vm792_vm14, 1.0, %v8788_v32  ;;  %vm806_vm15 = vcmp.ge.f32.partialorder %v6770_v34, 1.0  ;;  %v6889_v40 = vadd.f32 0.2, %v6662_v10 }
  0xbe   : > { %5822 = vmatprep.subr.bf16.mxu0 %v5821_v51  ;;  %v1505_v56 = vmul.f32 %v1499_v36, %v6870_v1  ;;  %v6882_v39 = vsel %vm806_vm15, 1.0, %v8788_v32  ;;  %v6886_v24 = vsub.f32 %v6670_v52, %v6877_v27  ;;  %v1177_v51 = vsub.f32 0.6, %v6662_v10 }
  0xbf   : > { %8803 = vst [vmem:[#allocation10_spill] sm:$0xff] %v6882_v39  ;;  %8804 = vst [vmem:[#allocation11_spill] sm:$0xff] %v6889_v40  ;;  %v6891_v2 = vadd.f32 %v1503_v7, %v1491_v23  ;;  %v6895_v61 = vsub.f32 %v6777_v20, %v6882_v39  ;;  %v6899_v5 = vadd.f32 -0.2, %v6770_v34  ;;  %v1165_v48 = vmul.f32 2.5, %v6889_v40 }
  0xc0   : > { %v6901_v31 = vadd.f32 %v1505_v56, %v1493_v29  ;;  %v1215_v52 = vsub.f32 1.0, %v6770_v34  ;;  %v1490_v0 = vmul.f32 1.25, %v8806_v30  ;;  %v1183_v9 = vmul.f32 2.5, %v1177_v51  ;;  %v8807_v56 = vld [vmem:[#allocation8_spill] sm:$0xff] }
  0xc1   : > { %8805 = vst [vmem:[#allocation12_spill] sm:$0xff] %v6899_v5  ;;  %v1744_v47 = vmul.f32 %v1738_v57, %v6891_v2  ;;  %v1203_v23 = vmul.f32 2.5, %v6899_v5  ;;  %v1502_v20 = vmul.f32 1.25, %v1177_v51  ;;  %v1171_v19 = vmul.f32 %v1165_v48, %v6683_v15 }
  0xc2   : > { %v1746_v55 = vmul.f32 %v1740_v44, %v6901_v31  ;;  %v1221_v4 = vmul.f32 2.5, %v1215_v52  ;;  %v1496_v29 = vmul.f32 %v1490_v0, %v6708_v16  ;;  %v1189_v46 = vmul.f32 %v1183_v9, %v6886_v24 }
  0xc3   : > { %v1750_v18 = vadd.f32 %v1744_v47, %v1732_v59  ;;  %v1209_v36 = vmul.f32 %v1203_v23, %v6784_v62  ;;  %v1516_v49 = vmul.f32 1.25, %v6787_v63  ;;  %v1528_v7 = vmul.f32 1.25, %v1215_v52 }
  0xc4   : > { %v1752_v12 = vadd.f32 %v1746_v55, %v1734_v26  ;;  %v1227_v57 = vmul.f32 %v1221_v4, %v6895_v61  ;;  %v1731_v5 = vmul.f32 0.8333333, %v8807_v56  ;;  %v6916_v39 = vadd.f32 %v1189_v46, %v1171_v19 }
  0xc5   : > { %v1522_v15 = vmul.f32 %v1516_v49, %v6815_v13  ;;  %v1743_v44 = vmul.f32 0.8333333, %v1177_v51  ;;  %v1757_v16 = vmul.f32 0.8333333, %v6584_v35  ;;  %v1769_v0 = vmul.f32 0.8333333, %v1215_v52 }
  0xc6   : > { %v5823_v59 = vpack.c.bf16 %v1752_v12, %v1750_v18  ;;  %v6920_v48 = vadd.f32 %v1227_v57, %v1209_v36  ;;  %v1737_v62 = vmul.f32 %v1731_v5, %v6744_v14  ;;  %v1508_v26 = vmul.f32 %v1502_v20, %v6916_v39 }
  0xc7   : > { %v1763_v47 = vmul.f32 %v1757_v16, %v6844_v17  ;;  %vm791_vm0 = vcmp.ge.f32.partialorder %v6718_v6, 0.6  ;;  %vm805_vm1 = vcmp.ge.f32.partialorder %v6822_v37, 1.0  ;;  %v6935_v14 = vadd.f32 0.2, %v6718_v6 }
  0xc8   : > { %5824 = vmatpush1.bf16.msra.mxu0 %v5823_v59  ;;  %v1534_v13 = vmul.f32 %v1528_v7, %v6920_v48  ;;  %v6929_v51 = vsel %vm791_vm0, 1.0, %v8788_v32  ;;  %v6932_v35 = vsel %vm805_vm1, 1.0, %v8788_v32  ;;  %v6937_v5 = vadd.f32 %v1508_v26, %v1496_v29 }
  0xc9   : > { %8808 = vst [vmem:[#allocation5_spill] sm:$0xff] %v6935_v14  ;;  %v6941_v17 = vsub.f32 %v6726_v50, %v6929_v51  ;;  %v6945_v52 = vsub.f32 %v6828_v8, %v6932_v35  ;;  %v1176_v9 = vsub.f32 0.6, %v6718_v6  ;;  %v1164_v20 = vmul.f32 2.5, %v6935_v14  ;;  %v8810_v50 = vld [vmem:[#allocation6_spill] sm:$0xff] }
  0xca   : > { %v6948_v23 = vadd.f32 %v1534_v13, %v1522_v15  ;;  %v6952_v55 = vadd.f32 -0.2, %v6822_v37  ;;  %v1214_v19 = vsub.f32 1.0, %v6822_v37  ;;  %v1749_v4 = vmul.f32 %v1743_v44, %v6937_v5 }
  0xcb   : > { %v1182_v29 = vmul.f32 2.5, %v1176_v9  ;;  %v1489_v18 = vmul.f32 1.25, %v8810_v50  ;;  %v1501_v46 = vmul.f32 1.25, %v1176_v9  ;;  %v1170_v36 = vmul.f32 %v1164_v20, %v6739_v25 }
  0xcc   : > { %8809 = vst [vmem:[#allocation8_spill] sm:$0xff] %v6952_v55  ;;  %v1775_v8 = vmul.f32 %v1769_v0, %v6948_v23  ;;  %v1202_v49 = vmul.f32 2.5, %v6952_v55  ;;  %v1220_v12 = vmul.f32 2.5, %v1214_v19  ;;  %v1755_v57 = vadd.f32 %v1749_v4, %v1737_v62  ;;  %v8811_v0 = vld [vmem:[#allocation4_spill] sm:$0xff] }
  0xcd   : > { %v1188_v7 = vmul.f32 %v1182_v29, %v6941_v17  ;;  %v1495_v56 = vmul.f32 %v1489_v18, %v6765_v60  ;;  %v1515_v15 = vmul.f32 1.25, %v6831_v21  ;;  %v1527_v26 = vmul.f32 1.25, %v1214_v19 }
  0xce   : > { %v1781_v16 = vadd.f32 %v1775_v8, %v1763_v47  ;;  %v1208_v44 = vmul.f32 %v1202_v49, %v6839_v22  ;;  %v1226_v59 = vmul.f32 %v1220_v12, %v6945_v52  ;;  %v1730_v20 = vmul.f32 0.8333333, %v8811_v0 }
  0xcf   : > { %v6965_v13 = vadd.f32 %v1188_v7, %v1170_v36  ;;  %v1521_v25 = vmul.f32 %v1515_v15, %v6867_v54  ;;  %v1742_v55 = vmul.f32 0.8333333, %v1176_v9  ;;  %v1756_v60 = vmul.f32 0.8333333, %v6632_v45 }
  0xd0   : > { %v5825_v62 = vpack.c.bf16 %v1781_v16, %v1755_v57  ;;  %v6969_v4 = vadd.f32 %v1226_v59, %v1208_v44  ;;  %v1768_v29 = vmul.f32 0.8333333, %v1214_v19  ;;  %v1736_v22 = vmul.f32 %v1730_v20, %v6794_v41 }
  0xd1   : > { %v1507_v47 = vmul.f32 %v1501_v46, %v6965_v13  ;;  %vm810_vm3 = vcmp.ge.f32.partialorder %v6662_v10, 1.0  ;;  %v1762_v18 = vmul.f32 %v1756_v60, %v6891_v2  ;;  %v6979_v9 = vsel %vm808_vm2, 1.0, %v8788_v32 }
  0xd2   : > { %5826 = vmatprep.subr.bf16.mxu0 %v5825_v62  ;;  %v1533_v54 = vmul.f32 %v1527_v26, %v6969_v4  ;;  %v6982_v8 = vsel %vm810_vm3, 1.0, %v8788_v32  ;;  %v6988_v41 = vsub.f32 %v6780_v43, %v6979_v9  ;;  %v6995_v46 = vadd.f32 -0.2, %v6656_v11 }
  0xd3   : > { %v6984_v45 = vadd.f32 %v1507_v47, %v1495_v56  ;;  %v6992_v19 = vsub.f32 %v6877_v27, %v6982_v8  ;;  %v7000_v36 = vadd.f32 -0.2, %v6662_v10  ;;  %v1217_v49 = vsub.f32 1.0, %v6656_v11 }
  0xd4   : > { %8812 = vst [vmem:[#allocation6_spill] sm:$0xff] %v6995_v46  ;;  %v6997_v2 = vadd.f32 %v1533_v54, %v1521_v25  ;;  %v1219_v12 = vsub.f32 1.0, %v6662_v10  ;;  %v1205_v43 = vmul.f32 2.5, %v6995_v46  ;;  %v1518_v7 = vmul.f32 1.25, %v6790_v3  ;;  %v8814_v54 = vld [vmem:[#allocation3_spill] sm:$0xff] }
  0xd5   : > { %8813 = vst [vmem:[#allocation4_spill] sm:$0xff] %v7000_v36  ;;  %v1748_v57 = vmul.f32 %v1742_v55, %v6984_v45  ;;  %v1520_v27 = vmul.f32 1.25, %v6889_v40  ;;  %v1207_v15 = vmul.f32 2.5, %v7000_v36  ;;  %v1223_v16 = vmul.f32 2.5, %v1217_v49 }
  0xd6   : > { %v1774_v56 = vmul.f32 %v1768_v29, %v6997_v2  ;;  %v1225_v44 = vmul.f32 2.5, %v1219_v12  ;;  %v1211_v26 = vmul.f32 %v1205_v43, %v6798_v42  ;;  %v1524_v25 = vmul.f32 %v1518_v7, %v6817_v58 }
  0xd7   : > { %v1754_v59 = vadd.f32 %v1748_v57, %v1736_v22  ;;  %v1526_v0 = vmul.f32 %v1520_v27, %v6916_v39  ;;  %v1213_v20 = vmul.f32 %v1207_v15, %v6886_v24  ;;  %v1229_v62 = vmul.f32 %v1223_v16, %v6988_v41 }
  0xd8   : > { %v1780_v55 = vadd.f32 %v1774_v56, %v1762_v18  ;;  %v1231_v60 = vmul.f32 %v1225_v44, %v6992_v19  ;;  %v1530_v47 = vmul.f32 1.25, %v1217_v49  ;;  %v1532_v29 = vmul.f32 1.25, %v1219_v12  ;;  %v8817_v44 = vld [vmem:[#allocation9_spill] sm:$0xff] }
  0xd9   : > { %v1759_v40 = vmul.f32 0.8333333, %v8814_v54  ;;  %v1761_v36 = vmul.f32 0.8333333, %v8806_v30  ;;  %v7018_v57 = vadd.f32 %v1229_v62, %v1211_v26  ;;  %v1771_v58 = vmul.f32 0.8333333, %v1217_v49 }
  0xda   : > { %v5827_v22 = vpack.c.bf16 %v1780_v55, %v1754_v59  ;;  %v7020_v42 = vadd.f32 %v1231_v60, %v1213_v20  ;;  %v1773_v18 = vmul.f32 0.8333333, %v1219_v12  ;;  %vm807_vm4 = vcmp.ge.f32.partialorder %v6711_v38, 1.0 }
  0xdb   : > { %v1765_v39 = vmul.f32 %v1759_v40, %v6852_v28  ;;  %v1767_v24 = vmul.f32 %v1761_v36, %v6937_v5  ;;  %v1536_v43 = vmul.f32 %v1530_v47, %v7018_v57  ;;  %vm809_vm5 = vcmp.ge.f32.partialorder %v6718_v6, 1.0 }
  0xdc   : > { %5828 = vmatpush1.bf16.msra.mxu0 %v5827_v22  ;;  %v1538_v7 = vmul.f32 %v1532_v29, %v7020_v42  ;;  %v7029_v30 = vsel %vm807_vm4, 1.0, %v8788_v32  ;;  %v7032_v27 = vsel %vm809_vm5, 1.0, %v8788_v32  ;;  %v7039_v40 = vadd.f32 -0.2, %v6711_v38 }
  0xdd   : > { %8815 = vst [vmem:[#allocation3_spill] sm:$0xff] %v7032_v27  ;;  %v7036_v28 = vsub.f32 %v6835_v33, %v7029_v30  ;;  %v7042_v5 = vadd.f32 -0.2, %v6718_v6  ;;  %v7044_v36 = vadd.f32 %v1536_v43, %v1524_v25  ;;  %v7050_v12 = vsub.f32 %v6929_v51, %v7032_v27 }
  0xde   : > { %v7046_v49 = vadd.f32 %v1538_v7, %v1526_v0  ;;  %v1216_v56 = vsub.f32 1.0, %v6711_v38  ;;  %v1204_v15 = vmul.f32 2.5, %v7039_v40  ;;  %v1218_v16 = vsub.f32 1.0, %v6718_v6  ;;  %v8818_v7 = vld [vmem:[#allocation2_spill] sm:$0xff] }
  0xdf   : > { %8816 = vst [vmem:[#allocation13_spill] sm:$0xff] %v7042_v5  ;;  %v1206_v33 = vmul.f32 2.5, %v7042_v5  ;;  %v1517_v59 = vmul.f32 1.25, %v8817_v44  ;;  %v1777_v26 = vmul.f32 %v1771_v58, %v7044_v36  ;;  %v1519_v55 = vmul.f32 1.25, %v6935_v14 }
  0xe0   : > { %v1779_v25 = vmul.f32 %v1773_v18, %v7046_v49  ;;  %v1222_v0 = vmul.f32 2.5, %v1216_v56  ;;  %v1210_v51 = vmul.f32 %v1204_v15, %v6848_v53  ;;  %v1224_v62 = vmul.f32 2.5, %v1218_v16 }
  0xe1   : > { %v1212_v20 = vmul.f32 %v1206_v33, %v6941_v17  ;;  %v1523_v60 = vmul.f32 %v1517_v59, %v6870_v1  ;;  %v1783_v47 = vadd.f32 %v1777_v26, %v1765_v39  ;;  %v1525_v22 = vmul.f32 %v1519_v55, %v6965_v13 }
  0xe2   : > { %v1785_v29 = vadd.f32 %v1779_v25, %v1767_v24  ;;  %v1228_v54 = vmul.f32 %v1222_v0, %v7036_v28  ;;  %v1230_v58 = vmul.f32 %v1224_v62, %v7050_v12  ;;  %v1529_v43 = vmul.f32 1.25, %v1216_v56 }
  0xe3   : > { %v1531_v18 = vmul.f32 1.25, %v1218_v16  ;;  %v1758_v5 = vmul.f32 0.8333333, %v8818_v7  ;;  %v1760_v53 = vmul.f32 0.8333333, %v8810_v50 }
  0xe4   : > { %v5829_v14 = vpack.c.bf16 %v1785_v29, %v1783_v47  ;;  %v7067_v27 = vadd.f32 %v1228_v54, %v1210_v51  ;;  %v1770_v17 = vmul.f32 0.8333333, %v1216_v56  ;;  %v7070_v15 = vadd.f32 %v1230_v58, %v1212_v20  ;;  %v8820_v51 = vld [vmem:[#allocation12_spill] sm:$0xff] }
  0xe5   : > { %v1764_v1 = vmul.f32 %v1758_v5, %v6901_v31  ;;  %v1772_v39 = vmul.f32 0.8333333, %v1218_v16  ;;  %vm824_vm6 = vcmp.ge.f32.partialorder %v6770_v34, 1.4  ;;  %v1766_v24 = vmul.f32 %v1760_v53, %v6984_v45  ;;  %v8819_v31 = vld [vmem:[#allocation10_spill] sm:$0xff] }
  0xe6   : > { %5830 = vmatprep.subr.bf16.mxu0 %v5829_v14  ;;  %v1535_v13 = vmul.f32 %v1529_v43, %v7067_v27  ;;  %vm826_vm7 = vcmp.ge.f32.partialorder %v6656_v11, 1.4  ;;  %v7078_v33 = vsel %vm824_vm6, 1.0, %v8788_v32  ;;  %v1537_v50 = vmul.f32 %v1531_v18, %v7070_v15 }
  0xe7   : > { %v7082_v56 = vsel %vm826_vm7, 1.0, %v8788_v32  ;;  %v7086_v5 = vsub.f32 %v8819_v31, %v7078_v33  ;;  %v7089_v14 = vadd.f32 -0.6, %v6770_v34  ;;  %v7098_v59 = vadd.f32 -0.6, %v6656_v11 }
  0xe8   : > { %v7091_v16 = vadd.f32 %v1535_v13, %v1523_v60  ;;  %v7095_v45 = vsub.f32 %v6979_v9, %v7082_v56  ;;  %v1257_v26 = vsub.f32 1.4, %v6770_v34  ;;  %v7101_v25 = vadd.f32 %v1537_v50, %v1525_v22 }
  0xe9   : > { %v1245_v0 = vmul.f32 2.5, %v7089_v14  ;;  %v1259_v55 = vsub.f32 1.4, %v6656_v11  ;;  %v1546_v20 = vmul.f32 1.25, %v8820_v51  ;;  %v1247_v60 = vmul.f32 2.5, %v7098_v59 }
  0xea   : > { %v1776_v62 = vmul.f32 %v1770_v17, %v7091_v16  ;;  %v1263_v47 = vmul.f32 2.5, %v1257_v26  ;;  %v1548_v9 = vmul.f32 1.25, %v6995_v46  ;;  %v1778_v29 = vmul.f32 %v1772_v39, %v7101_v25 }
  0xeb   : > { %v1251_v54 = vmul.f32 %v1245_v0, %v6895_v61  ;;  %v1265_v58 = vmul.f32 2.5, %v1259_v55  ;;  %v1552_v22 = vmul.f32 %v1546_v20, %v6920_v48  ;;  %v1253_v18 = vmul.f32 %v1247_v60, %v6988_v41 }
  0xec   : > { %v1782_v43 = vadd.f32 %v1776_v62, %v1764_v1  ;;  %v1269_v7 = vmul.f32 %v1263_v47, %v7086_v5  ;;  %v1554_v53 = vmul.f32 %v1548_v9, %v7018_v57  ;;  %v1784_v17 = vadd.f32 %v1778_v29, %v1766_v24 }
  0xed   : > { %v1271_v13 = vmul.f32 %v1265_v58, %v7095_v45  ;;  %v1558_v50 = vmul.f32 1.25, %v1257_v26  ;;  %v1560_v31 = vmul.f32 1.25, %v1259_v55  ;;  %v1787_v39 = vmul.f32 0.8333333, %v6787_v63 }
  0xee   : > { %v7116_v46 = vadd.f32 %v1269_v7, %v1251_v54  ;;  %v1789_v61 = vmul.f32 0.8333333, %v6790_v3  ;;  %v1799_v0 = vmul.f32 0.8333333, %v1257_v26  ;;  %v5831_v48 = vpack.c.bf16 %v1784_v17, %v1782_v43 }
  0xef   : > { %v7120_v1 = vadd.f32 %v1271_v13, %v1253_v18  ;;  %v1801_v41 = vmul.f32 0.8333333, %v1259_v55  ;;  %vm823_vm8 = vcmp.ge.f32.partialorder %v6822_v37, 1.4  ;;  %v1793_v24 = vmul.f32 %v1787_v39, %v6948_v23 }
  0xf0   : > { %v1564_v57 = vmul.f32 %v1558_v50, %v7116_v46  ;;  %v1795_v20 = vmul.f32 %v1789_v61, %v7044_v36  ;;  %vm825_vm9 = vcmp.ge.f32.partialorder %v6711_v38, 1.4  ;;  %5832 = vmatpush1.bf16.msra.mxu0 %v5831_v48  ;;  %v7129_v3 = vsel %vm823_vm8, 1.0, %v8788_v32 }
  0xf1   : > { %v1566_v63 = vmul.f32 %v1560_v31, %v7120_v1  ;;  %v7132_v26 = vsel %vm825_vm9, 1.0, %v8788_v32  ;;  %v7135_v55 = vadd.f32 -0.6, %v6822_v37  ;;  %v7141_v23 = vsub.f32 %v6932_v35, %v7129_v3 }
  0xf2   : > { %v7137_v62 = vadd.f32 %v1564_v57, %v1552_v22  ;;  %v7145_v36 = vsub.f32 %v7029_v30, %v7132_v26  ;;  %v7148_v60 = vadd.f32 -0.6, %v6711_v38  ;;  %v1256_v29 = vsub.f32 1.4, %v6822_v37  ;;  %v8821_v22 = vld [vmem:[#allocation8_spill] sm:$0xff] }
  0xf3   : > { %v7150_v47 = vadd.f32 %v1566_v63, %v1554_v53  ;;  %v1244_v9 = vmul.f32 2.5, %v7135_v55  ;;  %v1258_v54 = vsub.f32 1.4, %v6711_v38  ;;  %v1545_v43 = vmul.f32 1.25, %v8821_v22 }
  0xf4   : > { %v1805_v58 = vmul.f32 %v1799_v0, %v7137_v62  ;;  %v1246_v35 = vmul.f32 2.5, %v7148_v60  ;;  %v1547_v30 = vmul.f32 1.25, %v7039_v40  ;;  %v1262_v53 = vmul.f32 2.5, %v1256_v29 }
  0xf5   : > { %v1807_v18 = vmul.f32 %v1801_v41, %v7150_v47  ;;  %v1250_v7 = vmul.f32 %v1244_v9, %v6945_v52  ;;  %v1264_v17 = vmul.f32 2.5, %v1258_v54  ;;  %v1551_v31 = vmul.f32 %v1545_v43, %v6969_v4 }
  0xf6   : > { %v1811_v13 = vadd.f32 %v1805_v58, %v1793_v24  ;;  %v1252_v50 = vmul.f32 %v1246_v35, %v7036_v28  ;;  %v1553_v39 = vmul.f32 %v1547_v30, %v7067_v27  ;;  %v1268_v0 = vmul.f32 %v1262_v53, %v7141_v23 }
  0xf7   : > { %v1813_v61 = vadd.f32 %v1807_v18, %v1795_v20  ;;  %v1270_v48 = vmul.f32 %v1264_v17, %v7145_v36  ;;  %v1557_v57 = vmul.f32 1.25, %v1256_v29  ;;  %v1559_v63 = vmul.f32 1.25, %v1258_v54 }
  0xf8   : > { %v1786_v41 = vmul.f32 0.8333333, %v6831_v21  ;;  %v1788_v52 = vmul.f32 0.8333333, %v8817_v44  ;;  %v7169_v9 = vadd.f32 -1.0, %v6770_v34  ;;  %v7171_v28 = vadd.f32 %v1268_v0, %v1250_v7 }
  0xf9   : > { %v5833_v24 = vpack.c.bf16 %v1813_v61, %v1811_v13  ;;  %v7173_v4 = vadd.f32 %v1270_v48, %v1252_v50  ;;  %v1798_v27 = vmul.f32 0.8333333, %v1256_v29  ;;  %v1800_v35 = vmul.f32 0.8333333, %v1258_v54  ;;  %v8825_v50 = vld [vmem:[#allocation4_spill] sm:$0xff] }
  0xfa   : > { %v1792_v20 = vmul.f32 %v1786_v41, %v6997_v2  ;;  %v1794_v58 = vmul.f32 %v1788_v52, %v7091_v16  ;;  %vm828_vm10 = vcmp.ge.f32.partialorder %v6662_v10, 1.4  ;;  %v1563_v21 = vmul.f32 %v1557_v57, %v7171_v28 }
  0xfb   : > { %5834 = vmatprep.subr.bf16.mxu0 %v5833_v24  ;;  %v1565_v44 = vmul.f32 %v1559_v63, %v7173_v4  ;;  %v7181_v43 = vsel %vm828_vm10, 1.0, %v8788_v32  ;;  %vm842_vm11 = vcmp.ge.f32.partialorder %v6770_v34, 1.8  ;;  %v7192_v16 = vadd.f32 -0.6, %v6662_v10 }
  0xfc   : > { %v7185_v30 = vsel %vm842_vm11, 1.0, %v8788_v32  ;;  %v7189_v2 = vsub.f32 %v6982_v8, %v7181_v43  ;;  %v1261_v29 = vsub.f32 1.4, %v6662_v10  ;;  %v7195_v54 = vadd.f32 %v1563_v21, %v1551_v31 }
  0xfd   : > { %8822 = vst [vmem:[#allocation9_spill] sm:$0xff] %v7185_v30  ;;  %8823 = vst [vmem:[#allocation2_spill] sm:$0xff] %v7192_v16  ;;  %v7197_v18 = vadd.f32 %v1565_v44, %v1553_v39  ;;  %v7201_v7 = vsub.f32 %v7078_v33, %v7185_v30  ;;  %v1287_v53 = vmul.f32 2.5, %v7169_v9  ;;  %v1249_v17 = vmul.f32 2.5, %v7192_v16 }
  0xfe   : > { %v1267_v13 = vmul.f32 2.5, %v1261_v29  ;;  %v1299_v8 = vsub.f32 1.8, %v6770_v34  ;;  %v1550_v61 = vmul.f32 1.25, %v8825_v50  ;;  %v1804_v0 = vmul.f32 %v1798_v27, %v7195_v54 }
  0xff   : > { %8824 = vst [vmem:[#allocation10_spill] sm:$0xff] %v7197_v18  ;;  %v1806_v31 = vmul.f32 %v1800_v35, %v7197_v18  ;;  %v1293_v39 = vmul.f32 %v1287_v53, %v7086_v5  ;;  %v1562_v48 = vmul.f32 1.25, %v1261_v29  ;;  %v1255_v57 = vmul.f32 %v1249_v17, %v6992_v19  ;;  %v8826_v35 = vld [vmem:[#allocation11_spill] sm:$0xff] }
 0x100   : > { %v1273_v33 = vmul.f32 %v1267_v13, %v7189_v2  ;;  %v1305_v63 = vmul.f32 2.5, %v1299_v8  ;;  %v1556_v41 = vmul.f32 %v1550_v61, %v7020_v42  ;;  %v1810_v52 = vadd.f32 %v1804_v0, %v1792_v20 }
 0x101   : > { %v1812_v24 = vadd.f32 %v1806_v31, %v1794_v58  ;;  %v1576_v21 = vmul.f32 1.25, %v7089_v14  ;;  %v1588_v44 = vmul.f32 1.25, %v1299_v8  ;;  %v1791_v34 = vmul.f32 0.8333333, %v8826_v35 }
 0x102   : > { %v7214_v30 = vadd.f32 %v1273_v33, %v1255_v57  ;;  %v1311_v27 = vmul.f32 %v1305_v63, %v7201_v7  ;;  %v1803_v5 = vmul.f32 0.8333333, %v1261_v29  ;;  %v1817_v17 = vmul.f32 0.8333333, %v8820_v51  ;;  %v8830_v63 = vld [vmem:[#allocation13_spill] sm:$0xff] }
 0x103   : > { %v5835_v53 = vpack.c.bf16 %v1812_v24, %v1810_v52  ;;  %v1582_v19 = vmul.f32 %v1576_v21, %v7116_v46  ;;  %v1829_v13 = vmul.f32 0.8333333, %v1299_v8  ;;  %v1797_v20 = vmul.f32 %v1791_v34, %v7046_v49  ;;  %v8828_v34 = vld [vmem:[#allocation3_spill] sm:$0xff] }
 0x104   : > { %v7220_v18 = vadd.f32 %v1311_v27, %v1293_v39  ;;  %v1568_v42 = vmul.f32 %v1562_v48, %v7214_v30  ;;  %vm827_vm12 = vcmp.ge.f32.partialorder %v6718_v6, 1.4  ;;  %v1823_v58 = vmul.f32 %v1817_v17, %v7137_v62 }
 0x105   : > { %5836 = vmatpush1.bf16.msra.mxu0 %v5835_v53  ;;  %v7227_v61 = vsel %vm827_vm12, 1.0, %v8788_v32  ;;  %vm841_vm13 = vcmp.ge.f32.partialorder %v6822_v37, 1.8  ;;  %v7231_v46 = vadd.f32 -0.6, %v6718_v6  ;;  %v7250_v39 = vadd.f32 -1.0, %v6822_v37 }
 0x106   : > { %v7233_v51 = vadd.f32 %v1568_v42, %v1556_v41  ;;  %v1594_v29 = vmul.f32 %v1588_v44, %v7220_v18  ;;  %v7237_v8 = vsel %vm841_vm13, 1.0, %v8788_v32  ;;  %v7241_v49 = vsub.f32 %v8828_v34, %v7227_v61  ;;  %v8831_v34 = vld [vmem:[#allocation5_spill] sm:$0xff] }
 0x107   : > { %8827 = vst [vmem:[#allocation12_spill] sm:$0xff] %v7237_v8  ;;  %v7245_v62 = vsub.f32 %v7129_v3, %v7237_v8  ;;  %v1248_v0 = vmul.f32 2.5, %v7231_v46  ;;  %v1260_v31 = vsub.f32 1.4, %v6718_v6  ;;  %8829 = vst [vmem:[#allocation8_spill] sm:$0xff] %v7250_v39  ;;  %v1549_v41 = vmul.f32 1.25, %v8830_v63 }
 0x108   : > { %v7252_v48 = vadd.f32 %v1594_v29, %v1582_v19  ;;  %v1809_v57 = vmul.f32 %v1803_v5, %v7233_v51  ;;  %v1298_v33 = vsub.f32 1.8, %v6822_v37  ;;  %v1286_v3 = vmul.f32 2.5, %v7250_v39 }
 0x109   : > { %v1254_v52 = vmul.f32 %v1248_v0, %v7050_v12  ;;  %v1266_v24 = vmul.f32 2.5, %v1260_v31  ;;  %v1561_v21 = vmul.f32 1.25, %v1260_v31  ;;  %v1555_v53 = vmul.f32 %v1549_v41, %v7070_v15 }
 0x10a   : > { %v1815_v44 = vadd.f32 %v1809_v57, %v1797_v20  ;;  %v1835_v27 = vmul.f32 %v1829_v13, %v7252_v48  ;;  %v1304_v35 = vmul.f32 2.5, %v1298_v33  ;;  %v1292_v5 = vmul.f32 %v1286_v3, %v7141_v23 }
 0x10b   : > { %v1272_v19 = vmul.f32 %v1266_v24, %v7241_v49  ;;  %v1575_v17 = vmul.f32 1.25, %v7135_v55  ;;  %v1587_v42 = vmul.f32 1.25, %v1298_v33  ;;  %v1790_v0 = vmul.f32 0.8333333, %v8831_v34  ;;  %v7301_v24 = vld [vmem:[%s6213_s0 + $0x28] sm:$0xff] }
 0x10c   : > { %v1841_v29 = vadd.f32 %v1835_v27, %v1823_v58  ;;  %v1310_v12 = vmul.f32 %v1304_v35, %v7245_v62  ;;  %v1802_v39 = vmul.f32 0.8333333, %v1260_v31  ;;  %v1816_v15 = vmul.f32 0.8333333, %v8821_v22 }
 0x10d   : > { %v7266_v8 = vadd.f32 %v1272_v19, %v1254_v52  ;;  %v1581_v13 = vmul.f32 %v1575_v17, %v7171_v28  ;;  %v1828_v20 = vmul.f32 0.8333333, %v1298_v33  ;;  %v1796_v41 = vmul.f32 %v1790_v0, %v7101_v25 }
 0x10e   : > { %v5837_v57 = vpack.c.bf16 %v1841_v29, %v1815_v44  ;;  %v7270_v23 = vadd.f32 %v1310_v12, %v1292_v5  ;;  %vm844_vm14 = vcmp.ge.f32.partialorder %v6656_v11, 1.8  ;;  %v1822_v31 = vmul.f32 %v1816_v15, %v7195_v54  ;;  %v7289_v11 = vld [vmem:[%s6213_s0 + $0x18] sm:$0xff] }
 0x10f   : > { %v1567_v58 = vmul.f32 %v1561_v21, %v7266_v8  ;;  %vm846_vm15 = vcmp.ge.f32.partialorder %v6662_v10, 1.8  ;;  %v7278_v52 = vsel %vm844_vm14, 1.0, %v8788_v32  ;;  %v7292_v33 = vadd.f32 -1.0, %v7289_v11 }
 0x110   : > { %5838 = vmatprep.subr.bf16.mxu0 %v5837_v57  ;;  %v1593_v22 = vmul.f32 %v1587_v42, %v7270_v23  ;;  %v7282_v28 = vsel %vm846_vm15, 1.0, %v8788_v32  ;;  %v7286_v25 = vsub.f32 %v7082_v56, %v7278_v52  ;;  %v7304_v3 = vadd.f32 -1.0, %v7301_v24 }
 0x111   : > { %v7294_v54 = vadd.f32 %v1567_v58, %v1555_v53  ;;  %v7298_v10 = vsub.f32 %v7181_v43, %v7282_v28  ;;  %v1301_v21 = vsub.f32 1.8, %v7289_v11  ;;  %v1289_v44 = vmul.f32 2.5, %v7292_v33 }
 0x112   : > { %v7307_v56 = vadd.f32 %v1593_v22, %v1581_v13  ;;  %v1303_v27 = vsub.f32 1.8, %v7301_v24  ;;  %v1578_v35 = vmul.f32 1.25, %v7098_v59  ;;  %v1291_v43 = vmul.f32 2.5, %v7304_v3 }
 0x113   : > { %v1808_v53 = vmul.f32 %v1802_v39, %v7294_v54  ;;  %v1307_v19 = vmul.f32 2.5, %v1301_v21  ;;  %v1580_v5 = vmul.f32 1.25, %v7192_v16  ;;  %v1295_v42 = vmul.f32 %v1289_v44, %v7095_v45 }
 0x114   : > { %v1834_v17 = vmul.f32 %v1828_v20, %v7307_v56  ;;  %v1309_v29 = vmul.f32 2.5, %v1303_v27  ;;  %v1584_v12 = vmul.f32 %v1578_v35, %v7120_v1  ;;  %v1297_v0 = vmul.f32 %v1291_v43, %v7189_v2  ;;  %v8832_v20 = vld [vmem:[#allocation6_spill] sm:$0xff] }
 0x115   : > { %v1814_v34 = vadd.f32 %v1808_v53, %v1796_v41  ;;  %v1313_v13 = vmul.f32 %v1307_v19, %v7286_v25  ;;  %v1586_v15 = vmul.f32 %v1580_v5, %v7214_v30  ;;  %v1590_v58 = vmul.f32 1.25, %v1301_v21 }
 0x116   : > { %v1840_v39 = vadd.f32 %v1834_v17, %v1822_v31  ;;  %v1315_v57 = vmul.f32 %v1309_v29, %v7298_v10  ;;  %v1592_v22 = vmul.f32 1.25, %v1303_v27  ;;  %v1819_v45 = vmul.f32 0.8333333, %v8832_v20 }
 0x117   : > { %v7322_v16 = vadd.f32 %v1313_v13, %v1295_v42  ;;  %v1821_v44 = vmul.f32 0.8333333, %v8825_v50  ;;  %v1831_v1 = vmul.f32 0.8333333, %v1301_v21  ;;  %v1833_v2 = vmul.f32 0.8333333, %v1303_v27 }
 0x118   : > { %v5839_v41 = vpack.c.bf16 %v1840_v39, %v1814_v34  ;;  %v7326_v35 = vadd.f32 %v1315_v57, %v1297_v0  ;;  %vm843_vm0 = vcmp.ge.f32.partialorder %v6711_v38, 1.8  ;;  %v1825_v31 = vmul.f32 %v1819_v45, %v7150_v47  ;;  %v7341_v27 = vld [vmem:[%s6213_s0 + $0x10] sm:$0xff] }
 0x119   : > { %v1596_v30 = vmul.f32 %v1590_v58, %v7322_v16  ;;  %v1827_v53 = vmul.f32 %v1821_v44, %v7233_v51  ;;  %vm845_vm1 = vcmp.ge.f32.partialorder %v6718_v6, 1.8  ;;  %v7335_v50 = vsel %vm843_vm0, 1.0, %v8788_v32  ;;  %v7357_v51 = vld [vmem:[%s6213_s0 + $0x20] sm:$0xff] }
 0x11a   : > { %5840 = vmatpush1.bf16.msra.mxu0 %v5839_v41  ;;  %v1598_v43 = vmul.f32 %v1592_v22, %v7326_v35  ;;  %v7338_v21 = vsel %vm845_vm1, 1.0, %v8788_v32  ;;  %v7344_v38 = vadd.f32 -1.0, %v7341_v27  ;;  %v7350_v47 = vsub.f32 %v7132_v26, %v7335_v50 }
 0x11b   : > { %v7346_v19 = vadd.f32 %v1596_v30, %v1584_v12  ;;  %v7354_v6 = vsub.f32 %v7227_v61, %v7338_v21  ;;  %v7360_v5 = vadd.f32 -1.0, %v7357_v51  ;;  %v1300_v29 = vsub.f32 1.8, %v7341_v27 }
 0x11c   : > { %v7362_v17 = vadd.f32 %v1598_v43, %v1586_v15  ;;  %v1288_v42 = vmul.f32 2.5, %v7344_v38  ;;  %v1302_v12 = vsub.f32 1.8, %v7357_v51  ;;  %v1577_v61 = vmul.f32 1.25, %v7148_v60 }
 0x11d   : > { %v1837_v26 = vmul.f32 %v1831_v1, %v7346_v19  ;;  %v1290_v34 = vmul.f32 2.5, %v7360_v5  ;;  %v1579_v0 = vmul.f32 1.25, %v7231_v46  ;;  %v1306_v15 = vmul.f32 2.5, %v1300_v29 }
 0x11e   : > { %v1839_v13 = vmul.f32 %v1833_v2, %v7362_v17  ;;  %v1294_v39 = vmul.f32 %v1288_v42, %v7145_v36  ;;  %v1308_v57 = vmul.f32 2.5, %v1302_v12  ;;  %v1583_v20 = vmul.f32 %v1577_v61, %v7173_v4 }
 0x11f   : > { %v1843_v58 = vadd.f32 %v1837_v26, %v1825_v31  ;;  %v1296_v22 = vmul.f32 %v1290_v34, %v7241_v49  ;;  %v1585_v45 = vmul.f32 %v1579_v0, %v7266_v8  ;;  %v1312_v1 = vmul.f32 %v1306_v15, %v7350_v47  ;;  %v8834_v0 = vld [vmem:[#allocation7_spill] sm:$0xff] }
 0x120   : > { %v1845_v44 = vadd.f32 %v1839_v13, %v1827_v53  ;;  %v1314_v41 = vmul.f32 %v1308_v57, %v7354_v6  ;;  %v1589_v30 = vmul.f32 1.25, %v1300_v29  ;;  %v1591_v43 = vmul.f32 1.25, %v1302_v12  ;;  %v8833_v53 = vld [vmem:[#allocation10_spill] sm:$0xff]  ;;  %v7395_v15 = vld [vmem:[%s6213_s0 + $0x8] sm:$0xff] }
 0x121   : > { %v1818_v2 = vmul.f32 0.8333333, %v7039_v40  ;;  %v1820_v36 = vmul.f32 0.8333333, %v8830_v63  ;;  %v1606_v42 = vmul.f32 1.25, %v7169_v9  ;;  %v7381_v49 = vadd.f32 %v1312_v1, %v1294_v39  ;;  %v8835_v39 = vld [vmem:[#allocation9_spill] sm:$0xff] }
 0x122   : > { %v5841_v31 = vpack.c.bf16 %v1845_v44, %v1843_v58  ;;  %v7383_v4 = vadd.f32 %v1314_v41, %v1296_v22  ;;  %v1830_v8 = vmul.f32 0.8333333, %v1300_v29  ;;  %v1832_v61 = vmul.f32 0.8333333, %v1302_v12 }
 0x123   : > { %v1824_v26 = vmul.f32 %v1818_v2, %v8833_v53  ;;  %v1826_v34 = vmul.f32 %v1820_v36, %v7294_v54  ;;  %vm860_vm2 = vcmp.ge.f32.partialorder %v8834_v0, 2.2  ;;  %v1595_v40 = vmul.f32 %v1589_v30, %v7381_v49 }
 0x124   : > { %5842 = vmatprep.subr.bf16.mxu0 %v5841_v31  ;;  %v1597_v63 = vmul.f32 %v1591_v43, %v7383_v4  ;;  %vm862_vm3 = vcmp.ge.f32.partialorder %v7289_v11, 2.2  ;;  %v5505_v9 = vsel %vm860_vm2, 1.0, %v8788_v32  ;;  %v5565_v54 = vadd.f32 -1.4, %v7395_v15 }
 0x125   : > { %v5507_v13 = vsel %vm862_vm3, 1.0, %v8788_v32  ;;  %v938_v29 = vsub.f32 %v8835_v39, %v5505_v9  ;;  %v5567_v12 = vadd.f32 -1.4, %v7289_v11  ;;  %v7399_v57 = vadd.f32 %v1595_v40, %v1583_v20 }
 0x126   : > { %v7401_v58 = vadd.f32 %v1597_v63, %v1585_v45  ;;  %v940_v22 = vsub.f32 %v7278_v52, %v5507_v13  ;;  %v1341_v44 = vsub.f32 2.2, %v7395_v15  ;;  %v1329_v1 = vmul.f32 2.5, %v5565_v54 }
 0x127   : > { %v1331_v41 = vmul.f32 2.5, %v5567_v12  ;;  %v1343_v30 = vsub.f32 2.2, %v7289_v11  ;;  %v1608_v43 = vmul.f32 1.25, %v7292_v33  ;;  %v1836_v2 = vmul.f32 %v1830_v8, %v7399_v57 }
 0x128   : > { %v1838_v36 = vmul.f32 %v1832_v61, %v7401_v58  ;;  %v1347_v31 = vmul.f32 2.5, %v1341_v44  ;;  %v1612_v20 = vmul.f32 %v1606_v42, %v7220_v18  ;;  %v1335_v45 = vmul.f32 %v1329_v1, %v7201_v7 }
 0x129   : > { %v1337_v53 = vmul.f32 %v1331_v41, %v7286_v25  ;;  %v1349_v52 = vmul.f32 2.5, %v1343_v30  ;;  %v1614_v0 = vmul.f32 %v1608_v43, %v7322_v16  ;;  %v1842_v40 = vadd.f32 %v1836_v2, %v1824_v26 }
 0x12a   : > { %v1844_v63 = vadd.f32 %v1838_v36, %v1826_v34  ;;  %v1353_v9 = vmul.f32 %v1347_v31, %v938_v29  ;;  %v1618_v13 = vmul.f32 1.25, %v1341_v44  ;;  %v1620_v33 = vmul.f32 1.25, %v1343_v30 }
 0x12b   : > { %v1355_v39 = vmul.f32 %v1349_v52, %v940_v22  ;;  %v1847_v8 = vmul.f32 0.8333333, %v7089_v14  ;;  %v1849_v61 = vmul.f32 0.8333333, %v7098_v59  ;;  %v1859_v18 = vmul.f32 0.8333333, %v1341_v44 }
 0x12c   : > { %v5843_v54 = vpack.c.bf16 %v1844_v63, %v1842_v40  ;;  %v1359_v12 = vadd.f32 %v1353_v9, %v1335_v45  ;;  %v1861_v42 = vmul.f32 0.8333333, %v1343_v30  ;;  %vm859_vm4 = vcmp.ge.f32.partialorder %v6822_v37, 2.2  ;;  %v8836_v22 = vld [vmem:[#allocation12_spill] sm:$0xff]  ;;  %v7426_v30 = vld [vmem:[%s6213_s0] sm:$0xff] }
 0x12d   : > { %v1361_v7 = vadd.f32 %v1355_v39, %v1337_v53  ;;  %v1853_v25 = vmul.f32 %v1847_v8, %v7252_v48  ;;  %v1855_v16 = vmul.f32 %v1849_v61, %v7346_v19  ;;  %vm861_vm5 = vcmp.ge.f32.partialorder %v7341_v27, 2.2 }
 0x12e   : > { %5844 = vmatpush1.bf16.msra.mxu0 %v5843_v54  ;;  %v1624_v26 = vmul.f32 %v1618_v13, %v1359_v12  ;;  %v5504_v14 = vsel %vm859_vm4, 1.0, %v8788_v32  ;;  %v5564_v59 = vadd.f32 -1.4, %v6822_v37  ;;  %v5506_v29 = vsel %vm861_vm5, 1.0, %v8788_v32  ;;  %v8837_v37 = vld [vmem:[#allocation8_spill] sm:$0xff] }
 0x12f   : > { %v1626_v34 = vmul.f32 %v1620_v33, %v1361_v7  ;;  %v937_v44 = vsub.f32 %v8836_v22, %v5504_v14  ;;  %v5566_v1 = vadd.f32 -1.4, %v7341_v27  ;;  %v939_v19 = vsub.f32 %v7335_v50, %v5506_v29 }
 0x130   : > { %v1630_v48 = vadd.f32 %v1624_v26, %v1612_v20  ;;  %v1328_v41 = vmul.f32 2.5, %v5564_v59  ;;  %v1340_v43 = vsub.f32 2.2, %v7426_v30  ;;  %v1342_v31 = vsub.f32 2.2, %v7341_v27 }
 0x131   : > { %v1632_v2 = vadd.f32 %v1626_v34, %v1614_v0  ;;  %v1330_v36 = vmul.f32 2.5, %v5566_v1  ;;  %v1605_v45 = vmul.f32 1.25, %v8837_v37  ;;  %v1607_v63 = vmul.f32 1.25, %v7344_v38 }
 0x132   : > { %v1865_v53 = vmul.f32 %v1859_v18, %v1630_v48  ;;  %v1334_v52 = vmul.f32 %v1328_v41, %v7245_v62  ;;  %v1346_v40 = vmul.f32 2.5, %v1340_v43  ;;  %v1348_v9 = vmul.f32 2.5, %v1342_v31 }
 0x133   : > { %v1867_v20 = vmul.f32 %v1861_v42, %v1632_v2  ;;  %v1336_v50 = vmul.f32 %v1330_v36, %v7350_v47  ;;  %v1617_v33 = vmul.f32 1.25, %v1340_v43  ;;  %v1619_v61 = vmul.f32 1.25, %v1342_v31 }
 0x134   : > { %v1871_v13 = vadd.f32 %v1865_v53, %v1853_v25  ;;  %v1352_v39 = vmul.f32 %v1346_v40, %v937_v44  ;;  %v1354_v0 = vmul.f32 %v1348_v9, %v939_v19  ;;  %v1611_v12 = vmul.f32 %v1605_v45, %v7270_v23 }
 0x135   : > { %v1873_v8 = vadd.f32 %v1867_v20, %v1855_v16  ;;  %v1613_v18 = vmul.f32 %v1607_v63, %v7381_v49  ;;  %v1846_v62 = vmul.f32 0.8333333, %v7135_v55  ;;  %v1848_v38 = vmul.f32 0.8333333, %v7148_v60 }
 0x136   : > { %v1358_v54 = vadd.f32 %v1352_v39, %v1334_v52  ;;  %v1360_v26 = vadd.f32 %v1354_v0, %v1336_v50  ;;  %vm864_vm6 = vcmp.ge.f32.partialorder %v7301_v24, 2.2  ;;  %v1858_v42 = vmul.f32 0.8333333, %v1340_v43 }
 0x137   : > { %v5845_v7 = vpack.c.bf16 %v1873_v8, %v1871_v13  ;;  %v5509_v25 = vsel %vm864_vm6, 1.0, %v8788_v32  ;;  %v5569_v16 = vadd.f32 -1.4, %v7301_v24  ;;  %v1860_v59 = vmul.f32 0.8333333, %v1342_v31  ;;  %v8838_v31 = vld [vmem:[#allocation2_spill] sm:$0xff] }
 0x138   : > { %v1623_v47 = vmul.f32 %v1617_v33, %v1358_v54  ;;  %v1625_v14 = vmul.f32 %v1619_v61, %v1360_v26  ;;  %v942_v23 = vsub.f32 %v7282_v28, %v5509_v25  ;;  %v1345_v49 = vsub.f32 2.2, %v7301_v24  ;;  %v1877_v33 = vld [vmem:[%s8724_s2] sm:$0xf] }
 0x139   : > { %5846 = vmatprep.subr.bf16.mxu0 %v5845_v7  ;;  %v1852_v34 = vmul.f32 %v1846_v62, %v7307_v56  ;;  %v1333_v29 = vmul.f32 2.5, %v5569_v16  ;;  %vm863_vm7 = vcmp.ge.f32.partialorder %v7357_v51, 2.2  ;;  %v1854_v22 = vmul.f32 %v1848_v38, %v7399_v57 }
 0x13a   : > { %v1629_v55 = vadd.f32 %v1623_v47, %v1611_v12  ;;  %v1631_v60 = vadd.f32 %v1625_v14, %v1613_v18  ;;  %v1351_v44 = vmul.f32 2.5, %v1345_v49  ;;  %v1610_v1 = vmul.f32 1.25, %v7304_v3 }
 0x13b   : > { %v1339_v19 = vmul.f32 %v1333_v29, %v7298_v10  ;;  %v1622_v41 = vmul.f32 1.25, %v1345_v49  ;;  %v5508_v2 = vsel %vm863_vm7, 1.0, %v8788_v32  ;;  %v5568_v36 = vadd.f32 -1.4, %v7357_v51  ;;  %v1876_v10 = vld [vmem:[%s8839_s19] sm:$0xff] }
 0x13c   : > { %v1864_v48 = vmul.f32 %v1858_v42, %v1629_v55  ;;  %v1866_v43 = vmul.f32 %v1860_v59, %v1631_v60  ;;  %v1357_v28 = vmul.f32 %v1351_v44, %v942_v23  ;;  %v1851_v37 = vmul.f32 0.8333333, %v8838_v31  ;;  %v4135_v55 = vld [vmem:[%s8731_s9] sm:$0xff] }
 0x13d   : > { %v941_v45 = vsub.f32 %v7338_v21, %v5508_v2  ;;  %v1344_v57 = vsub.f32 2.2, %v7357_v51  ;;  %v1616_v3 = vmul.f32 %v1610_v1, %v7326_v35  ;;  %v1332_v40 = vmul.f32 2.5, %v5568_v36 }
 0x13e   : > { %v1870_v56 = vadd.f32 %v1864_v48, %v1852_v34  ;;  %v1872_v53 = vadd.f32 %v1866_v43, %v1854_v22  ;;  %v1363_v52 = vadd.f32 %v1357_v28, %v1339_v19  ;;  %v1863_v63 = vmul.f32 0.8333333, %v1345_v49  ;;  %v1988_v49 = vld [vmem:[%s8729_s7] sm:$0xf] }
 0x13f   : > { %v1350_v20 = vmul.f32 2.5, %v1344_v57  ;;  %v1609_v50 = vmul.f32 1.25, %v7360_v5  ;;  %v1338_v39 = vmul.f32 %v1332_v40, %v7354_v6  ;;  %v1621_v21 = vmul.f32 1.25, %v1344_v57 }
 0x140   : > { %v5847_v9 = vpack.c.bf16 %v1872_v53, %v1870_v56  ;;  %v1628_v13 = vmul.f32 %v1622_v41, %v1363_v52  ;;  %v1884_v35 = vcombine.high %v1876_v10, %v1876_v10  ;;  %vm1885_vm8 = vcmask 719872   ;;  %v2077_v52 = vld [vmem:[%s8726_s4] sm:$0xf] }
 0x141   : > { %v1356_v8 = vmul.f32 %v1350_v20, %v941_v45  ;;  %v1857_v61 = vmul.f32 %v1851_v37, %v7362_v17  ;;  %v6104_v54 = vmov 0   ;;  %v1615_v5 = vmul.f32 %v1609_v50, %v7383_v4 }
 0x142   : > { %5848 = vmatpush1.bf16.msra.mxu0 %v5847_v9  ;;  %v1634_v0 = vadd.f32 %v1628_v13, %v1616_v3  ;;  %5967 = vset.pattern.permute.xlu0 %v6104_v54  ;;  %v1850_v18 = vmul.f32 0.8333333, %v7231_v46  ;;  %v1862_v7 = vmul.f32 0.8333333, %v1344_v57  ;;  %vm1999_vm9 = vcmask 1043456  }
 0x143   : > { %v1362_v12 = vadd.f32 %v1356_v8, %v1338_v39  ;;  %5570 = vmatprep.mubr.msk.f32.mxu0 %vm1885_vm8, %v1884_v35  ;;  %1880 = vperm.xlu0 %5967, %v1877_v33   ;;  %vm1995_vm10 = vcmask 31744   ;;  %v568_v34 = vlaneseq  ;;  %vm2086_vm5 = vcmask 64512   ;;  %v2161_v33 = vld [vmem:[%s8727_s5] sm:$0xf] }
 0x144   : > { %v1869_v6 = vmul.f32 %v1863_v63, %v1634_v0  ;;  %5968 = vset.pattern.permute.xlu1 %v6104_v54  ;;  %v1856_v47 = vmul.f32 %v1850_v18, %v7401_v58  ;;  %v1989_v58 = vld [vmem:[%s8725_s3] sm:$0xf]  ;;  %vm2251_vm6 = vcmask 130048  }
 0x145   : > { %v1627_v62 = vmul.f32 %v1621_v21, %v1362_v12  ;;  %v7509_v29 = vand.u32 127, %v568_v34 }
 0x146   : > { %v1875_v26 = vadd.f32 %v1869_v6, %v1857_v61 }
 0x147   : > { %v1633_v38 = vadd.f32 %v1627_v62, %v1615_v5  ;;  %v570_v60 = vadd.s32 128, %v7509_v29  ;;  %v575_v44 = vand.u32 15, %v7509_v29  ;;  %vm1965_vm15 = vcmp.lt.s32.totalorder %v7509_v29, 127  ;;  %v2242_v5 = vld [vmem:[%s8728_s6] sm:$0xf] }
 0x148   : > { %1940 = vmatprep.subr.mxu0 %v1875_v26  ;;  %vm1974_vm2 = vcmp.lt.s32.totalorder %v7509_v29, 112  ;;  %vm1983_vm4 = vcmp.lt.s32.totalorder %v7509_v29, 111 }
 0x149   : > { %v1868_v42 = vmul.f32 %v1862_v7, %v1633_v38  ;;  %v582_v22 = vand.u32 15, %v570_v60  ;;  %vm598_vm12 = vcmp.lt.s32.totalorder %v570_v60, 255  ;;  %vm595_vm13 = vcmp.ne.s32.totalorder %v575_v44, 15 }
 0x14a   : > { %vm606_vm0 = vcmp.lt.s32.totalorder %v570_v60, 240  ;;  %vm612_vm1 = vcmp.lt.s32.totalorder %v570_v60, 239 }
 0x14b   : > { %v1874_v17 = vadd.f32 %v1868_v42, %v1856_v47  ;;  %vm7513_vm11 = vcmp.ne.s32.totalorder %v582_v22, 15  ;;  %v7534_v43 = vsel %vm606_vm0, 1.0, %v8788_v32 }
 0x14c   : > { %vm600_vm14 = vmand %vm7513_vm11, %vm598_vm12 }
 0x14d   : > { %1941 = vmatpush1.msra.mxu0 %v1874_v17  ;;  %vm614_vm3 = vmand %vm7513_vm11, %vm612_vm1 }
 0x14e   : > { %1953 = vmatmul.mubr.f32.vlgmr.msra.gmra.mrb[0].mxu0 %v1876_v10  ;;  %v7553_v40 = vsel %vm614_vm3, 1.0, %v8788_v32 }
 0x14f   : > { %4233 = vmatprep.mubr.f32.mxu0 %v8788_v32 }
 0x1c2   : > { %v1881_v4 = vpop.permute.xlu0 %1880 }
 0x221   : > { %v1954_v25 = vpop.f32.mrb[0].mxu0 }
 0x222   : > { %v1955_v46 = vadd.f32 %v1954_v25, %v1881_v4  ;;  %v1956_v16 = vpop.f32.mrb[1].mxu0 }
 0x223   : > { %v1957_v14 = vadd.f32 %v1956_v16, %v1881_v4 }
 0x224   : > { %v7467_v59 = vmax.f32 %v1955_v46, 0.0 }
 0x225   : > { %v7469_v23 = vmax.f32 %v1957_v14, 0.0 }
 0x226   : > { %1961 = vrot.lane.b32.xlu0 %v7467_v59, %s6105_s21  ;;  %v2162_v10 = vrot.slane %v7467_v59, 4 }
 0x227   : > { %1963 = vrot.lane.b32.xlu1 %v7469_v23, %s6105_s21  ;;  %5571 = vmatprep.subr.msk.mxu1 %vm1999_vm9, %v7469_v23  ;;  %v2163_v31 = vrot.slane %v7469_v23, 4 }
 0x228   : > { %5572 = vmatpush1.msk.msra.mxu1 %vm1999_vm9, %v7467_v59 }
 0x229   : > { %5573 = vmatmul.mubr.msk.f32.vlgmr.msra.gmra.mrb[0].mxu1 %vm1995_vm10, %v1989_v58 }
 0x22a   : > { %1972 = vrot.lane.b32.xlu0 %v7469_v23, %s6106_s26  ;;  %2154 = vmatprep.mubr.f32.mxu1 %v8788_v32 }
 0x22b   : > { %1970 = vrot.lane.b32.xlu1 %v7467_v59, %s6106_s26 }
 0x22e   : > { %1981 = vrot.lane.b32.xlu0 %v7469_v23, %s6107_s27 }
 0x22f   : > { %1979 = vrot.lane.b32.xlu1 %v7467_v59, %s6107_s27 }
 0x232   : > { %4566 = vrot.lane.b32.xlu0 %v7426_v30, %s6105_s21 }
 0x233   : > { %1992 = vperm.xlu1 %5968, %v1988_v49  }
 0x236   : > { %4568 = vrot.lane.b32.xlu0 %v7341_v27, %s6105_s21 }
 0x237   : > { %4572 = vrot.lane.b32.xlu1 %v7395_v15, %s6105_s21 }
 0x23a   : > { %4574 = vrot.lane.b32.xlu0 %v7289_v11, %s6105_s21 }
 0x23b   : > { %4570 = vrot.lane.b32.xlu1 %v7357_v51, %s6105_s21 }
 0x23e   : > { %4590 = vrot.lane.b32.xlu0 %v7426_v30, %s6106_s26 }
 0x23f   : > { %4576 = vrot.lane.b32.xlu1 %v7301_v24, %s6105_s21 }
 0x242   : > { %4596 = vrot.lane.b32.xlu0 %v7395_v15, %s6106_s26 }
 0x243   : > { %4592 = vrot.lane.b32.xlu1 %v7341_v27, %s6106_s26 }
 0x246   : > { %4138 = vperm.xlu0 %5967, %v4135_v55  }
 0x247   : > { %4598 = vrot.lane.b32.xlu1 %v7289_v11, %s6106_s26 }
 0x24a   : > { %4600 = vrot.lane.b32.xlu0 %v7301_v24, %s6106_s26 }
 0x24b   : > { %4594 = vrot.lane.b32.xlu1 %v7357_v51, %s6106_s26 }
 0x24e   : > { %4620 = vrot.lane.b32.xlu0 %v7395_v15, %s6107_s27 }
 0x24f   : > { %4614 = vrot.lane.b32.xlu1 %v7426_v30, %s6107_s27 }
 0x252   : > { %4618 = vrot.lane.b32.xlu0 %v7357_v51, %s6107_s27 }
 0x253   : > { %4616 = vrot.lane.b32.xlu1 %v7341_v27, %s6107_s27  ;;  %v7524_v27 = vsel %vm600_vm14, 1.0, %v8788_v32 }
 0x256   : > { %4624 = vrot.lane.b32.xlu0 %v7301_v24, %s6107_s27  ;;  %v7521_v24 = vsel %vm595_vm13, 1.0, %v8788_v32 }
 0x257   : > { %4622 = vrot.lane.b32.xlu1 %v7289_v11, %s6107_s27  ;;  %s8685_s27 = scalar_lea.vmem %s8738_s16, %s5795_s22 }
 0x298   : > { %v1962_v11 = vpop.permute.xlu0 %1961 }
 0x299   : > { %v1964_v51 = vpop.permute.xlu1 %1963 }
 0x29a   : > { %v1966_v30 = vsel %vm1965_vm15, %v1962_v11, %v1964_v51  ;;  %v1967_v1 = vsel %vm1965_vm15, %v1964_v51, %v1962_v11 }
 0x29b   : > { %v1968_v48 = vmul.f32 %v7521_v24, %v1966_v30  ;;  %v1969_v19 = vmul.f32 %v7524_v27, %v1967_v1 }
 0x29c   : > { %v1973_v41 = vpop.permute.xlu0 %1972 }
 0x29d   : > { %v2080_v28 = vrot.slane %v1968_v48, 4  ;;  %v2081_v2 = vrot.slane %v1969_v19, 4  ;;  %v1971_v36 = vpop.permute.xlu1 %1970 }
 0x29e   : > { %v1976_v56 = vsel %vm1974_vm2, %v1973_v41, %v1971_v36  ;;  %v1975_v37 = vsel %vm1974_vm2, %v1971_v36, %v1973_v41 }
 0x29f   : > { %v1978_v45 = vmul.f32 %v7534_v43, %v1976_v56  ;;  %v2085_v57 = vsel %vm1999_vm9, %v7469_v23, %v2081_v2  ;;  %v2084_v53 = vsel %vm1999_vm9, %v7467_v59, %v2080_v28  ;;  %v2166_v13 = vsel %vm1999_vm9, %v1975_v37, %v2162_v10 }
 0x2a0   : > { %v1982_v3 = vpop.permute.xlu0 %1981  ;;  %2090 = vmatprep.subr.mxu1 %v2085_v57 }
 0x2a1   : > { %v1980_v63 = vpop.permute.xlu1 %1979  ;;  %2091 = vmatpush1.msra.mxu1 %v2084_v53  ;;  %v2167_v20 = vsel %vm1999_vm9, %v1978_v45, %v2163_v31 }
 0x2a2   : > { %v1984_v50 = vsel %vm1983_vm4, %v1980_v63, %v1982_v3  ;;  %v1985_v9 = vsel %vm1983_vm4, %v1982_v3, %v1980_v63  ;;  %5574 = vmatmul.mubr.msk.f32.vlgmr.msra.gmra.mrb[2].mxu1 %vm2086_vm5, %v2077_v52  ;;  %2171 = vmatprep.subr.mxu1 %v2167_v20 }
 0x2a3   : > { %v1986_v39 = vmul.f32 %v7521_v24, %v1984_v50  ;;  %v1987_v21 = vmul.f32 %v7553_v40, %v1985_v9  ;;  %2172 = vmatpush1.msra.mxu1 %v2166_v13  ;;  %2235 = vmatprep.mubr.f32.mxu1 %v8788_v32 }
 0x2a5   : > { %v2245_v8 = vrot.slane %v1986_v39, 4  ;;  %v2246_v35 = vrot.slane %v1987_v21, 4 }
 0x2a6   : > { %5575 = vmatmul.mubr.msk.f32.vlgmr.msra.gmra.mrb[4].mxu1 %vm2086_vm5, %v2161_v33 }
 0x2a7   : > { %v2250_v0 = vsel %vm1999_vm9, %v1969_v19, %v2246_v35  ;;  %v2249_v61 = vsel %vm1999_vm9, %v1968_v48, %v2245_v8  ;;  %2319 = vmatprep.mubr.f32.mxu1 %v8788_v32 }
 0x2a8   : > { %v5849_v54 = vpack.c.bf16 %v2250_v0, %v2167_v20  ;;  %v5851_v12 = vpack.c.bf16 %v2249_v61, %v2166_v13 }
 0x2aa   : > { %5850 = vmatprep.subr.bf16.mxu1 %v5849_v54 }
 0x2ab   : > { %5852 = vmatpush1.bf16.msra.mxu1 %v5851_v12 }
 0x2ae   : > { %5576 = vmatmul.mubr.msk.f32.vlgmr.msra.gmra.mrb[6].mxu1 %vm2251_vm6, %v2242_v5 }
 0x2af   : > { %4304 = vmatprep.mubr.f32.mxu1 %v8788_v32 }
 0x2b2   : > { %v7577_v18 = vpop.permute.xlu1 %1992 }
 0x2fc   : > { %v2072_v6 = vpop.f32.mrb[0].mxu1 }
 0x2fd   : > { %v2073_v62 = vadd.f32 %v2072_v6, %v7577_v18  ;;  %v2074_v7 = vpop.f32.mrb[1].mxu1 }
 0x2fe   : > { %v2075_v26 = vadd.f32 %v2074_v7, %v7577_v18 }
 0x2ff   : > { %v7581_v38 = vmax.f32 %v2073_v62, 0.0 }
 0x300   : > { %v7583_v47 = vmax.f32 %v2075_v26, 0.0 }
 0x301   : > { %v7586_v42 = vmul.f32 -1.442695, %v7581_v38  ;;  %vm2390_vm0 = vcmp.ge.f32.partialorder %v7581_v38, -2.2  ;;  %vm2414_vm1 = vcmp.ge.f32.partialorder %v7581_v38, -1.8 }
 0x302   : > { %v5578_v17 = vmul.f32 -1.442695, %v7583_v47  ;;  %vm2391_vm7 = vcmp.ge.f32.partialorder %v7583_v47, -2.2  ;;  %vm2415_vm8 = vcmp.ge.f32.partialorder %v7583_v47, -1.8 }
 0x303   : > { %v5586_v4 = vsel %vm2391_vm7, 1.0, %v8788_v32  ;;  %v5594_v25 = vsel %vm2415_vm8, 1.0, %v8788_v32  ;;  %vm2439_vm10 = vcmp.ge.f32.partialorder %v7583_v47, -1.4  ;;  %vm2463_vm11 = vcmp.ge.f32.partialorder %v7583_v47, -1.0 }
 0x304   : > { %5994 = vpow2.f32 %v5578_v17  ;;  %v5602_v46 = vsel %vm2439_vm10, 1.0, %v8788_v32  ;;  %v5610_v16 = vsel %vm2463_vm11, 1.0, %v8788_v32  ;;  %vm2487_vm12 = vcmp.ge.f32.partialorder %v7583_v47, -0.6 }
 0x305   : > { %v5618_v14 = vsel %vm2487_vm12, 1.0, %v8788_v32  ;;  %vm2511_vm13 = vcmp.ge.f32.partialorder %v7583_v47, -0.2  ;;  %vm2535_vm14 = vcmp.ge.f32.partialorder %v7583_v47, 0.2  ;;  %v2679_v59 = vsub.f32 %v5586_v4, %v5594_v25 }
 0x306   : > { %v5626_v23 = vsel %vm2511_vm13, 1.0, %v8788_v32  ;;  %v7603_v58 = vsel %vm2535_vm14, 1.0, %v8788_v32  ;;  %v2687_v49 = vsub.f32 %v5594_v25, %v5602_v46  ;;  %v2695_v55 = vsub.f32 %v5602_v46, %v5610_v16 }
 0x307   : > { %v2703_v34 = vsub.f32 %v5610_v16, %v5618_v14  ;;  %v2711_v60 = vsub.f32 %v5618_v14, %v5626_v23  ;;  %v7606_v22 = vsub.f32 %v5626_v23, %v7603_v58  ;;  %v5682_v44 = vadd.f32 2.2, %v7583_v47 }
 0x308   : > { %v2791_v15 = vsub.f32 -1.4, %v7583_v47  ;;  %v5690_v11 = vadd.f32 1.8, %v7583_v47  ;;  %v2847_v51 = vsub.f32 -1.0, %v7583_v47  ;;  %v7613_v30 = vadd.f32 1.0, %v7583_v47 }
 0x309   : > { %v2775_v1 = vmul.f32 2.5, %v5682_v44  ;;  %v5698_v48 = vadd.f32 1.4, %v7583_v47  ;;  %v2903_v19 = vsub.f32 -0.6, %v7583_v47  ;;  %v3327_v41 = vmul.f32 1.25, %v5682_v44 }
 0x30a   : > { %v2799_v28 = vmul.f32 2.5, %v2791_v15  ;;  %v2831_v2 = vmul.f32 2.5, %v5690_v11  ;;  %v2855_v36 = vmul.f32 2.5, %v2847_v51  ;;  %v2943_v56 = vmul.f32 2.5, %v7613_v30 }
 0x30b   : > { %v2783_v31 = vmul.f32 %v2775_v1, %v2679_v59  ;;  %v2887_v37 = vmul.f32 2.5, %v5698_v48  ;;  %v2911_v45 = vmul.f32 2.5, %v2903_v19  ;;  %v2959_v57 = vsub.f32 -0.2, %v7583_v47 }
 0x30c   : > { %v2807_v53 = vmul.f32 %v2799_v28, %v2687_v49  ;;  %v2839_v52 = vmul.f32 %v2831_v2, %v2687_v49  ;;  %v2863_v3 = vmul.f32 %v2855_v36, %v2695_v55  ;;  %v2951_v10 = vmul.f32 %v2943_v56, %v2703_v34 }
 0x30d   : > { %v2895_v63 = vmul.f32 %v2887_v37, %v2695_v55  ;;  %v2919_v20 = vmul.f32 %v2911_v45, %v2703_v34  ;;  %v2967_v50 = vmul.f32 2.5, %v2959_v57  ;;  %v7620_v9 = vadd.f32 0.6, %v7583_v47 }
 0x30e   : > { %v5995_v13 = vpop.eup %5994  ;;  %v2815_v39 = vadd.f32 %v2807_v53, %v2783_v31  ;;  %v2871_v21 = vadd.f32 %v2863_v3, %v2839_v52  ;;  %v3015_v33 = vsub.f32 0.2, %v7583_v47  ;;  %v3343_v8 = vmul.f32 1.25, %v2847_v51 }
 0x30f   : > { %v2359_v35 = vadd.f32 1.0, %v5995_v13  ;;  %v2927_v0 = vadd.f32 %v2919_v20, %v2895_v63  ;;  %v2975_v61 = vmul.f32 %v2967_v50, %v2711_v60  ;;  %v2999_v54 = vmul.f32 2.5, %v7620_v9 }
 0x310   : > { %v3023_v12 = vmul.f32 2.5, %v3015_v33  ;;  %v3335_v5 = vmul.f32 %v3327_v41, %v2815_v39  ;;  %v3351_v6 = vmul.f32 %v3343_v8, %v2871_v21  ;;  %v3367_v62 = vmul.f32 1.25, %v5690_v11 }
 0x311   : > { %5996 = vrcp.f32 %v2359_v35  ;;  %v2983_v7 = vadd.f32 %v2975_v61, %v2951_v10  ;;  %v3007_v26 = vmul.f32 %v2999_v54, %v2711_v60  ;;  %v3383_v17 = vmul.f32 1.25, %v2903_v19 }
 0x312   : > { %v3031_v4 = vmul.f32 %v3023_v12, %v7606_v22  ;;  %v3359_v25 = vadd.f32 %v3351_v6, %v3335_v5  ;;  %v3375_v46 = vmul.f32 %v3367_v62, %v2871_v21  ;;  %v3407_v16 = vmul.f32 1.25, %v5698_v48 }
 0x313   : > { %v3391_v14 = vmul.f32 %v3383_v17, %v2927_v0  ;;  %v3423_v59 = vmul.f32 1.25, %v2959_v57  ;;  %v3447_v23 = vmul.f32 1.25, %v7613_v30  ;;  %v3463_v49 = vmul.f32 1.25, %v3015_v33 }
 0x314   : > { %v7628_v55 = vadd.f32 %v3031_v4, %v3007_v26  ;;  %v3415_v34 = vmul.f32 %v3407_v16, %v2927_v0  ;;  %v3687_v15 = vmul.f32 0.8333333, %v5682_v44  ;;  %v3703_v51 = vmul.f32 0.8333333, %v2903_v19 }
 0x315   : > { %v3399_v1 = vadd.f32 %v3391_v14, %v3375_v46  ;;  %v3431_v41 = vmul.f32 %v3423_v59, %v2983_v7  ;;  %v3455_v28 = vmul.f32 %v3447_v23, %v2983_v7  ;;  %v3727_v60 = vmul.f32 0.8333333, %v5690_v11 }
 0x316   : > { %v3471_v2 = vmul.f32 %v3463_v49, %v7628_v55  ;;  %v3695_v36 = vmul.f32 %v3687_v15, %v3359_v25  ;;  %v3743_v56 = vmul.f32 0.8333333, %v2959_v57  ;;  %v3767_v31 = vmul.f32 0.8333333, %v5698_v48 }
 0x317   : > { %v3439_v37 = vadd.f32 %v3431_v41, %v3415_v34  ;;  %v3711_v45 = vmul.f32 %v3703_v51, %v3399_v1  ;;  %v3735_v53 = vmul.f32 %v3727_v60, %v3399_v1  ;;  %v3783_v52 = vmul.f32 0.8333333, %v3015_v33 }
 0x318   : > { %v7631_v3 = vadd.f32 %v3471_v2, %v3455_v28  ;;  %5998 = vpow2.f32 %v7586_v42  ;;  %v5585_v44 = vsel %vm2390_vm0, 1.0, %v8788_v32  ;;  %v5593_v11 = vsel %vm2414_vm1, 1.0, %v8788_v32 }
 0x319   : > { %v3719_v19 = vadd.f32 %v3711_v45, %v3695_v36  ;;  %v3751_v10 = vmul.f32 %v3743_v56, %v3439_v37  ;;  %v3775_v57 = vmul.f32 %v3767_v31, %v3439_v37  ;;  %vm2438_vm3 = vcmp.ge.f32.partialorder %v7581_v38, -1.4 }
 0x31a   : > { %v3791_v48 = vmul.f32 %v3783_v52, %v7631_v3  ;;  %v5601_v63 = vsel %vm2438_vm3, 1.0, %v8788_v32  ;;  %vm2462_vm6 = vcmp.ge.f32.partialorder %v7581_v38, -1.0  ;;  %vm2486_vm7 = vcmp.ge.f32.partialorder %v7581_v38, -0.6 }
 0x31b   : > { %v5997_v42 = vpop.eup %5996  ;;  %v3759_v20 = vadd.f32 %v3751_v10, %v3735_v53  ;;  %v4015_v50 = vrot.slane %v3719_v19, 4  ;;  %v5609_v13 = vsel %vm2462_vm6, 1.0, %v8788_v32  ;;  %v5617_v39 = vsel %vm2486_vm7, 1.0, %v8788_v32 }
 0x31c   : > { %v2383_v21 = vmul.f32 %v5997_v42, %v7583_v47  ;;  %v3799_v33 = vadd.f32 %v3791_v48, %v3775_v57  ;;  %vm2510_vm8 = vcmp.ge.f32.partialorder %v7581_v38, -0.2  ;;  %vm2534_vm10 = vcmp.ge.f32.partialorder %v7581_v38, 0.2 }
 0x31d   : > { %v5625_v8 = vsel %vm2510_vm8, 1.0, %v8788_v32  ;;  %v7652_v35 = vsel %vm2534_vm10, 1.0, %v8788_v32  ;;  %v2678_v0 = vsub.f32 %v5585_v44, %v5593_v11  ;;  %v2686_v61 = vsub.f32 %v5593_v11, %v5601_v63 }
 0x31e   : > { %v4039_v54 = vrot.slane %v3799_v33, 4  ;;  %v4103_v12 = vsel %vm1999_vm9, %v2383_v21, %v4015_v50  ;;  %v2694_v5 = vsub.f32 %v5601_v63, %v5609_v13  ;;  %v2702_v6 = vsub.f32 %v5609_v13, %v5617_v39 }
 0x31f   : > { %v2710_v62 = vsub.f32 %v5617_v39, %v5625_v8  ;;  %v7656_v7 = vsub.f32 %v5625_v8, %v7652_v35  ;;  %v5681_v26 = vadd.f32 2.2, %v7581_v38  ;;  %v2790_v17 = vsub.f32 -1.4, %v7581_v38 }
 0x320   : > { %v4111_v4 = vsel %vm1999_vm9, %v3759_v20, %v4039_v54  ;;  %v5689_v25 = vadd.f32 1.8, %v7581_v38  ;;  %v2846_v46 = vsub.f32 -1.0, %v7581_v38  ;;  %v5697_v16 = vadd.f32 1.4, %v7581_v38 }
 0x321   : > { %v5853_v14 = vpack.c.bf16 %v4111_v4, %v4103_v12  ;;  %v2774_v59 = vmul.f32 2.5, %v5681_v26  ;;  %v2798_v23 = vmul.f32 2.5, %v2790_v17  ;;  %v2902_v49 = vsub.f32 -0.6, %v7581_v38 }
 0x322   : > { %v5999_v34 = vpop.eup %5998  ;;  %v2830_v15 = vmul.f32 2.5, %v5689_v25  ;;  %v2854_v51 = vmul.f32 2.5, %v2846_v46  ;;  %v2886_v1 = vmul.f32 2.5, %v5697_v16  ;;  %v7666_v41 = vadd.f32 1.0, %v7581_v38 }
 0x323   : > { %5854 = vmatprep.subr.bf16.mxu0 %v5853_v14  ;;  %v2358_v28 = vadd.f32 1.0, %v5999_v34  ;;  %v2782_v60 = vmul.f32 %v2774_v59, %v2678_v0  ;;  %v2806_v2 = vmul.f32 %v2798_v23, %v2686_v61  ;;  %v2910_v36 = vmul.f32 2.5, %v2902_v49 }
 0x324   : > { %v2838_v56 = vmul.f32 %v2830_v15, %v2686_v61  ;;  %v2862_v31 = vmul.f32 %v2854_v51, %v2694_v5  ;;  %v2894_v37 = vmul.f32 %v2886_v1, %v2694_v5  ;;  %v2942_v45 = vmul.f32 2.5, %v7666_v41 }
 0x325   : > { %6000 = vrcp.f32 %v2358_v28  ;;  %v2814_v53 = vadd.f32 %v2806_v2, %v2782_v60  ;;  %v2918_v52 = vmul.f32 %v2910_v36, %v2702_v6  ;;  %v2958_v44 = vsub.f32 -0.2, %v7581_v38 }
 0x326   : > { %v2870_v11 = vadd.f32 %v2862_v31, %v2838_v56  ;;  %v2950_v19 = vmul.f32 %v2942_v45, %v2702_v6  ;;  %v7671_v10 = vadd.f32 0.6, %v7581_v38  ;;  %v3014_v57 = vsub.f32 0.2, %v7581_v38 }
 0x327   : > { %v2926_v48 = vadd.f32 %v2918_v52, %v2894_v37  ;;  %v2966_v63 = vmul.f32 2.5, %v2958_v44  ;;  %v3326_v42 = vmul.f32 1.25, %v5681_v26  ;;  %v3342_v20 = vmul.f32 1.25, %v2846_v46 }
 0x328   : > { %v2998_v50 = vmul.f32 2.5, %v7671_v10  ;;  %v3022_v13 = vmul.f32 2.5, %v3014_v57  ;;  %v3366_v39 = vmul.f32 1.25, %v5689_v25  ;;  %v3382_v21 = vmul.f32 1.25, %v2902_v49 }
 0x329   : > { %v2974_v33 = vmul.f32 %v2966_v63, %v2710_v62  ;;  %v3334_v8 = vmul.f32 %v3326_v42, %v2814_v53  ;;  %v3350_v0 = vmul.f32 %v3342_v20, %v2870_v11  ;;  %v3406_v61 = vmul.f32 1.25, %v5697_v16 }
 0x32a   : > { %v3006_v54 = vmul.f32 %v2998_v50, %v2710_v62  ;;  %v3030_v12 = vmul.f32 %v3022_v13, %v7656_v7  ;;  %v3374_v5 = vmul.f32 %v3366_v39, %v2870_v11  ;;  %v3390_v6 = vmul.f32 %v3382_v21, %v2926_v48 }
 0x32b   : > { %v2982_v17 = vadd.f32 %v2974_v33, %v2950_v19  ;;  %v3358_v4 = vadd.f32 %v3350_v0, %v3334_v8  ;;  %v3414_v14 = vmul.f32 %v3406_v61, %v2926_v48  ;;  %v3422_v59 = vmul.f32 1.25, %v2958_v44 }
 0x32c   : > { %v7676_v23 = vadd.f32 %v3030_v12, %v3006_v54  ;;  %v3398_v46 = vadd.f32 %v3390_v6, %v3374_v5  ;;  %v3446_v34 = vmul.f32 1.25, %v7666_v41  ;;  %v3462_v15 = vmul.f32 1.25, %v3014_v57 }
 0x32d   : > { %v3430_v51 = vmul.f32 %v3422_v59, %v2982_v17  ;;  %v3686_v1 = vmul.f32 0.8333333, %v5681_v26  ;;  %v3702_v28 = vmul.f32 0.8333333, %v2902_v49  ;;  %v3726_v60 = vmul.f32 0.8333333, %v5689_v25 }
 0x32e   : > { %v3454_v2 = vmul.f32 %v3446_v34, %v2982_v17  ;;  %v3470_v62 = vmul.f32 %v3462_v15, %v7676_v23  ;;  %v3742_v36 = vmul.f32 0.8333333, %v2958_v44  ;;  %v3766_v56 = vmul.f32 0.8333333, %v5697_v16 }
 0x32f   : > { %v6001_v31 = vpop.eup %6000  ;;  %v3438_v37 = vadd.f32 %v3430_v51, %v3414_v14  ;;  %v3694_v45 = vmul.f32 %v3686_v1, %v3358_v4  ;;  %v3710_v53 = vmul.f32 %v3702_v28, %v3398_v46  ;;  %v3734_v52 = vmul.f32 %v3726_v60, %v3398_v46 }
 0x330   : > { %v2382_v11 = vmul.f32 %v6001_v31, %v7581_v38  ;;  %v7681_v19 = vadd.f32 %v3470_v62, %v3454_v2  ;;  %v3782_v48 = vmul.f32 0.8333333, %v3014_v57  ;;  %vm2559_vm11 = vcmp.ge.f32.partialorder %v7583_v47, 0.6 }
 0x331   : > { %v3718_v26 = vadd.f32 %v3710_v53, %v3694_v45  ;;  %v3750_v49 = vmul.f32 %v3742_v36, %v3438_v37  ;;  %v3774_v25 = vmul.f32 %v3766_v56, %v3438_v37  ;;  %v5642_v63 = vsel %vm2559_vm11, 1.0, %v8788_v32 }
 0x332   : > { %v3790_v44 = vmul.f32 %v3782_v48, %v7681_v19  ;;  %vm2583_vm12 = vcmp.ge.f32.partialorder %v7583_v47, 1.0  ;;  %vm2607_vm13 = vcmp.ge.f32.partialorder %v7583_v47, 1.4  ;;  %vm2631_vm14 = vcmp.ge.f32.partialorder %v7583_v47, 1.8 }
 0x333   : > { %v3758_v16 = vadd.f32 %v3750_v49, %v3734_v52  ;;  %v4014_v42 = vrot.slane %v3718_v26, 4  ;;  %v5650_v20 = vsel %vm2583_vm12, 1.0, %v8788_v32  ;;  %v5658_v57 = vsel %vm2607_vm13, 1.0, %v8788_v32 }
 0x334   : > { %v3798_v50 = vadd.f32 %v3790_v44, %v3774_v25  ;;  %v7692_v13 = vsel %vm2631_vm14, 1.0, %v8788_v32  ;;  %v2727_v39 = vsub.f32 %v7603_v58, %v5642_v63  ;;  %v2735_v21 = vsub.f32 %v5642_v63, %v5650_v20 }
 0x335   : > { %v4102_v33 = vsel %vm1999_vm9, %v2382_v11, %v4014_v42  ;;  %v2743_v8 = vsub.f32 %v5650_v20, %v5658_v57  ;;  %v7697_v0 = vsub.f32 %v5658_v57, %v7692_v13  ;;  %v5722_v61 = vadd.f32 0.2, %v7583_v47 }
 0x336   : > { %v4038_v54 = vrot.slane %v3798_v50, 4  ;;  %v3071_v12 = vsub.f32 0.6, %v7583_v47  ;;  %v5730_v5 = vadd.f32 -0.2, %v7583_v47  ;;  %v3127_v6 = vsub.f32 1.0, %v7583_v47 }
 0x337   : > { %v3055_v17 = vmul.f32 2.5, %v5722_v61  ;;  %v7704_v4 = vadd.f32 -0.6, %v7583_v47  ;;  %v3183_v58 = vsub.f32 1.4, %v7583_v47  ;;  %v7708_v14 = vadd.f32 -1.0, %v7583_v47 }
 0x338   : > { %v4110_v59 = vsel %vm1999_vm9, %v3758_v16, %v4038_v54  ;;  %v3079_v46 = vmul.f32 2.5, %v3071_v12  ;;  %v3111_v34 = vmul.f32 2.5, %v5730_v5  ;;  %v3135_v15 = vmul.f32 2.5, %v3127_v6 }
 0x339   : > { %v5855_v51 = vpack.c.bf16 %v4110_v59, %v4102_v33  ;;  %v3063_v1 = vmul.f32 %v3055_v17, %v7606_v22  ;;  %v3167_v28 = vmul.f32 2.5, %v7704_v4  ;;  %v3191_v60 = vmul.f32 2.5, %v3183_v58 }
 0x33a   : > { %v3087_v2 = vmul.f32 %v3079_v46, %v2727_v39  ;;  %v3119_v62 = vmul.f32 %v3111_v34, %v2727_v39  ;;  %v3143_v36 = vmul.f32 %v3135_v15, %v2735_v21  ;;  %v3223_v56 = vmul.f32 2.5, %v7708_v14 }
 0x33b   : > { %5856 = vmatpush1.bf16.msra.mxu0 %v5855_v51  ;;  %v3175_v31 = vmul.f32 %v3167_v28, %v2735_v21  ;;  %v3199_v37 = vmul.f32 %v3191_v60, %v2743_v8  ;;  %v3239_v45 = vsub.f32 1.8, %v7583_v47  ;;  %v3487_v53 = vmul.f32 1.25, %v7620_v9 }
 0x33c   : > { %v3095_v52 = vadd.f32 %v3087_v2, %v3063_v1  ;;  %v3151_v11 = vadd.f32 %v3143_v36, %v3119_v62  ;;  %v3231_v48 = vmul.f32 %v3223_v56, %v2743_v8  ;;  %v3503_v26 = vmul.f32 1.25, %v3071_v12 }
 0x33d   : > { %v3207_v22 = vadd.f32 %v3199_v37, %v3175_v31  ;;  %v3247_v49 = vmul.f32 2.5, %v3239_v45  ;;  %v3495_v25 = vmul.f32 %v3487_v53, %v7628_v55  ;;  %v3527_v63 = vmul.f32 1.25, %v5722_v61 }
 0x33e   : > { %v3511_v44 = vmul.f32 %v3503_v26, %v3095_v52  ;;  %v3543_v16 = vmul.f32 1.25, %v3127_v6  ;;  %v3567_v42 = vmul.f32 1.25, %v5730_v5  ;;  %v3583_v20 = vmul.f32 1.25, %v3183_v58 }
 0x33f   : > { %v3255_v57 = vmul.f32 %v3247_v49, %v7697_v0  ;;  %v3535_v50 = vmul.f32 %v3527_v63, %v3095_v52  ;;  %v3607_v39 = vmul.f32 1.25, %v7704_v4  ;;  %v3623_v21 = vmul.f32 1.25, %v3239_v45 }
 0x340   : > { %v3519_v33 = vadd.f32 %v3511_v44, %v3495_v25  ;;  %v3551_v54 = vmul.f32 %v3543_v16, %v3151_v11  ;;  %v3575_v17 = vmul.f32 %v3567_v42, %v3151_v11  ;;  %v3591_v8 = vmul.f32 %v3583_v20, %v3207_v22 }
 0x341   : > { %v7719_v59 = vadd.f32 %v3255_v57, %v3231_v48  ;;  %v3615_v46 = vmul.f32 %v3607_v39, %v3207_v22  ;;  %v3807_v55 = vmul.f32 0.8333333, %v7613_v30  ;;  %v3823_v34 = vmul.f32 0.8333333, %v3071_v12 }
 0x342   : > { %v3559_v15 = vadd.f32 %v3551_v54, %v3535_v50  ;;  %v3599_v51 = vadd.f32 %v3591_v8, %v3575_v17  ;;  %v3847_v1 = vmul.f32 0.8333333, %v7620_v9  ;;  %v3863_v28 = vmul.f32 0.8333333, %v3127_v6 }
 0x343   : > { %v3631_v60 = vmul.f32 %v3623_v21, %v7719_v59  ;;  %v3815_v2 = vmul.f32 %v3807_v55, %v7631_v3  ;;  %v3831_v62 = vmul.f32 %v3823_v34, %v3519_v33  ;;  %v3887_v36 = vmul.f32 0.8333333, %v5722_v61 }
 0x344   : > { %v3855_v56 = vmul.f32 %v3847_v1, %v3519_v33  ;;  %v3871_v31 = vmul.f32 %v3863_v28, %v3559_v15  ;;  %v3903_v37 = vmul.f32 0.8333333, %v3183_v58  ;;  %v3927_v53 = vmul.f32 0.8333333, %v5730_v5 }
 0x345   : > { %v7725_v52 = vadd.f32 %v3631_v60, %v3615_v46  ;;  %v3839_v11 = vadd.f32 %v3831_v62, %v3815_v2  ;;  %v3895_v30 = vmul.f32 %v3887_v36, %v3559_v15  ;;  %v3943_v12 = vmul.f32 0.8333333, %v3239_v45 }
 0x346   : > { %v3879_v48 = vadd.f32 %v3871_v31, %v3855_v56  ;;  %v3911_v26 = vmul.f32 %v3903_v37, %v3599_v51  ;;  %v3935_v22 = vmul.f32 %v3927_v53, %v3599_v51  ;;  %vm2558_vm0 = vcmp.ge.f32.partialorder %v7581_v38, 0.6 }
 0x347   : > { %v3951_v9 = vmul.f32 %v3943_v12, %v7725_v52  ;;  %v5641_v3 = vsel %vm2558_vm0, 1.0, %v8788_v32  ;;  %vm2582_vm1 = vcmp.ge.f32.partialorder %v7581_v38, 1.0  ;;  %vm2606_vm3 = vcmp.ge.f32.partialorder %v7581_v38, 1.4 }
 0x348   : > { %v3919_v61 = vadd.f32 %v3911_v26, %v3895_v30  ;;  %v4063_v5 = vrot.slane %v3879_v48, 4  ;;  %v5649_v6 = vsel %vm2582_vm1, 1.0, %v8788_v32  ;;  %v5657_v58 = vsel %vm2606_vm3, 1.0, %v8788_v32 }
 0x349   : > { %v3959_v45 = vadd.f32 %v3951_v9, %v3935_v22  ;;  %vm2630_vm6 = vcmp.ge.f32.partialorder %v7581_v38, 1.8  ;;  %v2726_v49 = vsub.f32 %v7652_v35, %v5641_v3  ;;  %v2734_v25 = vsub.f32 %v5641_v3, %v5649_v6 }
 0x34a   : > { %v4119_v63 = vsel %vm1999_vm9, %v3839_v11, %v4063_v5  ;;  %v7738_v44 = vsel %vm2630_vm6, 1.0, %v8788_v32  ;;  %v2742_v16 = vsub.f32 %v5649_v6, %v5657_v58  ;;  %v5721_v42 = vadd.f32 0.2, %v7581_v38 }
 0x34b   : > { %v4087_v20 = vrot.slane %v3959_v45, 4  ;;  %v7742_v57 = vsub.f32 %v5657_v58, %v7738_v44  ;;  %v3070_v50 = vsub.f32 0.6, %v7581_v38  ;;  %v5729_v39 = vadd.f32 -0.2, %v7581_v38 }
 0x34c   : > { %v3054_v21 = vmul.f32 2.5, %v5721_v42  ;;  %v3126_v35 = vsub.f32 1.0, %v7581_v38  ;;  %v7748_v33 = vadd.f32 -0.6, %v7581_v38  ;;  %v3182_v54 = vsub.f32 1.4, %v7581_v38 }
 0x34d   : > { %v4127_v17 = vsel %vm1999_vm9, %v3919_v61, %v4087_v20  ;;  %v3078_v8 = vmul.f32 2.5, %v3070_v50  ;;  %v3110_v46 = vmul.f32 2.5, %v5729_v39  ;;  %v7753_v55 = vadd.f32 -1.0, %v7581_v38 }
 0x34e   : > { %v5857_v34 = vpack.c.bf16 %v4127_v17, %v4119_v63  ;;  %v3062_v15 = vmul.f32 %v3054_v21, %v7656_v7  ;;  %v3134_v51 = vmul.f32 2.5, %v3126_v35  ;;  %v3166_v1 = vmul.f32 2.5, %v7748_v33 }
 0x34f   : > { %v3086_v28 = vmul.f32 %v3078_v8, %v2726_v49  ;;  %v3118_v60 = vmul.f32 %v3110_v46, %v2726_v49  ;;  %v3190_v2 = vmul.f32 2.5, %v3182_v54  ;;  %v3222_v62 = vmul.f32 2.5, %v7753_v55 }
 0x350   : > { %5858 = vmatprep.subr.bf16.mxu0 %v5857_v34  ;;  %v3142_v36 = vmul.f32 %v3134_v51, %v2734_v25  ;;  %v3174_v56 = vmul.f32 %v3166_v1, %v2734_v25  ;;  %v3238_v31 = vsub.f32 1.8, %v7581_v38  ;;  %v3486_v37 = vmul.f32 1.25, %v7671_v10 }
 0x351   : > { %v3094_v53 = vadd.f32 %v3086_v28, %v3062_v15  ;;  %v3198_v11 = vmul.f32 %v3190_v2, %v2742_v16  ;;  %v3230_v30 = vmul.f32 %v3222_v62, %v2742_v16  ;;  %v3502_v12 = vmul.f32 1.25, %v3070_v50 }
 0x352   : > { %v3150_v7 = vadd.f32 %v3142_v36, %v3118_v60  ;;  %v3246_v48 = vmul.f32 2.5, %v3238_v31  ;;  %v3494_v26 = vmul.f32 %v3486_v37, %v7676_v23  ;;  %v3526_v22 = vmul.f32 1.25, %v5721_v42 }
 0x353   : > { %v3206_v9 = vadd.f32 %v3198_v11, %v3174_v56  ;;  %v3510_v3 = vmul.f32 %v3502_v12, %v3094_v53  ;;  %v3542_v61 = vmul.f32 1.25, %v3126_v35  ;;  %v3566_v5 = vmul.f32 1.25, %v5729_v39 }
 0x354   : > { %v3254_v6 = vmul.f32 %v3246_v48, %v7742_v57  ;;  %v3534_v58 = vmul.f32 %v3526_v22, %v3094_v53  ;;  %v3582_v45 = vmul.f32 1.25, %v3182_v54  ;;  %v3606_v49 = vmul.f32 1.25, %v7748_v33 }
 0x355   : > { %v3518_v25 = vadd.f32 %v3510_v3, %v3494_v26  ;;  %v3550_v63 = vmul.f32 %v3542_v61, %v3150_v7  ;;  %v3574_v20 = vmul.f32 %v3566_v5, %v3150_v7  ;;  %v3622_v16 = vmul.f32 1.25, %v3238_v31 }
 0x356   : > { %v7763_v21 = vadd.f32 %v3254_v6, %v3230_v30  ;;  %v3590_v17 = vmul.f32 %v3582_v45, %v3206_v9  ;;  %v3614_v8 = vmul.f32 %v3606_v49, %v3206_v9  ;;  %v3806_v23 = vmul.f32 0.8333333, %v7666_v41 }
 0x357   : > { %v3558_v46 = vadd.f32 %v3550_v63, %v3534_v58  ;;  %v3822_v34 = vmul.f32 0.8333333, %v3070_v50  ;;  %v3846_v15 = vmul.f32 0.8333333, %v7671_v10  ;;  %v3862_v51 = vmul.f32 0.8333333, %v3126_v35 }
 0x358   : > { %v3598_v1 = vadd.f32 %v3590_v17, %v3574_v20  ;;  %v3630_v28 = vmul.f32 %v3622_v16, %v7763_v21  ;;  %v3814_v60 = vmul.f32 %v3806_v23, %v7681_v19  ;;  %v3886_v2 = vmul.f32 0.8333333, %v5721_v42 }
 0x359   : > { %v3830_v62 = vmul.f32 %v3822_v34, %v3518_v25  ;;  %v3854_v36 = vmul.f32 %v3846_v15, %v3518_v25  ;;  %v3870_v56 = vmul.f32 %v3862_v51, %v3558_v46  ;;  %v3902_v37 = vmul.f32 0.8333333, %v3182_v54 }
 0x35a   : > { %v3638_v53 = vadd.f32 %v3630_v28, %v3614_v8  ;;  %v3894_v11 = vmul.f32 %v3886_v2, %v3558_v46  ;;  %v3926_v30 = vmul.f32 0.8333333, %v5729_v39  ;;  %v3942_v12 = vmul.f32 0.8333333, %v3238_v31 }
 0x35b   : > { %v3838_v41 = vadd.f32 %v3830_v62, %v3814_v60  ;;  %v3878_v7 = vadd.f32 %v3870_v56, %v3854_v36  ;;  %v3910_v50 = vmul.f32 %v3902_v37, %v3598_v1  ;;  %vm2655_vm7 = vcmp.ge.f32.partialorder %v7583_v47, 2.2 }
 0x35c   : > { %v3934_v10 = vmul.f32 %v3926_v30, %v3598_v1  ;;  %v3950_v35 = vmul.f32 %v3942_v12, %v3638_v53  ;;  %v5674_v48 = vsel %vm2655_vm7, 1.0, %v8788_v32  ;;  %v5754_v19 = vadd.f32 -1.4, %v7583_v47 }
 0x35d   : > { %v4062_v42 = vrot.slane %v3878_v7, 4  ;;  %v2759_v26 = vsub.f32 %v7692_v13, %v5674_v48  ;;  %v3295_v54 = vsub.f32 2.2, %v7583_v47  ;;  %v3918_v22 = vadd.f32 %v3910_v50, %v3894_v11  ;;  %v7794_v11 = vld [vmem:[%s8730_s8] sm:$0xff] }
 0x35e   : > { %v3958_v9 = vadd.f32 %v3950_v35, %v3934_v10  ;;  %v3279_v39 = vmul.f32 2.5, %v5754_v19  ;;  %v3647_v31 = vmul.f32 1.25, %v7708_v14  ;;  %vm2654_vm8 = vcmp.ge.f32.partialorder %v7581_v38, 2.2 }
 0x35f   : > { %v3303_v3 = vmul.f32 2.5, %v3295_v54  ;;  %v4118_v5 = vsel %vm1999_vm9, %v3838_v41, %v4062_v42  ;;  %v3663_v58 = vmul.f32 1.25, %v3295_v54  ;;  %v5753_v49 = vadd.f32 -1.4, %v7581_v38 }
 0x360   : > { %v4086_v61 = vrot.slane %v3958_v9, 4  ;;  %v3287_v6 = vmul.f32 %v3279_v39, %v7697_v0  ;;  %v3294_v13 = vsub.f32 2.2, %v7581_v38  ;;  %v3655_v25 = vmul.f32 %v3647_v31, %v7719_v59 }
 0x361   : > { %v3311_v45 = vmul.f32 %v3303_v3, %v2759_v26  ;;  %v3967_v14 = vmul.f32 0.8333333, %v7704_v4  ;;  %v5673_v63 = vsel %vm2654_vm8, 1.0, %v8788_v32  ;;  %v3278_v17 = vmul.f32 2.5, %v5753_v49 }
 0x362   : > { %v4126_v47 = vsel %vm1999_vm9, %v3918_v22, %v4086_v61  ;;  %v2758_v0 = vsub.f32 %v7738_v44, %v5673_v63  ;;  %v3302_v8 = vmul.f32 2.5, %v3294_v13  ;;  %v3646_v23 = vmul.f32 1.25, %v7753_v55 }
 0x363   : > { %v5859_v20 = vpack.c.bf16 %v4126_v47, %v4118_v5  ;;  %v3319_v16 = vadd.f32 %v3311_v45, %v3287_v6  ;;  %v3983_v34 = vmul.f32 0.8333333, %v3295_v54  ;;  %v3286_v38 = vmul.f32 %v3278_v17, %v7742_v57 }
 0x364   : > { %v3310_v15 = vmul.f32 %v3302_v8, %v2758_v0  ;;  %v3662_v51 = vmul.f32 1.25, %v3294_v13  ;;  %v3975_v4 = vmul.f32 %v3967_v14, %v7725_v52  ;;  %v3654_v28 = vmul.f32 %v3646_v23, %v7763_v21 }
 0x365   : > { %5860 = vmatpush1.bf16.msra.mxu0 %v5859_v20  ;;  %v3671_v46 = vmul.f32 %v3663_v58, %v3319_v16  ;;  %v3966_v60 = vmul.f32 0.8333333, %v7748_v33  ;;  %v3982_v62 = vmul.f32 0.8333333, %v3294_v13  ;;  %vm4141_vm10 = vcmask 293888  }
 0x366   : > { %v3318_v1 = vadd.f32 %v3310_v15, %v3286_v38 }
 0x367   : > { %v3679_v59 = vadd.f32 %v3671_v46, %v3655_v25  ;;  %v3974_v56 = vmul.f32 %v3966_v60, %v3638_v53 }
 0x368   : > { %v3670_v2 = vmul.f32 %v3662_v51, %v3318_v1 }
 0x369   : > { %v3991_v44 = vmul.f32 %v3983_v34, %v3679_v59 }
 0x36a   : > { %v3678_v55 = vadd.f32 %v3670_v2, %v3654_v28 }
 0x36b   : > { %v3999_v36 = vadd.f32 %v3991_v44, %v3975_v4 }
 0x36c   : > { %v3990_v37 = vmul.f32 %v3982_v62, %v3678_v55 }
 0x36d   : > { %5761 = vmatprep.subr.msk.mxu0 %vm1999_vm9, %v3999_v36 }
 0x36e   : > { %v3998_v57 = vadd.f32 %v3990_v37, %v3974_v56 }
 0x370   : > { %5762 = vmatpush1.msk.msra.mxu0 %vm1999_vm9, %v3998_v57 }
 0x371   : > { %5763 = vmatmul.mubr.msk.f32.vlgmr.msra.gmra.mrb[2].mxu0 %vm4141_vm10, %v7794_v11 }
 0x372   : > { %4723 = vmatprep.mubr.f32.mxu0 %v8788_v32 }
 0x375   : > { %v2156_v52 = vpop.f32.mrb[2].mxu1 }
 0x376   : > { %v2157_v33 = vadd.f32 %v2156_v52, %v7577_v18  ;;  %v2158_v21 = vpop.f32.mrb[3].mxu1 }
 0x377   : > { %v2159_v53 = vadd.f32 %v2158_v21, %v7577_v18 }
 0x378   : > { %v7802_v30 = vmax.f32 %v2157_v33, 0.0 }
 0x379   : > { %v7804_v12 = vmax.f32 %v2159_v53, 0.0  ;;  %v2237_v41 = vpop.f32.mrb[4].mxu1 }
 0x37a   : > { %v2238_v7 = vadd.f32 %v2237_v41, %v7577_v18  ;;  %v2239_v50 = vpop.f32.mrb[5].mxu1  ;;  %v7815_v42 = vmul.f32 -1.442695, %v7802_v30  ;;  %vm2392_vm6 = vcmp.ge.f32.partialorder %v7802_v30, -2.2  ;;  %vm2464_vm7 = vcmp.ge.f32.partialorder %v7802_v30, -1.0 }
 0x37b   : > { %v2240_v10 = vadd.f32 %v2239_v50, %v7577_v18  ;;  %v5580_v35 = vmul.f32 -1.442695, %v7804_v12  ;;  %vm2393_vm11 = vcmp.ge.f32.partialorder %v7804_v12, -2.2  ;;  %vm2417_vm12 = vcmp.ge.f32.partialorder %v7804_v12, -1.8 }
 0x37c   : > { %v5588_v48 = vsel %vm2393_vm11, 1.0, %v8788_v32  ;;  %v5596_v19 = vsel %vm2417_vm12, 1.0, %v8788_v32  ;;  %vm2441_vm13 = vcmp.ge.f32.partialorder %v7804_v12, -1.4  ;;  %v7817_v26 = vmax.f32 %v2238_v7, 0.0 }
 0x37d   : > { %6002 = vpow2.f32 %v5580_v35  ;;  %v5604_v54 = vsel %vm2441_vm13, 1.0, %v8788_v32  ;;  %vm2465_vm14 = vcmp.ge.f32.partialorder %v7804_v12, -1.0  ;;  %v7821_v22 = vmax.f32 %v2240_v10, 0.0 }
 0x37e   : > { %v5612_v9 = vsel %vm2465_vm14, 1.0, %v8788_v32  ;;  %vm2489_vm0 = vcmp.ge.f32.partialorder %v7804_v12, -0.6  ;;  %vm2513_vm1 = vcmp.ge.f32.partialorder %v7804_v12, -0.2  ;;  %v2681_v3 = vsub.f32 %v5588_v48, %v5596_v19 }
 0x37f   : > { %v5620_v39 = vsel %vm2489_vm0, 1.0, %v8788_v32  ;;  %v5628_v31 = vsel %vm2513_vm1, 1.0, %v8788_v32  ;;  %vm2537_vm3 = vcmp.ge.f32.partialorder %v7804_v12, 0.2  ;;  %v2689_v5 = vsub.f32 %v5596_v19, %v5604_v54 }
 0x380   : > { %v7830_v61 = vsel %vm2537_vm3, 1.0, %v8788_v32  ;;  %v2697_v6 = vsub.f32 %v5604_v54, %v5612_v9  ;;  %v2705_v58 = vsub.f32 %v5612_v9, %v5620_v39  ;;  %v2713_v49 = vsub.f32 %v5620_v39, %v5628_v31 }
 0x381   : > { %v2321_v45 = vpop.f32.mrb[6].mxu1  ;;  %v5684_v13 = vadd.f32 2.2, %v7804_v12  ;;  %v2793_v47 = vsub.f32 -1.4, %v7804_v12  ;;  %v2849_v25 = vsub.f32 -1.0, %v7804_v12  ;;  %v7844_v17 = vsub.f32 %v5628_v31, %v7830_v61 }
 0x382   : > { %v2322_v14 = vadd.f32 %v2321_v45, %v7577_v18  ;;  %v2323_v63 = vpop.f32.mrb[7].mxu1  ;;  %v5692_v20 = vadd.f32 1.8, %v7804_v12  ;;  %v7838_v16 = vadd.f32 1.4, %v7804_v12  ;;  %v7841_v0 = vadd.f32 1.0, %v7804_v12 }
 0x383   : > { %v2777_v8 = vmul.f32 2.5, %v5684_v13  ;;  %v2801_v23 = vmul.f32 2.5, %v2793_v47  ;;  %v2857_v46 = vmul.f32 2.5, %v2849_v25  ;;  %v7847_v34 = vadd.f32 %v2323_v63, %v7577_v18 }
 0x384   : > { %v2833_v38 = vmul.f32 2.5, %v5692_v20  ;;  %v2889_v15 = vmul.f32 2.5, %v7838_v16  ;;  %v2905_v51 = vsub.f32 -0.6, %v7804_v12  ;;  %v7851_v59 = vmax.f32 %v2322_v14, 0.0 }
 0x385   : > { %v2785_v4 = vmul.f32 %v2777_v8, %v2681_v3  ;;  %v2809_v1 = vmul.f32 %v2801_v23, %v2689_v5  ;;  %v2865_v28 = vmul.f32 %v2857_v46, %v2697_v6  ;;  %v2945_v62 = vmul.f32 2.5, %v7841_v0 }
 0x386   : > { %v2841_v60 = vmul.f32 %v2833_v38, %v2689_v5  ;;  %v2897_v44 = vmul.f32 %v2889_v15, %v2697_v6  ;;  %v2913_v2 = vmul.f32 2.5, %v2905_v51  ;;  %v2961_v18 = vsub.f32 -0.2, %v7804_v12 }
 0x387   : > { %v6003_v36 = vpop.eup %6002  ;;  %v2817_v55 = vadd.f32 %v2809_v1, %v2785_v4  ;;  %v7856_v56 = vadd.f32 0.6, %v7804_v12  ;;  %v3017_v37 = vsub.f32 0.2, %v7804_v12  ;;  %v2953_v21 = vmul.f32 %v2945_v62, %v2705_v58 }
 0x388   : > { %v2361_v57 = vadd.f32 1.0, %v6003_v36  ;;  %v2873_v52 = vadd.f32 %v2865_v28, %v2841_v60  ;;  %v2921_v33 = vmul.f32 %v2913_v2, %v2705_v58  ;;  %v2969_v53 = vmul.f32 2.5, %v2961_v18 }
 0x389   : > { %v3001_v41 = vmul.f32 2.5, %v7856_v56  ;;  %v3025_v7 = vmul.f32 2.5, %v3017_v37  ;;  %v3329_v50 = vmul.f32 1.25, %v5684_v13  ;;  %v3345_v35 = vmul.f32 1.25, %v2849_v25 }
 0x38a   : > { %6004 = vrcp.f32 %v2361_v57  ;;  %v2929_v10 = vadd.f32 %v2921_v33, %v2897_v44  ;;  %v3369_v48 = vmul.f32 1.25, %v5692_v20  ;;  %v2977_v19 = vmul.f32 %v2969_v53, %v2713_v49 }
 0x38b   : > { %v3009_v54 = vmul.f32 %v3001_v41, %v2713_v49  ;;  %v3033_v9 = vmul.f32 %v3025_v7, %v7844_v17  ;;  %v3337_v39 = vmul.f32 %v3329_v50, %v2817_v55  ;;  %v3353_v31 = vmul.f32 %v3345_v35, %v2873_v52 }
 0x38c   : > { %v3377_v3 = vmul.f32 %v3369_v48, %v2873_v52  ;;  %v3385_v5 = vmul.f32 1.25, %v2905_v51  ;;  %v3409_v6 = vmul.f32 1.25, %v7838_v16  ;;  %v2985_v58 = vadd.f32 %v2977_v19, %v2953_v21 }
 0x38d   : > { %v7864_v45 = vadd.f32 %v3033_v9, %v3009_v54  ;;  %v3425_v47 = vmul.f32 1.25, %v2961_v18  ;;  %v3449_v14 = vmul.f32 1.25, %v7841_v0  ;;  %v3361_v25 = vadd.f32 %v3353_v31, %v3337_v39 }
 0x38e   : > { %v3393_v63 = vmul.f32 %v3385_v5, %v2929_v10  ;;  %v3417_v8 = vmul.f32 %v3409_v6, %v2929_v10  ;;  %v3465_v23 = vmul.f32 1.25, %v3017_v37  ;;  %v3689_v38 = vmul.f32 0.8333333, %v5684_v13 }
 0x38f   : > { %v3433_v46 = vmul.f32 %v3425_v47, %v2985_v58  ;;  %v3457_v49 = vmul.f32 %v3449_v14, %v2985_v58  ;;  %v3705_v15 = vmul.f32 0.8333333, %v2905_v51  ;;  %v3729_v28 = vmul.f32 0.8333333, %v5692_v20 }
 0x390   : > { %v3401_v4 = vadd.f32 %v3393_v63, %v3377_v3  ;;  %v3473_v1 = vmul.f32 %v3465_v23, %v7864_v45  ;;  %v3745_v60 = vmul.f32 0.8333333, %v2961_v18  ;;  %v3697_v2 = vmul.f32 %v3689_v38, %v3361_v25 }
 0x391   : > { %v3441_v44 = vadd.f32 %v3433_v46, %v3417_v8  ;;  %v3769_v62 = vmul.f32 0.8333333, %v7838_v16  ;;  %v3785_v36 = vmul.f32 0.8333333, %v3017_v37  ;;  %6006 = vpow2.f32 %v7815_v42 }
 0x392   : > { %v7869_v55 = vadd.f32 %v3473_v1, %v3457_v49  ;;  %v3713_v57 = vmul.f32 %v3705_v15, %v3401_v4  ;;  %v3737_v52 = vmul.f32 %v3729_v28, %v3401_v4  ;;  %v5587_v13 = vsel %vm2392_vm6, 1.0, %v8788_v32 }
 0x393   : > { %v3753_v33 = vmul.f32 %v3745_v60, %v3441_v44  ;;  %v3777_v21 = vmul.f32 %v3769_v62, %v3441_v44  ;;  %vm2416_vm8 = vcmp.ge.f32.partialorder %v7802_v30, -1.8  ;;  %vm2440_vm11 = vcmp.ge.f32.partialorder %v7802_v30, -1.4 }
 0x394   : > { %v6005_v20 = vpop.eup %6004  ;;  %v3721_v51 = vadd.f32 %v3713_v57, %v3697_v2  ;;  %v3793_v18 = vmul.f32 %v3785_v36, %v7869_v55  ;;  %v5595_v16 = vsel %vm2416_vm8, 1.0, %v8788_v32  ;;  %v5603_v42 = vsel %vm2440_vm11, 1.0, %v8788_v32 }
 0x395   : > { %v2385_v37 = vmul.f32 %v6005_v20, %v7804_v12  ;;  %v3761_v53 = vadd.f32 %v3753_v33, %v3737_v52  ;;  %v5611_v41 = vsel %vm2464_vm7, 1.0, %v8788_v32  ;;  %vm2488_vm12 = vcmp.ge.f32.partialorder %v7802_v30, -0.6 }
 0x396   : > { %v3801_v7 = vadd.f32 %v3793_v18, %v3777_v21  ;;  %v4017_v50 = vrot.slane %v3721_v51, 4  ;;  %vm2512_vm13 = vcmp.ge.f32.partialorder %v7802_v30, -0.2  ;;  %v5619_v10 = vsel %vm2488_vm12, 1.0, %v8788_v32 }
 0x397   : > { %v5627_v35 = vsel %vm2512_vm13, 1.0, %v8788_v32  ;;  %vm2536_vm14 = vcmp.ge.f32.partialorder %v7802_v30, 0.2  ;;  %v2680_v48 = vsub.f32 %v5587_v13, %v5595_v16  ;;  %v2688_v39 = vsub.f32 %v5595_v16, %v5603_v42 }
 0x398   : > { %v4041_v19 = vrot.slane %v3801_v7, 4  ;;  %v4105_v54 = vsel %vm1999_vm9, %v2385_v37, %v4017_v50  ;;  %v7891_v9 = vsel %vm2536_vm14, 1.0, %v8788_v32  ;;  %v2696_v31 = vsub.f32 %v5603_v42, %v5611_v41 }
 0x399   : > { %v2704_v3 = vsub.f32 %v5611_v41, %v5619_v10  ;;  %v2712_v5 = vsub.f32 %v5619_v10, %v5627_v35  ;;  %v7894_v6 = vsub.f32 %v5627_v35, %v7891_v9  ;;  %v5683_v47 = vadd.f32 2.2, %v7802_v30 }
 0x39a   : > { %v4113_v58 = vsel %vm1999_vm9, %v3761_v53, %v4041_v19  ;;  %v2792_v14 = vsub.f32 -1.4, %v7802_v30  ;;  %v5691_v25 = vadd.f32 1.8, %v7802_v30  ;;  %v2848_v8 = vsub.f32 -1.0, %v7802_v30 }
 0x39b   : > { %v5861_v63 = vpack.c.bf16 %v4113_v58, %v4105_v54  ;;  %v5699_v23 = vadd.f32 1.4, %v7802_v30  ;;  %v2904_v46 = vsub.f32 -0.6, %v7802_v30  ;;  %v6007_v49 = vpop.eup %6006  ;;  %v2776_v38 = vmul.f32 2.5, %v5683_v47 }
 0x39c   : > { %v2800_v15 = vmul.f32 2.5, %v2792_v14  ;;  %v2832_v4 = vmul.f32 2.5, %v5691_v25  ;;  %v7904_v1 = vadd.f32 1.0, %v7802_v30  ;;  %v2360_v28 = vadd.f32 1.0, %v6007_v49 }
 0x39d   : > { %5862 = vmatprep.subr.bf16.mxu1 %v5861_v63  ;;  %v2856_v60 = vmul.f32 2.5, %v2848_v8  ;;  %v2888_v44 = vmul.f32 2.5, %v5699_v23  ;;  %v2912_v2 = vmul.f32 2.5, %v2904_v46  ;;  %v2784_v62 = vmul.f32 %v2776_v38, %v2680_v48 }
 0x39e   : > { %v2808_v36 = vmul.f32 %v2800_v15, %v2688_v39  ;;  %v2840_v57 = vmul.f32 %v2832_v4, %v2688_v39  ;;  %v2944_v52 = vmul.f32 2.5, %v7904_v1  ;;  %6008 = vrcp.f32 %v2360_v28 }
 0x39f   : > { %v2864_v33 = vmul.f32 %v2856_v60, %v2696_v31  ;;  %v2896_v21 = vmul.f32 %v2888_v44, %v2696_v31  ;;  %v2920_v13 = vmul.f32 %v2912_v2, %v2704_v3  ;;  %v2960_v18 = vsub.f32 -0.2, %v7802_v30 }
 0x3a0   : > { %v2816_v20 = vadd.f32 %v2808_v36, %v2784_v62  ;;  %v2952_v51 = vmul.f32 %v2944_v52, %v2704_v3  ;;  %v7909_v16 = vadd.f32 0.6, %v7802_v30  ;;  %v3016_v42 = vsub.f32 0.2, %v7802_v30 }
 0x3a1   : > { %v2872_v37 = vadd.f32 %v2864_v33, %v2840_v57  ;;  %v2928_v53 = vadd.f32 %v2920_v13, %v2896_v21  ;;  %v3328_v41 = vmul.f32 1.25, %v5683_v47  ;;  %v2968_v7 = vmul.f32 2.5, %v2960_v18 }
 0x3a2   : > { %v3000_v50 = vmul.f32 2.5, %v7909_v16  ;;  %v3344_v10 = vmul.f32 1.25, %v2848_v8  ;;  %v3368_v35 = vmul.f32 1.25, %v5691_v25  ;;  %v3024_v48 = vmul.f32 2.5, %v3016_v42 }
 0x3a3   : > { %v3336_v19 = vmul.f32 %v3328_v41, %v2816_v20  ;;  %v3384_v54 = vmul.f32 1.25, %v2904_v46  ;;  %v3408_v39 = vmul.f32 1.25, %v5699_v23  ;;  %v2976_v31 = vmul.f32 %v2968_v7, %v2712_v5 }
 0x3a4   : > { %v3008_v3 = vmul.f32 %v3000_v50, %v2712_v5  ;;  %v3352_v58 = vmul.f32 %v3344_v10, %v2872_v37  ;;  %v3376_v14 = vmul.f32 %v3368_v35, %v2872_v37  ;;  %v3032_v63 = vmul.f32 %v3024_v48, %v7894_v6 }
 0x3a5   : > { %v3392_v49 = vmul.f32 %v3384_v54, %v2928_v53  ;;  %v3416_v38 = vmul.f32 %v3408_v39, %v2928_v53  ;;  %v3424_v15 = vmul.f32 1.25, %v2960_v18  ;;  %v2984_v4 = vadd.f32 %v2976_v31, %v2952_v51 }
 0x3a6   : > { %v3360_v28 = vadd.f32 %v3352_v58, %v3336_v19  ;;  %v3448_v60 = vmul.f32 1.25, %v7904_v1  ;;  %v3464_v44 = vmul.f32 1.25, %v3016_v42  ;;  %v7915_v8 = vadd.f32 %v3032_v63, %v3008_v3 }
 0x3a7   : > { %v3400_v2 = vadd.f32 %v3392_v49, %v3376_v14  ;;  %v3688_v62 = vmul.f32 0.8333333, %v5683_v47  ;;  %v3704_v36 = vmul.f32 0.8333333, %v2904_v46  ;;  %v3432_v57 = vmul.f32 %v3424_v15, %v2984_v4 }
 0x3a8   : > { %v3456_v52 = vmul.f32 %v3448_v60, %v2984_v4  ;;  %v3728_v5 = vmul.f32 0.8333333, %v5691_v25  ;;  %v3744_v33 = vmul.f32 0.8333333, %v2960_v18  ;;  %v6009_v21 = vpop.eup %6008  ;;  %v3472_v13 = vmul.f32 %v3464_v44, %v7915_v8 }
 0x3a9   : > { %v3696_v20 = vmul.f32 %v3688_v62, %v3360_v28  ;;  %v3712_v37 = vmul.f32 %v3704_v36, %v3400_v2  ;;  %v3768_v53 = vmul.f32 0.8333333, %v5699_v23  ;;  %v2384_v51 = vmul.f32 %v6009_v21, %v7802_v30 }
 0x3aa   : > { %v3440_v41 = vadd.f32 %v3432_v57, %v3416_v38  ;;  %v3736_v7 = vmul.f32 %v3728_v5, %v3400_v2  ;;  %v3784_v50 = vmul.f32 0.8333333, %v3016_v42  ;;  %v7919_v10 = vadd.f32 %v3472_v13, %v3456_v52 }
 0x3ab   : > { %v3720_v35 = vadd.f32 %v3712_v37, %v3696_v20  ;;  %vm2561_vm0 = vcmp.ge.f32.partialorder %v7804_v12, 0.6  ;;  %vm2585_vm1 = vcmp.ge.f32.partialorder %v7804_v12, 1.0  ;;  %vm2609_vm3 = vcmp.ge.f32.partialorder %v7804_v12, 1.4 }
 0x3ac   : > { %v3752_v47 = vmul.f32 %v3744_v33, %v3440_v41  ;;  %v3776_v25 = vmul.f32 %v3768_v53, %v3440_v41  ;;  %v5644_v46 = vsel %vm2561_vm0, 1.0, %v8788_v32  ;;  %v5652_v18 = vsel %vm2585_vm1, 1.0, %v8788_v32 }
 0x3ad   : > { %v3792_v23 = vmul.f32 %v3784_v50, %v7919_v10  ;;  %v4016_v48 = vrot.slane %v3720_v35, 4  ;;  %vm2633_vm6 = vcmp.ge.f32.partialorder %v7804_v12, 1.8  ;;  %v5660_v19 = vsel %vm2609_vm3, 1.0, %v8788_v32 }
 0x3ae   : > { %v3760_v42 = vadd.f32 %v3752_v47, %v3736_v7  ;;  %v7930_v54 = vsel %vm2633_vm6, 1.0, %v8788_v32  ;;  %v2729_v39 = vsub.f32 %v7830_v61, %v5644_v46  ;;  %v2737_v58 = vsub.f32 %v5644_v46, %v5652_v18 }
 0x3af   : > { %v3800_v31 = vadd.f32 %v3792_v23, %v3776_v25  ;;  %v4104_v3 = vsel %vm1999_vm9, %v2384_v51, %v4016_v48  ;;  %v2745_v14 = vsub.f32 %v5652_v18, %v5660_v19  ;;  %v7935_v63 = vsub.f32 %v5660_v19, %v7930_v54 }
 0x3b0   : > { %v5724_v49 = vadd.f32 0.2, %v7804_v12  ;;  %v3073_v38 = vsub.f32 0.6, %v7804_v12  ;;  %v5732_v15 = vadd.f32 -0.2, %v7804_v12 }
 0x3b1   : > { %v4040_v4 = vrot.slane %v3800_v31, 4  ;;  %v3129_v28 = vsub.f32 1.0, %v7804_v12  ;;  %v7942_v60 = vadd.f32 -0.6, %v7804_v12  ;;  %v3185_v61 = vsub.f32 1.4, %v7804_v12 }
 0x3b2   : > { %v3057_v44 = vmul.f32 2.5, %v5724_v49  ;;  %v3081_v2 = vmul.f32 2.5, %v3073_v38  ;;  %v3113_v62 = vmul.f32 2.5, %v5732_v15  ;;  %v7946_v36 = vadd.f32 -1.0, %v7804_v12 }
 0x3b3   : > { %v4112_v57 = vsel %vm1999_vm9, %v3760_v42, %v4040_v4  ;;  %v3137_v52 = vmul.f32 2.5, %v3129_v28  ;;  %v3169_v5 = vmul.f32 2.5, %v7942_v60  ;;  %v3193_v33 = vmul.f32 2.5, %v3185_v61 }
 0x3b4   : > { %v5863_v21 = vpack.c.bf16 %v4112_v57, %v4104_v3  ;;  %v3065_v13 = vmul.f32 %v3057_v44, %v7844_v17  ;;  %v3089_v20 = vmul.f32 %v3081_v2, %v2729_v39  ;;  %v3121_v37 = vmul.f32 %v3113_v62, %v2729_v39 }
 0x3b5   : > { %v3145_v53 = vmul.f32 %v3137_v52, %v2737_v58  ;;  %v3177_v51 = vmul.f32 %v3169_v5, %v2737_v58  ;;  %v3201_v41 = vmul.f32 %v3193_v33, %v2745_v14  ;;  %v3225_v7 = vmul.f32 2.5, %v7946_v36 }
 0x3b6   : > { %5864 = vmatpush1.bf16.msra.mxu1 %v5863_v21  ;;  %v3097_v50 = vadd.f32 %v3089_v20, %v3065_v13  ;;  %v3241_v35 = vsub.f32 1.8, %v7804_v12  ;;  %v3489_v47 = vmul.f32 1.25, %v7856_v56  ;;  %v3505_v25 = vmul.f32 1.25, %v3073_v38 }
 0x3b7   : > { %v3153_v46 = vadd.f32 %v3145_v53, %v3121_v37  ;;  %v3209_v18 = vadd.f32 %v3201_v41, %v3177_v51  ;;  %v3233_v23 = vmul.f32 %v3225_v7, %v2745_v14  ;;  %v3529_v48 = vmul.f32 1.25, %v5724_v49 }
 0x3b8   : > { %v3249_v42 = vmul.f32 2.5, %v3241_v35  ;;  %v3497_v17 = vmul.f32 %v3489_v47, %v7864_v45  ;;  %v3513_v19 = vmul.f32 %v3505_v25, %v3097_v50  ;;  %v3545_v39 = vmul.f32 1.25, %v3129_v28 }
 0x3b9   : > { %v3537_v31 = vmul.f32 %v3529_v48, %v3097_v50  ;;  %v3569_v3 = vmul.f32 1.25, %v5732_v15  ;;  %v3585_v58 = vmul.f32 1.25, %v3185_v61  ;;  %v3609_v4 = vmul.f32 1.25, %v7942_v60 }
 0x3ba   : > { %v3257_v44 = vmul.f32 %v3249_v42, %v7935_v63  ;;  %v3521_v2 = vadd.f32 %v3513_v19, %v3497_v17  ;;  %v3553_v62 = vmul.f32 %v3545_v39, %v3153_v46  ;;  %v3625_v57 = vmul.f32 1.25, %v3241_v35 }
 0x3bb   : > { %v3577_v52 = vmul.f32 %v3569_v3, %v3153_v46  ;;  %v3593_v5 = vmul.f32 %v3585_v58, %v3209_v18  ;;  %v3617_v33 = vmul.f32 %v3609_v4, %v3209_v18  ;;  %v3809_v14 = vmul.f32 0.8333333, %v7841_v0 }
 0x3bc   : > { %v7958_v21 = vadd.f32 %v3257_v44, %v3233_v23  ;;  %v3561_v45 = vadd.f32 %v3553_v62, %v3537_v31  ;;  %v3825_v13 = vmul.f32 0.8333333, %v3073_v38  ;;  %v3849_v20 = vmul.f32 0.8333333, %v7856_v56 }
 0x3bd   : > { %v3601_v37 = vadd.f32 %v3593_v5, %v3577_v52  ;;  %v3817_v53 = vmul.f32 %v3809_v14, %v7869_v55  ;;  %v3865_v51 = vmul.f32 0.8333333, %v3129_v28  ;;  %v3889_v41 = vmul.f32 0.8333333, %v5724_v49 }
 0x3be   : > { %v3633_v7 = vmul.f32 %v3625_v57, %v7958_v21  ;;  %v3833_v50 = vmul.f32 %v3825_v13, %v3521_v2  ;;  %v3857_v47 = vmul.f32 %v3849_v20, %v3521_v2  ;;  %v3905_v25 = vmul.f32 0.8333333, %v3185_v61 }
 0x3bf   : > { %v3873_v46 = vmul.f32 %v3865_v51, %v3561_v45  ;;  %v3897_v18 = vmul.f32 %v3889_v41, %v3561_v45  ;;  %v3929_v48 = vmul.f32 0.8333333, %v5732_v15  ;;  %v3945_v0 = vmul.f32 0.8333333, %v3241_v35 }
 0x3c0   : > { %v7963_v23 = vadd.f32 %v3633_v7, %v3617_v33  ;;  %v3841_v42 = vadd.f32 %v3833_v50, %v3817_v53  ;;  %v3913_v38 = vmul.f32 %v3905_v25, %v3601_v37  ;;  %vm2560_vm7 = vcmp.ge.f32.partialorder %v7802_v30, 0.6 }
 0x3c1   : > { %v3881_v56 = vadd.f32 %v3873_v46, %v3857_v47  ;;  %v3937_v17 = vmul.f32 %v3929_v48, %v3601_v37  ;;  %v5643_v55 = vsel %vm2560_vm7, 1.0, %v8788_v32  ;;  %vm2584_vm8 = vcmp.ge.f32.partialorder %v7802_v30, 1.0 }
 0x3c2   : > { %v3921_v49 = vadd.f32 %v3913_v38, %v3897_v18  ;;  %v3953_v28 = vmul.f32 %v3945_v0, %v7963_v23  ;;  %v5651_v61 = vsel %vm2584_vm8, 1.0, %v8788_v32  ;;  %vm2608_vm11 = vcmp.ge.f32.partialorder %v7802_v30, 1.4 }
 0x3c3   : > { %v4065_v15 = vrot.slane %v3881_v56, 4  ;;  %v5659_v35 = vsel %vm2608_vm11, 1.0, %v8788_v32  ;;  %vm2632_vm12 = vcmp.ge.f32.partialorder %v7802_v30, 1.8  ;;  %v2728_v19 = vsub.f32 %v7891_v9, %v5643_v55 }
 0x3c4   : > { %v3961_v39 = vadd.f32 %v3953_v28, %v3937_v17  ;;  %v7975_v31 = vsel %vm2632_vm12, 1.0, %v8788_v32  ;;  %v2736_v3 = vsub.f32 %v5643_v55, %v5651_v61  ;;  %v2744_v58 = vsub.f32 %v5651_v61, %v5659_v35 }
 0x3c5   : > { %v4121_v4 = vsel %vm1999_vm9, %v3841_v42, %v4065_v15  ;;  %v7979_v44 = vsub.f32 %v5659_v35, %v7975_v31  ;;  %v5723_v2 = vadd.f32 0.2, %v7802_v30  ;;  %v3072_v62 = vsub.f32 0.6, %v7802_v30 }
 0x3c6   : > { %v4089_v57 = vrot.slane %v3961_v39, 4  ;;  %v5731_v52 = vadd.f32 -0.2, %v7802_v30  ;;  %v3128_v9 = vsub.f32 1.0, %v7802_v30  ;;  %v7986_v5 = vadd.f32 -0.6, %v7802_v30 }
 0x3c7   : > { %v3056_v33 = vmul.f32 2.5, %v5723_v2  ;;  %v3080_v14 = vmul.f32 2.5, %v3072_v62  ;;  %v3184_v45 = vsub.f32 1.4, %v7802_v30  ;;  %v7990_v13 = vadd.f32 -1.0, %v7802_v30 }
 0x3c8   : > { %v4129_v20 = vsel %vm1999_vm9, %v3921_v49, %v4089_v57  ;;  %v3112_v37 = vmul.f32 2.5, %v5731_v52  ;;  %v3136_v53 = vmul.f32 2.5, %v3128_v9  ;;  %v3168_v51 = vmul.f32 2.5, %v7986_v5 }
 0x3c9   : > { %v5865_v41 = vpack.c.bf16 %v4129_v20, %v4121_v4  ;;  %v3064_v7 = vmul.f32 %v3056_v33, %v7894_v6  ;;  %v3088_v50 = vmul.f32 %v3080_v14, %v2728_v19  ;;  %v3192_v47 = vmul.f32 2.5, %v3184_v45 }
 0x3ca   : > { %v3120_v25 = vmul.f32 %v3112_v37, %v2728_v19  ;;  %v3144_v46 = vmul.f32 %v3136_v53, %v2736_v3  ;;  %v3176_v18 = vmul.f32 %v3168_v51, %v2736_v3  ;;  %v3224_v48 = vmul.f32 2.5, %v7990_v13 }
 0x3cb   : > { %5866 = vmatprep.subr.bf16.mxu1 %v5865_v41  ;;  %v3096_v0 = vadd.f32 %v3088_v50, %v3064_v7  ;;  %v3200_v42 = vmul.f32 %v3192_v47, %v2744_v58  ;;  %v3240_v38 = vsub.f32 1.8, %v7802_v30  ;;  %v3488_v56 = vmul.f32 1.25, %v7909_v16 }
 0x3cc   : > { %v3152_v17 = vadd.f32 %v3144_v46, %v3120_v25  ;;  %v3232_v55 = vmul.f32 %v3224_v48, %v2744_v58  ;;  %v3504_v49 = vmul.f32 1.25, %v3072_v62  ;;  %v3528_v28 = vmul.f32 1.25, %v5723_v2 }
 0x3cd   : > { %v3208_v61 = vadd.f32 %v3200_v42, %v3176_v18  ;;  %v3248_v6 = vmul.f32 2.5, %v3240_v38  ;;  %v3496_v15 = vmul.f32 %v3488_v56, %v7915_v8  ;;  %v3544_v35 = vmul.f32 1.25, %v3128_v9 }
 0x3ce   : > { %v3512_v19 = vmul.f32 %v3504_v49, %v3096_v0  ;;  %v3536_v39 = vmul.f32 %v3528_v28, %v3096_v0  ;;  %v3568_v3 = vmul.f32 1.25, %v5731_v52  ;;  %v3584_v4 = vmul.f32 1.25, %v3184_v45 }
 0x3cf   : > { %v3256_v57 = vmul.f32 %v3248_v6, %v7979_v44  ;;  %v3552_v33 = vmul.f32 %v3544_v35, %v3152_v17  ;;  %v3608_v14 = vmul.f32 1.25, %v7986_v5  ;;  %v3624_v20 = vmul.f32 1.25, %v3240_v38 }
 0x3d0   : > { %v3520_v37 = vadd.f32 %v3512_v19, %v3496_v15  ;;  %v3576_v53 = vmul.f32 %v3568_v3, %v3152_v17  ;;  %v3592_v58 = vmul.f32 %v3584_v4, %v3208_v61  ;;  %v3808_v51 = vmul.f32 0.8333333, %v7904_v1 }
 0x3d1   : > { %v3264_v41 = vadd.f32 %v3256_v57, %v3232_v55  ;;  %v3560_v7 = vadd.f32 %v3552_v33, %v3536_v39  ;;  %v3616_v50 = vmul.f32 %v3608_v14, %v3208_v61  ;;  %v3824_v8 = vmul.f32 0.8333333, %v3072_v62 }
 0x3d2   : > { %v3600_v47 = vadd.f32 %v3592_v58, %v3576_v53  ;;  %v3816_v25 = vmul.f32 %v3808_v51, %v7919_v10  ;;  %v3848_v46 = vmul.f32 0.8333333, %v7909_v16  ;;  %v3864_v18 = vmul.f32 0.8333333, %v3128_v9 }
 0x3d3   : > { %v3632_v48 = vmul.f32 %v3624_v20, %v3264_v41  ;;  %v3832_v0 = vmul.f32 %v3824_v8, %v3520_v37  ;;  %v3888_v42 = vmul.f32 0.8333333, %v5723_v2  ;;  %v3904_v56 = vmul.f32 0.8333333, %v3184_v45 }
 0x3d4   : > { %v3856_v49 = vmul.f32 %v3848_v46, %v3520_v37  ;;  %v3872_v28 = vmul.f32 %v3864_v18, %v3560_v7  ;;  %v3928_v17 = vmul.f32 0.8333333, %v5731_v52  ;;  %v3944_v6 = vmul.f32 0.8333333, %v3240_v38 }
 0x3d5   : > { %v3640_v15 = vadd.f32 %v3632_v48, %v3616_v50  ;;  %v3840_v1 = vadd.f32 %v3832_v0, %v3816_v25  ;;  %v3896_v55 = vmul.f32 %v3888_v42, %v3560_v7  ;;  %v3912_v35 = vmul.f32 %v3904_v56, %v3600_v47 }
 0x3d6   : > { %v3880_v61 = vadd.f32 %v3872_v28, %v3856_v49  ;;  %v3936_v62 = vmul.f32 %v3928_v17, %v3600_v47  ;;  %vm2657_vm13 = vcmp.ge.f32.partialorder %v7804_v12, 2.2  ;;  %v5756_v10 = vadd.f32 -1.4, %v7804_v12 }
 0x3d7   : > { %v3920_v16 = vadd.f32 %v3912_v35, %v3896_v55  ;;  %v3952_v9 = vmul.f32 %v3944_v6, %v3640_v15  ;;  %v5676_v19 = vsel %vm2657_vm13, 1.0, %v8788_v32  ;;  %v3297_v2 = vsub.f32 2.2, %v7804_v12 }
 0x3d8   : > { %v4064_v45 = vrot.slane %v3880_v61, 4  ;;  %v2761_v52 = vsub.f32 %v7930_v54, %v5676_v19  ;;  %v3281_v38 = vmul.f32 2.5, %v5756_v10  ;;  %v3649_v39 = vmul.f32 1.25, %v7946_v36 }
 0x3d9   : > { %v3960_v3 = vadd.f32 %v3952_v9, %v3936_v62  ;;  %v3305_v4 = vmul.f32 2.5, %v3297_v2  ;;  %v3665_v57 = vmul.f32 1.25, %v3297_v2  ;;  %v3969_v33 = vmul.f32 0.8333333, %v7942_v60 }
 0x3da   : > { %v4120_v14 = vsel %vm1999_vm9, %v3840_v1, %v4064_v45  ;;  %v3289_v20 = vmul.f32 %v3281_v38, %v7935_v63  ;;  %v3657_v37 = vmul.f32 %v3649_v39, %v7958_v21  ;;  %v3985_v53 = vmul.f32 0.8333333, %v3297_v2 }
 0x3db   : > { %v4088_v58 = vrot.slane %v3960_v3, 4  ;;  %v3313_v12 = vmul.f32 %v3305_v4, %v2761_v52  ;;  %v3977_v51 = vmul.f32 %v3969_v33, %v7963_v23  ;;  %vm2656_vm14 = vcmp.ge.f32.partialorder %v7802_v30, 2.2 }
 0x3dc   : > { %v5675_v54 = vsel %vm2656_vm14, 1.0, %v8788_v32  ;;  %v5755_v36 = vadd.f32 -1.4, %v7802_v30  ;;  %v3296_v7 = vsub.f32 2.2, %v7802_v30  ;;  %v3648_v60 = vmul.f32 1.25, %v7990_v13 }
 0x3dd   : > { %v4128_v50 = vsel %vm1999_vm9, %v3920_v16, %v4088_v58  ;;  %v3321_v63 = vadd.f32 %v3313_v12, %v3289_v20  ;;  %v2760_v21 = vsub.f32 %v7975_v31, %v5675_v54  ;;  %v3968_v8 = vmul.f32 0.8333333, %v7986_v5 }
 0x3de   : > { %v5867_v47 = vpack.c.bf16 %v4128_v50, %v4120_v14  ;;  %v3280_v25 = vmul.f32 2.5, %v5755_v36  ;;  %v3304_v23 = vmul.f32 2.5, %v3296_v7  ;;  %v3656_v46 = vmul.f32 %v3648_v60, %v3264_v41 }
 0x3df   : > { %v3673_v18 = vmul.f32 %v3665_v57, %v3321_v63  ;;  %v3664_v48 = vmul.f32 1.25, %v3296_v7  ;;  %v3976_v0 = vmul.f32 %v3968_v8, %v3640_v15  ;;  %v3984_v42 = vmul.f32 0.8333333, %v3296_v7 }
 0x3e0   : > { %5868 = vmatpush1.bf16.msra.mxu1 %v5867_v47  ;;  %v3288_v30 = vmul.f32 %v3280_v25, %v7979_v44  ;;  %v3312_v56 = vmul.f32 %v3304_v23, %v2760_v21  ;;  %v5582_v13 = vmul.f32 -1.442695, %v7821_v22  ;;  %vm2395_vm0 = vcmp.ge.f32.partialorder %v7821_v22, -2.2 }
 0x3e1   : > { %v3681_v49 = vadd.f32 %v3673_v18, %v3657_v37  ;;  %v5590_v31 = vsel %vm2395_vm0, 1.0, %v8788_v32  ;;  %vm2419_vm1 = vcmp.ge.f32.partialorder %v7821_v22, -1.8  ;;  %vm2443_vm3 = vcmp.ge.f32.partialorder %v7821_v22, -1.4 }
 0x3e2   : > { %v3320_v5 = vadd.f32 %v3312_v56, %v3288_v30  ;;  %6010 = vpow2.f32 %v5582_v13  ;;  %v5598_v41 = vsel %vm2419_vm1, 1.0, %v8788_v32  ;;  %v5606_v28 = vsel %vm2443_vm3, 1.0, %v8788_v32 }
 0x3e3   : > { %v3993_v17 = vmul.f32 %v3985_v53, %v3681_v49  ;;  %vm2467_vm6 = vcmp.ge.f32.partialorder %v7821_v22, -1.0  ;;  %vm2491_vm7 = vcmp.ge.f32.partialorder %v7821_v22, -0.6  ;;  %vm2515_vm8 = vcmp.ge.f32.partialorder %v7821_v22, -0.2 }
 0x3e4   : > { %v3672_v44 = vmul.f32 %v3664_v48, %v3320_v5  ;;  %v5614_v6 = vsel %vm2467_vm6, 1.0, %v8788_v32  ;;  %v5622_v15 = vsel %vm2491_vm7, 1.0, %v8788_v32  ;;  %v5630_v1 = vsel %vm2515_vm8, 1.0, %v8788_v32 }
 0x3e5   : > { %v4001_v55 = vadd.f32 %v3993_v17, %v3977_v51  ;;  %vm2539_vm11 = vcmp.ge.f32.partialorder %v7821_v22, 0.2  ;;  %v2683_v35 = vsub.f32 %v5590_v31, %v5598_v41  ;;  %v2691_v61 = vsub.f32 %v5598_v41, %v5606_v28 }
 0x3e6   : > { %v3680_v62 = vadd.f32 %v3672_v44, %v3656_v46  ;;  %v8039_v10 = vsel %vm2539_vm11, 1.0, %v8788_v32  ;;  %v2699_v16 = vsub.f32 %v5606_v28, %v5614_v6  ;;  %v2707_v9 = vsub.f32 %v5614_v6, %v5622_v15 }
 0x3e7   : > { %5764 = vmatprep.subr.msk.mxu1 %vm1999_vm9, %v4001_v55  ;;  %v2715_v19 = vsub.f32 %v5622_v15, %v5630_v1  ;;  %v8043_v2 = vsub.f32 %v5630_v1, %v8039_v10  ;;  %v5686_v45 = vadd.f32 2.2, %v7821_v22  ;;  %v2795_v52 = vsub.f32 -1.4, %v7821_v22 }
 0x3e8   : > { %v3992_v38 = vmul.f32 %v3984_v42, %v3680_v62  ;;  %v5694_v39 = vadd.f32 1.8, %v7821_v22  ;;  %v2851_v3 = vsub.f32 -1.0, %v7821_v22  ;;  %v8050_v4 = vadd.f32 1.4, %v7821_v22 }
 0x3e9   : > { %v2779_v57 = vmul.f32 2.5, %v5686_v45  ;;  %v2803_v33 = vmul.f32 2.5, %v2795_v52  ;;  %v2907_v14 = vsub.f32 -0.6, %v7821_v22  ;;  %v8054_v20 = vadd.f32 1.0, %v7821_v22 }
 0x3ea   : > { %v4000_v37 = vadd.f32 %v3992_v38, %v3976_v0  ;;  %v2835_v53 = vmul.f32 2.5, %v5694_v39  ;;  %v2859_v58 = vmul.f32 2.5, %v2851_v3  ;;  %v2891_v12 = vmul.f32 2.5, %v8050_v4 }
 0x3eb   : > { %v2787_v51 = vmul.f32 %v2779_v57, %v2683_v35  ;;  %v2811_v54 = vmul.f32 %v2803_v33, %v2691_v61  ;;  %v2915_v36 = vmul.f32 2.5, %v2907_v14  ;;  %v2947_v7 = vmul.f32 2.5, %v8054_v20 }
 0x3ec   : > { %v6011_v60 = vpop.eup %6010  ;;  %5765 = vmatpush1.msk.msra.mxu1 %vm1999_vm9, %v4000_v37  ;;  %v2843_v50 = vmul.f32 %v2835_v53, %v2691_v61  ;;  %v2867_v63 = vmul.f32 %v2859_v58, %v2699_v16  ;;  %v2899_v21 = vmul.f32 %v2891_v12, %v2699_v16  ;;  %v2963_v8 = vsub.f32 -0.2, %v7821_v22 }
 0x3ed   : > { %5766 = vmatmul.mubr.msk.f32.vlgmr.msra.gmra.mrb[8].mxu1 %vm4141_vm10, %v7794_v11  ;;  %v2363_v47 = vadd.f32 1.0, %v6011_v60  ;;  %v2819_v25 = vadd.f32 %v2811_v54, %v2787_v51  ;;  %v2923_v23 = vmul.f32 %v2915_v36, %v2707_v9  ;;  %v2955_v46 = vmul.f32 %v2947_v7, %v2707_v9 }
 0x3ee   : > { %v2875_v18 = vadd.f32 %v2867_v63, %v2843_v50  ;;  %v2971_v48 = vmul.f32 2.5, %v2963_v8  ;;  %v8063_v0 = vadd.f32 0.6, %v7821_v22  ;;  %v3019_v42 = vsub.f32 0.2, %v7821_v22  ;;  %4375 = vmatprep.mubr.f32.mxu1 %v8788_v32 }
 0x3ef   : > { %6012 = vrcp.f32 %v2363_v47  ;;  %v2931_v30 = vadd.f32 %v2923_v23, %v2899_v21  ;;  %v3331_v56 = vmul.f32 1.25, %v5686_v45  ;;  %v3347_v13 = vmul.f32 1.25, %v2851_v3 }
 0x3f0   : > { %v2979_v49 = vmul.f32 %v2971_v48, %v2715_v19  ;;  %v3003_v11 = vmul.f32 2.5, %v8063_v0  ;;  %v3027_v31 = vmul.f32 2.5, %v3019_v42  ;;  %v3371_v5 = vmul.f32 1.25, %v5694_v39 }
 0x3f1   : > { %v3339_v41 = vmul.f32 %v3331_v56, %v2819_v25  ;;  %v3355_v28 = vmul.f32 %v3347_v13, %v2875_v18  ;;  %v3387_v17 = vmul.f32 1.25, %v2907_v14  ;;  %v3411_v44 = vmul.f32 1.25, %v8050_v4 }
 0x3f2   : > { %v2987_v6 = vadd.f32 %v2979_v49, %v2955_v46  ;;  %v3011_v15 = vmul.f32 %v3003_v11, %v2715_v19  ;;  %v3035_v1 = vmul.f32 %v3027_v31, %v8043_v2  ;;  %v3379_v55 = vmul.f32 %v3371_v5, %v2875_v18 }
 0x3f3   : > { %v3363_v35 = vadd.f32 %v3355_v28, %v3339_v41  ;;  %v3395_v61 = vmul.f32 %v3387_v17, %v2931_v30  ;;  %v3419_v62 = vmul.f32 %v3411_v44, %v2931_v30  ;;  %v3427_v16 = vmul.f32 1.25, %v2963_v8 }
 0x3f4   : > { %v8070_v9 = vadd.f32 %v3035_v1, %v3011_v15  ;;  %v3451_v52 = vmul.f32 1.25, %v8054_v20  ;;  %v3467_v38 = vmul.f32 1.25, %v3019_v42  ;;  %v3691_v3 = vmul.f32 0.8333333, %v5686_v45 }
 0x3f5   : > { %v3403_v57 = vadd.f32 %v3395_v61, %v3379_v55  ;;  %v3435_v33 = vmul.f32 %v3427_v16, %v2987_v6  ;;  %v3707_v37 = vmul.f32 0.8333333, %v2907_v14  ;;  %v3731_v53 = vmul.f32 0.8333333, %v5694_v39 }
 0x3f6   : > { %v3459_v58 = vmul.f32 %v3451_v52, %v2987_v6  ;;  %v3475_v19 = vmul.f32 %v3467_v38, %v8070_v9  ;;  %v3699_v12 = vmul.f32 %v3691_v3, %v3363_v35  ;;  %v3747_v51 = vmul.f32 0.8333333, %v2963_v8 }
 0x3f7   : > { %v3443_v54 = vadd.f32 %v3435_v33, %v3419_v62  ;;  %v3715_v36 = vmul.f32 %v3707_v37, %v3403_v57  ;;  %v3739_v7 = vmul.f32 %v3731_v53, %v3403_v57  ;;  %v3771_v60 = vmul.f32 0.8333333, %v8050_v4 }
 0x3f8   : > { %v8075_v50 = vadd.f32 %v3475_v19, %v3459_v58  ;;  %v3787_v63 = vmul.f32 0.8333333, %v3019_v42  ;;  %v5581_v21 = vmul.f32 -1.442695, %v7817_v26  ;;  %vm2394_vm12 = vcmp.ge.f32.partialorder %v7817_v26, -2.2 }
 0x3f9   : > { %v6013_v45 = vpop.eup %6012  ;;  %v3723_v14 = vadd.f32 %v3715_v36, %v3699_v12  ;;  %v3755_v39 = vmul.f32 %v3747_v51, %v3443_v54  ;;  %v3779_v47 = vmul.f32 %v3771_v60, %v3443_v54  ;;  %v5589_v25 = vsel %vm2394_vm12, 1.0, %v8788_v32 }
 0x3fa   : > { %v2387_v8 = vmul.f32 %v6013_v45, %v7821_v22  ;;  %v3795_v23 = vmul.f32 %v3787_v63, %v8075_v50  ;;  %6014 = vpow2.f32 %v5581_v21  ;;  %vm2418_vm13 = vcmp.ge.f32.partialorder %v7817_v26, -1.8 }
 0x3fb   : > { %v3763_v4 = vadd.f32 %v3755_v39, %v3739_v7  ;;  %v4019_v46 = vrot.slane %v3723_v14, 4  ;;  %v5597_v18 = vsel %vm2418_vm13, 1.0, %v8788_v32  ;;  %vm2442_vm14 = vcmp.ge.f32.partialorder %v7817_v26, -1.4 }
 0x3fc   : > { %v3803_v48 = vadd.f32 %v3795_v23, %v3779_v47  ;;  %v5605_v42 = vsel %vm2442_vm14, 1.0, %v8788_v32  ;;  %vm2466_vm0 = vcmp.ge.f32.partialorder %v7817_v26, -1.0  ;;  %vm2490_vm1 = vcmp.ge.f32.partialorder %v7817_v26, -0.6 }
 0x3fd   : > { %v4107_v30 = vsel %vm1999_vm9, %v2387_v8, %v4019_v46  ;;  %v5613_v56 = vsel %vm2466_vm0, 1.0, %v8788_v32  ;;  %v5621_v13 = vsel %vm2490_vm1, 1.0, %v8788_v32  ;;  %vm2514_vm3 = vcmp.ge.f32.partialorder %v7817_v26, -0.2 }
 0x3fe   : > { %v4043_v49 = vrot.slane %v3803_v48, 4  ;;  %v5629_v11 = vsel %vm2514_vm3, 1.0, %v8788_v32  ;;  %vm2538_vm6 = vcmp.ge.f32.partialorder %v7817_v26, 0.2  ;;  %v2682_v31 = vsub.f32 %v5589_v25, %v5597_v18 }
 0x3ff   : > { %v8095_v5 = vsel %vm2538_vm6, 1.0, %v8788_v32  ;;  %v2690_v41 = vsub.f32 %v5597_v18, %v5605_v42  ;;  %v2698_v28 = vsub.f32 %v5605_v42, %v5613_v56  ;;  %v2706_v17 = vsub.f32 %v5613_v56, %v5621_v13 }
 0x400   : > { %v4115_v44 = vsel %vm1999_vm9, %v3763_v4, %v4043_v49  ;;  %v2714_v6 = vsub.f32 %v5621_v13, %v5629_v11  ;;  %v8099_v15 = vsub.f32 %v5629_v11, %v8095_v5  ;;  %v5685_v1 = vadd.f32 2.2, %v7817_v26 }
 0x401   : > { %v5869_v55 = vpack.c.bf16 %v4115_v44, %v4107_v30  ;;  %v2794_v35 = vsub.f32 -1.4, %v7817_v26  ;;  %v5693_v61 = vadd.f32 1.8, %v7817_v26  ;;  %v2850_v62 = vsub.f32 -1.0, %v7817_v26 }
 0x402   : > { %v2778_v16 = vmul.f32 2.5, %v5685_v1  ;;  %v5701_v52 = vadd.f32 1.4, %v7817_v26  ;;  %v2906_v38 = vsub.f32 -0.6, %v7817_v26  ;;  %v8108_v3 = vadd.f32 1.0, %v7817_v26 }
 0x403   : > { %5870 = vmatprep.subr.bf16.mxu1 %v5869_v55  ;;  %v2802_v57 = vmul.f32 2.5, %v2794_v35  ;;  %v2834_v33 = vmul.f32 2.5, %v5693_v61  ;;  %v2858_v37 = vmul.f32 2.5, %v2850_v62  ;;  %v2962_v53 = vsub.f32 -0.2, %v7817_v26 }
 0x404   : > { %v6015_v58 = vpop.eup %6014  ;;  %v2786_v19 = vmul.f32 %v2778_v16, %v2682_v31  ;;  %v2890_v12 = vmul.f32 2.5, %v5701_v52  ;;  %v2914_v51 = vmul.f32 2.5, %v2906_v38  ;;  %v2946_v54 = vmul.f32 2.5, %v8108_v3 }
 0x405   : > { %v2362_v36 = vadd.f32 1.0, %v6015_v58  ;;  %v2810_v7 = vmul.f32 %v2802_v57, %v2690_v41  ;;  %v2842_v60 = vmul.f32 %v2834_v33, %v2690_v41  ;;  %v2866_v63 = vmul.f32 %v2858_v37, %v2698_v28 }
 0x406   : > { %v2898_v21 = vmul.f32 %v2890_v12, %v2698_v28  ;;  %v2922_v45 = vmul.f32 %v2914_v51, %v2706_v17  ;;  %v2954_v14 = vmul.f32 %v2946_v54, %v2706_v17  ;;  %v2970_v39 = vmul.f32 2.5, %v2962_v53 }
 0x407   : > { %6016 = vrcp.f32 %v2362_v36  ;;  %v2818_v47 = vadd.f32 %v2810_v7, %v2786_v19  ;;  %v2874_v25 = vadd.f32 %v2866_v63, %v2842_v60  ;;  %v8113_v8 = vadd.f32 0.6, %v7817_v26 }
 0x408   : > { %v2930_v23 = vadd.f32 %v2922_v45, %v2898_v21  ;;  %v2978_v4 = vmul.f32 %v2970_v39, %v2714_v6  ;;  %v3018_v46 = vsub.f32 0.2, %v7817_v26  ;;  %v3330_v18 = vmul.f32 1.25, %v5685_v1 }
 0x409   : > { %v3002_v48 = vmul.f32 2.5, %v8113_v8  ;;  %v3346_v42 = vmul.f32 1.25, %v2850_v62  ;;  %v3370_v30 = vmul.f32 1.25, %v5693_v61  ;;  %v3386_v56 = vmul.f32 1.25, %v2906_v38 }
 0x40a   : > { %v2986_v13 = vadd.f32 %v2978_v4, %v2954_v14  ;;  %v3026_v49 = vmul.f32 2.5, %v3018_v46  ;;  %v3338_v11 = vmul.f32 %v3330_v18, %v2818_v47  ;;  %v3410_v31 = vmul.f32 1.25, %v5701_v52 }
 0x40b   : > { %v3010_v41 = vmul.f32 %v3002_v48, %v2714_v6  ;;  %v3354_v28 = vmul.f32 %v3346_v42, %v2874_v25  ;;  %v3378_v17 = vmul.f32 %v3370_v30, %v2874_v25  ;;  %v3394_v44 = vmul.f32 %v3386_v56, %v2930_v23 }
 0x40c   : > { %v3034_v55 = vmul.f32 %v3026_v49, %v8099_v15  ;;  %v3418_v35 = vmul.f32 %v3410_v31, %v2930_v23  ;;  %v3426_v16 = vmul.f32 1.25, %v2962_v53  ;;  %v3450_v57 = vmul.f32 1.25, %v8108_v3 }
 0x40d   : > { %v3362_v33 = vadd.f32 %v3354_v28, %v3338_v11  ;;  %v3402_v37 = vadd.f32 %v3394_v44, %v3378_v17  ;;  %v3466_v58 = vmul.f32 1.25, %v3018_v46  ;;  %v3690_v62 = vmul.f32 0.8333333, %v5685_v1 }
 0x40e   : > { %v8119_v19 = vadd.f32 %v3034_v55, %v3010_v41  ;;  %v3434_v12 = vmul.f32 %v3426_v16, %v2986_v13  ;;  %v3458_v51 = vmul.f32 %v3450_v57, %v2986_v13  ;;  %v3706_v54 = vmul.f32 0.8333333, %v2906_v38 }
 0x40f   : > { %v3698_v36 = vmul.f32 %v3690_v62, %v3362_v33  ;;  %v3730_v6 = vmul.f32 0.8333333, %v5693_v61  ;;  %v3746_v7 = vmul.f32 0.8333333, %v2962_v53  ;;  %v3770_v60 = vmul.f32 0.8333333, %v5701_v52 }
 0x410   : > { %v3442_v63 = vadd.f32 %v3434_v12, %v3418_v35  ;;  %v3474_v21 = vmul.f32 %v3466_v58, %v8119_v19  ;;  %v3714_v45 = vmul.f32 %v3706_v54, %v3402_v37  ;;  %v3786_v14 = vmul.f32 0.8333333, %v3018_v46 }
 0x411   : > { %v6017_v39 = vpop.eup %6016  ;;  %v3738_v47 = vmul.f32 %v3730_v6, %v3402_v37  ;;  %vm2563_vm7 = vcmp.ge.f32.partialorder %v7821_v22, 0.6  ;;  %vm2587_vm8 = vcmp.ge.f32.partialorder %v7821_v22, 1.0  ;;  %vm2611_vm11 = vcmp.ge.f32.partialorder %v7821_v22, 1.4 }
 0x412   : > { %v2386_v1 = vmul.f32 %v6017_v39, %v7817_v26  ;;  %v8126_v38 = vadd.f32 %v3474_v21, %v3458_v51  ;;  %v3722_v61 = vadd.f32 %v3714_v45, %v3698_v36  ;;  %v3754_v53 = vmul.f32 %v3746_v7, %v3442_v63 }
 0x413   : > { %v3778_v52 = vmul.f32 %v3770_v60, %v3442_v63  ;;  %v5646_v25 = vsel %vm2563_vm7, 1.0, %v8788_v32  ;;  %v5654_v23 = vsel %vm2587_vm8, 1.0, %v8788_v32  ;;  %v5662_v4 = vsel %vm2611_vm11, 1.0, %v8788_v32 }
 0x414   : > { %v3762_v46 = vadd.f32 %v3754_v53, %v3738_v47  ;;  %v3794_v18 = vmul.f32 %v3786_v14, %v8126_v38  ;;  %v4018_v48 = vrot.slane %v3722_v61, 4  ;;  %vm2635_vm12 = vcmp.ge.f32.partialorder %v7821_v22, 1.8 }
 0x415   : > { %v8134_v42 = vsel %vm2635_vm12, 1.0, %v8788_v32  ;;  %v2731_v30 = vsub.f32 %v8039_v10, %v5646_v25  ;;  %v2739_v56 = vsub.f32 %v5646_v25, %v5654_v23  ;;  %v2747_v13 = vsub.f32 %v5654_v23, %v5662_v4 }
 0x416   : > { %v3802_v49 = vadd.f32 %v3794_v18, %v3778_v52  ;;  %v4106_v11 = vsel %vm1999_vm9, %v2386_v1, %v4018_v48  ;;  %v8139_v31 = vsub.f32 %v5662_v4, %v8134_v42  ;;  %v5726_v41 = vadd.f32 0.2, %v7821_v22 }
 0x417   : > { %v3075_v28 = vsub.f32 0.6, %v7821_v22  ;;  %v5734_v17 = vadd.f32 -0.2, %v7821_v22  ;;  %v3131_v44 = vsub.f32 1.0, %v7821_v22  ;;  %v8146_v55 = vadd.f32 -1.0, %v7821_v22 }
 0x418   : > { %v4042_v10 = vrot.slane %v3802_v49, 4  ;;  %v3059_v35 = vmul.f32 2.5, %v5726_v41  ;;  %v8149_v16 = vadd.f32 -0.6, %v7821_v22  ;;  %v3187_v57 = vsub.f32 1.4, %v7821_v22 }
 0x419   : > { %v3083_v33 = vmul.f32 2.5, %v3075_v28  ;;  %v3115_v37 = vmul.f32 2.5, %v5734_v17  ;;  %v3139_v58 = vmul.f32 2.5, %v3131_v44  ;;  %v3227_v62 = vmul.f32 2.5, %v8146_v55 }
 0x41a   : > { %v4114_v12 = vsel %vm1999_vm9, %v3762_v46, %v4042_v10  ;;  %v3067_v51 = vmul.f32 %v3059_v35, %v8043_v2  ;;  %v3171_v54 = vmul.f32 2.5, %v8149_v16  ;;  %v3195_v36 = vmul.f32 2.5, %v3187_v57 }
 0x41b   : > { %v5871_v6 = vpack.c.bf16 %v4114_v12, %v4106_v11  ;;  %v3091_v7 = vmul.f32 %v3083_v33, %v2731_v30  ;;  %v3123_v60 = vmul.f32 %v3115_v37, %v2731_v30  ;;  %v3147_v63 = vmul.f32 %v3139_v58, %v2739_v56 }
 0x41c   : > { %v3179_v21 = vmul.f32 %v3171_v54, %v2739_v56  ;;  %v3203_v45 = vmul.f32 %v3195_v36, %v2747_v13  ;;  %v3235_v14 = vmul.f32 %v3227_v62, %v2747_v13  ;;  %v3243_v39 = vsub.f32 1.8, %v7821_v22 }
 0x41d   : > { %5872 = vmatpush1.bf16.msra.mxu1 %v5871_v6  ;;  %v3099_v47 = vadd.f32 %v3091_v7, %v3067_v51  ;;  %v3155_v1 = vadd.f32 %v3147_v63, %v3123_v60  ;;  %v3491_v61 = vmul.f32 1.25, %v8063_v0  ;;  %v3507_v53 = vmul.f32 1.25, %v3075_v28 }
 0x41e   : > { %v3211_v52 = vadd.f32 %v3203_v45, %v3179_v21  ;;  %v3251_v2 = vmul.f32 2.5, %v3243_v39  ;;  %v3531_v25 = vmul.f32 1.25, %v5726_v41  ;;  %v3547_v23 = vmul.f32 1.25, %v3131_v44 }
 0x41f   : > { %v3499_v4 = vmul.f32 %v3491_v61, %v8070_v9  ;;  %v3515_v46 = vmul.f32 %v3507_v53, %v3099_v47  ;;  %v3571_v18 = vmul.f32 1.25, %v5734_v17  ;;  %v3587_v48 = vmul.f32 1.25, %v3187_v57 }
 0x420   : > { %v3259_v30 = vmul.f32 %v3251_v2, %v8139_v31  ;;  %v3539_v56 = vmul.f32 %v3531_v25, %v3099_v47  ;;  %v3555_v13 = vmul.f32 %v3547_v23, %v3155_v1  ;;  %v3611_v49 = vmul.f32 1.25, %v8149_v16 }
 0x421   : > { %v3523_v11 = vadd.f32 %v3515_v46, %v3499_v4  ;;  %v3579_v10 = vmul.f32 %v3571_v18, %v3155_v1  ;;  %v3595_v35 = vmul.f32 %v3587_v48, %v3211_v52  ;;  %v3627_v33 = vmul.f32 1.25, %v3243_v39 }
 0x422   : > { %v8161_v37 = vadd.f32 %v3259_v30, %v3235_v14  ;;  %v3563_v58 = vadd.f32 %v3555_v13, %v3539_v56  ;;  %v3619_v62 = vmul.f32 %v3611_v49, %v3211_v52  ;;  %v3811_v12 = vmul.f32 0.8333333, %v8054_v20 }
 0x423   : > { %v3603_v9 = vadd.f32 %v3595_v35, %v3579_v10  ;;  %v3827_v51 = vmul.f32 0.8333333, %v3075_v28  ;;  %v3851_v54 = vmul.f32 0.8333333, %v8063_v0  ;;  %v3867_v36 = vmul.f32 0.8333333, %v3131_v44 }
 0x424   : > { %v3635_v6 = vmul.f32 %v3627_v33, %v8161_v37  ;;  %v3819_v7 = vmul.f32 %v3811_v12, %v8075_v50  ;;  %v3891_v60 = vmul.f32 0.8333333, %v5726_v41  ;;  %v3907_v63 = vmul.f32 0.8333333, %v3187_v57 }
 0x425   : > { %v3835_v21 = vmul.f32 %v3827_v51, %v3523_v11  ;;  %v3859_v45 = vmul.f32 %v3851_v54, %v3523_v11  ;;  %v3875_v47 = vmul.f32 %v3867_v36, %v3563_v58  ;;  %v3931_v14 = vmul.f32 0.8333333, %v5734_v17 }
 0x426   : > { %v8167_v1 = vadd.f32 %v3635_v6, %v3619_v62  ;;  %v3899_v61 = vmul.f32 %v3891_v60, %v3563_v58  ;;  %v3915_v53 = vmul.f32 %v3907_v63, %v3603_v9  ;;  %v3947_v20 = vmul.f32 0.8333333, %v3243_v39 }
 0x427   : > { %v8170_v28 = vmax.f32 %v7847_v34, 0.0  ;;  %v3883_v0 = vadd.f32 %v3875_v47, %v3859_v45  ;;  %v3939_v44 = vmul.f32 %v3931_v14, %v3603_v9  ;;  %vm2562_vm13 = vcmp.ge.f32.partialorder %v7817_v26, 0.6 }
 0x428   : > { %v3843_v52 = vadd.f32 %v3835_v21, %v3819_v7  ;;  %v3955_v50 = vmul.f32 %v3947_v20, %v8167_v1  ;;  %v5645_v41 = vsel %vm2562_vm13, 1.0, %v8788_v32  ;;  %vm2586_vm14 = vcmp.ge.f32.partialorder %v7817_v26, 1.0 }
 0x429   : > { %v4067_v17 = vrot.slane %v3883_v0, 4  ;;  %v5653_v57 = vsel %vm2586_vm14, 1.0, %v8788_v32  ;;  %vm2610_vm0 = vcmp.ge.f32.partialorder %v7817_v26, 1.4  ;;  %vm2634_vm1 = vcmp.ge.f32.partialorder %v7817_v26, 1.8 }
 0x42a   : > { %v3923_v34 = vadd.f32 %v3915_v53, %v3899_v61  ;;  %v3963_v39 = vadd.f32 %v3955_v50, %v3939_v44  ;;  %v5661_v2 = vsel %vm2610_vm0, 1.0, %v8788_v32  ;;  %v8181_v25 = vsel %vm2634_vm1, 1.0, %v8788_v32 }
 0x42b   : > { %v4123_v23 = vsel %vm1999_vm9, %v3843_v52, %v4067_v17  ;;  %v2730_v4 = vsub.f32 %v8095_v5, %v5645_v41  ;;  %v2738_v46 = vsub.f32 %v5645_v41, %v5653_v57  ;;  %v2746_v18 = vsub.f32 %v5653_v57, %v5661_v2 }
 0x42c   : > { %v4091_v48 = vrot.slane %v3963_v39, 4  ;;  %v5725_v30 = vadd.f32 0.2, %v7817_v26  ;;  %v3074_v56 = vsub.f32 0.6, %v7817_v26  ;;  %v3130_v13 = vsub.f32 1.0, %v7817_v26 }
 0x42d   : > { %v8189_v49 = vsub.f32 %v5661_v2, %v8181_v25  ;;  %v5733_v11 = vadd.f32 -0.2, %v7817_v26  ;;  %v8193_v10 = vadd.f32 -0.6, %v7817_v26  ;;  %v3186_v35 = vsub.f32 1.4, %v7817_v26 }
 0x42e   : > { %v4131_v5 = vsel %vm1999_vm9, %v3923_v34, %v4091_v48  ;;  %v3058_v33 = vmul.f32 2.5, %v5725_v30  ;;  %v3082_v58 = vmul.f32 2.5, %v3074_v56  ;;  %v3138_v62 = vmul.f32 2.5, %v3130_v13 }
 0x42f   : > { %v5873_v12 = vpack.c.bf16 %v4131_v5, %v4123_v23  ;;  %v3114_v9 = vmul.f32 2.5, %v5733_v11  ;;  %v3170_v51 = vmul.f32 2.5, %v8193_v10  ;;  %v3194_v54 = vmul.f32 2.5, %v3186_v35 }
 0x430   : > { %v3066_v36 = vmul.f32 %v3058_v33, %v8099_v15  ;;  %v3090_v6 = vmul.f32 %v3082_v58, %v2730_v4  ;;  %v3146_v7 = vmul.f32 %v3138_v62, %v2738_v46  ;;  %v8200_v60 = vadd.f32 -1.0, %v7817_v26 }
 0x431   : > { %5874 = vmatprep.subr.bf16.mxu1 %v5873_v12  ;;  %v3122_v63 = vmul.f32 %v3114_v9, %v2730_v4  ;;  %v3178_v21 = vmul.f32 %v3170_v51, %v2738_v46  ;;  %v3202_v45 = vmul.f32 %v3194_v54, %v2746_v18  ;;  %v3242_v47 = vsub.f32 1.8, %v7817_v26 }
 0x432   : > { %v3098_v14 = vadd.f32 %v3090_v6, %v3066_v36  ;;  %v3226_v61 = vmul.f32 2.5, %v8200_v60  ;;  %v3490_v53 = vmul.f32 1.25, %v8113_v8  ;;  %v3506_v20 = vmul.f32 1.25, %v3074_v56 }
 0x433   : > { %v3154_v0 = vadd.f32 %v3146_v7, %v3122_v63  ;;  %v3210_v44 = vadd.f32 %v3202_v45, %v3178_v21  ;;  %v3250_v15 = vmul.f32 2.5, %v3242_v47  ;;  %v3530_v52 = vmul.f32 1.25, %v5725_v30 }
 0x434   : > { %v3234_v50 = vmul.f32 %v3226_v61, %v2746_v18  ;;  %v3498_v41 = vmul.f32 %v3490_v53, %v8119_v19  ;;  %v3514_v17 = vmul.f32 %v3506_v20, %v3098_v14  ;;  %v3546_v57 = vmul.f32 1.25, %v3130_v13 }
 0x435   : > { %v3258_v34 = vmul.f32 %v3250_v15, %v8189_v49  ;;  %v3538_v39 = vmul.f32 %v3530_v52, %v3098_v14  ;;  %v3570_v2 = vmul.f32 1.25, %v5733_v11  ;;  %v3586_v23 = vmul.f32 1.25, %v3186_v35 }
 0x436   : > { %v3522_v4 = vadd.f32 %v3514_v17, %v3498_v41  ;;  %v3554_v46 = vmul.f32 %v3546_v57, %v3154_v0  ;;  %v3610_v48 = vmul.f32 1.25, %v8193_v10  ;;  %v3626_v5 = vmul.f32 1.25, %v3242_v47 }
 0x437   : > { %v3266_v33 = vadd.f32 %v3258_v34, %v3234_v50  ;;  %v3578_v58 = vmul.f32 %v3570_v2, %v3154_v0  ;;  %v3594_v62 = vmul.f32 %v3586_v23, %v3210_v44  ;;  %v3810_v12 = vmul.f32 0.8333333, %v8108_v3 }
 0x438   : > { %v3562_v18 = vadd.f32 %v3554_v46, %v3538_v39  ;;  %v3618_v9 = vmul.f32 %v3610_v48, %v3210_v44  ;;  %v3826_v19 = vmul.f32 0.8333333, %v3074_v56  ;;  %v3850_v51 = vmul.f32 0.8333333, %v8113_v8 }
 0x439   : > { %v3602_v54 = vadd.f32 %v3594_v62, %v3578_v58  ;;  %v3634_v36 = vmul.f32 %v3626_v5, %v3266_v33  ;;  %v3818_v6 = vmul.f32 %v3810_v12, %v8126_v38  ;;  %v3866_v7 = vmul.f32 0.8333333, %v3130_v13 }
 0x43a   : > { %v3834_v63 = vmul.f32 %v3826_v19, %v3522_v4  ;;  %v3858_v21 = vmul.f32 %v3850_v51, %v3522_v4  ;;  %v3890_v45 = vmul.f32 0.8333333, %v5725_v30  ;;  %v3906_v14 = vmul.f32 0.8333333, %v3186_v35 }
 0x43b   : > { %v3642_v61 = vadd.f32 %v3634_v36, %v3618_v9  ;;  %v3874_v53 = vmul.f32 %v3866_v7, %v3562_v18  ;;  %v3930_v20 = vmul.f32 0.8333333, %v5733_v11  ;;  %v3946_v0 = vmul.f32 0.8333333, %v3242_v47 }
 0x43c   : > { %v3842_v15 = vadd.f32 %v3834_v63, %v3818_v6  ;;  %v3898_v3 = vmul.f32 %v3890_v45, %v3562_v18  ;;  %v3914_v52 = vmul.f32 %v3906_v14, %v3602_v54  ;;  %vm2659_vm3 = vcmp.ge.f32.partialorder %v7821_v22, 2.2 }
 0x43d   : > { %v3882_v56 = vadd.f32 %v3874_v53, %v3858_v21  ;;  %v3938_v8 = vmul.f32 %v3930_v20, %v3602_v54  ;;  %v3954_v44 = vmul.f32 %v3946_v0, %v3642_v61  ;;  %v5678_v50 = vsel %vm2659_vm3, 1.0, %v8788_v32 }
 0x43e   : > { %v3922_v38 = vadd.f32 %v3914_v52, %v3898_v3  ;;  %v2763_v13 = vsub.f32 %v8134_v42, %v5678_v50  ;;  %v5758_v30 = vadd.f32 -1.4, %v7821_v22  ;;  %v3299_v35 = vsub.f32 2.2, %v7821_v22 }
 0x43f   : > { %v3962_v41 = vadd.f32 %v3954_v44, %v3938_v8  ;;  %v4066_v11 = vrot.slane %v3882_v56, 4  ;;  %v3651_v47 = vmul.f32 1.25, %v8146_v55  ;;  %v3971_v17 = vmul.f32 0.8333333, %v8149_v16 }
 0x440   : > { %v3283_v57 = vmul.f32 2.5, %v5758_v30  ;;  %v3307_v34 = vmul.f32 2.5, %v3299_v35  ;;  %v3667_v39 = vmul.f32 1.25, %v3299_v35  ;;  %v3987_v2 = vmul.f32 0.8333333, %v3299_v35 }
 0x441   : > { %v4090_v23 = vrot.slane %v3962_v41, 4  ;;  %v4122_v4 = vsel %vm1999_vm9, %v3842_v15, %v4066_v11  ;;  %v3659_v46 = vmul.f32 %v3651_v47, %v8161_v37  ;;  %v3979_v42 = vmul.f32 %v3971_v17, %v8167_v1 }
 0x442   : > { %v3291_v48 = vmul.f32 %v3283_v57, %v8139_v31  ;;  %v3315_v22 = vmul.f32 %v3307_v34, %v2763_v13  ;;  %vm2658_vm6 = vcmp.ge.f32.partialorder %v7817_v26, 2.2  ;;  %v5757_v55 = vadd.f32 -1.4, %v7817_v26 }
 0x443   : > { %v4130_v16 = vsel %vm1999_vm9, %v3922_v38, %v4090_v23  ;;  %v5677_v5 = vsel %vm2658_vm6, 1.0, %v8788_v32  ;;  %v3298_v58 = vsub.f32 2.2, %v7817_v26  ;;  %v3650_v62 = vmul.f32 1.25, %v8200_v60 }
 0x444   : > { %v5875_v12 = vpack.c.bf16 %v4130_v16, %v4122_v4  ;;  %v3323_v18 = vadd.f32 %v3315_v22, %v3291_v48  ;;  %v2762_v37 = vsub.f32 %v8181_v25, %v5677_v5  ;;  %v3282_v1 = vmul.f32 2.5, %v5757_v55  ;;  %v8232_v26 = vpop.f32.mrb[2].mxu0 }
 0x445   : > { %v3306_v9 = vmul.f32 2.5, %v3298_v58  ;;  %v3658_v31 = vmul.f32 %v3650_v62, %v3266_v33  ;;  %v3666_v19 = vmul.f32 1.25, %v3298_v58  ;;  %v3970_v51 = vmul.f32 0.8333333, %v8193_v10  ;;  %v8236_v25 = vpop.f32.mrb[3].mxu0 }
 0x446   : > { %5876 = vmatpush1.bf16.msra.mxu1 %v5875_v12  ;;  %v3675_v54 = vmul.f32 %v3667_v39, %v3323_v18  ;;  %v3290_v36 = vmul.f32 %v3282_v1, %v8189_v49  ;;  %v3986_v6 = vmul.f32 0.8333333, %v3298_v58  ;;  %v5584_v7 = vmul.f32 -1.442695, %v8170_v28  ;;  %v8270_v1 = vld [vmem:[%s8730_s8] sm:$0xff] }
 0x447   : > { %v3314_v60 = vmul.f32 %v3306_v9, %v2762_v37  ;;  %v3978_v63 = vmul.f32 %v3970_v51, %v3642_v61  ;;  %vm2397_vm7 = vcmp.ge.f32.partialorder %v8170_v28, -2.2  ;;  %vm2421_vm8 = vcmp.ge.f32.partialorder %v8170_v28, -1.8 }
 0x448   : > { %v3683_v33 = vadd.f32 %v3675_v54, %v3659_v46  ;;  %6018 = vpow2.f32 %v5584_v7  ;;  %v5592_v10 = vsel %vm2397_vm7, 1.0, %v8788_v32  ;;  %v5600_v21 = vsel %vm2421_vm8, 1.0, %v8788_v32 }
 0x449   : > { %v3322_v49 = vadd.f32 %v3314_v60, %v3290_v36  ;;  %vm2445_vm11 = vcmp.ge.f32.partialorder %v8170_v28, -1.4  ;;  %vm2469_vm12 = vcmp.ge.f32.partialorder %v8170_v28, -1.0  ;;  %vm2493_vm13 = vcmp.ge.f32.partialorder %v8170_v28, -0.6 }
 0x44a   : > { %v3995_v45 = vmul.f32 %v3987_v2, %v3683_v33  ;;  %v5608_v14 = vsel %vm2445_vm11, 1.0, %v8788_v32  ;;  %v5616_v61 = vsel %vm2469_vm12, 1.0, %v8788_v32  ;;  %v5624_v53 = vsel %vm2493_vm13, 1.0, %v8788_v32 }
 0x44b   : > { %v3674_v20 = vmul.f32 %v3666_v19, %v3322_v49  ;;  %vm2517_vm14 = vcmp.ge.f32.partialorder %v8170_v28, -0.2  ;;  %vm2541_vm0 = vcmp.ge.f32.partialorder %v8170_v28, 0.2  ;;  %v2685_v0 = vsub.f32 %v5592_v10, %v5600_v21 }
 0x44c   : > { %v4003_v15 = vadd.f32 %v3995_v45, %v3979_v42  ;;  %v5632_v3 = vsel %vm2517_vm14, 1.0, %v8788_v32  ;;  %v8250_v52 = vsel %vm2541_vm0, 1.0, %v8788_v32  ;;  %v2693_v56 = vsub.f32 %v5600_v21, %v5608_v14 }
 0x44d   : > { %v3682_v8 = vadd.f32 %v3674_v20, %v3658_v31  ;;  %v2701_v44 = vsub.f32 %v5608_v14, %v5616_v61  ;;  %v2709_v50 = vsub.f32 %v5616_v61, %v5624_v53  ;;  %v2717_v38 = vsub.f32 %v5624_v53, %v5632_v3 }
 0x44e   : > { %5767 = vmatprep.subr.msk.mxu1 %vm1999_vm9, %v4003_v15  ;;  %v8254_v13 = vsub.f32 %v5632_v3, %v8250_v52  ;;  %v5688_v30 = vadd.f32 2.2, %v8170_v28  ;;  %v2797_v35 = vsub.f32 -1.4, %v8170_v28  ;;  %v5696_v41 = vadd.f32 1.8, %v8170_v28 }
 0x44f   : > { %v3994_v11 = vmul.f32 %v3986_v6, %v3682_v8  ;;  %v2853_v47 = vsub.f32 -1.0, %v8170_v28  ;;  %v5704_v17 = vadd.f32 1.4, %v8170_v28  ;;  %v2909_v57 = vsub.f32 -0.6, %v8170_v28 }
 0x450   : > { %v2781_v34 = vmul.f32 2.5, %v5688_v30  ;;  %v2805_v39 = vmul.f32 2.5, %v2797_v35  ;;  %v2837_v2 = vmul.f32 2.5, %v5696_v41  ;;  %v8263_v23 = vadd.f32 1.0, %v8170_v28 }
 0x451   : > { %v4002_v4 = vadd.f32 %v3994_v11, %v3978_v63  ;;  %v2861_v46 = vmul.f32 2.5, %v2853_v47  ;;  %v2893_v42 = vmul.f32 2.5, %v5704_v17  ;;  %v2917_v48 = vmul.f32 2.5, %v2909_v57 }
 0x452   : > { %v6019_v22 = vpop.eup %6018  ;;  %v2789_v55 = vmul.f32 %v2781_v34, %v2685_v0  ;;  %v2813_v16 = vmul.f32 %v2805_v39, %v2693_v56  ;;  %v2845_v5 = vmul.f32 %v2837_v2, %v2693_v56  ;;  %v2949_v58 = vmul.f32 2.5, %v8263_v23 }
 0x453   : > { %5768 = vmatpush1.msk.msra.mxu1 %vm1999_vm9, %v4002_v4  ;;  %v2365_v62 = vadd.f32 1.0, %v6019_v22  ;;  %v2869_v12 = vmul.f32 %v2861_v46, %v2701_v44  ;;  %v2901_v18 = vmul.f32 %v2893_v42, %v2701_v44  ;;  %v2925_v37 = vmul.f32 %v2917_v48, %v2709_v50 }
 0x454   : > { %5769 = vmatmul.mubr.msk.f32.vlgmr.msra.gmra.mrb[10].mxu1 %vm4141_vm10, %v8270_v1  ;;  %v2821_v9 = vadd.f32 %v2813_v16, %v2789_v55  ;;  %v2957_v31 = vmul.f32 %v2949_v58, %v2709_v50  ;;  %v2965_v19 = vsub.f32 -0.2, %v8170_v28  ;;  %v8276_v51 = vadd.f32 0.6, %v8170_v28 }
 0x455   : > { %6020 = vrcp.f32 %v2365_v62  ;;  %v2877_v54 = vadd.f32 %v2869_v12, %v2845_v5  ;;  %v2933_v36 = vadd.f32 %v2925_v37, %v2901_v18  ;;  %v3021_v6 = vsub.f32 0.2, %v8170_v28  ;;  %4446 = vmatprep.mubr.f32.mxu1 %v8788_v32 }
 0x456   : > { %v2973_v7 = vmul.f32 2.5, %v2965_v19  ;;  %v3005_v60 = vmul.f32 2.5, %v8276_v51  ;;  %v3333_v63 = vmul.f32 1.25, %v5688_v30  ;;  %v3349_v33 = vmul.f32 1.25, %v2853_v47 }
 0x457   : > { %v3029_v10 = vmul.f32 2.5, %v3021_v6  ;;  %v3373_v21 = vmul.f32 1.25, %v5696_v41  ;;  %v3389_v49 = vmul.f32 1.25, %v2909_v57  ;;  %v3413_v45 = vmul.f32 1.25, %v5704_v17 }
 0x458   : > { %v2981_v14 = vmul.f32 %v2973_v7, %v2717_v38  ;;  %v3013_v61 = vmul.f32 %v3005_v60, %v2717_v38  ;;  %v3341_v53 = vmul.f32 %v3333_v63, %v2821_v9  ;;  %v3357_v20 = vmul.f32 %v3349_v33, %v2877_v54 }
 0x459   : > { %v3037_v0 = vmul.f32 %v3029_v10, %v8254_v13  ;;  %v3381_v15 = vmul.f32 %v3373_v21, %v2877_v54  ;;  %v3397_v3 = vmul.f32 %v3389_v49, %v2933_v36  ;;  %v3421_v56 = vmul.f32 %v3413_v45, %v2933_v36 }
 0x45a   : > { %v2989_v8 = vadd.f32 %v2981_v14, %v2957_v31  ;;  %v3365_v44 = vadd.f32 %v3357_v20, %v3341_v53  ;;  %v3429_v50 = vmul.f32 1.25, %v2965_v19  ;;  %v3453_v35 = vmul.f32 1.25, %v8263_v23 }
 0x45b   : > { %v8283_v11 = vadd.f32 %v3037_v0, %v3013_v61  ;;  %v3405_v47 = vadd.f32 %v3397_v3, %v3381_v15  ;;  %v3469_v34 = vmul.f32 1.25, %v3021_v6  ;;  %v3693_v39 = vmul.f32 0.8333333, %v5688_v30 }
 0x45c   : > { %v3437_v2 = vmul.f32 %v3429_v50, %v2989_v8  ;;  %v3461_v4 = vmul.f32 %v3453_v35, %v2989_v8  ;;  %v3709_v38 = vmul.f32 0.8333333, %v2909_v57  ;;  %v3733_v46 = vmul.f32 0.8333333, %v5696_v41 }
 0x45d   : > { %v3477_v42 = vmul.f32 %v3469_v34, %v8283_v11  ;;  %v3701_v48 = vmul.f32 %v3693_v39, %v3365_v44  ;;  %v3749_v22 = vmul.f32 0.8333333, %v2965_v19  ;;  %v3773_v55 = vmul.f32 0.8333333, %v5704_v17 }
 0x45e   : > { %v3445_v16 = vadd.f32 %v3437_v2, %v3421_v56  ;;  %v3717_v5 = vmul.f32 %v3709_v38, %v3405_v47  ;;  %v3741_v58 = vmul.f32 %v3733_v46, %v3405_v47  ;;  %v3789_v62 = vmul.f32 0.8333333, %v3021_v6 }
 0x45f   : > { %v6021_v12 = vpop.eup %6020  ;;  %v8286_v18 = vadd.f32 %v3477_v42, %v3461_v4  ;;  %v5583_v37 = vmul.f32 -1.442695, %v7851_v59  ;;  %vm2396_vm1 = vcmp.ge.f32.partialorder %v7851_v59, -2.2  ;;  %vm2420_vm3 = vcmp.ge.f32.partialorder %v7851_v59, -1.8 }
 0x460   : > { %v2389_v30 = vmul.f32 %v6021_v12, %v8170_v28  ;;  %v3725_v41 = vadd.f32 %v3717_v5, %v3701_v48  ;;  %v3757_v57 = vmul.f32 %v3749_v22, %v3445_v16  ;;  %v3781_v9 = vmul.f32 %v3773_v55, %v3445_v16 }
 0x461   : > { %v3797_v17 = vmul.f32 %v3789_v62, %v8286_v18  ;;  %6022 = vpow2.f32 %v5583_v37  ;;  %v5591_v31 = vsel %vm2396_vm1, 1.0, %v8788_v32  ;;  %v5599_v19 = vsel %vm2420_vm3, 1.0, %v8788_v32 }
 0x462   : > { %v3765_v54 = vadd.f32 %v3757_v57, %v3741_v58  ;;  %v4021_v36 = vrot.slane %v3725_v41, 4  ;;  %vm2444_vm6 = vcmp.ge.f32.partialorder %v7851_v59, -1.4  ;;  %vm2468_vm7 = vcmp.ge.f32.partialorder %v7851_v59, -1.0 }
 0x463   : > { %v3805_v6 = vadd.f32 %v3797_v17, %v3781_v9  ;;  %v5607_v7 = vsel %vm2444_vm6, 1.0, %v8788_v32  ;;  %v5615_v60 = vsel %vm2468_vm7, 1.0, %v8788_v32  ;;  %vm2492_vm8 = vcmp.ge.f32.partialorder %v7851_v59, -0.6 }
 0x464   : > { %v4109_v63 = vsel %vm1999_vm9, %v2389_v30, %v4021_v36  ;;  %v5623_v33 = vsel %vm2492_vm8, 1.0, %v8788_v32  ;;  %vm2516_vm11 = vcmp.ge.f32.partialorder %v7851_v59, -0.2  ;;  %vm2540_vm12 = vcmp.ge.f32.partialorder %v7851_v59, 0.2 }
 0x465   : > { %v4045_v10 = vrot.slane %v3805_v6, 4  ;;  %v5631_v21 = vsel %vm2516_vm11, 1.0, %v8788_v32  ;;  %v8306_v49 = vsel %vm2540_vm12, 1.0, %v8788_v32  ;;  %v2684_v45 = vsub.f32 %v5591_v31, %v5599_v19 }
 0x466   : > { %v2692_v14 = vsub.f32 %v5599_v19, %v5607_v7  ;;  %v2700_v61 = vsub.f32 %v5607_v7, %v5615_v60  ;;  %v2708_v53 = vsub.f32 %v5615_v60, %v5623_v33  ;;  %v2716_v20 = vsub.f32 %v5623_v33, %v5631_v21 }
 0x467   : > { %v4117_v0 = vsel %vm1999_vm9, %v3765_v54, %v4045_v10  ;;  %v8310_v15 = vsub.f32 %v5631_v21, %v8306_v49  ;;  %v5687_v3 = vadd.f32 2.2, %v7851_v59  ;;  %v2796_v56 = vsub.f32 -1.4, %v7851_v59 }
 0x468   : > { %v5877_v8 = vpack.c.bf16 %v4117_v0, %v4109_v63  ;;  %v5695_v44 = vadd.f32 1.8, %v7851_v59  ;;  %v2852_v50 = vsub.f32 -1.0, %v7851_v59  ;;  %v5703_v35 = vadd.f32 1.4, %v7851_v59 }
 0x469   : > { %v2780_v47 = vmul.f32 2.5, %v5687_v3  ;;  %v2804_v34 = vmul.f32 2.5, %v2796_v56  ;;  %v2908_v39 = vsub.f32 -0.6, %v7851_v59  ;;  %v8319_v2 = vadd.f32 1.0, %v7851_v59 }
 0x46a   : > { %5878 = vmatprep.subr.bf16.mxu1 %v5877_v8  ;;  %v2836_v4 = vmul.f32 2.5, %v5695_v44  ;;  %v2860_v38 = vmul.f32 2.5, %v2852_v50  ;;  %v2892_v46 = vmul.f32 2.5, %v5703_v35  ;;  %v2964_v42 = vsub.f32 -0.2, %v7851_v59 }
 0x46b   : > { %v6023_v48 = vpop.eup %6022  ;;  %v2788_v22 = vmul.f32 %v2780_v47, %v2684_v45  ;;  %v2812_v55 = vmul.f32 %v2804_v34, %v2692_v14  ;;  %v2916_v16 = vmul.f32 2.5, %v2908_v39  ;;  %v2948_v5 = vmul.f32 2.5, %v8319_v2 }
 0x46c   : > { %v2364_v58 = vadd.f32 1.0, %v6023_v48  ;;  %v2844_v62 = vmul.f32 %v2836_v4, %v2692_v14  ;;  %v2868_v12 = vmul.f32 %v2860_v38, %v2700_v61  ;;  %v2900_v37 = vmul.f32 %v2892_v46, %v2700_v61 }
 0x46d   : > { %v2820_v30 = vadd.f32 %v2812_v55, %v2788_v22  ;;  %v2924_v41 = vmul.f32 %v2916_v16, %v2708_v53  ;;  %v2956_v57 = vmul.f32 %v2948_v5, %v2708_v53  ;;  %v2972_v9 = vmul.f32 2.5, %v2964_v42 }
 0x46e   : > { %6024 = vrcp.f32 %v2364_v58  ;;  %v2876_v17 = vadd.f32 %v2868_v12, %v2844_v62  ;;  %v8324_v31 = vadd.f32 0.6, %v7851_v59  ;;  %v3020_v19 = vsub.f32 0.2, %v7851_v59 }
 0x46f   : > { %v2932_v54 = vadd.f32 %v2924_v41, %v2900_v37  ;;  %v2980_v36 = vmul.f32 %v2972_v9, %v2716_v20  ;;  %v3332_v6 = vmul.f32 1.25, %v5687_v3  ;;  %v3348_v7 = vmul.f32 1.25, %v2852_v50 }
 0x470   : > { %v3004_v60 = vmul.f32 2.5, %v8324_v31  ;;  %v3028_v63 = vmul.f32 2.5, %v3020_v19  ;;  %v3372_v33 = vmul.f32 1.25, %v5695_v44  ;;  %v3388_v10 = vmul.f32 1.25, %v2908_v39 }
 0x471   : > { %v2988_v21 = vadd.f32 %v2980_v36, %v2956_v57  ;;  %v3340_v45 = vmul.f32 %v3332_v6, %v2820_v30  ;;  %v3356_v14 = vmul.f32 %v3348_v7, %v2876_v17  ;;  %v3412_v61 = vmul.f32 1.25, %v5703_v35 }
 0x472   : > { %v3012_v53 = vmul.f32 %v3004_v60, %v2716_v20  ;;  %v3036_v0 = vmul.f32 %v3028_v63, %v8310_v15  ;;  %v3380_v56 = vmul.f32 %v3372_v33, %v2876_v17  ;;  %v3396_v8 = vmul.f32 %v3388_v10, %v2932_v54 }
 0x473   : > { %v3364_v47 = vadd.f32 %v3356_v14, %v3340_v45  ;;  %v3420_v34 = vmul.f32 %v3412_v61, %v2932_v54  ;;  %v3428_v4 = vmul.f32 1.25, %v2964_v42  ;;  %v3452_v38 = vmul.f32 1.25, %v8319_v2 }
 0x474   : > { %v8330_v50 = vadd.f32 %v3036_v0, %v3012_v53  ;;  %v3404_v46 = vadd.f32 %v3396_v8, %v3380_v56  ;;  %v3468_v48 = vmul.f32 1.25, %v3020_v19  ;;  %v3692_v22 = vmul.f32 0.8333333, %v5687_v3 }
 0x475   : > { %v3436_v55 = vmul.f32 %v3428_v4, %v2988_v21  ;;  %v3460_v16 = vmul.f32 %v3452_v38, %v2988_v21  ;;  %v3708_v5 = vmul.f32 0.8333333, %v2908_v39  ;;  %v3732_v58 = vmul.f32 0.8333333, %v5695_v44 }
 0x476   : > { %v3476_v20 = vmul.f32 %v3468_v48, %v8330_v50  ;;  %v3700_v62 = vmul.f32 %v3692_v22, %v3364_v47  ;;  %v3748_v12 = vmul.f32 0.8333333, %v2964_v42  ;;  %v3772_v37 = vmul.f32 0.8333333, %v5703_v35 }
 0x477   : > { %v3444_v30 = vadd.f32 %v3436_v55, %v3420_v34  ;;  %v3716_v41 = vmul.f32 %v3708_v5, %v3404_v46  ;;  %v3740_v57 = vmul.f32 %v3732_v58, %v3404_v46  ;;  %v3788_v9 = vmul.f32 0.8333333, %v3020_v19 }
 0x478   : > { %v6025_v17 = vpop.eup %6024  ;;  %v8333_v54 = vadd.f32 %v3476_v20, %v3460_v16  ;;  %vm2565_vm13 = vcmp.ge.f32.partialorder %v8170_v28, 0.6  ;;  %vm2589_vm14 = vcmp.ge.f32.partialorder %v8170_v28, 1.0  ;;  %vm2613_vm0 = vcmp.ge.f32.partialorder %v8170_v28, 1.4 }
 0x479   : > { %v2388_v3 = vmul.f32 %v6025_v17, %v7851_v59  ;;  %v3724_v44 = vadd.f32 %v3716_v41, %v3700_v62  ;;  %v3756_v39 = vmul.f32 %v3748_v12, %v3444_v30  ;;  %v3780_v36 = vmul.f32 %v3772_v37, %v3444_v30 }
 0x47a   : > { %v3796_v35 = vmul.f32 %v3788_v9, %v8333_v54  ;;  %v5648_v42 = vsel %vm2565_vm13, 1.0, %v8788_v32  ;;  %v5656_v19 = vsel %vm2589_vm14, 1.0, %v8788_v32  ;;  %v5664_v6 = vsel %vm2613_vm0, 1.0, %v8788_v32 }
 0x47b   : > { %v3764_v7 = vadd.f32 %v3756_v39, %v3740_v57  ;;  %v4020_v60 = vrot.slane %v3724_v44, 4  ;;  %vm2637_vm1 = vcmp.ge.f32.partialorder %v8170_v28, 1.8  ;;  %v2733_v63 = vsub.f32 %v8250_v52, %v5648_v42 }
 0x47c   : > { %v3804_v33 = vadd.f32 %v3796_v35, %v3780_v36  ;;  %v8346_v10 = vsel %vm2637_vm1, 1.0, %v8788_v32  ;;  %v2741_v21 = vsub.f32 %v5648_v42, %v5656_v19  ;;  %v2749_v45 = vsub.f32 %v5656_v19, %v5664_v6 }
 0x47d   : > { %v4108_v14 = vsel %vm1999_vm9, %v2388_v3, %v4020_v60  ;;  %v8350_v61 = vsub.f32 %v5664_v6, %v8346_v10  ;;  %v5728_v53 = vadd.f32 0.2, %v8170_v28  ;;  %v3077_v0 = vsub.f32 0.6, %v8170_v28 }
 0x47e   : > { %v4044_v56 = vrot.slane %v3804_v33, 4  ;;  %v5736_v8 = vadd.f32 -0.2, %v8170_v28  ;;  %v3133_v52 = vsub.f32 1.0, %v8170_v28  ;;  %v8357_v47 = vadd.f32 -0.6, %v8170_v28 }
 0x47f   : > { %v3061_v34 = vmul.f32 2.5, %v5728_v53  ;;  %v3085_v4 = vmul.f32 2.5, %v3077_v0  ;;  %v3189_v38 = vsub.f32 1.4, %v8170_v28  ;;  %v8361_v46 = vadd.f32 -1.0, %v8170_v28 }
 0x480   : > { %v4116_v48 = vsel %vm1999_vm9, %v3764_v7, %v4044_v56  ;;  %v3117_v22 = vmul.f32 2.5, %v5736_v8  ;;  %v3141_v55 = vmul.f32 2.5, %v3133_v52  ;;  %v3173_v16 = vmul.f32 2.5, %v8357_v47 }
 0x481   : > { %v5879_v5 = vpack.c.bf16 %v4116_v48, %v4108_v14  ;;  %v3069_v58 = vmul.f32 %v3061_v34, %v8254_v13  ;;  %v3093_v20 = vmul.f32 %v3085_v4, %v2733_v63  ;;  %v3197_v62 = vmul.f32 2.5, %v3189_v38 }
 0x482   : > { %v3125_v12 = vmul.f32 %v3117_v22, %v2733_v63  ;;  %v3149_v37 = vmul.f32 %v3141_v55, %v2741_v21  ;;  %v3181_v30 = vmul.f32 %v3173_v16, %v2741_v21  ;;  %v3229_v41 = vmul.f32 2.5, %v8361_v46 }
 0x483   : > { %5880 = vmatpush1.bf16.msra.mxu1 %v5879_v5  ;;  %v3101_v57 = vadd.f32 %v3093_v20, %v3069_v58  ;;  %v3205_v9 = vmul.f32 %v3197_v62, %v2749_v45  ;;  %v3245_v17 = vsub.f32 1.8, %v8170_v28  ;;  %v3493_v3 = vmul.f32 1.25, %v8276_v51 }
 0x484   : > { %v3157_v44 = vadd.f32 %v3149_v37, %v3125_v12  ;;  %v3237_v39 = vmul.f32 %v3229_v41, %v2749_v45  ;;  %v3509_v36 = vmul.f32 1.25, %v3077_v0  ;;  %v3533_v35 = vmul.f32 1.25, %v5728_v53 }
 0x485   : > { %v3213_v42 = vadd.f32 %v3205_v9, %v3181_v30  ;;  %v3253_v13 = vmul.f32 2.5, %v3245_v17  ;;  %v3501_v19 = vmul.f32 %v3493_v3, %v8283_v11  ;;  %v3549_v6 = vmul.f32 1.25, %v3133_v52 }
 0x486   : > { %v3517_v7 = vmul.f32 %v3509_v36, %v3101_v57  ;;  %v3541_v60 = vmul.f32 %v3533_v35, %v3101_v57  ;;  %v3573_v63 = vmul.f32 1.25, %v5736_v8  ;;  %v3589_v33 = vmul.f32 1.25, %v3189_v38 }
 0x487   : > { %v3261_v21 = vmul.f32 %v3253_v13, %v8350_v61  ;;  %v3557_v14 = vmul.f32 %v3549_v6, %v3157_v44  ;;  %v3613_v56 = vmul.f32 1.25, %v8357_v47  ;;  %v3629_v34 = vmul.f32 1.25, %v3245_v17 }
 0x488   : > { %v3525_v4 = vadd.f32 %v3517_v7, %v3501_v19  ;;  %v3581_v48 = vmul.f32 %v3573_v63, %v3157_v44  ;;  %v3597_v45 = vmul.f32 %v3589_v33, %v3213_v42  ;;  %v3813_v22 = vmul.f32 0.8333333, %v8263_v23 }
 0x489   : > { %v8373_v55 = vadd.f32 %v3261_v21, %v3237_v39  ;;  %v3565_v16 = vadd.f32 %v3557_v14, %v3541_v60  ;;  %v3621_v11 = vmul.f32 %v3613_v56, %v3213_v42  ;;  %v3829_v5 = vmul.f32 0.8333333, %v3077_v0 }
 0x48a   : > { %v3605_v58 = vadd.f32 %v3597_v45, %v3581_v48  ;;  %v3821_v20 = vmul.f32 %v3813_v22, %v8286_v18  ;;  %v3853_v62 = vmul.f32 0.8333333, %v8276_v51  ;;  %v3869_v12 = vmul.f32 0.8333333, %v3133_v52 }
 0x48b   : > { %v3637_v37 = vmul.f32 %v3629_v34, %v8373_v55  ;;  %v3837_v30 = vmul.f32 %v3829_v5, %v3525_v4  ;;  %v3893_v41 = vmul.f32 0.8333333, %v5728_v53  ;;  %v3909_v57 = vmul.f32 0.8333333, %v3189_v38 }
 0x48c   : > { %v3861_v9 = vmul.f32 %v3853_v62, %v3525_v4  ;;  %v3877_v3 = vmul.f32 %v3869_v12, %v3565_v16  ;;  %v3933_v44 = vmul.f32 0.8333333, %v5736_v8  ;;  %v3949_v23 = vmul.f32 0.8333333, %v3245_v17  ;;  %v8388_v17 = vpop.permute.xlu0 %4566  ;;  %v8410_v62 = vpop.permute.xlu1 %4572 }
 0x48d   : > { %v8378_v39 = vadd.f32 %v3637_v37, %v3621_v11  ;;  %v3845_v36 = vadd.f32 %v3837_v30, %v3821_v20  ;;  %v3901_v35 = vmul.f32 %v3893_v41, %v3565_v16  ;;  %v3917_v0 = vmul.f32 %v3909_v57, %v3605_v58 }
 0x48e   : > { %v3885_v42 = vadd.f32 %v3877_v3, %v3861_v9  ;;  %v3941_v13 = vmul.f32 %v3933_v44, %v3605_v58  ;;  %vm2564_vm3 = vcmp.ge.f32.partialorder %v7851_v59, 0.6  ;;  %vm2588_vm6 = vcmp.ge.f32.partialorder %v7851_v59, 1.0 }
 0x48f   : > { %v3925_v51 = vadd.f32 %v3917_v0, %v3901_v35  ;;  %v3957_v18 = vmul.f32 %v3949_v23, %v8378_v39  ;;  %v5647_v53 = vsel %vm2564_vm3, 1.0, %v8788_v32  ;;  %v5655_v52 = vsel %vm2588_vm6, 1.0, %v8788_v32 }
 0x490   : > { %v4069_v8 = vrot.slane %v3885_v42, 4  ;;  %vm2612_vm7 = vcmp.ge.f32.partialorder %v7851_v59, 1.4  ;;  %vm2636_vm8 = vcmp.ge.f32.partialorder %v7851_v59, 1.8  ;;  %v2732_v38 = vsub.f32 %v8306_v49, %v5647_v53  ;;  %v8414_v57 = vpop.permute.xlu0 %4568 }
 0x491   : > { %v3965_v19 = vadd.f32 %v3957_v18, %v3941_v13  ;;  %v5663_v6 = vsel %vm2612_vm7, 1.0, %v8788_v32  ;;  %v8392_v7 = vsel %vm2636_vm8, 1.0, %v8788_v32  ;;  %v2740_v60 = vsub.f32 %v5647_v53, %v5655_v52 }
 0x492   : > { %v4125_v63 = vsel %vm1999_vm9, %v3845_v36, %v4069_v8  ;;  %v2748_v33 = vsub.f32 %v5655_v52, %v5663_v6  ;;  %v8396_v21 = vsub.f32 %v5663_v6, %v8392_v7  ;;  %v5727_v14 = vadd.f32 0.2, %v7851_v59 }
 0x493   : > { %v4093_v56 = vrot.slane %v3965_v19, 4  ;;  %v3076_v49 = vsub.f32 0.6, %v7851_v59  ;;  %v5735_v34 = vadd.f32 -0.2, %v7851_v59  ;;  %v3132_v4 = vsub.f32 1.0, %v7851_v59 }
 0x494   : > { %v3060_v48 = vmul.f32 2.5, %v5727_v14  ;;  %v8403_v45 = vadd.f32 -0.6, %v7851_v59  ;;  %v3188_v22 = vsub.f32 1.4, %v7851_v59  ;;  %v8407_v16 = vadd.f32 -1.0, %v7851_v59 }
 0x495   : > { %v4133_v11 = vsel %vm1999_vm9, %v3925_v51, %v4093_v56  ;;  %v3084_v5 = vmul.f32 2.5, %v3076_v49  ;;  %v3116_v58 = vmul.f32 2.5, %v5735_v34  ;;  %v3140_v20 = vmul.f32 2.5, %v3132_v4 }
 0x496   : > { %v5881_v12 = vpack.c.bf16 %v4133_v11, %v4125_v63  ;;  %v3068_v37 = vmul.f32 %v3060_v48, %v8310_v15  ;;  %v3172_v30 = vmul.f32 2.5, %v8403_v45  ;;  %v3196_v41 = vmul.f32 2.5, %v3188_v22  ;;  %v8420_v48 = vpop.permute.xlu1 %4570 }
 0x497   : > { %v3092_v9 = vmul.f32 %v3084_v5, %v2732_v38  ;;  %v3124_v3 = vmul.f32 %v3116_v58, %v2732_v38  ;;  %v3148_v44 = vmul.f32 %v3140_v20, %v2740_v60  ;;  %v3228_v23 = vmul.f32 2.5, %v8407_v16  ;;  %v8424_v20 = vpop.permute.xlu0 %4574 }
 0x498   : > { %5882 = vmatprep.subr.bf16.mxu1 %v5881_v12  ;;  %v3180_v36 = vmul.f32 %v3172_v30, %v2740_v60  ;;  %v3204_v35 = vmul.f32 %v3196_v41, %v2748_v33  ;;  %v3244_v0 = vsub.f32 1.8, %v7851_v59  ;;  %v3492_v42 = vmul.f32 1.25, %v8324_v31 }
 0x499   : > { %v3100_v13 = vadd.f32 %v3092_v9, %v3068_v37  ;;  %v3156_v51 = vadd.f32 %v3148_v44, %v3124_v3  ;;  %v3236_v15 = vmul.f32 %v3228_v23, %v2748_v33  ;;  %v3508_v18 = vmul.f32 1.25, %v3076_v49 }
 0x49a   : > { %v3212_v53 = vadd.f32 %v3204_v35, %v3180_v36  ;;  %v3252_v52 = vmul.f32 2.5, %v3244_v0  ;;  %v3500_v8 = vmul.f32 %v3492_v42, %v8330_v50  ;;  %v3532_v19 = vmul.f32 1.25, %v5727_v14 }
 0x49b   : > { %v3516_v38 = vmul.f32 %v3508_v18, %v3100_v13  ;;  %v3548_v6 = vmul.f32 1.25, %v3132_v4  ;;  %v3572_v63 = vmul.f32 1.25, %v5735_v34  ;;  %v3588_v56 = vmul.f32 1.25, %v3188_v22 }
 0x49c   : > { %v3260_v60 = vmul.f32 %v3252_v52, %v8396_v21  ;;  %v3540_v11 = vmul.f32 %v3532_v19, %v3100_v13  ;;  %v3612_v5 = vmul.f32 1.25, %v8403_v45  ;;  %v3628_v58 = vmul.f32 1.25, %v3244_v0 }
 0x49d   : > { %v3524_v33 = vadd.f32 %v3516_v38, %v3500_v8  ;;  %v3556_v12 = vmul.f32 %v3548_v6, %v3156_v51  ;;  %v3580_v37 = vmul.f32 %v3572_v63, %v3156_v51  ;;  %v3596_v30 = vmul.f32 %v3588_v56, %v3212_v53  ;;  %v8432_v38 = vpop.permute.xlu1 %4576  ;;  %v8436_v6 = vpop.permute.xlu0 %4590 }
 0x49e   : > { %v8426_v50 = vadd.f32 %v3260_v60, %v3236_v15  ;;  %v3620_v41 = vmul.f32 %v3612_v5, %v3212_v53  ;;  %v3812_v9 = vmul.f32 0.8333333, %v8319_v2  ;;  %v3828_v3 = vmul.f32 0.8333333, %v3076_v49 }
 0x49f   : > { %v3564_v44 = vadd.f32 %v3556_v12, %v3540_v11  ;;  %v3604_v23 = vadd.f32 %v3596_v30, %v3580_v37  ;;  %v3852_v36 = vmul.f32 0.8333333, %v8324_v31  ;;  %v3868_v35 = vmul.f32 0.8333333, %v3132_v4 }
 0x4a0   : > { %v3636_v42 = vmul.f32 %v3628_v58, %v8426_v50  ;;  %v3820_v13 = vmul.f32 %v3812_v9, %v8333_v54  ;;  %v3836_v18 = vmul.f32 %v3828_v3, %v3524_v33  ;;  %v3892_v52 = vmul.f32 0.8333333, %v5727_v14 }
 0x4a1   : > { %v3860_v8 = vmul.f32 %v3852_v36, %v3524_v33  ;;  %v3876_v51 = vmul.f32 %v3868_v35, %v3564_v44  ;;  %v3908_v19 = vmul.f32 0.8333333, %v3188_v22  ;;  %v3932_v15 = vmul.f32 0.8333333, %v5735_v34  ;;  %v8446_v30 = vpop.permute.xlu1 %4592 }
 0x4a2   : > { %v8434_v53 = vadd.f32 %v3636_v42, %v3620_v41  ;;  %v3900_v2 = vmul.f32 %v3892_v52, %v3564_v44  ;;  %v3948_v49 = vmul.f32 0.8333333, %v3244_v0  ;;  %vm2661_vm11 = vcmp.ge.f32.partialorder %v8170_v28, 2.2 }
 0x4a3   : > { %v3884_v31 = vadd.f32 %v3876_v51, %v3860_v8  ;;  %v3916_v4 = vmul.f32 %v3908_v19, %v3604_v23  ;;  %v3940_v63 = vmul.f32 %v3932_v15, %v3604_v23  ;;  %v5680_v14 = vsel %vm2661_vm11, 1.0, %v8788_v32 }
 0x4a4   : > { %v3956_v54 = vmul.f32 %v3948_v49, %v8434_v53  ;;  %v5760_v22 = vadd.f32 -1.4, %v8170_v28  ;;  %v3301_v34 = vsub.f32 2.2, %v8170_v28  ;;  %v3844_v56 = vadd.f32 %v3836_v18, %v3820_v13  ;;  %v8450_v28 = vpop.permute.xlu0 %4596 }
 0x4a5   : > { %v4068_v60 = vrot.slane %v3884_v31, 4  ;;  %v2765_v11 = vsub.f32 %v8346_v10, %v5680_v14  ;;  %v3924_v33 = vadd.f32 %v3916_v4, %v3900_v2  ;;  %v3653_v37 = vmul.f32 1.25, %v8361_v46  ;;  %v4599_v2 = vpop.permute.xlu1 %4598  ;;  %v6089_v14 = vld [vmem:[%s6213_s0 + $0x8] sm:$0xff] }
 0x4a6   : > { %v3964_v0 = vadd.f32 %v3956_v54, %v3940_v63  ;;  %v3285_v5 = vmul.f32 2.5, %v5760_v22  ;;  %v3309_v58 = vmul.f32 2.5, %v3301_v34  ;;  %vm2660_vm12 = vcmp.ge.f32.partialorder %v7851_v59, 2.2  ;;  %v8467_v22 = vld [vmem:[%s6213_s0 + $0x18] sm:$0xff] }
 0x4a7   : > { %v4124_v12 = vsel %vm1999_vm9, %v3844_v56, %v4068_v60  ;;  %v3669_v44 = vmul.f32 1.25, %v3301_v34  ;;  %v5679_v10 = vsel %vm2660_vm12, 1.0, %v8788_v32  ;;  %v5759_v23 = vadd.f32 -1.4, %v7851_v59 }
 0x4a8   : > { %v4092_v41 = vrot.slane %v3964_v0, 4  ;;  %v3293_v9 = vmul.f32 %v3285_v5, %v8350_v61  ;;  %v3317_v3 = vmul.f32 %v3309_v58, %v2765_v11  ;;  %v3300_v36 = vsub.f32 2.2, %v7851_v59  ;;  %v6091_v5 = vld [vmem:[%s6213_s0] sm:$0xff]  ;;  %v8482_v58 = vld [vmem:[%s6213_s0 + $0x10] sm:$0xff] }
 0x4a9   : > { %v3661_v42 = vmul.f32 %v3653_v37, %v8373_v55  ;;  %v2764_v13 = vsub.f32 %v8392_v7, %v5679_v10  ;;  %v3284_v18 = vmul.f32 2.5, %v5759_v23  ;;  %v3973_v51 = vmul.f32 0.8333333, %v8357_v47  ;;  %v8462_v7 = vpop.permute.xlu0 %4138  ;;  %v6093_v23 = vld [vmem:[%s6213_s0 + $0x28] sm:$0xff] }
 0x4aa   : > { %v4132_v35 = vsel %vm1999_vm9, %v3924_v33, %v4092_v41  ;;  %v3325_v46 = vadd.f32 %v3317_v3, %v3293_v9  ;;  %v3308_v52 = vmul.f32 2.5, %v3300_v36  ;;  %v3652_v59 = vmul.f32 1.25, %v8407_v16 }
 0x4ab   : > { %v5883_v61 = vpack.c.bf16 %v4132_v35, %v4124_v12  ;;  %v3292_v19 = vmul.f32 %v3284_v18, %v8396_v21  ;;  %v3981_v55 = vmul.f32 %v3973_v51, %v8378_v39  ;;  %v3989_v31 = vmul.f32 0.8333333, %v3301_v34  ;;  %v4595_v12 = vpop.permute.xlu1 %4594 }
 0x4ac   : > { %v3677_v8 = vmul.f32 %v3669_v44, %v3325_v46  ;;  %v3316_v15 = vmul.f32 %v3308_v52, %v2764_v13  ;;  %v3660_v63 = vmul.f32 %v3652_v59, %v8426_v50  ;;  %v3668_v54 = vmul.f32 1.25, %v3300_v36 }
 0x4ad   : > { %5884 = vmatpush1.bf16.msra.mxu1 %v5883_v61  ;;  %v5885_v21 = vpack.c.bf16 %v8467_v22, %v6089_v14  ;;  %v3972_v56 = vmul.f32 0.8333333, %v8403_v45  ;;  %v4581_v39 = vsel %vm1965_vm15, %v8410_v62, %v8388_v17  ;;  %v4605_v50 = vsel %vm1974_vm2, %v8450_v28, %v8436_v6  ;;  %v4601_v37 = vpop.permute.xlu0 %4600 }
 0x4ae   : > { %v3685_v49 = vadd.f32 %v3677_v8, %v3661_v42  ;;  %v3324_v4 = vadd.f32 %v3316_v15, %v3292_v19  ;;  %v3988_v60 = vmul.f32 0.8333333, %v3300_v36  ;;  %v5887_v45 = vpack.c.bf16 %v8482_v58, %v6091_v5  ;;  %v6094_v8 = vld [vmem:[%s6213_s0 + $0x20] sm:$0xff]  ;;  %s561_s0 = scalar_lea.vmem %s8739_s17, %s5795_s22 }
 0x4af   : > { %5886 = vmatprep.subr.bf16.mxu0 %v5885_v21  ;;  %v3980_v0 = vmul.f32 %v3972_v56, %v8434_v53  ;;  %v4606_v33 = vsel %vm1974_vm2, %v4599_v2, %v8446_v30  ;;  %v4578_v41 = vsel %vm1965_vm15, %v8388_v17, %v8410_v62  ;;  %v8494_v53 = vmul.f32 %v7524_v27, %v4581_v39 }
 0x4b0   : > { %v3997_v47 = vmul.f32 %v3989_v31, %v3685_v49  ;;  %v3676_v16 = vmul.f32 %v3668_v54, %v3324_v4  ;;  %v4582_v9 = vsel %vm1965_vm15, %v8424_v20, %v8414_v57  ;;  %v4583_v44 = vsel %vm1965_vm15, %v8432_v38, %v8420_v48  ;;  %5888 = vmatpush1.bf16.msra.mxu0 %v5887_v45  ;;  %v4615_v54 = vpop.permute.xlu1 %4614 }
 0x4b1   : > { %v4609_v10 = vmul.f32 %v7534_v43, %v4605_v50  ;;  %v4611_v17 = vmul.f32 %v7534_v43, %v4606_v33  ;;  %v4607_v62 = vsel %vm1974_vm2, %v4601_v37, %v4595_v12  ;;  %4663 = vmatprep.subr.mxu0 %v6093_v23  ;;  %v4579_v36 = vsel %vm1965_vm15, %v8414_v57, %v8424_v20 }
 0x4b2   : > { %v4005_v34 = vadd.f32 %v3997_v47, %v3981_v55  ;;  %v3684_v11 = vadd.f32 %v3676_v16, %v3660_v63  ;;  %v4584_v46 = vmul.f32 %v7521_v24, %v4578_v41  ;;  %v4587_v42 = vmul.f32 %v7524_v27, %v4582_v9  ;;  %v4736_v55 = vld [vmem:[%s8733_s11] sm:$0xff]  ;;  %v4621_v47 = vpop.permute.xlu0 %4620 }
 0x4b3   : > { %v4580_v13 = vsel %vm1965_vm15, %v8420_v48, %v8432_v38  ;;  %v8520_v61 = vmul.f32 %v7524_v27, %v4583_v44  ;;  %v5893_v18 = vpack.c.bf16 %v8494_v53, %v6093_v23  ;;  %v4602_v57 = vsel %vm1974_vm2, %v8436_v6, %v8450_v28  ;;  %v4640_v48 = vld [vmem:[%s8732_s10] sm:$0xff] }
 0x4b4   : > { %5770 = vmatprep.subr.msk.mxu1 %vm1999_vm9, %v4005_v34  ;;  %v3996_v3 = vmul.f32 %v3988_v60, %v3684_v11  ;;  %v4603_v20 = vsel %vm1974_vm2, %v8446_v30, %v4599_v2  ;;  %v4613_v52 = vmul.f32 %v7534_v43, %v4607_v62  ;;  %4664 = vmatpush1.msra.mxu0 %v6094_v8  ;;  %vm4652_vm15 = vcmask 195584   ;;  %v4822_v34 = vld [vmem:[%s8734_s12] sm:$0xff] }
 0x4b5   : > { %v5901_v27 = vpack.c.bf16 %v4611_v17, %v4609_v10  ;;  %v4586_v38 = vmul.f32 %v7521_v24, %v4579_v36  ;;  %v5895_v6 = vpack.c.bf16 %v4584_v46, %v6094_v8  ;;  %v4588_v28 = vmul.f32 %v7521_v24, %v4580_v13  ;;  %5781 = vmatmul.mubr.msk.f32.vlgmr.msra.gmra.mrb[4].mxu0 %vm4652_vm15, %v4640_v48  ;;  %v4639_v48 = vld [vmem:[%s8736_s14 + $0x8] sm:$0xff] }
 0x4b6   : > { %v4004_v35 = vadd.f32 %v3996_v3, %v3980_v0  ;;  %v5903_v43 = vpack.c.bf16 %v4603_v20, %v4602_v57  ;;  %v5897_v30 = vpack.c.bf16 %v8520_v61, %v4587_v42  ;;  %v5905_v51 = vpack.c.bf16 %v6089_v14, %v4613_v52  ;;  %4729 = vmatprep.mubr.f32.mxu0 %v8788_v32  ;;  %v4641_v14 = vld [vmem:[%s8732_s10 + $0x8] sm:$0xff] }
 0x4b7   : > { %5902 = vmatprep.subr.bf16.mxu0 %v5901_v27  ;;  %v5899_v19 = vpack.c.bf16 %v4588_v28, %v4586_v38  ;;  %v5909_v2 = vpack.c.bf16 %v6093_v23, %v8467_v22  ;;  %v5911_v31 = vpack.c.bf16 %v6094_v8, %v8482_v58  ;;  %v5925_v4 = vpack.c.bf16 %v4587_v42, %v8494_v53  ;;  %v4737_v22 = vld [vmem:[%s8733_s11 + $0x8] sm:$0xff]  ;;  %v4619_v58 = vpop.permute.xlu0 %4618  ;;  %v4907_v23 = vld [vmem:[%s8735_s13] sm:$0xff] }
 0x4b8   : > { %5771 = vmatpush1.msk.msra.mxu1 %vm1999_vm9, %v4004_v35  ;;  %5904 = vmatpush1.bf16.msra.mxu0 %v5903_v43  ;;  %vm4738_vm9 = vcmask 392192   ;;  %v5927_v63 = vpack.c.bf16 %v4586_v38, %v4584_v46  ;;  %v4629_v16 = vsel %vm1983_vm4, %v4621_v47, %v4615_v54  ;;  %v8599_v29 = vadd.f32 %v8232_v26, %v8462_v7 }
 0x4b9   : > { %5772 = vmatmul.mubr.msk.f32.vlgmr.msra.gmra.mrb[12].mxu1 %vm4141_vm10, %v8270_v1  ;;  %5890 = vmatprep.subr.bf16.mxu1 %v5885_v21  ;;  %v4604_v1 = vsel %vm1974_vm2, %v4595_v12, %v4601_v37  ;;  %v4626_v21 = vsel %vm1983_vm4, %v4615_v54, %v4621_v47  ;;  %v4633_v50 = vmul.f32 %v7553_v40, %v4629_v16  ;;  %vm4909_vm2 = vcmask 785408  }
 0x4ba   : > { %5892 = vmatpush1.bf16.msra.mxu1 %v5887_v45  ;;  %4809 = vmatprep.mubr.f32.mxu1 %v8788_v32  ;;  %v5907_v15 = vpack.c.bf16 %v6091_v5, %v4604_v1  ;;  %v4632_v39 = vmul.f32 %v7521_v24, %v4626_v21  ;;  %v4617_v5 = vpop.permute.xlu1 %4616 }
 0x4bb   : > { %5894 = vmatprep.subr.bf16.mxu1 %v5893_v18  ;;  %5906 = vmatprep.subr.bf16.mxu0 %v5905_v51  ;;  %v5929_v0 = vpack.c.bf16 %v4633_v50, %v8520_v61  ;;  %v4625_v33 = vpop.permute.xlu0 %4624  ;;  %v4638_v50 = vld [vmem:[%s8736_s14] sm:$0xff] }
 0x4bc   : > { %5908 = vmatpush1.bf16.msra.mxu0 %v5907_v15  ;;  %v5931_v11 = vpack.c.bf16 %v4632_v39, %v4588_v28  ;;  %v4628_v41 = vsel %vm1983_vm4, %v4619_v58, %v4625_v33  ;;  %v4631_v53 = vsel %vm1983_vm4, %v4625_v33, %v4619_v58  ;;  %v4908_v58 = vld [vmem:[%s8735_s13 + $0x8] sm:$0xff] }
 0x4bd   : > { %5910 = vmatprep.subr.bf16.mxu0 %v5909_v2  ;;  %5782 = vmatmul.mubr.msk.f32.gmra.mrb[6].mxu0 %vm4652_vm15, %v4641_v14  ;;  %v4636_v44 = vmul.f32 %v7521_v24, %v4628_v41  ;;  %v4637_v10 = vmul.f32 %v7553_v40, %v4631_v53 }
 0x4be   : > { %5896 = vmatpush1.bf16.msra.mxu1 %v5895_v6  ;;  %4894 = vmatprep.mubr.f32.mxu0 %v8788_v32  ;;  %v4623_v45 = vpop.permute.xlu1 %4622 }
 0x4bf   : > { %5898 = vmatprep.subr.bf16.mxu1 %v5897_v30  ;;  %v4627_v12 = vsel %vm1983_vm4, %v4617_v5, %v4623_v45  ;;  %v4630_v37 = vsel %vm1983_vm4, %v4623_v45, %v4617_v5  ;;  %v4823_v5 = vld [vmem:[%s8734_s12 + $0x8] sm:$0xff] }
 0x4c0   : > { %v8546_v59 = vpop.f32.mrb[8].mxu1  ;;  %5912 = vmatpush1.bf16.msra.mxu0 %v5911_v31  ;;  %v4634_v9 = vmul.f32 %v7521_v24, %v4627_v12  ;;  %v4635_v3 = vmul.f32 %v7553_v40, %v4630_v37  ;;  %v8603_v24 = vadd.f32 %v8236_v25, %v8462_v7 }
 0x4c1   : > { %v8549_v49 = vpop.f32.mrb[9].mxu1  ;;  %v8607_v40 = vadd.f32 %v8546_v59, %v8462_v7 }
 0x4c2   : > { %5900 = vmatpush1.bf16.msra.mxu1 %v5899_v19  ;;  %v5935_v17 = vpack.c.bf16 %v4636_v44, %v4634_v9  ;;  %v5933_v62 = vpack.c.bf16 %v4637_v10, %v4635_v3  ;;  %v4453_v36 = vadd.f32 %v8603_v24, %v8599_v29  ;;  %v8614_v46 = vadd.f32 %v8549_v49, %v8462_v7 }
 0x4c3   : > { %5914 = vmatprep.subr.bf16.mxu1 %v5901_v27  ;;  %5785 = vmatmul.mubr.msk.f32.vlgmr.msra.gmra.mrb[8].mxu0 %vm4738_vm9, %v4822_v34 }
 0x4c4   : > { %4900 = vmatprep.mubr.f32.mxu0 %v8788_v32  ;;  %v4454_v35 = vadd.f32 %v4453_v36, %v8607_v40 }
 0x4c5   : > { %5783 = vmatmul.mubr.msk.f32.vlgmr.msra.gmra.mrb[14].mxu1 %vm4738_vm9, %v4736_v55 }
 0x4c6   : > { %5916 = vmatpush1.bf16.msra.mxu1 %v5903_v43  ;;  %4815 = vmatprep.mubr.f32.mxu1 %v8788_v32  ;;  %v4455_v42 = vadd.f32 %v4454_v35, %v8614_v46 }
 0x4c7   : > { %5918 = vmatprep.subr.bf16.mxu1 %v5905_v51  ;;  %5786 = vmatmul.mubr.msk.f32.gmra.mrb[10].mxu0 %vm4738_vm9, %v4823_v5 }
 0x4c8   : > { %5077 = vmatprep.mubr.f32.mxu0 %v8788_v32 }
 0x4c9   : > { %5784 = vmatmul.mubr.msk.f32.gmra.mrb[16].mxu1 %vm4738_vm9, %v4737_v22 }
 0x4ca   : > { %5920 = vmatpush1.bf16.msra.mxu1 %v5907_v15  ;;  %4980 = vmatprep.mubr.f32.mxu1 %v8788_v32 }
 0x4cb   : > { %5922 = vmatprep.subr.bf16.mxu1 %v5909_v2 }
 0x4ce   : > { %5924 = vmatpush1.bf16.msra.mxu1 %v5911_v31 }
 0x4cf   : > { %5926 = vmatprep.subr.bf16.mxu1 %v5925_v4 }
 0x4d2   : > { %5928 = vmatpush1.bf16.msra.mxu1 %v5927_v63 }
 0x4d3   : > { %5930 = vmatprep.subr.bf16.mxu1 %v5929_v0 }
 0x4d6   : > { %5932 = vmatpush1.bf16.msra.mxu1 %v5931_v11 }
 0x4d7   : > { %5934 = vmatprep.subr.bf16.mxu1 %v5933_v62 }
 0x4da   : > { %5936 = vmatpush1.bf16.msra.mxu1 %v5935_v17 }
 0x4dd   : > { %5787 = vmatmul.mubr.msk.f32.vlgmr.msra.gmra.mrb[18].mxu1 %vm4909_vm2, %v4907_v23 }
 0x4de   : > { %4986 = vmatprep.mubr.f32.mxu1 %v8788_v32 }
 0x4e1   : > { %5788 = vmatmul.mubr.msk.f32.gmra.mrb[20].mxu1 %vm4909_vm2, %v4908_v58 }
 0x4e2   : > { %5148 = vmatprep.mubr.f32.mxu1 %v8788_v32 }
 0x527   : > { %v4377_v56 = vpop.f32.mrb[10].mxu1 }
 0x528   : > { %v4379_v60 = vpop.f32.mrb[11].mxu1  ;;  %v8617_v26 = vadd.f32 %v4377_v56, %v8462_v7 }
 0x529   : > { %v8622_v13 = vadd.f32 %v4379_v60, %v8462_v7 }
 0x52a   : > { %v4456_v25 = vadd.f32 %v4455_v42, %v8617_v26 }
 0x52c   : > { %v4457_v18 = vadd.f32 %v4456_v25, %v8622_v13 }
 0x588   : > { %v8647_v34 = vpop.f32.mrb[4].mxu0 }
 0x589   : > { %v8651_v11 = vpop.f32.mrb[5].mxu0 }
 0x58c   : > { %v4448_v61 = vpop.f32.mrb[12].mxu1 }
 0x58d   : > { %v8626_v57 = vadd.f32 %v4448_v61, %v8462_v7  ;;  %v4450_v20 = vpop.f32.mrb[13].mxu1 }
 0x58e   : > { %v8629_v52 = vadd.f32 %v4450_v20, %v8462_v7 }
 0x58f   : > { %v4458_v8 = vadd.f32 %v4457_v18, %v8626_v57 }
 0x591   : > { %v4459_v27 = vadd.f32 %v4458_v8, %v8629_v52 }
 0x593   : > { %4460 = vadd.xlane.f32.xlu1 %v4459_v27 }
 0x596   : > { %v8661_v45 = vpop.f32.mrb[8].mxu0 }
 0x597   : > { %v8666_v12 = vpop.f32.mrb[9].mxu0 }
 0x598   : > { %v8649_v60 = vpop.f32.mrb[14].mxu1 }
 0x599   : > { %v8653_v0 = vpop.f32.mrb[15].mxu1 }
 0x5a4   : > { %4649 = vperm.xlu1 %5968, %v4639_v48  }
 0x5b0   : > { %v8663_v33 = vpop.f32.mrb[18].mxu1 }
 0x5b1   : > { %v8668_v37 = vpop.f32.mrb[19].mxu1 }
 0x620   : > { %v4461_v38 = vpop.xlane.xlu1 %4460 }
 0x621   : > { %v4462_v6 = vmul.f32 0.0009765625, %v4461_v38 }
 0x623   : > { %v4463_v28 = vsub.f32 %v8599_v29, %v4462_v6  ;;  %v4464_v43 = vsub.f32 %v8603_v24, %v4462_v6  ;;  %v4465_v30 = vsub.f32 %v8607_v40, %v4462_v6  ;;  %v4466_v7 = vsub.f32 %v8614_v46, %v4462_v6 }
 0x624   : > { %v4467_v19 = vsub.f32 %v8617_v26, %v4462_v6  ;;  %v4468_v2 = vsub.f32 %v8622_v13, %v4462_v6  ;;  %v4469_v31 = vsub.f32 %v8626_v57, %v4462_v6  ;;  %v4470_v54 = vsub.f32 %v8629_v52, %v4462_v6 }
 0x625   : > { %v4471_v1 = vmul.f32 %v4463_v28, %v4463_v28  ;;  %v4472_v51 = vmul.f32 %v4464_v43, %v4464_v43  ;;  %v4473_v15 = vmul.f32 %v4465_v30, %v4465_v30  ;;  %v4474_v49 = vmul.f32 %v4466_v7, %v4466_v7 }
 0x626   : > { %v4475_v4 = vmul.f32 %v4467_v19, %v4467_v19  ;;  %v4476_v47 = vmul.f32 %v4468_v2, %v4468_v2  ;;  %v4477_v22 = vmul.f32 %v4469_v31, %v4469_v31  ;;  %v4478_v16 = vmul.f32 %v4470_v54, %v4470_v54 }
 0x627   : > { %v4479_v59 = vadd.f32 %v4472_v51, %v4471_v1 }
 0x629   : > { %v4480_v55 = vadd.f32 %v4479_v59, %v4473_v15 }
 0x62b   : > { %v4481_v63 = vadd.f32 %v4480_v55, %v4474_v49 }
 0x62d   : > { %v4482_v14 = vadd.f32 %v4481_v63, %v4475_v4 }
 0x62f   : > { %v4483_v21 = vadd.f32 %v4482_v14, %v4476_v47 }
 0x631   : > { %v4484_v56 = vadd.f32 %v4483_v21, %v4477_v22 }
 0x633   : > { %v4485_v39 = vadd.f32 %v4484_v56, %v4478_v16 }
 0x635   : > { %4486 = vadd.xlane.f32.xlu0 %v4485_v39 }
 0x64b   : > { %4644 = vperm.xlu0 %5967, %v4638_v50  }
 0x6c2   : > { %v4487_v41 = vpop.xlane.xlu0 %4486 }
 0x6c3   : > { %v4489_v53 = vmul.f32 0.0009775171, %v4487_v41 }
 0x6c5   : > { %v4490_v9 = vadd.f32 0.0001, %v4489_v53 }
 0x6c7   : > { %v4491_v3 = vmul.f32 4.0, %v4490_v9 }
 0x6c9   : > { %6026 = vrcp.f32 %v4491_v3 }
 0x6ca   : > { %v4645_v5 = vpop.permute.xlu0 %4644 }
 0x6cb   : > { %v4728_v9 = vadd.f32 %v8651_v11, %v4645_v5 }
 0x6d3   : > { %v6027_v44 = vpop.eup %6026 }
 0x6d4   : > { %v4495_v10 = vmul.f32 %v6027_v44, %v4472_v51  ;;  %v4497_v17 = vmul.f32 %v6027_v44, %v4474_v49  ;;  %v4494_v62 = vmul.f32 %v6027_v44, %v4471_v1  ;;  %v4496_v23 = vmul.f32 %v6027_v44, %v4473_v15 }
 0x6d5   : > { %v4499_v36 = vmul.f32 %v6027_v44, %v4476_v47  ;;  %v4501_v35 = vmul.f32 %v6027_v44, %v4478_v16  ;;  %v4498_v42 = vmul.f32 %v6027_v44, %v4475_v4  ;;  %v4500_v25 = vmul.f32 %v6027_v44, %v4477_v22 }
 0x6d6   : > { %v4503_v61 = vadd.f32 0.5, %v4495_v10  ;;  %v4505_v18 = vadd.f32 0.5, %v4497_v17  ;;  %v4502_v20 = vadd.f32 0.5, %v4494_v62  ;;  %v4504_v8 = vadd.f32 0.5, %v4496_v23 }
 0x6d7   : > { %v4507_v27 = vadd.f32 0.5, %v4499_v36  ;;  %v4509_v48 = vadd.f32 0.5, %v4501_v35  ;;  %v4506_v38 = vadd.f32 0.5, %v4498_v42  ;;  %v4508_v7 = vadd.f32 0.5, %v4500_v25 }
 0x6d8   : > { %v5774_v6 = vmul.f32 -1.442695, %v4503_v61  ;;  %v5776_v28 = vmul.f32 -1.442695, %v4505_v18  ;;  %v5773_v43 = vmul.f32 -1.442695, %v4502_v20  ;;  %v4814_v10 = vadd.f32 %v8653_v0, %v4645_v5 }
 0x6d9   : > { %v5775_v30 = vmul.f32 -1.442695, %v4504_v8  ;;  %v5778_v51 = vmul.f32 -1.442695, %v4507_v27  ;;  %v5780_v1 = vmul.f32 -1.442695, %v4509_v48  ;;  %v4726_v36 = vadd.f32 %v8647_v34, %v4645_v5 }
 0x6da   : > { %6028 = vpow2.f32 %v5774_v6  ;;  %v5777_v19 = vmul.f32 -1.442695, %v4506_v38  ;;  %v5779_v15 = vmul.f32 -1.442695, %v4508_v7  ;;  %v4899_v34 = vadd.f32 %v8666_v12, %v4645_v5  ;;  %v4650_v7 = vpop.permute.xlu1 %4649 }
 0x6db   : > { %6030 = vpow2.f32 %v5776_v28  ;;  %v4985_v27 = vadd.f32 %v8668_v37, %v4645_v5  ;;  %v4897_v38 = vadd.f32 %v8661_v45, %v4645_v5  ;;  %v4983_v28 = vadd.f32 %v8663_v33, %v4645_v5 }
 0x6dc   : > { %6032 = vpow2.f32 %v5773_v43 }
 0x6dd   : > { %6034 = vpow2.f32 %v5775_v30 }
 0x6de   : > { %6036 = vpow2.f32 %v5778_v51 }
 0x6df   : > { %6038 = vpow2.f32 %v5780_v1 }
 0x6e0   : > { %6040 = vpow2.f32 %v5777_v19 }
 0x6e1   : > { %6042 = vpow2.f32 %v5779_v15 }
 0x6e4   : > { %v6029_v59 = vpop.eup %6028 }
 0x6e5   : > { %v6031_v2 = vpop.eup %6030  ;;  %v4535_v49 = vadd.f32 1.0, %v6029_v59 }
 0x6e6   : > { %v6033_v55 = vpop.eup %6032  ;;  %v4537_v31 = vadd.f32 1.0, %v6031_v2 }
 0x6e7   : > { %v6035_v4 = vpop.eup %6034  ;;  %6044 = vrcp.f32 %v4535_v49  ;;  %v4534_v63 = vadd.f32 1.0, %v6033_v55 }
 0x6e8   : > { %v6037_v54 = vpop.eup %6036  ;;  %6046 = vrcp.f32 %v4537_v31  ;;  %v4536_v47 = vadd.f32 1.0, %v6035_v4 }
 0x6e9   : > { %v6039_v14 = vpop.eup %6038  ;;  %6048 = vrcp.f32 %v4534_v63  ;;  %v4539_v22 = vadd.f32 1.0, %v6037_v54 }
 0x6ea   : > { %v6041_v21 = vpop.eup %6040  ;;  %6050 = vrcp.f32 %v4536_v47  ;;  %v4541_v16 = vadd.f32 1.0, %v6039_v14 }
 0x6eb   : > { %v6043_v56 = vpop.eup %6042  ;;  %6052 = vrcp.f32 %v4539_v22  ;;  %v4538_v39 = vadd.f32 1.0, %v6041_v21 }
 0x6ec   : > { %6054 = vrcp.f32 %v4541_v16  ;;  %v4540_v50 = vadd.f32 1.0, %v6043_v56 }
 0x6ed   : > { %6056 = vrcp.f32 %v4538_v39 }
 0x6ee   : > { %6058 = vrcp.f32 %v4540_v50 }
 0x6f1   : > { %v6045_v58 = vpop.eup %6044 }
 0x6f2   : > { %v6047_v41 = vpop.eup %6046  ;;  %v4559_v53 = vmul.f32 %v6045_v58, %v8603_v24 }
 0x6f3   : > { %v6049_v3 = vpop.eup %6048  ;;  %v4561_v44 = vmul.f32 %v6047_v41, %v8614_v46  ;;  %v4812_v46 = vadd.f32 %v8649_v60, %v4645_v5 }
 0x6f4   : > { %v6051_v17 = vpop.eup %6050  ;;  %v4994_v62 = vadd.f32 %v4728_v9, %v4559_v53  ;;  %v4558_v23 = vmul.f32 %v6049_v3, %v8599_v29 }
 0x6f5   : > { %v6053_v35 = vpop.eup %6052  ;;  %v4996_v24 = vadd.f32 %v4814_v10, %v4561_v44  ;;  %v4560_v11 = vmul.f32 %v6051_v17, %v8607_v40 }
 0x6f6   : > { %v6055_v0 = vpop.eup %6054  ;;  %v5002_v42 = vmax.f32 %v4994_v62, 0.0  ;;  %v4993_v25 = vadd.f32 %v4726_v36, %v4558_v23  ;;  %v4563_v29 = vmul.f32 %v6053_v35, %v8622_v13  ;;  %v5009_v13 = vld [vmem:[%s8737_s15] sm:$0xff] }
 0x6f7   : > { %v6057_v61 = vpop.eup %6056  ;;  %v5004_v18 = vmax.f32 %v4996_v24, 0.0  ;;  %v4995_v20 = vadd.f32 %v4812_v46, %v4560_v11  ;;  %v4565_v8 = vmul.f32 %v6055_v0, %v8629_v52 }
 0x6f8   : > { %v6059_v48 = vpop.eup %6058  ;;  %5013 = vmatprep.subr.mxu0 %v5002_v42  ;;  %5298 = vst [vmem:[%s8685_s27 + $0x8] sm:$0xff] %v5002_v42  ;;  %v5001_v40 = vmax.f32 %v4993_v25, 0.0  ;;  %v4998_v60 = vadd.f32 %v4899_v34, %v4563_v29  ;;  %v4562_v12 = vmul.f32 %v6057_v61, %v8617_v26 }
 0x6f9   : > { %5084 = vmatprep.subr.mxu1 %v5004_v18  ;;  %5300 = vst [vmem:[%s8685_s27 + $0x18] sm:$0xff] %v5004_v18  ;;  %v5003_v52 = vmax.f32 %v4995_v20, 0.0  ;;  %v5000_v37 = vadd.f32 %v4985_v27, %v4565_v8  ;;  %v4564_v6 = vmul.f32 %v6059_v48, %v8626_v57 }
 0x6fa   : > { %5014 = vmatpush1.msra.mxu0 %v5001_v40  ;;  %5297 = vst [vmem:[%s8685_s27] sm:$0xff] %v5001_v40  ;;  %v5006_v43 = vmax.f32 %v4998_v60, 0.0  ;;  %v4997_v30 = vadd.f32 %v4897_v38, %v4562_v12 }
 0x6fb   : > { %5085 = vmatpush1.msra.mxu1 %v5003_v52  ;;  %5299 = vst [vmem:[%s8685_s27 + $0x10] sm:$0xff] %v5003_v52  ;;  %5789 = vmatmul.mubr.msk.f32.vlgmr.msra.gmra.mrb[6].mxu0 %vm2086_vm5, %v5009_v13  ;;  %v5008_v26 = vmax.f32 %v5000_v37, 0.0  ;;  %v4999_v45 = vadd.f32 %v4983_v28, %v4564_v6 }
 0x6fc   : > { %5790 = vmatmul.mubr.msk.f32.vlgmr.msra.gmra.mrb[16].mxu1 %vm2086_vm5, %v5009_v13  ;;  %5155 = vmatprep.subr.mxu0 %v5006_v43  ;;  %5302 = vst [vmem:[%s8685_s27 + $0x28] sm:$0xff] %v5006_v43  ;;  %v5005_v57 = vmax.f32 %v4997_v30, 0.0 }
 0x6fd   : > { %5226 = vmatprep.subr.mxu1 %v5008_v26  ;;  %5304 = vst [vmem:[%s8685_s27 + $0x38] sm:$0xff] %v5008_v26  ;;  %v5007_v33 = vmax.f32 %v4999_v45, 0.0  ;;  %5219 = vmatprep.mubr.f32.mxu0 %v8788_v32 }
 0x6fe   : > { %5156 = vmatpush1.msra.mxu0 %v5005_v57  ;;  %5301 = vst [vmem:[%s8685_s27 + $0x20] sm:$0xff] %v5005_v57  ;;  %5290 = vmatprep.mubr.f32.mxu1 %v8788_v32 }
 0x6ff   : > { %5227 = vmatpush1.msra.mxu1 %v5007_v33  ;;  %5303 = vst [vmem:[%s8685_s27 + $0x30] sm:$0xff] %v5007_v33  ;;  %5791 = vmatmul.mubr.msk.f32.vlgmr.msra.gmra.mrb[10].mxu0 %vm2086_vm5, %v5009_v13 }
 0x700   : > { %5792 = vmatmul.mubr.msk.f32.vlgmr.msra.gmra.mrb[20].mxu1 %vm2086_vm5, %v5009_v13 }
 0x7ce   : > { %v5079_v51 = vpop.f32.mrb[6].mxu0 }
 0x7cf   : > { %v5937_v1 = vadd.f32 %v5079_v51, %v4650_v7  ;;  %v5150_v19 = vpop.f32.mrb[16].mxu1  ;;  %v5081_v15 = vpop.f32.mrb[7].mxu0 }
 0x7d0   : > { %v5939_v59 = vadd.f32 %v5150_v19, %v4650_v7  ;;  %v5938_v2 = vadd.f32 %v5081_v15, %v4650_v7  ;;  %v5152_v49 = vpop.f32.mrb[17].mxu1 }
 0x7d1   : > { %6060 = vtanh.f32 %v5937_v1  ;;  %v5940_v55 = vadd.f32 %v5152_v49, %v4650_v7 }
 0x7d2   : > { %6062 = vtanh.f32 %v5939_v59  ;;  %v5221_v31 = vpop.f32.mrb[10].mxu0 }
 0x7d3   : > { %6064 = vtanh.f32 %v5938_v2  ;;  %v5941_v32 = vadd.f32 %v5221_v31, %v4650_v7  ;;  %v5292_v4 = vpop.f32.mrb[20].mxu1  ;;  %v5223_v63 = vpop.f32.mrb[11].mxu0 }
 0x7d4   : > { %6066 = vtanh.f32 %v5940_v55  ;;  %v5943_v54 = vadd.f32 %v5292_v4, %v4650_v7  ;;  %v5942_v47 = vadd.f32 %v5223_v63, %v4650_v7  ;;  %v5294_v14 = vpop.f32.mrb[21].mxu1 }
 0x7d5   : > { %6068 = vtanh.f32 %v5941_v32  ;;  %v5944_v22 = vadd.f32 %v5294_v14, %v4650_v7 }
 0x7d6   : > { %6070 = vtanh.f32 %v5943_v54 }
 0x7d7   : > { %6072 = vtanh.f32 %v5942_v47 }
 0x7d8   : > { %6074 = vtanh.f32 %v5944_v22 }
 0x7db   : > { %v6061_v21 = vpop.eup %6060 }
 0x7dc   : > { %v6063_v16 = vpop.eup %6062  ;;  %5321 = vst [vmem:[%s561_s0] sm:$0xff] %v6061_v21 }
 0x7dd   : > { %v6065_v56 = vpop.eup %6064  ;;  %5323 = vst [vmem:[%s561_s0 + $0x10] sm:$0xff] %v6063_v16 }
 0x7de   : > { %v6067_v39 = vpop.eup %6066  ;;  %5322 = vst [vmem:[%s561_s0 + $0x8] sm:$0xff] %v6065_v56 }
 0x7df   : > { %v6069_v50 = vpop.eup %6068  ;;  %5324 = vst [vmem:[%s561_s0 + $0x18] sm:$0xff] %v6067_v39 }
 0x7e0   : > { %v6071_v5 = vpop.eup %6070  ;;  %5325 = vst [vmem:[%s561_s0 + $0x20] sm:$0xff] %v6069_v50 }
 0x7e1   : > { %v6073_v58 = vpop.eup %6072  ;;  %5327 = vst [vmem:[%s561_s0 + $0x30] sm:$0xff] %v6071_v5 }
 0x7e2   : > { %v6075_v41 = vpop.eup %6074  ;;  %5326 = vst [vmem:[%s561_s0 + $0x28] sm:$0xff] %v6073_v58 }
 0x7e3   : > { %5328 = vst [vmem:[%s561_s0 + $0x38] sm:$0xff] %v6075_v41 }
 0x7e4 PF: > { %s28_s24 = sadd.s32 1, %s6101_s24  }
 0x7e5   : > { %p25_p4 = scmp.ge.s32.totalorder %s28_s24, 4  }
 0x7e7   :  { %27 = sbr.rel (!%p25_p4) target bundleno = 3 (0x3), region = 126 }

</bundles_post_ra>
